<compile_context>
chip_gen: v7x
topology: tpu7x:2x2x1
jax: 0.10.0
libtpu: 0.0.40
codegen_flags: <defaults>
</compile_context>

<pallas_src>
import functools

import jax
import jax.numpy as jnp
from jax import lax
from jax.experimental import pallas as pl
from jax.experimental.pallas import tpu as pltpu

# ----------------------------- config --------------------------------------
L1, L2, L3 = 4, 8, 16        # encoder kernel sizes, stride = L1 // 2
STRIDE = L1 // 2
N_ENC = 16                   # speech_encoder_out_channels
EMB = 32                     # extractor_emb_dim
HID = 32                     # extractor_intermed_dim (TCN hidden)
SPK = 32                     # speaker embedding dim
NUM_SPK = 10                 # speakers for the classification head
STACKS = 2                   # TCN stacks
BLOCKS = 2                   # TCN blocks per stack (dilation 2**b)
N_RESNET = 3                 # ResNet blocks in the speaker encoder
PRELU_SLOPE = 0.25           # nn.PReLU() default init (forward-only constant)
BN_SCALE = 1.0 / (1.0 + 1e-5) ** 0.5   # eval-mode BatchNorm with default stats

TCN_DILATIONS = tuple(2 ** (k % BLOCKS) for k in range(STACKS * BLOCKS))

ACT_DTYPE = jnp.bfloat16     # inter-kernel (HBM) activation storage dtype
# conservative: leaves headroom on v7x (64 MiB physical VMEM per TensorCore).
# TODO(synk): derive per chip (pltpu.get_tpu_info) and per T for long audio.
_VMEM_LIMIT = 32 * 1024 * 1024

_BATCH_IMAPS = {2: lambda i: (i, 0), 3: lambda i: (i, 0, 0)}
_SHARED_IMAPS = {2: lambda i: (0, 0), 3: lambda i: (0, 0, 0)}


# ======================= pallas_call plumbing ================================
def _batched_call(kernel, args, out_shapes, *, nb, scratch_shapes=()):
    """Run `kernel` on a grid over batch tiles of `nb` samples each.

    args: list of (array, batched).  Batched arrays get an (nb, ...) block
    indexed by the grid; shared (weight) arrays get a full-extent block.
    """
    arrays, in_specs, grid = [], [], None
    for a, batched in args:
        arrays.append(a)
        if batched:
            grid = (a.shape[0] // nb,)
            in_specs.append(pl.BlockSpec((nb,) + a.shape[1:], _BATCH_IMAPS[a.ndim]))
        else:
            in_specs.append(pl.BlockSpec(a.shape, _SHARED_IMAPS[a.ndim]))
    outs = tuple(out_shapes)
    out_specs = tuple(
        pl.BlockSpec((nb,) + o.shape[1:], _BATCH_IMAPS[len(o.shape)]) for o in outs)
    return pl.pallas_call(
        kernel,
        out_shape=outs,
        grid=grid,
        in_specs=in_specs,
        out_specs=out_specs,
        scratch_shapes=list(scratch_shapes),
        compiler_params=pltpu.CompilerParams(
            dimension_semantics=("parallel",),
            vmem_limit_bytes=_VMEM_LIMIT),
    )(*arrays)


# ======================= in-kernel helpers ===================================
def _prelu(x):
    return jnp.where(x >= 0.0, x, PRELU_SLOPE * x)


def _bmm(w, x):
    """Per-sample 1x1-conv matmul: (O, C) @ (Nb, C, T) -> (Nb, O, T), f32 acc."""
    wb = jnp.broadcast_to(w[None], (x.shape[0],) + w.shape)
    return jnp.einsum('boc,bct->bot', wb, x, preferred_element_type=jnp.float32)


def _gln(x, g, b):
    """Global LayerNorm over (C, T) per sample, single pass (sum & sum-sq)."""
    n = x.shape[1] * x.shape[2]
    s1 = jnp.sum(jnp.sum(x, axis=2, keepdims=True), axis=1, keepdims=True)
    s2 = jnp.sum(jnp.sum(x * x, axis=2, keepdims=True), axis=1, keepdims=True)
    mu = s1 * (1.0 / n)
    var = jnp.maximum(s2 * (1.0 / n) - mu * mu, 0.0)
    return (x - mu) * lax.rsqrt(var + 1e-8) * g + b


def _shift_frames(x, offset):
    """out[..., t] = x[..., t + offset] where defined, 0 outside [0, T)."""
    if offset == 0:
        return x
    T = x.shape[-1]
    if abs(offset) >= T:
        return jnp.zeros_like(x)
    zeros = jnp.zeros(x.shape[:-1] + (abs(offset),), x.dtype)
    if offset > 0:
        return jnp.concatenate([x[..., offset:], zeros], axis=-1)
    return jnp.concatenate([zeros, x[..., :T + offset]], axis=-1)


def _pool_max3(x, stride):
    """MaxPool1d(kernel=3) on the dilated frame layout: valid frames live at
    lane positions that are multiples of `stride`; pooled frame j lands at lane
    3*stride*j.  Garbage at non-valid lanes is never read downstream."""
    return jnp.maximum(jnp.maximum(x, _shift_frames(x, stride)),
                       _shift_frames(x, 2 * stride))


def _embed_at(row, offset, J):
    """Place a (Nb, 1, T) row at lane offset `offset` inside a length-J row."""
    T = row.shape[-1]
    pieces = []
    if offset > 0:
        pieces.append(jnp.zeros(row.shape[:-1] + (offset,), row.dtype))
    pieces.append(row)
    tail = J - T - offset
    if tail > 0:
        pieces.append(jnp.zeros(row.shape[:-1] + (tail,), row.dtype))
    return pieces[0] if len(pieces) == 1 else jnp.concatenate(pieces, axis=-1)


# ======================= fused kernels =======================================
def _encoder_kernel(wav_ref, wenc_ref, benc_ref, g_ref, b_ref,
                    wproj_ref, bproj_ref, ecat_ref, y_ref, fr_ref, *, n_frames):
    """Framing (stride 2) + 3 encoder convs + ReLU + cLN + 1x1 projection.

    wav_ref: (Nb, 2, Tfp) de-interleaved waveform phases: wav[2q+r] = w2[r, q].
    The (Nb, 16, T) shifted-frame matrix is built once in VMEM scratch and fed
    to a single K=16 MXU pass (instead of 8 K=2 passes)."""
    T = n_frames
    w2 = wav_ref[...].astype(jnp.float32)                      # (Nb, 2, Tfp)
    for k in range(L3):                                        # frames[k,t]=wav[2t+k]
        fr_ref[:, k:k + 1, :] = w2[:, (k % 2):(k % 2) + 1, (k // 2):(k // 2) + T]
    e = jnp.maximum(_bmm(wenc_ref[...], fr_ref[...]) + benc_ref[...], 0.0)
    ecat_ref[...] = e.astype(ecat_ref.dtype)                   # (Nb, 48, T) ReLU'd
    # channel-wise LayerNorm (per frame, over the 48 channels), single pass
    mu = jnp.mean(e, axis=1, keepdims=True)
    var = jnp.maximum(jnp.mean(e * e, axis=1, keepdims=True) - mu * mu, 0.0)
    en = (e - mu) * lax.rsqrt(var + 1e-5) * g_ref[...] + b_ref[...]
    y = _bmm(wproj_ref[...], en) + bproj_ref[...]
    y_ref[...] = y.astype(y_ref.dtype)


def _speaker_encoder_kernel(x_ref, w1_ref, b1_ref, w2_ref, b2_ref,
                            wp_ref, bp_ref, o_ref, *, n_valid):
    """Whole speaker-encoder stack in one kernel:
    3x [conv1x1 -> BN -> PReLU -> conv1x1 -> BN -> residual -> PReLU -> pool3]
    followed by the 1x1 speaker projection and the frame sum (divide outside).
    Max-pools keep a fixed lane extent with valid frames on a strided grid."""
    x = x_ref[...].astype(jnp.float32)                         # (Nb, EMB, T)
    stride = 1
    for blk in range(w1_ref.shape[0]):
        y = _prelu((_bmm(w1_ref[blk], x) + b1_ref[blk]) * BN_SCALE)
        y = (_bmm(w2_ref[blk], y) + b2_ref[blk]) * BN_SCALE
        x = _prelu(x + y)
        x = _pool_max3(x, stride)
        stride *= 3
    p = _bmm(wp_ref[...], x) + bp_ref[...]                     # (Nb, SPK, T)
    pos = lax.broadcasted_iota(jnp.int32, p.shape, 2)
    valid = (pos % stride == 0) & (pos < stride * n_valid)
    # NOTE: sums over ALL n_valid pooled frames (matches the PyTorch spec,
    # which divides by the true_len-derived count outside).
    o_ref[...] = jnp.sum(jnp.where(valid, p, 0.0), axis=2, keepdims=True)


def _tcn_stack_kernel(x_ref, a1_ref, w1_ref, g1g_ref, g1b_ref, dww_ref, dwb_ref,
                      g2g_ref, g2b_ref, w2_ref, b2_ref, o_ref, *, dilations):
    """All TCN blocks fused: per block pw1(+spk rank-1 term) -> PReLU -> gLN ->
    dilated depthwise conv (shifted taps built in registers) -> PReLU -> gLN ->
    pw2 -> residual; plus the external `+ out` skip of the SpEXPlus forward."""
    x0 = x_ref[...].astype(jnp.float32)                        # (Nb, EMB, T)
    a1 = a1_ref[...].astype(jnp.float32)                       # (Nb, nblk*HID, 1)
    x = x0
    for blk, d in enumerate(dilations):
        bias1 = a1[:, blk * HID:(blk + 1) * HID, :]            # spk term + pw1 bias
        y = _bmm(w1_ref[blk], x) + bias1
        y = _gln(_prelu(y), g1g_ref[blk], g1b_ref[blk])        # (Nb, HID, T)
        w = dww_ref[blk]                                       # (HID, 3)
        z = (_shift_frames(y, -d) * w[:, 0:1] + y * w[:, 1:2]
             + _shift_frames(y, d) * w[:, 2:3] + dwb_ref[blk])
        z = _gln(_prelu(z), g2g_ref[blk], g2b_ref[blk])
        x = x + _bmm(w2_ref[blk], z) + b2_ref[blk]
    o_ref[...] = (x + x0).astype(o_ref.dtype)                  # res_out = TCN(out)+out


def _mask_decode_kernel(r_ref, ecat_ref, wm_ref, bm_ref, wd_ref,
                        o1_ref, o2_ref, o3_ref):
    """Fused: three 1x1 mask convs (one 48-wide matmul) -> ReLU -> encoder
    masking -> block-diagonal ConvTranspose matmul -> stride-2 overlap-add
    accumulated in registers and stored once per output phase."""
    r = r_ref[...].astype(jnp.float32)                          # (Nb, EMB, T)
    nb, _, T = r.shape
    s = jnp.maximum(_bmm(wm_ref[...], r) + bm_ref[...], 0.0)    # (Nb, 48, T)
    s = s * ecat_ref[...].astype(jnp.float32)
    contrib = _bmm(wd_ref[...], s)                              # (Nb, 28, T)
    # contrib[r0 + 2m + ph, t] adds to output position 2t + 2m + ph.
    for o_ref, r0, L in ((o1_ref, 0, L1), (o2_ref, L1, L2), (o3_ref, L1 + L2, L3)):
        J = o_ref.shape[-1]
        for ph in range(2):                                     # even / odd phase
            acc = jnp.zeros((nb, 1, J), jnp.float32)
            for m in range(L // 2):
                row = contrib[:, r0 + 2 * m + ph:r0 + 2 * m + ph + 1, :]
                acc = acc + _embed_at(row, m, J)
            o_ref[:, ph:ph + 1, :] = acc


# ======================= model pieces (kernel wrappers) ======================
def _pad_batch(a, bp):
    b = a.shape[0]
    if bp == b:
        return a
    return jnp.pad(a, [(0, bp - b)] + [(0, 0)] * (a.ndim - 1))


def encode_branch(wav, params, g, b, wproj, bproj, nb):
    """wav: (B, Lw) -> e_cat (B, 48, Tf) bf16, y (B, EMB, Tf) bf16."""
    B, Lw = wav.shape
    Tf = (Lw - L1) // STRIDE + 1
    Tfp = Tf + L3 // 2 - 1
    wav_p = jnp.pad(wav, ((0, 0), (0, 2 * Tfp - Lw)))
    wav2 = jnp.transpose(wav_p.reshape(B, Tfp, 2), (0, 2, 1)).astype(jnp.float32)
    e_cat, y = _batched_call(
        functools.partial(_encoder_kernel, n_frames=Tf),
        [(wav2, True), (params["enc_w"], False), (params["enc_b"], False),
         (g, False), (b, False), (wproj, False), (bproj, False)],
        (jax.ShapeDtypeStruct((B, 3 * N_ENC, Tf), ACT_DTYPE),
         jax.ShapeDtypeStruct((B, EMB, Tf), ACT_DTYPE)),
        nb=nb,
        scratch_shapes=(pltpu.VMEM((nb, L3, Tf), jnp.float32),),
    )
    return e_cat, y


def speaker_branch(y_ref, params, nb):
    """(B, EMB, Tr) -> per-sample summed speaker features (B, SPK)."""
    B, _, Tr = y_ref.shape
    n_valid = ((Tr // 3) // 3) // 3
    outs = _batched_call(
        functools.partial(_speaker_encoder_kernel, n_valid=n_valid),
        [(y_ref, True),
         (params["res_w1"], False), (params["res_b1"], False),
         (params["res_w2"], False), (params["res_b2"], False),
         (params["proj_w"], False), (params["proj_b"], False)],
        (jax.ShapeDtypeStruct((B, SPK, 1), jnp.float32),), nb=nb)
    return outs[0][:, :, 0]


def extract_and_residual(out, spk_emb, params, nb):
    """Fused TCN stacks; speaker embedding folded into pw1 as a rank-1 term."""
    B = out.shape[0]
    a1 = (jnp.einsum('bs,khs->bkh', spk_emb, params["tcn_ws"])
          + params["tcn_b1"][None]).reshape(B, -1, 1).astype(jnp.float32)
    outs = _batched_call(
        functools.partial(_tcn_stack_kernel, dilations=TCN_DILATIONS),
        [(out, True), (a1, True),
         (params["tcn_w1"], False),
         (params["tcn_g1g"], False), (params["tcn_g1b"], False),
         (params["tcn_dww"], False), (params["tcn_dwb"], False),
         (params["tcn_g2g"], False), (params["tcn_g2b"], False),
         (params["tcn_w2"], False), (params["tcn_b2"], False)],
        (jax.ShapeDtypeStruct(out.shape, ACT_DTYPE),), nb=nb)
    return outs[0]


def mask_and_decode(res_plus, e_cat, params, nb):
    B, _, T = res_plus.shape
    J1, J2, J3 = T + L1 // 2 - 1, T + L2 // 2 - 1, T + L3 // 2 - 1
    return _batched_call(
        _mask_decode_kernel,
        [(res_plus, True), (e_cat, True),
         (params["mask_w"], False), (params["mask_b"], False),
         (params["dec_w"], False)],
        (jax.ShapeDtypeStruct((B, 2, J1), jnp.float32),
         jax.ShapeDtypeStruct((B, 2, J2), jnp.float32),
         jax.ShapeDtypeStruct((B, 2, J3), jnp.float32)), nb=nb)


def _assemble_decoder(phases, bias, Lx):
    """(B, 2, J) even/odd phases -> interleaved waveform, pad/trim to Lx."""
    B, _, J = phases.shape
    full = jnp.transpose(phases, (0, 2, 1)).reshape(B, 2 * J) + bias
    if 2 * J >= Lx:
        full = full[:, :Lx]
    else:
        full = jnp.pad(full, ((0, 0), (0, Lx - 2 * J)))
    return full[:, None, :].astype(jnp.float32)


# ======================= full forward ========================================
def spex_plus_forward(x, ref_audio, true_len, params):
    B = x.shape[0]
    nb = max(1, min(B, 4))                 # samples per grid step
    Bp = -(-B // nb) * nb
    xp, refp, tlp = _pad_batch(x, Bp), _pad_batch(ref_audio, Bp), _pad_batch(true_len, Bp)

    # --- mixture branch: framing + encoders + cLN + 1x1 conv (one kernel) ----
    e_cat, out = encode_branch(xp, params, params["cln_g"], params["cln_b"],
                               params["extr_w"], params["extr_b"], nb)

    # --- reference / speaker branch -------------------------------------------
    _, y_ref = encode_branch(refp, params, params["cln_spk_g"], params["cln_spk_b"],
                             params["spk_w"], params["spk_b"], nb)
    spk_sum = speaker_branch(y_ref, params, nb)                 # (Bp, SPK)
    tl = (tlp - L1) // STRIDE + 1
    tl = tl // 3 // 3 // 3
    tl = jnp.maximum(tl, 1)    # guard div-by-zero for very short references
    spk_emb = spk_sum / tl.astype(jnp.float32)[:, None]

    # --- extractor + fused masks / decoders -----------------------------------
    res_plus = extract_and_residual(out, spk_emb, params, nb)   # TCN(out) + out
    o1, o2, o3 = mask_and_decode(res_plus, e_cat, params, nb)

    Lx = x.shape[-1]
    dec1 = _assemble_decoder(o1, params["dec_b1"], Lx)[:B]
    dec2 = _assemble_decoder(o2, params["dec_b2"], Lx)[:B]
    dec3 = _assemble_decoder(o3, params["dec_b3"], Lx)[:B]

    logits = (spk_emb @ params["cls_w"] + params["cls_b"])[:B]  # tiny: left to XLA
    return dec1, dec2, dec3, logits


# ======================= deterministic params ================================
def init_params(seed=0):
    key = jax.random.PRNGKey(seed)

    def nxt(shape, scale=0.1):
        nonlocal key
        key, sub = jax.random.split(key)
        return jax.random.normal(sub, shape, jnp.float32) * scale

    # fused encoder weights: (3*N_ENC out channels, L3 taps), zero-padded taps
    enc_w = jnp.zeros((3 * N_ENC, L3), jnp.float32)
    enc_b = []
    for i, L in enumerate((L1, L2, L3)):
        enc_w = enc_w.at[i * N_ENC:(i + 1) * N_ENC, :L].set(nxt((N_ENC, L)))
        enc_b.append(nxt((N_ENC,), 0.01))
    enc_b = jnp.concatenate(enc_b).reshape(3 * N_ENC, 1)

    p = {
        "enc_w": enc_w, "enc_b": enc_b,
        "cln_g": jnp.ones((3 * N_ENC, 1), jnp.float32),
        "cln_b": jnp.zeros((3 * N_ENC, 1), jnp.float32),
        "cln_spk_g": jnp.ones((3 * N_ENC, 1), jnp.float32),
        "cln_spk_b": jnp.zeros((3 * N_ENC, 1), jnp.float32),
        "extr_w": nxt((EMB, 3 * N_ENC)), "extr_b": nxt((EMB, 1), 0.01),
        "spk_w": nxt((EMB, 3 * N_ENC)), "spk_b": nxt((EMB, 1), 0.01),
        "proj_w": nxt((SPK, EMB)), "proj_b": nxt((SPK, 1), 0.01),
        "cls_w": nxt((SPK, NUM_SPK)), "cls_b": nxt((NUM_SPK,), 0.01),
        "dec_b1": nxt((), 0.01), "dec_b2": nxt((), 0.01), "dec_b3": nxt((), 0.01),
    }

    # fused mask weights: m1|m2|m3 stacked along output channels -> (48, EMB)
    p["mask_w"] = jnp.concatenate([nxt((N_ENC, EMB)) for _ in range(3)], axis=0)
    p["mask_b"] = nxt((3 * N_ENC, 1), 0.01)

    # fused block-diagonal ConvTranspose weights: (L1+L2+L3, 3*N_ENC)
    dec_w = jnp.zeros((L1 + L2 + L3, 3 * N_ENC), jnp.float32)
    r0, c0 = 0, 0
    for L in (L1, L2, L3):
        dec_w = dec_w.at[r0:r0 + L, c0:c0 + N_ENC].set(nxt((L, N_ENC)))
        r0 += L
        c0 += N_ENC
    p["dec_w"] = dec_w

    # speaker-encoder ResNet stack, weights stacked along a leading block axis
    p["res_w1"] = jnp.stack([nxt((EMB, EMB)) for _ in range(N_RESNET)])
    p["res_b1"] = jnp.stack([nxt((EMB, 1), 0.01) for _ in range(N_RESNET)])
    p["res_w2"] = jnp.stack([nxt((EMB, EMB)) for _ in range(N_RESNET)])
    p["res_b2"] = jnp.stack([nxt((EMB, 1), 0.01) for _ in range(N_RESNET)])

    # TCN stack, weights stacked along a leading block axis (4 blocks)
    nblk = STACKS * BLOCKS
    p["tcn_w1"] = jnp.stack([nxt((HID, EMB)) for _ in range(nblk)])
    p["tcn_ws"] = jnp.stack(  # speaker-concat half of pw1; zero when unused
        [nxt((HID, SPK)) if (k % BLOCKS == 0) else jnp.zeros((HID, SPK), jnp.float32)
         for k in range(nblk)])
    p["tcn_b1"] = jnp.stack([nxt((HID,), 0.01) for _ in range(nblk)])
    p["tcn_g1g"] = jnp.ones((nblk, HID, 1), jnp.float32)
    p["tcn_g1b"] = jnp.zeros((nblk, HID, 1), jnp.float32)
    p["tcn_dww"] = jnp.stack([nxt((HID, 3)) for _ in range(nblk)])
    p["tcn_dwb"] = jnp.stack([nxt((HID, 1), 0.01) for _ in range(nblk)])
    p["tcn_g2g"] = jnp.ones((nblk, HID, 1), jnp.float32)
    p["tcn_g2b"] = jnp.zeros((nblk, HID, 1), jnp.float32)
    p["tcn_w2"] = jnp.stack([nxt((EMB, HID)) for _ in range(nblk)])
    p["tcn_b2"] = jnp.stack([nxt((EMB, 1), 0.01) for _ in range(nblk)])
    return p


# ======================= demo =================================================
if __name__ == "__main__":
    params = init_params(0)

    key = jax.random.PRNGKey(0)
    k1, k2 = jax.random.split(key)
    B, T_WAV = 2, 64
    x = jax.random.normal(k1, (B, T_WAV), jnp.float32)           # mixture
    ref_audio = jax.random.normal(k2, (B, T_WAV), jnp.float32)   # reference
    true_len = jnp.array([64, 60], jnp.int32)                    # raw ref lengths

    fwd = jax.jit(spex_plus_forward)
    dec1, dec2, dec3, logits = fwd(x, ref_audio, true_len, params)
    jax.block_until_ready((dec1, dec2, dec3, logits))

    assert dec1.shape == (B, 1, T_WAV)
    assert dec2.shape == (B, 1, T_WAV)
    assert dec3.shape == (B, 1, T_WAV)
    assert logits.shape == (B, NUM_SPK)
    print("KERNEL_OK")
</pallas_src>

<mosaic_0001>
module attributes {stable_mosaic.version = 11 : i64} {
  func.func @_encoder_kernel(%arg0: i32, %arg1: memref<2x2x38xf32, #tpu.memory_space<vmem>>, %arg2: memref<48x16xf32, #tpu.memory_space<vmem>>, %arg3: memref<48x1xf32, #tpu.memory_space<vmem>>, %arg4: memref<48x1xf32, #tpu.memory_space<vmem>>, %arg5: memref<48x1xf32, #tpu.memory_space<vmem>>, %arg6: memref<32x48xf32, #tpu.memory_space<vmem>>, %arg7: memref<32x1xf32, #tpu.memory_space<vmem>>, %arg8: memref<2x48x31xbf16, #tpu.memory_space<vmem>>, %arg9: memref<2x32x31xbf16, #tpu.memory_space<vmem>>, %arg10: memref<2x16x31xf32, #tpu.memory_space<vmem>>) attributes {dimension_semantics = [#tpu.dimension_semantics<parallel>], iteration_bounds = array<i64: 1>, scalar_prefetch = 0 : i64, scratch_operands = 1 : i64, tpu.core_type = #tpu.core_type<tc>, window_params = [{transform_indices = @transform_0, window_bounds = array<i64: 2, 2, 38>}, {pipeline_mode = #tpu.pipeline_mode<synchronous>, transform_indices = @transform_1, window_bounds = array<i64: 48, 16>}, {pipeline_mode = #tpu.pipeline_mode<synchronous>, transform_indices = @transform_2, window_bounds = array<i64: 48, 1>}, {pipeline_mode = #tpu.pipeline_mode<synchronous>, transform_indices = @transform_3, window_bounds = array<i64: 48, 1>}, {pipeline_mode = #tpu.pipeline_mode<synchronous>, transform_indices = @transform_4, window_bounds = array<i64: 48, 1>}, {pipeline_mode = #tpu.pipeline_mode<synchronous>, transform_indices = @transform_5, window_bounds = array<i64: 32, 48>}, {pipeline_mode = #tpu.pipeline_mode<synchronous>, transform_indices = @transform_6, window_bounds = array<i64: 32, 1>}, {transform_indices = @transform_7, window_bounds = array<i64: 2, 48, 31>}, {transform_indices = @transform_8, window_bounds = array<i64: 2, 32, 31>}]} {
    %c0 = arith.constant 0 : index
    %c0_0 = arith.constant 0 : index
    %c0_1 = arith.constant 0 : index
    %0 = vector.load %arg1[%c0, %c0_0, %c0_1] : memref<2x2x38xf32, #tpu.memory_space<vmem>>, vector<2x2x38xf32>
    %1 = vector.extract_strided_slice %0 {offsets = [0, 0, 0], sizes = [2, 1, 31], strides = [1, 1, 1]} : vector<2x2x38xf32> to vector<2x1x31xf32>
    %c0_2 = arith.constant 0 : index
    %c0_3 = arith.constant 0 : index
    %c0_4 = arith.constant 0 : index
    %2 = vector.load %arg10[%c0_2, %c0_3, %c0_4] : memref<2x16x31xf32, #tpu.memory_space<vmem>>, vector<2x1x31xf32>
    tpu.vector_store %arg10[%c0_2, %c0_3, %c0_4], %1 {strides = array<i32>} : memref<2x16x31xf32, #tpu.memory_space<vmem>>, vector<2x1x31xf32>,
    %3 = vector.extract_strided_slice %0 {offsets = [0, 1, 0], sizes = [2, 1, 31], strides = [1, 1, 1]} : vector<2x2x38xf32> to vector<2x1x31xf32>
    %c0_5 = arith.constant 0 : index
    %c1 = arith.constant 1 : index
    %c0_6 = arith.constant 0 : index
    %4 = vector.load %arg10[%c0_5, %c1, %c0_6] : memref<2x16x31xf32, #tpu.memory_space<vmem>>, vector<2x1x31xf32>
    tpu.vector_store %arg10[%c0_5, %c1, %c0_6], %3 {strides = array<i32>} : memref<2x16x31xf32, #tpu.memory_space<vmem>>, vector<2x1x31xf32>,
    %5 = vector.extract_strided_slice %0 {offsets = [0, 0, 1], sizes = [2, 1, 31], strides = [1, 1, 1]} : vector<2x2x38xf32> to vector<2x1x31xf32>
    %c0_7 = arith.constant 0 : index
    %c2 = arith.constant 2 : index
    %c0_8 = arith.constant 0 : index
    %6 = vector.load %arg10[%c0_7, %c2, %c0_8] : memref<2x16x31xf32, #tpu.memory_space<vmem>>, vector<2x1x31xf32>
    tpu.vector_store %arg10[%c0_7, %c2, %c0_8], %5 {strides = array<i32>} : memref<2x16x31xf32, #tpu.memory_space<vmem>>, vector<2x1x31xf32>,
    %7 = vector.extract_strided_slice %0 {offsets = [0, 1, 1], sizes = [2, 1, 31], strides = [1, 1, 1]} : vector<2x2x38xf32> to vector<2x1x31xf32>
    %c0_9 = arith.constant 0 : index
    %c3 = arith.constant 3 : index
    %c0_10 = arith.constant 0 : index
    %8 = vector.load %arg10[%c0_9, %c3, %c0_10] : memref<2x16x31xf32, #tpu.memory_space<vmem>>, vector<2x1x31xf32>
    tpu.vector_store %arg10[%c0_9, %c3, %c0_10], %7 {strides = array<i32>} : memref<2x16x31xf32, #tpu.memory_space<vmem>>, vector<2x1x31xf32>,
    %9 = vector.extract_strided_slice %0 {offsets = [0, 0, 2], sizes = [2, 1, 31], strides = [1, 1, 1]} : vector<2x2x38xf32> to vector<2x1x31xf32>
    %c0_11 = arith.constant 0 : index
    %c4 = arith.constant 4 : index
    %c0_12 = arith.constant 0 : index
    %10 = vector.load %arg10[%c0_11, %c4, %c0_12] : memref<2x16x31xf32, #tpu.memory_space<vmem>>, vector<2x1x31xf32>
    tpu.vector_store %arg10[%c0_11, %c4, %c0_12], %9 {strides = array<i32>} : memref<2x16x31xf32, #tpu.memory_space<vmem>>, vector<2x1x31xf32>,
    %11 = vector.extract_strided_slice %0 {offsets = [0, 1, 2], sizes = [2, 1, 31], strides = [1, 1, 1]} : vector<2x2x38xf32> to vector<2x1x31xf32>
    %c0_13 = arith.constant 0 : index
    %c5 = arith.constant 5 : index
    %c0_14 = arith.constant 0 : index
    %12 = vector.load %arg10[%c0_13, %c5, %c0_14] : memref<2x16x31xf32, #tpu.memory_space<vmem>>, vector<2x1x31xf32>
    tpu.vector_store %arg10[%c0_13, %c5, %c0_14], %11 {strides = array<i32>} : memref<2x16x31xf32, #tpu.memory_space<vmem>>, vector<2x1x31xf32>,
    %13 = vector.extract_strided_slice %0 {offsets = [0, 0, 3], sizes = [2, 1, 31], strides = [1, 1, 1]} : vector<2x2x38xf32> to vector<2x1x31xf32>
    %c0_15 = arith.constant 0 : index
    %c6 = arith.constant 6 : index
    %c0_16 = arith.constant 0 : index
    %14 = vector.load %arg10[%c0_15, %c6, %c0_16] : memref<2x16x31xf32, #tpu.memory_space<vmem>>, vector<2x1x31xf32>
    tpu.vector_store %arg10[%c0_15, %c6, %c0_16], %13 {strides = array<i32>} : memref<2x16x31xf32, #tpu.memory_space<vmem>>, vector<2x1x31xf32>,
    %15 = vector.extract_strided_slice %0 {offsets = [0, 1, 3], sizes = [2, 1, 31], strides = [1, 1, 1]} : vector<2x2x38xf32> to vector<2x1x31xf32>
    %c0_17 = arith.constant 0 : index
    %c7 = arith.constant 7 : index
    %c0_18 = arith.constant 0 : index
    %16 = vector.load %arg10[%c0_17, %c7, %c0_18] : memref<2x16x31xf32, #tpu.memory_space<vmem>>, vector<2x1x31xf32>
    tpu.vector_store %arg10[%c0_17, %c7, %c0_18], %15 {strides = array<i32>} : memref<2x16x31xf32, #tpu.memory_space<vmem>>, vector<2x1x31xf32>,
    %17 = vector.extract_strided_slice %0 {offsets = [0, 0, 4], sizes = [2, 1, 31], strides = [1, 1, 1]} : vector<2x2x38xf32> to vector<2x1x31xf32>
    %c0_19 = arith.constant 0 : index
    %c8 = arith.constant 8 : index
    %c0_20 = arith.constant 0 : index
    %18 = vector.load %arg10[%c0_19, %c8, %c0_20] : memref<2x16x31xf32, #tpu.memory_space<vmem>>, vector<2x1x31xf32>
    tpu.vector_store %arg10[%c0_19, %c8, %c0_20], %17 {strides = array<i32>} : memref<2x16x31xf32, #tpu.memory_space<vmem>>, vector<2x1x31xf32>,
    %19 = vector.extract_strided_slice %0 {offsets = [0, 1, 4], sizes = [2, 1, 31], strides = [1, 1, 1]} : vector<2x2x38xf32> to vector<2x1x31xf32>
    %c0_21 = arith.constant 0 : index
    %c9 = arith.constant 9 : index
    %c0_22 = arith.constant 0 : index
    %20 = vector.load %arg10[%c0_21, %c9, %c0_22] : memref<2x16x31xf32, #tpu.memory_space<vmem>>, vector<2x1x31xf32>
    tpu.vector_store %arg10[%c0_21, %c9, %c0_22], %19 {strides = array<i32>} : memref<2x16x31xf32, #tpu.memory_space<vmem>>, vector<2x1x31xf32>,
    %21 = vector.extract_strided_slice %0 {offsets = [0, 0, 5], sizes = [2, 1, 31], strides = [1, 1, 1]} : vector<2x2x38xf32> to vector<2x1x31xf32>
    %c0_23 = arith.constant 0 : index
    %c10 = arith.constant 10 : index
    %c0_24 = arith.constant 0 : index
    %22 = vector.load %arg10[%c0_23, %c10, %c0_24] : memref<2x16x31xf32, #tpu.memory_space<vmem>>, vector<2x1x31xf32>
    tpu.vector_store %arg10[%c0_23, %c10, %c0_24], %21 {strides = array<i32>} : memref<2x16x31xf32, #tpu.memory_space<vmem>>, vector<2x1x31xf32>,
    %23 = vector.extract_strided_slice %0 {offsets = [0, 1, 5], sizes = [2, 1, 31], strides = [1, 1, 1]} : vector<2x2x38xf32> to vector<2x1x31xf32>
    %c0_25 = arith.constant 0 : index
    %c11 = arith.constant 11 : index
    %c0_26 = arith.constant 0 : index
    %24 = vector.load %arg10[%c0_25, %c11, %c0_26] : memref<2x16x31xf32, #tpu.memory_space<vmem>>, vector<2x1x31xf32>
    tpu.vector_store %arg10[%c0_25, %c11, %c0_26], %23 {strides = array<i32>} : memref<2x16x31xf32, #tpu.memory_space<vmem>>, vector<2x1x31xf32>,
    %25 = vector.extract_strided_slice %0 {offsets = [0, 0, 6], sizes = [2, 1, 31], strides = [1, 1, 1]} : vector<2x2x38xf32> to vector<2x1x31xf32>
    %c0_27 = arith.constant 0 : index
    %c12 = arith.constant 12 : index
    %c0_28 = arith.constant 0 : index
    %26 = vector.load %arg10[%c0_27, %c12, %c0_28] : memref<2x16x31xf32, #tpu.memory_space<vmem>>, vector<2x1x31xf32>
    tpu.vector_store %arg10[%c0_27, %c12, %c0_28], %25 {strides = array<i32>} : memref<2x16x31xf32, #tpu.memory_space<vmem>>, vector<2x1x31xf32>,
    %27 = vector.extract_strided_slice %0 {offsets = [0, 1, 6], sizes = [2, 1, 31], strides = [1, 1, 1]} : vector<2x2x38xf32> to vector<2x1x31xf32>
    %c0_29 = arith.constant 0 : index
    %c13 = arith.constant 13 : index
    %c0_30 = arith.constant 0 : index
    %28 = vector.load %arg10[%c0_29, %c13, %c0_30] : memref<2x16x31xf32, #tpu.memory_space<vmem>>, vector<2x1x31xf32>
    tpu.vector_store %arg10[%c0_29, %c13, %c0_30], %27 {strides = array<i32>} : memref<2x16x31xf32, #tpu.memory_space<vmem>>, vector<2x1x31xf32>,
    %29 = vector.extract_strided_slice %0 {offsets = [0, 0, 7], sizes = [2, 1, 31], strides = [1, 1, 1]} : vector<2x2x38xf32> to vector<2x1x31xf32>
    %c0_31 = arith.constant 0 : index
    %c14 = arith.constant 14 : index
    %c0_32 = arith.constant 0 : index
    %30 = vector.load %arg10[%c0_31, %c14, %c0_32] : memref<2x16x31xf32, #tpu.memory_space<vmem>>, vector<2x1x31xf32>
    tpu.vector_store %arg10[%c0_31, %c14, %c0_32], %29 {strides = array<i32>} : memref<2x16x31xf32, #tpu.memory_space<vmem>>, vector<2x1x31xf32>,
    %31 = vector.extract_strided_slice %0 {offsets = [0, 1, 7], sizes = [2, 1, 31], strides = [1, 1, 1]} : vector<2x2x38xf32> to vector<2x1x31xf32>
    %c0_33 = arith.constant 0 : index
    %c15 = arith.constant 15 : index
    %c0_34 = arith.constant 0 : index
    %32 = vector.load %arg10[%c0_33, %c15, %c0_34] : memref<2x16x31xf32, #tpu.memory_space<vmem>>, vector<2x1x31xf32>
    tpu.vector_store %arg10[%c0_33, %c15, %c0_34], %31 {strides = array<i32>} : memref<2x16x31xf32, #tpu.memory_space<vmem>>, vector<2x1x31xf32>,
    %c0_35 = arith.constant 0 : index
    %c0_36 = arith.constant 0 : index
    %33 = vector.load %arg2[%c0_35, %c0_36] : memref<48x16xf32, #tpu.memory_space<vmem>>, vector<48x16xf32>
    %c0_37 = arith.constant 0 : index
    %c0_38 = arith.constant 0 : index
    %c0_39 = arith.constant 0 : index
    %34 = vector.load %arg10[%c0_37, %c0_38, %c0_39] : memref<2x16x31xf32, #tpu.memory_space<vmem>>, vector<2x16x31xf32>
    %35 = vector.shape_cast %33 : vector<48x16xf32> to vector<1x48x16xf32>
    %36 = vector.shape_cast %35 : vector<1x48x16xf32> to vector<1x48x16xf32>
    %37 = vector.broadcast %36 : vector<1x48x16xf32> to vector<2x48x16xf32>
    "tpu.trace_start"() <{level = 10 : i32, message = "boc,bct->bot"}> : () -> ()
    %cst = arith.constant dense<0.000000e+00> : vector<2x48x31xf32>
    %38 = tpu.matmul %37, %34, %cst {dimension_numbers = #tpu.dot_dimension_numbers<[2], [1], [1], [2], [0, 0, 0, 1, 1, 2], [0], [0]>} : vector<2x48x16xf32>, vector<2x16x31xf32>, vector<2x48x31xf32> -> vector<2x48x31xf32>
    "tpu.trace_stop"() : () -> ()
    %c0_40 = arith.constant 0 : index
    %c0_41 = arith.constant 0 : index
    %39 = vector.load %arg3[%c0_40, %c0_41] : memref<48x1xf32, #tpu.memory_space<vmem>>, vector<48x1xf32>
    %40 = vector.shape_cast %39 : vector<48x1xf32> to vector<1x48x1xf32>
    %41 = vector.broadcast %40 : vector<1x48x1xf32> to vector<2x48x31xf32>
    %42 = arith.addf %38, %41 : vector<2x48x31xf32>
    %cst_42 = arith.constant 0.000000e+00 : f32
    %43 = vector.broadcast %cst_42 : f32 to vector<2x48x31xf32>
    %44 = arith.maximumf %42, %43 : vector<2x48x31xf32>
    %45 = arith.truncf %44 : vector<2x48x31xf32> to vector<2x48x31xbf16>
    %c0_43 = arith.constant 0 : index
    %c0_44 = arith.constant 0 : index
    %c0_45 = arith.constant 0 : index
    %46 = vector.load %arg8[%c0_43, %c0_44, %c0_45] : memref<2x48x31xbf16, #tpu.memory_space<vmem>>, vector<2x48x31xbf16>
    tpu.vector_store %arg8[%c0_43, %c0_44, %c0_45], %45 {strides = array<i32>} : memref<2x48x31xbf16, #tpu.memory_space<vmem>>, vector<2x48x31xbf16>,
    %cst_46 = arith.constant dense<0.000000e+00> : vector<2x31xf32>
    %47 = vector.multi_reduction <add>, %44, %cst_46 [1] : vector<2x48x31xf32> to vector<2x31xf32>
    %48 = vector.shape_cast %47 : vector<2x31xf32> to vector<2x1x31xf32>
    %cst_47 = arith.constant 4.800000e+01 : f32
    %49 = vector.broadcast %cst_47 : f32 to vector<2x1x31xf32>
    %50 = arith.divf %48, %49 : vector<2x1x31xf32>
    %51 = arith.mulf %44, %44 : vector<2x48x31xf32>
    %cst_48 = arith.constant dense<0.000000e+00> : vector<2x31xf32>
    %52 = vector.multi_reduction <add>, %51, %cst_48 [1] : vector<2x48x31xf32> to vector<2x31xf32>
    %53 = vector.shape_cast %52 : vector<2x31xf32> to vector<2x1x31xf32>
    %cst_49 = arith.constant 4.800000e+01 : f32
    %54 = vector.broadcast %cst_49 : f32 to vector<2x1x31xf32>
    %55 = arith.divf %53, %54 : vector<2x1x31xf32>
    %56 = arith.mulf %50, %50 : vector<2x1x31xf32>
    %57 = arith.subf %55, %56 : vector<2x1x31xf32>
    %cst_50 = arith.constant 0.000000e+00 : f32
    %58 = vector.broadcast %cst_50 : f32 to vector<2x1x31xf32>
    %59 = arith.maximumf %57, %58 : vector<2x1x31xf32>
    %60 = vector.broadcast %50 : vector<2x1x31xf32> to vector<2x48x31xf32>
    %61 = arith.subf %44, %60 : vector<2x48x31xf32>
    %cst_51 = arith.constant 9.99999974E-6 : f32
    %62 = vector.broadcast %cst_51 : f32 to vector<2x1x31xf32>
    %63 = arith.addf %59, %62 : vector<2x1x31xf32>
    %64 = math.rsqrt %63 : vector<2x1x31xf32>
    %65 = vector.broadcast %64 : vector<2x1x31xf32> to vector<2x48x31xf32>
    %66 = arith.mulf %61, %65 : vector<2x48x31xf32>
    %c0_52 = arith.constant 0 : index
    %c0_53 = arith.constant 0 : index
    %67 = vector.load %arg4[%c0_52, %c0_53] : memref<48x1xf32, #tpu.memory_space<vmem>>, vector<48x1xf32>
    %68 = vector.shape_cast %67 : vector<48x1xf32> to vector<1x48x1xf32>
    %69 = vector.broadcast %68 : vector<1x48x1xf32> to vector<2x48x31xf32>
    %70 = arith.mulf %66, %69 : vector<2x48x31xf32>
    %c0_54 = arith.constant 0 : index
    %c0_55 = arith.constant 0 : index
    %71 = vector.load %arg5[%c0_54, %c0_55] : memref<48x1xf32, #tpu.memory_space<vmem>>, vector<48x1xf32>
    %72 = vector.shape_cast %71 : vector<48x1xf32> to vector<1x48x1xf32>
    %73 = vector.broadcast %72 : vector<1x48x1xf32> to vector<2x48x31xf32>
    %74 = arith.addf %70, %73 : vector<2x48x31xf32>
    %c0_56 = arith.constant 0 : index
    %c0_57 = arith.constant 0 : index
    %75 = vector.load %arg6[%c0_56, %c0_57] : memref<32x48xf32, #tpu.memory_space<vmem>>, vector<32x48xf32>
    %76 = vector.shape_cast %75 : vector<32x48xf32> to vector<1x32x48xf32>
    %77 = vector.shape_cast %76 : vector<1x32x48xf32> to vector<1x32x48xf32>
    %78 = vector.broadcast %77 : vector<1x32x48xf32> to vector<2x32x48xf32>
    "tpu.trace_start"() <{level = 10 : i32, message = "boc,bct->bot"}> : () -> ()
    %cst_58 = arith.constant dense<0.000000e+00> : vector<2x32x31xf32>
    %79 = tpu.matmul %78, %74, %cst_58 {dimension_numbers = #tpu.dot_dimension_numbers<[2], [1], [1], [2], [0, 0, 0, 1, 1, 2], [0], [0]>} : vector<2x32x48xf32>, vector<2x48x31xf32>, vector<2x32x31xf32> -> vector<2x32x31xf32>
    "tpu.trace_stop"() : () -> ()
    %c0_59 = arith.constant 0 : index
    %c0_60 = arith.constant 0 : index
    %80 = vector.load %arg7[%c0_59, %c0_60] : memref<32x1xf32, #tpu.memory_space<vmem>>, vector<32x1xf32>
    %81 = vector.shape_cast %80 : vector<32x1xf32> to vector<1x32x1xf32>
    %82 = vector.broadcast %81 : vector<1x32x1xf32> to vector<2x32x31xf32>
    %83 = arith.addf %79, %82 : vector<2x32x31xf32>
    %84 = arith.truncf %83 : vector<2x32x31xf32> to vector<2x32x31xbf16>
    %c0_61 = arith.constant 0 : index
    %c0_62 = arith.constant 0 : index
    %c0_63 = arith.constant 0 : index
    %85 = vector.load %arg9[%c0_61, %c0_62, %c0_63] : memref<2x32x31xbf16, #tpu.memory_space<vmem>>, vector<2x32x31xbf16>
    tpu.vector_store %arg9[%c0_61, %c0_62, %c0_63], %84 {strides = array<i32>} : memref<2x32x31xbf16, #tpu.memory_space<vmem>>, vector<2x32x31xbf16>,
    return
  }
  func.func @transform_0(%arg0: i32) -> (i32, i32, i32) {
    %c0_i32 = arith.constant 0 : i32
    %c0_i32_0 = arith.constant 0 : i32
    %c0_i32_1 = arith.constant 0 : i32
    return %arg0, %c0_i32, %c0_i32_0 : i32, i32, i32
  }
  func.func @transform_1(%arg0: i32) -> (i32, i32) {
    %c0_i32 = arith.constant 0 : i32
    %c0_i32_0 = arith.constant 0 : i32
    %c0_i32_1 = arith.constant 0 : i32
    return %c0_i32, %c0_i32_0 : i32, i32
  }
  func.func @transform_2(%arg0: i32) -> (i32, i32) {
    %c0_i32 = arith.constant 0 : i32
    %c0_i32_0 = arith.constant 0 : i32
    %c0_i32_1 = arith.constant 0 : i32
    return %c0_i32, %c0_i32_0 : i32, i32
  }
  func.func @transform_3(%arg0: i32) -> (i32, i32) {
    %c0_i32 = arith.constant 0 : i32
    %c0_i32_0 = arith.constant 0 : i32
    %c0_i32_1 = arith.constant 0 : i32
    return %c0_i32, %c0_i32_0 : i32, i32
  }
  func.func @transform_4(%arg0: i32) -> (i32, i32) {
    %c0_i32 = arith.constant 0 : i32
    %c0_i32_0 = arith.constant 0 : i32
    %c0_i32_1 = arith.constant 0 : i32
    return %c0_i32, %c0_i32_0 : i32, i32
  }
  func.func @transform_5(%arg0: i32) -> (i32, i32) {
    %c0_i32 = arith.constant 0 : i32
    %c0_i32_0 = arith.constant 0 : i32
    %c0_i32_1 = arith.constant 0 : i32
    return %c0_i32, %c0_i32_0 : i32, i32
  }
  func.func @transform_6(%arg0: i32) -> (i32, i32) {
    %c0_i32 = arith.constant 0 : i32
    %c0_i32_0 = arith.constant 0 : i32
    %c0_i32_1 = arith.constant 0 : i32
    return %c0_i32, %c0_i32_0 : i32, i32
  }
  func.func @transform_7(%arg0: i32) -> (i32, i32, i32) {
    %c0_i32 = arith.constant 0 : i32
    %c0_i32_0 = arith.constant 0 : i32
    %c0_i32_1 = arith.constant 0 : i32
    return %arg0, %c0_i32, %c0_i32_0 : i32, i32, i32
  }
  func.func @transform_8(%arg0: i32) -> (i32, i32, i32) {
    %c0_i32 = arith.constant 0 : i32
    %c0_i32_0 = arith.constant 0 : i32
    %c0_i32_1 = arith.constant 0 : i32
    return %arg0, %c0_i32, %c0_i32_0 : i32, i32, i32
  }
}

module attributes {stable_mosaic.version = 11 : i64} {
  func.func @_speaker_encoder_kernel(%arg0: i32, %arg1: memref<2x32x31xbf16, #tpu.memory_space<vmem>>, %arg2: memref<3x32x32xf32, #tpu.memory_space<vmem>>, %arg3: memref<3x32x1xf32, #tpu.memory_space<vmem>>, %arg4: memref<3x32x32xf32, #tpu.memory_space<vmem>>, %arg5: memref<3x32x1xf32, #tpu.memory_space<vmem>>, %arg6: memref<32x32xf32, #tpu.memory_space<vmem>>, %arg7: memref<32x1xf32, #tpu.memory_space<vmem>>, %arg8: memref<2x32x1xf32, #tpu.memory_space<vmem>>) attributes {dimension_semantics = [#tpu.dimension_semantics<parallel>], iteration_bounds = array<i64: 1>, scalar_prefetch = 0 : i64, scratch_operands = 0 : i64, tpu.core_type = #tpu.core_type<tc>, window_params = [{transform_indices = @transform_0, window_bounds = array<i64: 2, 32, 31>}, {pipeline_mode = #tpu.pipeline_mode<synchronous>, transform_indices = @transform_1, window_bounds = array<i64: 3, 32, 32>}, {pipeline_mode = #tpu.pipeline_mode<synchronous>, transform_indices = @transform_2, window_bounds = array<i64: 3, 32, 1>}, {pipeline_mode = #tpu.pipeline_mode<synchronous>, transform_indices = @transform_3, window_bounds = array<i64: 3, 32, 32>}, {pipeline_mode = #tpu.pipeline_mode<synchronous>, transform_indices = @transform_4, window_bounds = array<i64: 3, 32, 1>}, {pipeline_mode = #tpu.pipeline_mode<synchronous>, transform_indices = @transform_5, window_bounds = array<i64: 32, 32>}, {pipeline_mode = #tpu.pipeline_mode<synchronous>, transform_indices = @transform_6, window_bounds = array<i64: 32, 1>}, {transform_indices = @transform_7, window_bounds = array<i64: 2, 32, 1>}]} {
    %c0 = arith.constant 0 : index
    %c0_0 = arith.constant 0 : index
    %c0_1 = arith.constant 0 : index
    %0 = vector.load %arg1[%c0, %c0_0, %c0_1] : memref<2x32x31xbf16, #tpu.memory_space<vmem>>, vector<2x32x31xbf16>
    %1 = arith.extf %0 : vector<2x32x31xbf16> to vector<2x32x31xf32>
    %c0_2 = arith.constant 0 : index
    %c0_3 = arith.constant 0 : index
    %c0_4 = arith.constant 0 : index
    %2 = vector.load %arg2[%c0_2, %c0_3, %c0_4] : memref<3x32x32xf32, #tpu.memory_space<vmem>>, vector<1x32x32xf32>
    %3 = vector.shape_cast %2 : vector<1x32x32xf32> to vector<32x32xf32>
    %4 = vector.shape_cast %3 : vector<32x32xf32> to vector<1x32x32xf32>
    %5 = vector.shape_cast %4 : vector<1x32x32xf32> to vector<1x32x32xf32>
    %6 = vector.broadcast %5 : vector<1x32x32xf32> to vector<2x32x32xf32>
    "tpu.trace_start"() <{level = 10 : i32, message = "boc,bct->bot"}> : () -> ()
    %cst = arith.constant dense<0.000000e+00> : vector<2x32x31xf32>
    %7 = tpu.matmul %6, %1, %cst {dimension_numbers = #tpu.dot_dimension_numbers<[2], [1], [1], [2], [0, 0, 0, 1, 1, 2], [0], [0]>} : vector<2x32x32xf32>, vector<2x32x31xf32>, vector<2x32x31xf32> -> vector<2x32x31xf32>
    "tpu.trace_stop"() : () -> ()
    %c0_5 = arith.constant 0 : index
    %c0_6 = arith.constant 0 : index
    %c0_7 = arith.constant 0 : index
    %8 = vector.load %arg3[%c0_5, %c0_6, %c0_7] : memref<3x32x1xf32, #tpu.memory_space<vmem>>, vector<1x32x1xf32>
    %9 = vector.shape_cast %8 : vector<1x32x1xf32> to vector<32x1xf32>
    %10 = vector.shape_cast %9 : vector<32x1xf32> to vector<1x32x1xf32>
    %11 = vector.broadcast %10 : vector<1x32x1xf32> to vector<2x32x31xf32>
    %12 = arith.addf %7, %11 : vector<2x32x31xf32>
    %cst_8 = arith.constant 0.999994993 : f32
    %13 = vector.broadcast %cst_8 : f32 to vector<2x32x31xf32>
    %14 = arith.mulf %12, %13 : vector<2x32x31xf32>
    %cst_9 = arith.constant 0.000000e+00 : f32
    %15 = vector.broadcast %cst_9 : f32 to vector<2x32x31xf32>
    %16 = arith.cmpf oge, %14, %15 : vector<2x32x31xf32>
    %cst_10 = arith.constant 2.500000e-01 : f32
    %17 = vector.broadcast %cst_10 : f32 to vector<2x32x31xf32>
    %18 = arith.mulf %17, %14 : vector<2x32x31xf32>
    %19 = arith.select %16, %14, %18 : vector<2x32x31xi1>, vector<2x32x31xf32>
    %c0_11 = arith.constant 0 : index
    %c0_12 = arith.constant 0 : index
    %c0_13 = arith.constant 0 : index
    %20 = vector.load %arg4[%c0_11, %c0_12, %c0_13] : memref<3x32x32xf32, #tpu.memory_space<vmem>>, vector<1x32x32xf32>
    %21 = vector.shape_cast %20 : vector<1x32x32xf32> to vector<32x32xf32>
    %22 = vector.shape_cast %21 : vector<32x32xf32> to vector<1x32x32xf32>
    %23 = vector.shape_cast %22 : vector<1x32x32xf32> to vector<1x32x32xf32>
    %24 = vector.broadcast %23 : vector<1x32x32xf32> to vector<2x32x32xf32>
    "tpu.trace_start"() <{level = 10 : i32, message = "boc,bct->bot"}> : () -> ()
    %cst_14 = arith.constant dense<0.000000e+00> : vector<2x32x31xf32>
    %25 = tpu.matmul %24, %19, %cst_14 {dimension_numbers = #tpu.dot_dimension_numbers<[2], [1], [1], [2], [0, 0, 0, 1, 1, 2], [0], [0]>} : vector<2x32x32xf32>, vector<2x32x31xf32>, vector<2x32x31xf32> -> vector<2x32x31xf32>
    "tpu.trace_stop"() : () -> ()
    %c0_15 = arith.constant 0 : index
    %c0_16 = arith.constant 0 : index
    %c0_17 = arith.constant 0 : index
    %26 = vector.load %arg5[%c0_15, %c0_16, %c0_17] : memref<3x32x1xf32, #tpu.memory_space<vmem>>, vector<1x32x1xf32>
    %27 = vector.shape_cast %26 : vector<1x32x1xf32> to vector<32x1xf32>
    %28 = vector.shape_cast %27 : vector<32x1xf32> to vector<1x32x1xf32>
    %29 = vector.broadcast %28 : vector<1x32x1xf32> to vector<2x32x31xf32>
    %30 = arith.addf %25, %29 : vector<2x32x31xf32>
    %cst_18 = arith.constant 0.999994993 : f32
    %31 = vector.broadcast %cst_18 : f32 to vector<2x32x31xf32>
    %32 = arith.mulf %30, %31 : vector<2x32x31xf32>
    %33 = arith.addf %1, %32 : vector<2x32x31xf32>
    %cst_19 = arith.constant 0.000000e+00 : f32
    %34 = vector.broadcast %cst_19 : f32 to vector<2x32x31xf32>
    %35 = arith.cmpf oge, %33, %34 : vector<2x32x31xf32>
    %cst_20 = arith.constant 2.500000e-01 : f32
    %36 = vector.broadcast %cst_20 : f32 to vector<2x32x31xf32>
    %37 = arith.mulf %36, %33 : vector<2x32x31xf32>
    %38 = arith.select %35, %33, %37 : vector<2x32x31xi1>, vector<2x32x31xf32>
    %cst_21 = arith.constant 0.000000e+00 : f32
    %39 = vector.broadcast %cst_21 : f32 to vector<2x32x1xf32>
    %40 = vector.extract_strided_slice %38 {offsets = [0, 0, 1], sizes = [2, 32, 30], strides = [1, 1, 1]} : vector<2x32x31xf32> to vector<2x32x30xf32>
    %41 = tpu.concatenate %40, %39 in 2 : vector<2x32x30xf32>, vector<2x32x1xf32> -> vector<2x32x31xf32>
    %42 = arith.maximumf %38, %41 : vector<2x32x31xf32>
    %cst_22 = arith.constant 0.000000e+00 : f32
    %43 = vector.broadcast %cst_22 : f32 to vector<2x32x2xf32>
    %44 = vector.extract_strided_slice %38 {offsets = [0, 0, 2], sizes = [2, 32, 29], strides = [1, 1, 1]} : vector<2x32x31xf32> to vector<2x32x29xf32>
    %45 = tpu.concatenate %44, %43 in 2 : vector<2x32x29xf32>, vector<2x32x2xf32> -> vector<2x32x31xf32>
    %46 = arith.maximumf %42, %45 : vector<2x32x31xf32>
    %c1 = arith.constant 1 : index
    %c0_23 = arith.constant 0 : index
    %c0_24 = arith.constant 0 : index
    %47 = vector.load %arg2[%c1, %c0_23, %c0_24] : memref<3x32x32xf32, #tpu.memory_space<vmem>>, vector<1x32x32xf32>
    %48 = vector.shape_cast %47 : vector<1x32x32xf32> to vector<32x32xf32>
    %49 = vector.shape_cast %48 : vector<32x32xf32> to vector<1x32x32xf32>
    %50 = vector.shape_cast %49 : vector<1x32x32xf32> to vector<1x32x32xf32>
    %51 = vector.broadcast %50 : vector<1x32x32xf32> to vector<2x32x32xf32>
    "tpu.trace_start"() <{level = 10 : i32, message = "boc,bct->bot"}> : () -> ()
    %cst_25 = arith.constant dense<0.000000e+00> : vector<2x32x31xf32>
    %52 = tpu.matmul %51, %46, %cst_25 {dimension_numbers = #tpu.dot_dimension_numbers<[2], [1], [1], [2], [0, 0, 0, 1, 1, 2], [0], [0]>} : vector<2x32x32xf32>, vector<2x32x31xf32>, vector<2x32x31xf32> -> vector<2x32x31xf32>
    "tpu.trace_stop"() : () -> ()
    %c1_26 = arith.constant 1 : index
    %c0_27 = arith.constant 0 : index
    %c0_28 = arith.constant 0 : index
    %53 = vector.load %arg3[%c1_26, %c0_27, %c0_28] : memref<3x32x1xf32, #tpu.memory_space<vmem>>, vector<1x32x1xf32>
    %54 = vector.shape_cast %53 : vector<1x32x1xf32> to vector<32x1xf32>
    %55 = vector.shape_cast %54 : vector<32x1xf32> to vector<1x32x1xf32>
    %56 = vector.broadcast %55 : vector<1x32x1xf32> to vector<2x32x31xf32>
    %57 = arith.addf %52, %56 : vector<2x32x31xf32>
    %cst_29 = arith.constant 0.999994993 : f32
    %58 = vector.broadcast %cst_29 : f32 to vector<2x32x31xf32>
    %59 = arith.mulf %57, %58 : vector<2x32x31xf32>
    %cst_30 = arith.constant 0.000000e+00 : f32
    %60 = vector.broadcast %cst_30 : f32 to vector<2x32x31xf32>
    %61 = arith.cmpf oge, %59, %60 : vector<2x32x31xf32>
    %cst_31 = arith.constant 2.500000e-01 : f32
    %62 = vector.broadcast %cst_31 : f32 to vector<2x32x31xf32>
    %63 = arith.mulf %62, %59 : vector<2x32x31xf32>
    %64 = arith.select %61, %59, %63 : vector<2x32x31xi1>, vector<2x32x31xf32>
    %c1_32 = arith.constant 1 : index
    %c0_33 = arith.constant 0 : index
    %c0_34 = arith.constant 0 : index
    %65 = vector.load %arg4[%c1_32, %c0_33, %c0_34] : memref<3x32x32xf32, #tpu.memory_space<vmem>>, vector<1x32x32xf32>
    %66 = vector.shape_cast %65 : vector<1x32x32xf32> to vector<32x32xf32>
    %67 = vector.shape_cast %66 : vector<32x32xf32> to vector<1x32x32xf32>
    %68 = vector.shape_cast %67 : vector<1x32x32xf32> to vector<1x32x32xf32>
    %69 = vector.broadcast %68 : vector<1x32x32xf32> to vector<2x32x32xf32>
    "tpu.trace_start"() <{level = 10 : i32, message = "boc,bct->bot"}> : () -> ()
    %cst_35 = arith.constant dense<0.000000e+00> : vector<2x32x31xf32>
    %70 = tpu.matmul %69, %64, %cst_35 {dimension_numbers = #tpu.dot_dimension_numbers<[2], [1], [1], [2], [0, 0, 0, 1, 1, 2], [0], [0]>} : vector<2x32x32xf32>, vector<2x32x31xf32>, vector<2x32x31xf32> -> vector<2x32x31xf32>
    "tpu.trace_stop"() : () -> ()
    %c1_36 = arith.constant 1 : index
    %c0_37 = arith.constant 0 : index
    %c0_38 = arith.constant 0 : index
    %71 = vector.load %arg5[%c1_36, %c0_37, %c0_38] : memref<3x32x1xf32, #tpu.memory_space<vmem>>, vector<1x32x1xf32>
    %72 = vector.shape_cast %71 : vector<1x32x1xf32> to vector<32x1xf32>
    %73 = vector.shape_cast %72 : vector<32x1xf32> to vector<1x32x1xf32>
    %74 = vector.broadcast %73 : vector<1x32x1xf32> to vector<2x32x31xf32>
    %75 = arith.addf %70, %74 : vector<2x32x31xf32>
    %cst_39 = arith.constant 0.999994993 : f32
    %76 = vector.broadcast %cst_39 : f32 to vector<2x32x31xf32>
    %77 = arith.mulf %75, %76 : vector<2x32x31xf32>
    %78 = arith.addf %46, %77 : vector<2x32x31xf32>
    %cst_40 = arith.constant 0.000000e+00 : f32
    %79 = vector.broadcast %cst_40 : f32 to vector<2x32x31xf32>
    %80 = arith.cmpf oge, %78, %79 : vector<2x32x31xf32>
    %cst_41 = arith.constant 2.500000e-01 : f32
    %81 = vector.broadcast %cst_41 : f32 to vector<2x32x31xf32>
    %82 = arith.mulf %81, %78 : vector<2x32x31xf32>
    %83 = arith.select %80, %78, %82 : vector<2x32x31xi1>, vector<2x32x31xf32>
    %cst_42 = arith.constant 0.000000e+00 : f32
    %84 = vector.broadcast %cst_42 : f32 to vector<2x32x3xf32>
    %85 = vector.extract_strided_slice %83 {offsets = [0, 0, 3], sizes = [2, 32, 28], strides = [1, 1, 1]} : vector<2x32x31xf32> to vector<2x32x28xf32>
    %86 = tpu.concatenate %85, %84 in 2 : vector<2x32x28xf32>, vector<2x32x3xf32> -> vector<2x32x31xf32>
    %87 = arith.maximumf %83, %86 : vector<2x32x31xf32>
    %cst_43 = arith.constant 0.000000e+00 : f32
    %88 = vector.broadcast %cst_43 : f32 to vector<2x32x6xf32>
    %89 = vector.extract_strided_slice %83 {offsets = [0, 0, 6], sizes = [2, 32, 25], strides = [1, 1, 1]} : vector<2x32x31xf32> to vector<2x32x25xf32>
    %90 = tpu.concatenate %89, %88 in 2 : vector<2x32x25xf32>, vector<2x32x6xf32> -> vector<2x32x31xf32>
    %91 = arith.maximumf %87, %90 : vector<2x32x31xf32>
    %c2 = arith.constant 2 : index
    %c0_44 = arith.constant 0 : index
    %c0_45 = arith.constant 0 : index
    %92 = vector.load %arg2[%c2, %c0_44, %c0_45] : memref<3x32x32xf32, #tpu.memory_space<vmem>>, vector<1x32x32xf32>
    %93 = vector.shape_cast %92 : vector<1x32x32xf32> to vector<32x32xf32>
    %94 = vector.shape_cast %93 : vector<32x32xf32> to vector<1x32x32xf32>
    %95 = vector.shape_cast %94 : vector<1x32x32xf32> to vector<1x32x32xf32>
    %96 = vector.broadcast %95 : vector<1x32x32xf32> to vector<2x32x32xf32>
    "tpu.trace_start"() <{level = 10 : i32, message = "boc,bct->bot"}> : () -> ()
    %cst_46 = arith.constant dense<0.000000e+00> : vector<2x32x31xf32>
    %97 = tpu.matmul %96, %91, %cst_46 {dimension_numbers = #tpu.dot_dimension_numbers<[2], [1], [1], [2], [0, 0, 0, 1, 1, 2], [0], [0]>} : vector<2x32x32xf32>, vector<2x32x31xf32>, vector<2x32x31xf32> -> vector<2x32x31xf32>
    "tpu.trace_stop"() : () -> ()
    %c2_47 = arith.constant 2 : index
    %c0_48 = arith.constant 0 : index
    %c0_49 = arith.constant 0 : index
    %98 = vector.load %arg3[%c2_47, %c0_48, %c0_49] : memref<3x32x1xf32, #tpu.memory_space<vmem>>, vector<1x32x1xf32>
    %99 = vector.shape_cast %98 : vector<1x32x1xf32> to vector<32x1xf32>
    %100 = vector.shape_cast %99 : vector<32x1xf32> to vector<1x32x1xf32>
    %101 = vector.broadcast %100 : vector<1x32x1xf32> to vector<2x32x31xf32>
    %102 = arith.addf %97, %101 : vector<2x32x31xf32>
    %cst_50 = arith.constant 0.999994993 : f32
    %103 = vector.broadcast %cst_50 : f32 to vector<2x32x31xf32>
    %104 = arith.mulf %102, %103 : vector<2x32x31xf32>
    %cst_51 = arith.constant 0.000000e+00 : f32
    %105 = vector.broadcast %cst_51 : f32 to vector<2x32x31xf32>
    %106 = arith.cmpf oge, %104, %105 : vector<2x32x31xf32>
    %cst_52 = arith.constant 2.500000e-01 : f32
    %107 = vector.broadcast %cst_52 : f32 to vector<2x32x31xf32>
    %108 = arith.mulf %107, %104 : vector<2x32x31xf32>
    %109 = arith.select %106, %104, %108 : vector<2x32x31xi1>, vector<2x32x31xf32>
    %c2_53 = arith.constant 2 : index
    %c0_54 = arith.constant 0 : index
    %c0_55 = arith.constant 0 : index
    %110 = vector.load %arg4[%c2_53, %c0_54, %c0_55] : memref<3x32x32xf32, #tpu.memory_space<vmem>>, vector<1x32x32xf32>
    %111 = vector.shape_cast %110 : vector<1x32x32xf32> to vector<32x32xf32>
    %112 = vector.shape_cast %111 : vector<32x32xf32> to vector<1x32x32xf32>
    %113 = vector.shape_cast %112 : vector<1x32x32xf32> to vector<1x32x32xf32>
    %114 = vector.broadcast %113 : vector<1x32x32xf32> to vector<2x32x32xf32>
    "tpu.trace_start"() <{level = 10 : i32, message = "boc,bct->bot"}> : () -> ()
    %cst_56 = arith.constant dense<0.000000e+00> : vector<2x32x31xf32>
    %115 = tpu.matmul %114, %109, %cst_56 {dimension_numbers = #tpu.dot_dimension_numbers<[2], [1], [1], [2], [0, 0, 0, 1, 1, 2], [0], [0]>} : vector<2x32x32xf32>, vector<2x32x31xf32>, vector<2x32x31xf32> -> vector<2x32x31xf32>
    "tpu.trace_stop"() : () -> ()
    %c2_57 = arith.constant 2 : index
    %c0_58 = arith.constant 0 : index
    %c0_59 = arith.constant 0 : index
    %116 = vector.load %arg5[%c2_57, %c0_58, %c0_59] : memref<3x32x1xf32, #tpu.memory_space<vmem>>, vector<1x32x1xf32>
    %117 = vector.shape_cast %116 : vector<1x32x1xf32> to vector<32x1xf32>
    %118 = vector.shape_cast %117 : vector<32x1xf32> to vector<1x32x1xf32>
    %119 = vector.broadcast %118 : vector<1x32x1xf32> to vector<2x32x31xf32>
    %120 = arith.addf %115, %119 : vector<2x32x31xf32>
    %cst_60 = arith.constant 0.999994993 : f32
    %121 = vector.broadcast %cst_60 : f32 to vector<2x32x31xf32>
    %122 = arith.mulf %120, %121 : vector<2x32x31xf32>
    %123 = arith.addf %91, %122 : vector<2x32x31xf32>
    %cst_61 = arith.constant 0.000000e+00 : f32
    %124 = vector.broadcast %cst_61 : f32 to vector<2x32x31xf32>
    %125 = arith.cmpf oge, %123, %124 : vector<2x32x31xf32>
    %cst_62 = arith.constant 2.500000e-01 : f32
    %126 = vector.broadcast %cst_62 : f32 to vector<2x32x31xf32>
    %127 = arith.mulf %126, %123 : vector<2x32x31xf32>
    %128 = arith.select %125, %123, %127 : vector<2x32x31xi1>, vector<2x32x31xf32>
    %cst_63 = arith.constant 0.000000e+00 : f32
    %129 = vector.broadcast %cst_63 : f32 to vector<2x32x9xf32>
    %130 = vector.extract_strided_slice %128 {offsets = [0, 0, 9], sizes = [2, 32, 22], strides = [1, 1, 1]} : vector<2x32x31xf32> to vector<2x32x22xf32>
    %131 = tpu.concatenate %130, %129 in 2 : vector<2x32x22xf32>, vector<2x32x9xf32> -> vector<2x32x31xf32>
    %132 = arith.maximumf %128, %131 : vector<2x32x31xf32>
    %cst_64 = arith.constant 0.000000e+00 : f32
    %133 = vector.broadcast %cst_64 : f32 to vector<2x32x18xf32>
    %134 = vector.extract_strided_slice %128 {offsets = [0, 0, 18], sizes = [2, 32, 13], strides = [1, 1, 1]} : vector<2x32x31xf32> to vector<2x32x13xf32>
    %135 = tpu.concatenate %134, %133 in 2 : vector<2x32x13xf32>, vector<2x32x18xf32> -> vector<2x32x31xf32>
    %136 = arith.maximumf %132, %135 : vector<2x32x31xf32>
    %c0_65 = arith.constant 0 : index
    %c0_66 = arith.constant 0 : index
    %137 = vector.load %arg6[%c0_65, %c0_66] : memref<32x32xf32, #tpu.memory_space<vmem>>, vector<32x32xf32>
    %138 = vector.shape_cast %137 : vector<32x32xf32> to vector<1x32x32xf32>
    %139 = vector.shape_cast %138 : vector<1x32x32xf32> to vector<1x32x32xf32>
    %140 = vector.broadcast %139 : vector<1x32x32xf32> to vector<2x32x32xf32>
    "tpu.trace_start"() <{level = 10 : i32, message = "boc,bct->bot"}> : () -> ()
    %cst_67 = arith.constant dense<0.000000e+00> : vector<2x32x31xf32>
    %141 = tpu.matmul %140, %136, %cst_67 {dimension_numbers = #tpu.dot_dimension_numbers<[2], [1], [1], [2], [0, 0, 0, 1, 1, 2], [0], [0]>} : vector<2x32x32xf32>, vector<2x32x31xf32>, vector<2x32x31xf32> -> vector<2x32x31xf32>
    "tpu.trace_stop"() : () -> ()
    %c0_68 = arith.constant 0 : index
    %c0_69 = arith.constant 0 : index
    %142 = vector.load %arg7[%c0_68, %c0_69] : memref<32x1xf32, #tpu.memory_space<vmem>>, vector<32x1xf32>
    %143 = vector.shape_cast %142 : vector<32x1xf32> to vector<1x32x1xf32>
    %144 = vector.broadcast %143 : vector<1x32x1xf32> to vector<2x32x31xf32>
    %145 = arith.addf %141, %144 : vector<2x32x31xf32>
    %146 = tpu.iota {dimensions = array<i32: 2>} : vector<2x32x31xi32>
    %c27_i32 = arith.constant 27 : i32
    %c0_i32 = arith.constant 0 : i32
    %147 = arith.cmpi eq, %c27_i32, %c0_i32 : i32
    %c1_i32 = arith.constant 1 : i32
    %148 = arith.select %147, %c1_i32, %c27_i32 : i32
    %149 = vector.broadcast %148 : i32 to vector<2x32x31xi32>
    %150 = arith.remsi %146, %149 : vector<2x32x31xi32>
    %c0_i32_70 = arith.constant 0 : i32
    %151 = vector.broadcast %c0_i32_70 : i32 to vector<2x32x31xi32>
    %152 = arith.cmpi ne, %150, %151 : vector<2x32x31xi32>
    %c0_i32_71 = arith.constant 0 : i32
    %153 = vector.broadcast %c0_i32_71 : i32 to vector<2x32x31xi32>
    %154 = arith.cmpi slt, %150, %153 : vector<2x32x31xi32>
    %c0_i32_72 = arith.constant 0 : i32
    %155 = arith.cmpi slt, %148, %c0_i32_72 : i32
    %156 = vector.broadcast %155 : i1 to vector<2x32x31xi1>
    %157 = vector.broadcast %156 : vector<2x32x31xi1> to vector<2x32x31xi1>
    %158 = arith.xori %154, %157 : vector<2x32x31xi1>
    %159 = arith.andi %158, %152 : vector<2x32x31xi1>
    %160 = vector.broadcast %148 : i32 to vector<2x32x31xi32>
    %161 = arith.addi %150, %160 : vector<2x32x31xi32>
    %162 = arith.select %159, %161, %150 : vector<2x32x31xi1>, vector<2x32x31xi32>
    %c0_i32_73 = arith.constant 0 : i32
    %163 = vector.broadcast %c0_i32_73 : i32 to vector<2x32x31xi32>
    %164 = arith.cmpi eq, %162, %163 : vector<2x32x31xi32>
    %c27_i32_74 = arith.constant 27 : i32
    %165 = vector.broadcast %c27_i32_74 : i32 to vector<2x32x31xi32>
    %166 = arith.cmpi slt, %146, %165 : vector<2x32x31xi32>
    %167 = arith.andi %164, %166 : vector<2x32x31xi1>
    %cst_75 = arith.constant 0.000000e+00 : f32
    %168 = vector.broadcast %cst_75 : f32 to vector<2x32x31xf32>
    %169 = arith.select %167, %145, %168 : vector<2x32x31xi1>, vector<2x32x31xf32>
    %cst_76 = arith.constant dense<0.000000e+00> : vector<2x32xf32>
    %170 = vector.multi_reduction <add>, %169, %cst_76 [2] : vector<2x32x31xf32> to vector<2x32xf32>
    %171 = vector.shape_cast %170 : vector<2x32xf32> to vector<2x32x1xf32>
    %c0_77 = arith.constant 0 : index
    %c0_78 = arith.constant 0 : index
    %c0_79 = arith.constant 0 : index
    %172 = vector.load %arg8[%c0_77, %c0_78, %c0_79] : memref<2x32x1xf32, #tpu.memory_space<vmem>>, vector<2x32x1xf32>
    tpu.vector_store %arg8[%c0_77, %c0_78, %c0_79], %171 {strides = array<i32>} : memref<2x32x1xf32, #tpu.memory_space<vmem>>, vector<2x32x1xf32>,
    return
  }
  func.func @transform_0(%arg0: i32) -> (i32, i32, i32) {
    %c0_i32 = arith.constant 0 : i32
    %c0_i32_0 = arith.constant 0 : i32
    %c0_i32_1 = arith.constant 0 : i32
    return %arg0, %c0_i32, %c0_i32_0 : i32, i32, i32
  }
  func.func @transform_1(%arg0: i32) -> (i32, i32, i32) {
    %c0_i32 = arith.constant 0 : i32
    %c0_i32_0 = arith.constant 0 : i32
    %c0_i32_1 = arith.constant 0 : i32
    %c0_i32_2 = arith.constant 0 : i32
    return %c0_i32, %c0_i32_0, %c0_i32_1 : i32, i32, i32
  }
  func.func @transform_2(%arg0: i32) -> (i32, i32, i32) {
    %c0_i32 = arith.constant 0 : i32
    %c0_i32_0 = arith.constant 0 : i32
    %c0_i32_1 = arith.constant 0 : i32
    %c0_i32_2 = arith.constant 0 : i32
    return %c0_i32, %c0_i32_0, %c0_i32_1 : i32, i32, i32
  }
  func.func @transform_3(%arg0: i32) -> (i32, i32, i32) {
    %c0_i32 = arith.constant 0 : i32
    %c0_i32_0 = arith.constant 0 : i32
    %c0_i32_1 = arith.constant 0 : i32
    %c0_i32_2 = arith.constant 0 : i32
    return %c0_i32, %c0_i32_0, %c0_i32_1 : i32, i32, i32
  }
  func.func @transform_4(%arg0: i32) -> (i32, i32, i32) {
    %c0_i32 = arith.constant 0 : i32
    %c0_i32_0 = arith.constant 0 : i32
    %c0_i32_1 = arith.constant 0 : i32
    %c0_i32_2 = arith.constant 0 : i32
    return %c0_i32, %c0_i32_0, %c0_i32_1 : i32, i32, i32
  }
  func.func @transform_5(%arg0: i32) -> (i32, i32) {
    %c0_i32 = arith.constant 0 : i32
    %c0_i32_0 = arith.constant 0 : i32
    %c0_i32_1 = arith.constant 0 : i32
    return %c0_i32, %c0_i32_0 : i32, i32
  }
  func.func @transform_6(%arg0: i32) -> (i32, i32) {
    %c0_i32 = arith.constant 0 : i32
    %c0_i32_0 = arith.constant 0 : i32
    %c0_i32_1 = arith.constant 0 : i32
    return %c0_i32, %c0_i32_0 : i32, i32
  }
  func.func @transform_7(%arg0: i32) -> (i32, i32, i32) {
    %c0_i32 = arith.constant 0 : i32
    %c0_i32_0 = arith.constant 0 : i32
    %c0_i32_1 = arith.constant 0 : i32
    return %arg0, %c0_i32, %c0_i32_0 : i32, i32, i32
  }
}

module attributes {stable_mosaic.version = 11 : i64} {
  func.func @_encoder_kernel(%arg0: i32, %arg1: memref<2x2x38xf32, #tpu.memory_space<vmem>>, %arg2: memref<48x16xf32, #tpu.memory_space<vmem>>, %arg3: memref<48x1xf32, #tpu.memory_space<vmem>>, %arg4: memref<48x1xf32, #tpu.memory_space<vmem>>, %arg5: memref<48x1xf32, #tpu.memory_space<vmem>>, %arg6: memref<32x48xf32, #tpu.memory_space<vmem>>, %arg7: memref<32x1xf32, #tpu.memory_space<vmem>>, %arg8: memref<2x48x31xbf16, #tpu.memory_space<vmem>>, %arg9: memref<2x32x31xbf16, #tpu.memory_space<vmem>>, %arg10: memref<2x16x31xf32, #tpu.memory_space<vmem>>) attributes {dimension_semantics = [#tpu.dimension_semantics<parallel>], iteration_bounds = array<i64: 1>, scalar_prefetch = 0 : i64, scratch_operands = 1 : i64, tpu.core_type = #tpu.core_type<tc>, window_params = [{transform_indices = @transform_0, window_bounds = array<i64: 2, 2, 38>}, {pipeline_mode = #tpu.pipeline_mode<synchronous>, transform_indices = @transform_1, window_bounds = array<i64: 48, 16>}, {pipeline_mode = #tpu.pipeline_mode<synchronous>, transform_indices = @transform_2, window_bounds = array<i64: 48, 1>}, {pipeline_mode = #tpu.pipeline_mode<synchronous>, transform_indices = @transform_3, window_bounds = array<i64: 48, 1>}, {pipeline_mode = #tpu.pipeline_mode<synchronous>, transform_indices = @transform_4, window_bounds = array<i64: 48, 1>}, {pipeline_mode = #tpu.pipeline_mode<synchronous>, transform_indices = @transform_5, window_bounds = array<i64: 32, 48>}, {pipeline_mode = #tpu.pipeline_mode<synchronous>, transform_indices = @transform_6, window_bounds = array<i64: 32, 1>}, {transform_indices = @transform_7, window_bounds = array<i64: 2, 48, 31>}, {transform_indices = @transform_8, window_bounds = array<i64: 2, 32, 31>}]} {
    %c0 = arith.constant 0 : index
    %c0_0 = arith.constant 0 : index
    %c0_1 = arith.constant 0 : index
    %0 = vector.load %arg1[%c0, %c0_0, %c0_1] : memref<2x2x38xf32, #tpu.memory_space<vmem>>, vector<2x2x38xf32>
    %1 = vector.extract_strided_slice %0 {offsets = [0, 0, 0], sizes = [2, 1, 31], strides = [1, 1, 1]} : vector<2x2x38xf32> to vector<2x1x31xf32>
    %c0_2 = arith.constant 0 : index
    %c0_3 = arith.constant 0 : index
    %c0_4 = arith.constant 0 : index
    %2 = vector.load %arg10[%c0_2, %c0_3, %c0_4] : memref<2x16x31xf32, #tpu.memory_space<vmem>>, vector<2x1x31xf32>
    tpu.vector_store %arg10[%c0_2, %c0_3, %c0_4], %1 {strides = array<i32>} : memref<2x16x31xf32, #tpu.memory_space<vmem>>, vector<2x1x31xf32>,
    %3 = vector.extract_strided_slice %0 {offsets = [0, 1, 0], sizes = [2, 1, 31], strides = [1, 1, 1]} : vector<2x2x38xf32> to vector<2x1x31xf32>
    %c0_5 = arith.constant 0 : index
    %c1 = arith.constant 1 : index
    %c0_6 = arith.constant 0 : index
    %4 = vector.load %arg10[%c0_5, %c1, %c0_6] : memref<2x16x31xf32, #tpu.memory_space<vmem>>, vector<2x1x31xf32>
    tpu.vector_store %arg10[%c0_5, %c1, %c0_6], %3 {strides = array<i32>} : memref<2x16x31xf32, #tpu.memory_space<vmem>>, vector<2x1x31xf32>,
    %5 = vector.extract_strided_slice %0 {offsets = [0, 0, 1], sizes = [2, 1, 31], strides = [1, 1, 1]} : vector<2x2x38xf32> to vector<2x1x31xf32>
    %c0_7 = arith.constant 0 : index
    %c2 = arith.constant 2 : index
    %c0_8 = arith.constant 0 : index
    %6 = vector.load %arg10[%c0_7, %c2, %c0_8] : memref<2x16x31xf32, #tpu.memory_space<vmem>>, vector<2x1x31xf32>
    tpu.vector_store %arg10[%c0_7, %c2, %c0_8], %5 {strides = array<i32>} : memref<2x16x31xf32, #tpu.memory_space<vmem>>, vector<2x1x31xf32>,
    %7 = vector.extract_strided_slice %0 {offsets = [0, 1, 1], sizes = [2, 1, 31], strides = [1, 1, 1]} : vector<2x2x38xf32> to vector<2x1x31xf32>
    %c0_9 = arith.constant 0 : index
    %c3 = arith.constant 3 : index
    %c0_10 = arith.constant 0 : index
    %8 = vector.load %arg10[%c0_9, %c3, %c0_10] : memref<2x16x31xf32, #tpu.memory_space<vmem>>, vector<2x1x31xf32>
    tpu.vector_store %arg10[%c0_9, %c3, %c0_10], %7 {strides = array<i32>} : memref<2x16x31xf32, #tpu.memory_space<vmem>>, vector<2x1x31xf32>,
    %9 = vector.extract_strided_slice %0 {offsets = [0, 0, 2], sizes = [2, 1, 31], strides = [1, 1, 1]} : vector<2x2x38xf32> to vector<2x1x31xf32>
    %c0_11 = arith.constant 0 : index
    %c4 = arith.constant 4 : index
    %c0_12 = arith.constant 0 : index
    %10 = vector.load %arg10[%c0_11, %c4, %c0_12] : memref<2x16x31xf32, #tpu.memory_space<vmem>>, vector<2x1x31xf32>
    tpu.vector_store %arg10[%c0_11, %c4, %c0_12], %9 {strides = array<i32>} : memref<2x16x31xf32, #tpu.memory_space<vmem>>, vector<2x1x31xf32>,
    %11 = vector.extract_strided_slice %0 {offsets = [0, 1, 2], sizes = [2, 1, 31], strides = [1, 1, 1]} : vector<2x2x38xf32> to vector<2x1x31xf32>
    %c0_13 = arith.constant 0 : index
    %c5 = arith.constant 5 : index
    %c0_14 = arith.constant 0 : index
    %12 = vector.load %arg10[%c0_13, %c5, %c0_14] : memref<2x16x31xf32, #tpu.memory_space<vmem>>, vector<2x1x31xf32>
    tpu.vector_store %arg10[%c0_13, %c5, %c0_14], %11 {strides = array<i32>} : memref<2x16x31xf32, #tpu.memory_space<vmem>>, vector<2x1x31xf32>,
    %13 = vector.extract_strided_slice %0 {offsets = [0, 0, 3], sizes = [2, 1, 31], strides = [1, 1, 1]} : vector<2x2x38xf32> to vector<2x1x31xf32>
    %c0_15 = arith.constant 0 : index
    %c6 = arith.constant 6 : index
    %c0_16 = arith.constant 0 : index
    %14 = vector.load %arg10[%c0_15, %c6, %c0_16] : memref<2x16x31xf32, #tpu.memory_space<vmem>>, vector<2x1x31xf32>
    tpu.vector_store %arg10[%c0_15, %c6, %c0_16], %13 {strides = array<i32>} : memref<2x16x31xf32, #tpu.memory_space<vmem>>, vector<2x1x31xf32>,
    %15 = vector.extract_strided_slice %0 {offsets = [0, 1, 3], sizes = [2, 1, 31], strides = [1, 1, 1]} : vector<2x2x38xf32> to vector<2x1x31xf32>
    %c0_17 = arith.constant 0 : index
    %c7 = arith.constant 7 : index
    %c0_18 = arith.constant 0 : index
    %16 = vector.load %arg10[%c0_17, %c7, %c0_18] : memref<2x16x31xf32, #tpu.memory_space<vmem>>, vector<2x1x31xf32>
    tpu.vector_store %arg10[%c0_17, %c7, %c0_18], %15 {strides = array<i32>} : memref<2x16x31xf32, #tpu.memory_space<vmem>>, vector<2x1x31xf32>,
    %17 = vector.extract_strided_slice %0 {offsets = [0, 0, 4], sizes = [2, 1, 31], strides = [1, 1, 1]} : vector<2x2x38xf32> to vector<2x1x31xf32>
    %c0_19 = arith.constant 0 : index
    %c8 = arith.constant 8 : index
    %c0_20 = arith.constant 0 : index
    %18 = vector.load %arg10[%c0_19, %c8, %c0_20] : memref<2x16x31xf32, #tpu.memory_space<vmem>>, vector<2x1x31xf32>
    tpu.vector_store %arg10[%c0_19, %c8, %c0_20], %17 {strides = array<i32>} : memref<2x16x31xf32, #tpu.memory_space<vmem>>, vector<2x1x31xf32>,
    %19 = vector.extract_strided_slice %0 {offsets = [0, 1, 4], sizes = [2, 1, 31], strides = [1, 1, 1]} : vector<2x2x38xf32> to vector<2x1x31xf32>
    %c0_21 = arith.constant 0 : index
    %c9 = arith.constant 9 : index
    %c0_22 = arith.constant 0 : index
    %20 = vector.load %arg10[%c0_21, %c9, %c0_22] : memref<2x16x31xf32, #tpu.memory_space<vmem>>, vector<2x1x31xf32>
    tpu.vector_store %arg10[%c0_21, %c9, %c0_22], %19 {strides = array<i32>} : memref<2x16x31xf32, #tpu.memory_space<vmem>>, vector<2x1x31xf32>,
    %21 = vector.extract_strided_slice %0 {offsets = [0, 0, 5], sizes = [2, 1, 31], strides = [1, 1, 1]} : vector<2x2x38xf32> to vector<2x1x31xf32>
    %c0_23 = arith.constant 0 : index
    %c10 = arith.constant 10 : index
    %c0_24 = arith.constant 0 : index
    %22 = vector.load %arg10[%c0_23, %c10, %c0_24] : memref<2x16x31xf32, #tpu.memory_space<vmem>>, vector<2x1x31xf32>
    tpu.vector_store %arg10[%c0_23, %c10, %c0_24], %21 {strides = array<i32>} : memref<2x16x31xf32, #tpu.memory_space<vmem>>, vector<2x1x31xf32>,
    %23 = vector.extract_strided_slice %0 {offsets = [0, 1, 5], sizes = [2, 1, 31], strides = [1, 1, 1]} : vector<2x2x38xf32> to vector<2x1x31xf32>
    %c0_25 = arith.constant 0 : index
    %c11 = arith.constant 11 : index
    %c0_26 = arith.constant 0 : index
    %24 = vector.load %arg10[%c0_25, %c11, %c0_26] : memref<2x16x31xf32, #tpu.memory_space<vmem>>, vector<2x1x31xf32>
    tpu.vector_store %arg10[%c0_25, %c11, %c0_26], %23 {strides = array<i32>} : memref<2x16x31xf32, #tpu.memory_space<vmem>>, vector<2x1x31xf32>,
    %25 = vector.extract_strided_slice %0 {offsets = [0, 0, 6], sizes = [2, 1, 31], strides = [1, 1, 1]} : vector<2x2x38xf32> to vector<2x1x31xf32>
    %c0_27 = arith.constant 0 : index
    %c12 = arith.constant 12 : index
    %c0_28 = arith.constant 0 : index
    %26 = vector.load %arg10[%c0_27, %c12, %c0_28] : memref<2x16x31xf32, #tpu.memory_space<vmem>>, vector<2x1x31xf32>
    tpu.vector_store %arg10[%c0_27, %c12, %c0_28], %25 {strides = array<i32>} : memref<2x16x31xf32, #tpu.memory_space<vmem>>, vector<2x1x31xf32>,
    %27 = vector.extract_strided_slice %0 {offsets = [0, 1, 6], sizes = [2, 1, 31], strides = [1, 1, 1]} : vector<2x2x38xf32> to vector<2x1x31xf32>
    %c0_29 = arith.constant 0 : index
    %c13 = arith.constant 13 : index
    %c0_30 = arith.constant 0 : index
    %28 = vector.load %arg10[%c0_29, %c13, %c0_30] : memref<2x16x31xf32, #tpu.memory_space<vmem>>, vector<2x1x31xf32>
    tpu.vector_store %arg10[%c0_29, %c13, %c0_30], %27 {strides = array<i32>} : memref<2x16x31xf32, #tpu.memory_space<vmem>>, vector<2x1x31xf32>,
    %29 = vector.extract_strided_slice %0 {offsets = [0, 0, 7], sizes = [2, 1, 31], strides = [1, 1, 1]} : vector<2x2x38xf32> to vector<2x1x31xf32>
    %c0_31 = arith.constant 0 : index
    %c14 = arith.constant 14 : index
    %c0_32 = arith.constant 0 : index
    %30 = vector.load %arg10[%c0_31, %c14, %c0_32] : memref<2x16x31xf32, #tpu.memory_space<vmem>>, vector<2x1x31xf32>
    tpu.vector_store %arg10[%c0_31, %c14, %c0_32], %29 {strides = array<i32>} : memref<2x16x31xf32, #tpu.memory_space<vmem>>, vector<2x1x31xf32>,
    %31 = vector.extract_strided_slice %0 {offsets = [0, 1, 7], sizes = [2, 1, 31], strides = [1, 1, 1]} : vector<2x2x38xf32> to vector<2x1x31xf32>
    %c0_33 = arith.constant 0 : index
    %c15 = arith.constant 15 : index
    %c0_34 = arith.constant 0 : index
    %32 = vector.load %arg10[%c0_33, %c15, %c0_34] : memref<2x16x31xf32, #tpu.memory_space<vmem>>, vector<2x1x31xf32>
    tpu.vector_store %arg10[%c0_33, %c15, %c0_34], %31 {strides = array<i32>} : memref<2x16x31xf32, #tpu.memory_space<vmem>>, vector<2x1x31xf32>,
    %c0_35 = arith.constant 0 : index
    %c0_36 = arith.constant 0 : index
    %33 = vector.load %arg2[%c0_35, %c0_36] : memref<48x16xf32, #tpu.memory_space<vmem>>, vector<48x16xf32>
    %c0_37 = arith.constant 0 : index
    %c0_38 = arith.constant 0 : index
    %c0_39 = arith.constant 0 : index
    %34 = vector.load %arg10[%c0_37, %c0_38, %c0_39] : memref<2x16x31xf32, #tpu.memory_space<vmem>>, vector<2x16x31xf32>
    %35 = vector.shape_cast %33 : vector<48x16xf32> to vector<1x48x16xf32>
    %36 = vector.shape_cast %35 : vector<1x48x16xf32> to vector<1x48x16xf32>
    %37 = vector.broadcast %36 : vector<1x48x16xf32> to vector<2x48x16xf32>
    "tpu.trace_start"() <{level = 10 : i32, message = "boc,bct->bot"}> : () -> ()
    %cst = arith.constant dense<0.000000e+00> : vector<2x48x31xf32>
    %38 = tpu.matmul %37, %34, %cst {dimension_numbers = #tpu.dot_dimension_numbers<[2], [1], [1], [2], [0, 0, 0, 1, 1, 2], [0], [0]>} : vector<2x48x16xf32>, vector<2x16x31xf32>, vector<2x48x31xf32> -> vector<2x48x31xf32>
    "tpu.trace_stop"() : () -> ()
    %c0_40 = arith.constant 0 : index
    %c0_41 = arith.constant 0 : index
    %39 = vector.load %arg3[%c0_40, %c0_41] : memref<48x1xf32, #tpu.memory_space<vmem>>, vector<48x1xf32>
    %40 = vector.shape_cast %39 : vector<48x1xf32> to vector<1x48x1xf32>
    %41 = vector.broadcast %40 : vector<1x48x1xf32> to vector<2x48x31xf32>
    %42 = arith.addf %38, %41 : vector<2x48x31xf32>
    %cst_42 = arith.constant 0.000000e+00 : f32
    %43 = vector.broadcast %cst_42 : f32 to vector<2x48x31xf32>
    %44 = arith.maximumf %42, %43 : vector<2x48x31xf32>
    %45 = arith.truncf %44 : vector<2x48x31xf32> to vector<2x48x31xbf16>
    %c0_43 = arith.constant 0 : index
    %c0_44 = arith.constant 0 : index
    %c0_45 = arith.constant 0 : index
    %46 = vector.load %arg8[%c0_43, %c0_44, %c0_45] : memref<2x48x31xbf16, #tpu.memory_space<vmem>>, vector<2x48x31xbf16>
    tpu.vector_store %arg8[%c0_43, %c0_44, %c0_45], %45 {strides = array<i32>} : memref<2x48x31xbf16, #tpu.memory_space<vmem>>, vector<2x48x31xbf16>,
    %cst_46 = arith.constant dense<0.000000e+00> : vector<2x31xf32>
    %47 = vector.multi_reduction <add>, %44, %cst_46 [1] : vector<2x48x31xf32> to vector<2x31xf32>
    %48 = vector.shape_cast %47 : vector<2x31xf32> to vector<2x1x31xf32>
    %cst_47 = arith.constant 4.800000e+01 : f32
    %49 = vector.broadcast %cst_47 : f32 to vector<2x1x31xf32>
    %50 = arith.divf %48, %49 : vector<2x1x31xf32>
    %51 = arith.mulf %44, %44 : vector<2x48x31xf32>
    %cst_48 = arith.constant dense<0.000000e+00> : vector<2x31xf32>
    %52 = vector.multi_reduction <add>, %51, %cst_48 [1] : vector<2x48x31xf32> to vector<2x31xf32>
    %53 = vector.shape_cast %52 : vector<2x31xf32> to vector<2x1x31xf32>
    %cst_49 = arith.constant 4.800000e+01 : f32
    %54 = vector.broadcast %cst_49 : f32 to vector<2x1x31xf32>
    %55 = arith.divf %53, %54 : vector<2x1x31xf32>
    %56 = arith.mulf %50, %50 : vector<2x1x31xf32>
    %57 = arith.subf %55, %56 : vector<2x1x31xf32>
    %cst_50 = arith.constant 0.000000e+00 : f32
    %58 = vector.broadcast %cst_50 : f32 to vector<2x1x31xf32>
    %59 = arith.maximumf %57, %58 : vector<2x1x31xf32>
    %60 = vector.broadcast %50 : vector<2x1x31xf32> to vector<2x48x31xf32>
    %61 = arith.subf %44, %60 : vector<2x48x31xf32>
    %cst_51 = arith.constant 9.99999974E-6 : f32
    %62 = vector.broadcast %cst_51 : f32 to vector<2x1x31xf32>
    %63 = arith.addf %59, %62 : vector<2x1x31xf32>
    %64 = math.rsqrt %63 : vector<2x1x31xf32>
    %65 = vector.broadcast %64 : vector<2x1x31xf32> to vector<2x48x31xf32>
    %66 = arith.mulf %61, %65 : vector<2x48x31xf32>
    %c0_52 = arith.constant 0 : index
    %c0_53 = arith.constant 0 : index
    %67 = vector.load %arg4[%c0_52, %c0_53] : memref<48x1xf32, #tpu.memory_space<vmem>>, vector<48x1xf32>
    %68 = vector.shape_cast %67 : vector<48x1xf32> to vector<1x48x1xf32>
    %69 = vector.broadcast %68 : vector<1x48x1xf32> to vector<2x48x31xf32>
    %70 = arith.mulf %66, %69 : vector<2x48x31xf32>
    %c0_54 = arith.constant 0 : index
    %c0_55 = arith.constant 0 : index
    %71 = vector.load %arg5[%c0_54, %c0_55] : memref<48x1xf32, #tpu.memory_space<vmem>>, vector<48x1xf32>
    %72 = vector.shape_cast %71 : vector<48x1xf32> to vector<1x48x1xf32>
    %73 = vector.broadcast %72 : vector<1x48x1xf32> to vector<2x48x31xf32>
    %74 = arith.addf %70, %73 : vector<2x48x31xf32>
    %c0_56 = arith.constant 0 : index
    %c0_57 = arith.constant 0 : index
    %75 = vector.load %arg6[%c0_56, %c0_57] : memref<32x48xf32, #tpu.memory_space<vmem>>, vector<32x48xf32>
    %76 = vector.shape_cast %75 : vector<32x48xf32> to vector<1x32x48xf32>
    %77 = vector.shape_cast %76 : vector<1x32x48xf32> to vector<1x32x48xf32>
    %78 = vector.broadcast %77 : vector<1x32x48xf32> to vector<2x32x48xf32>
    "tpu.trace_start"() <{level = 10 : i32, message = "boc,bct->bot"}> : () -> ()
    %cst_58 = arith.constant dense<0.000000e+00> : vector<2x32x31xf32>
    %79 = tpu.matmul %78, %74, %cst_58 {dimension_numbers = #tpu.dot_dimension_numbers<[2], [1], [1], [2], [0, 0, 0, 1, 1, 2], [0], [0]>} : vector<2x32x48xf32>, vector<2x48x31xf32>, vector<2x32x31xf32> -> vector<2x32x31xf32>
    "tpu.trace_stop"() : () -> ()
    %c0_59 = arith.constant 0 : index
    %c0_60 = arith.constant 0 : index
    %80 = vector.load %arg7[%c0_59, %c0_60] : memref<32x1xf32, #tpu.memory_space<vmem>>, vector<32x1xf32>
    %81 = vector.shape_cast %80 : vector<32x1xf32> to vector<1x32x1xf32>
    %82 = vector.broadcast %81 : vector<1x32x1xf32> to vector<2x32x31xf32>
    %83 = arith.addf %79, %82 : vector<2x32x31xf32>
    %84 = arith.truncf %83 : vector<2x32x31xf32> to vector<2x32x31xbf16>
    %c0_61 = arith.constant 0 : index
    %c0_62 = arith.constant 0 : index
    %c0_63 = arith.constant 0 : index
    %85 = vector.load %arg9[%c0_61, %c0_62, %c0_63] : memref<2x32x31xbf16, #tpu.memory_space<vmem>>, vector<2x32x31xbf16>
    tpu.vector_store %arg9[%c0_61, %c0_62, %c0_63], %84 {strides = array<i32>} : memref<2x32x31xbf16, #tpu.memory_space<vmem>>, vector<2x32x31xbf16>,
    return
  }
  func.func @transform_0(%arg0: i32) -> (i32, i32, i32) {
    %c0_i32 = arith.constant 0 : i32
    %c0_i32_0 = arith.constant 0 : i32
    %c0_i32_1 = arith.constant 0 : i32
    return %arg0, %c0_i32, %c0_i32_0 : i32, i32, i32
  }
  func.func @transform_1(%arg0: i32) -> (i32, i32) {
    %c0_i32 = arith.constant 0 : i32
    %c0_i32_0 = arith.constant 0 : i32
    %c0_i32_1 = arith.constant 0 : i32
    return %c0_i32, %c0_i32_0 : i32, i32
  }
  func.func @transform_2(%arg0: i32) -> (i32, i32) {
    %c0_i32 = arith.constant 0 : i32
    %c0_i32_0 = arith.constant 0 : i32
    %c0_i32_1 = arith.constant 0 : i32
    return %c0_i32, %c0_i32_0 : i32, i32
  }
  func.func @transform_3(%arg0: i32) -> (i32, i32) {
    %c0_i32 = arith.constant 0 : i32
    %c0_i32_0 = arith.constant 0 : i32
    %c0_i32_1 = arith.constant 0 : i32
    return %c0_i32, %c0_i32_0 : i32, i32
  }
  func.func @transform_4(%arg0: i32) -> (i32, i32) {
    %c0_i32 = arith.constant 0 : i32
    %c0_i32_0 = arith.constant 0 : i32
    %c0_i32_1 = arith.constant 0 : i32
    return %c0_i32, %c0_i32_0 : i32, i32
  }
  func.func @transform_5(%arg0: i32) -> (i32, i32) {
    %c0_i32 = arith.constant 0 : i32
    %c0_i32_0 = arith.constant 0 : i32
    %c0_i32_1 = arith.constant 0 : i32
    return %c0_i32, %c0_i32_0 : i32, i32
  }
  func.func @transform_6(%arg0: i32) -> (i32, i32) {
    %c0_i32 = arith.constant 0 : i32
    %c0_i32_0 = arith.constant 0 : i32
    %c0_i32_1 = arith.constant 0 : i32
    return %c0_i32, %c0_i32_0 : i32, i32
  }
  func.func @transform_7(%arg0: i32) -> (i32, i32, i32) {
    %c0_i32 = arith.constant 0 : i32
    %c0_i32_0 = arith.constant 0 : i32
    %c0_i32_1 = arith.constant 0 : i32
    return %arg0, %c0_i32, %c0_i32_0 : i32, i32, i32
  }
  func.func @transform_8(%arg0: i32) -> (i32, i32, i32) {
    %c0_i32 = arith.constant 0 : i32
    %c0_i32_0 = arith.constant 0 : i32
    %c0_i32_1 = arith.constant 0 : i32
    return %arg0, %c0_i32, %c0_i32_0 : i32, i32, i32
  }
}

module attributes {stable_mosaic.version = 11 : i64} {
  func.func @_tcn_stack_kernel(%arg0: i32, %arg1: memref<2x32x31xbf16, #tpu.memory_space<vmem>>, %arg2: memref<2x128x1xf32, #tpu.memory_space<vmem>>, %arg3: memref<4x32x32xf32, #tpu.memory_space<vmem>>, %arg4: memref<4x32x1xf32, #tpu.memory_space<vmem>>, %arg5: memref<4x32x1xf32, #tpu.memory_space<vmem>>, %arg6: memref<4x32x3xf32, #tpu.memory_space<vmem>>, %arg7: memref<4x32x1xf32, #tpu.memory_space<vmem>>, %arg8: memref<4x32x1xf32, #tpu.memory_space<vmem>>, %arg9: memref<4x32x1xf32, #tpu.memory_space<vmem>>, %arg10: memref<4x32x32xf32, #tpu.memory_space<vmem>>, %arg11: memref<4x32x1xf32, #tpu.memory_space<vmem>>, %arg12: memref<2x32x31xbf16, #tpu.memory_space<vmem>>) attributes {dimension_semantics = [#tpu.dimension_semantics<parallel>], iteration_bounds = array<i64: 1>, scalar_prefetch = 0 : i64, scratch_operands = 0 : i64, tpu.core_type = #tpu.core_type<tc>, window_params = [{transform_indices = @transform_0, window_bounds = array<i64: 2, 32, 31>}, {transform_indices = @transform_1, window_bounds = array<i64: 2, 128, 1>}, {pipeline_mode = #tpu.pipeline_mode<synchronous>, transform_indices = @transform_2, window_bounds = array<i64: 4, 32, 32>}, {pipeline_mode = #tpu.pipeline_mode<synchronous>, transform_indices = @transform_3, window_bounds = array<i64: 4, 32, 1>}, {pipeline_mode = #tpu.pipeline_mode<synchronous>, transform_indices = @transform_4, window_bounds = array<i64: 4, 32, 1>}, {pipeline_mode = #tpu.pipeline_mode<synchronous>, transform_indices = @transform_5, window_bounds = array<i64: 4, 32, 3>}, {pipeline_mode = #tpu.pipeline_mode<synchronous>, transform_indices = @transform_6, window_bounds = array<i64: 4, 32, 1>}, {pipeline_mode = #tpu.pipeline_mode<synchronous>, transform_indices = @transform_7, window_bounds = array<i64: 4, 32, 1>}, {pipeline_mode = #tpu.pipeline_mode<synchronous>, transform_indices = @transform_8, window_bounds = array<i64: 4, 32, 1>}, {pipeline_mode = #tpu.pipeline_mode<synchronous>, transform_indices = @transform_9, window_bounds = array<i64: 4, 32, 32>}, {pipeline_mode = #tpu.pipeline_mode<synchronous>, transform_indices = @transform_10, window_bounds = array<i64: 4, 32, 1>}, {transform_indices = @transform_11, window_bounds = array<i64: 2, 32, 31>}]} {
    %c0 = arith.constant 0 : index
    %c0_0 = arith.constant 0 : index
    %c0_1 = arith.constant 0 : index
    %0 = vector.load %arg1[%c0, %c0_0, %c0_1] : memref<2x32x31xbf16, #tpu.memory_space<vmem>>, vector<2x32x31xbf16>
    %1 = arith.extf %0 : vector<2x32x31xbf16> to vector<2x32x31xf32>
    %c0_2 = arith.constant 0 : index
    %c0_3 = arith.constant 0 : index
    %c0_4 = arith.constant 0 : index
    %2 = vector.load %arg2[%c0_2, %c0_3, %c0_4] : memref<2x128x1xf32, #tpu.memory_space<vmem>>, vector<2x128x1xf32>
    %3 = vector.extract_strided_slice %2 {offsets = [0, 0, 0], sizes = [2, 32, 1], strides = [1, 1, 1]} : vector<2x128x1xf32> to vector<2x32x1xf32>
    %c0_5 = arith.constant 0 : index
    %c0_6 = arith.constant 0 : index
    %c0_7 = arith.constant 0 : index
    %4 = vector.load %arg3[%c0_5, %c0_6, %c0_7] : memref<4x32x32xf32, #tpu.memory_space<vmem>>, vector<1x32x32xf32>
    %5 = vector.shape_cast %4 : vector<1x32x32xf32> to vector<32x32xf32>
    %6 = vector.shape_cast %5 : vector<32x32xf32> to vector<1x32x32xf32>
    %7 = vector.shape_cast %6 : vector<1x32x32xf32> to vector<1x32x32xf32>
    %8 = vector.broadcast %7 : vector<1x32x32xf32> to vector<2x32x32xf32>
    "tpu.trace_start"() <{level = 10 : i32, message = "boc,bct->bot"}> : () -> ()
    %cst = arith.constant dense<0.000000e+00> : vector<2x32x31xf32>
    %9 = tpu.matmul %8, %1, %cst {dimension_numbers = #tpu.dot_dimension_numbers<[2], [1], [1], [2], [0, 0, 0, 1, 1, 2], [0], [0]>} : vector<2x32x32xf32>, vector<2x32x31xf32>, vector<2x32x31xf32> -> vector<2x32x31xf32>
    "tpu.trace_stop"() : () -> ()
    %10 = vector.broadcast %3 : vector<2x32x1xf32> to vector<2x32x31xf32>
    %11 = arith.addf %9, %10 : vector<2x32x31xf32>
    %cst_8 = arith.constant 0.000000e+00 : f32
    %12 = vector.broadcast %cst_8 : f32 to vector<2x32x31xf32>
    %13 = arith.cmpf oge, %11, %12 : vector<2x32x31xf32>
    %cst_9 = arith.constant 2.500000e-01 : f32
    %14 = vector.broadcast %cst_9 : f32 to vector<2x32x31xf32>
    %15 = arith.mulf %14, %11 : vector<2x32x31xf32>
    %16 = arith.select %13, %11, %15 : vector<2x32x31xi1>, vector<2x32x31xf32>
    %c0_10 = arith.constant 0 : index
    %c0_11 = arith.constant 0 : index
    %c0_12 = arith.constant 0 : index
    %17 = vector.load %arg4[%c0_10, %c0_11, %c0_12] : memref<4x32x1xf32, #tpu.memory_space<vmem>>, vector<1x32x1xf32>
    %18 = vector.shape_cast %17 : vector<1x32x1xf32> to vector<32x1xf32>
    %c0_13 = arith.constant 0 : index
    %c0_14 = arith.constant 0 : index
    %c0_15 = arith.constant 0 : index
    %19 = vector.load %arg5[%c0_13, %c0_14, %c0_15] : memref<4x32x1xf32, #tpu.memory_space<vmem>>, vector<1x32x1xf32>
    %20 = vector.shape_cast %19 : vector<1x32x1xf32> to vector<32x1xf32>
    %cst_16 = arith.constant dense<0.000000e+00> : vector<2x32xf32>
    %21 = vector.multi_reduction <add>, %16, %cst_16 [2] : vector<2x32x31xf32> to vector<2x32xf32>
    %22 = vector.shape_cast %21 : vector<2x32xf32> to vector<2x32x1xf32>
    %cst_17 = arith.constant dense<0.000000e+00> : vector<2x1xf32>
    %23 = vector.multi_reduction <add>, %22, %cst_17 [1] : vector<2x32x1xf32> to vector<2x1xf32>
    %24 = vector.shape_cast %23 : vector<2x1xf32> to vector<2x1x1xf32>
    %25 = arith.mulf %16, %16 : vector<2x32x31xf32>
    %cst_18 = arith.constant dense<0.000000e+00> : vector<2x32xf32>
    %26 = vector.multi_reduction <add>, %25, %cst_18 [2] : vector<2x32x31xf32> to vector<2x32xf32>
    %27 = vector.shape_cast %26 : vector<2x32xf32> to vector<2x32x1xf32>
    %cst_19 = arith.constant dense<0.000000e+00> : vector<2x1xf32>
    %28 = vector.multi_reduction <add>, %27, %cst_19 [1] : vector<2x32x1xf32> to vector<2x1xf32>
    %29 = vector.shape_cast %28 : vector<2x1xf32> to vector<2x1x1xf32>
    %cst_20 = arith.constant 0.00100806449 : f32
    %30 = vector.broadcast %cst_20 : f32 to vector<2x1x1xf32>
    %31 = arith.mulf %24, %30 : vector<2x1x1xf32>
    %cst_21 = arith.constant 0.00100806449 : f32
    %32 = vector.broadcast %cst_21 : f32 to vector<2x1x1xf32>
    %33 = arith.mulf %29, %32 : vector<2x1x1xf32>
    %34 = arith.mulf %31, %31 : vector<2x1x1xf32>
    %35 = arith.subf %33, %34 : vector<2x1x1xf32>
    %cst_22 = arith.constant 0.000000e+00 : f32
    %36 = vector.broadcast %cst_22 : f32 to vector<2x1x1xf32>
    %37 = arith.maximumf %35, %36 : vector<2x1x1xf32>
    %38 = vector.broadcast %31 : vector<2x1x1xf32> to vector<2x32x31xf32>
    %39 = arith.subf %16, %38 : vector<2x32x31xf32>
    %cst_23 = arith.constant 9.99999993E-9 : f32
    %40 = vector.broadcast %cst_23 : f32 to vector<2x1x1xf32>
    %41 = arith.addf %37, %40 : vector<2x1x1xf32>
    %42 = math.rsqrt %41 : vector<2x1x1xf32>
    %43 = vector.broadcast %42 : vector<2x1x1xf32> to vector<2x32x31xf32>
    %44 = arith.mulf %39, %43 : vector<2x32x31xf32>
    %45 = vector.shape_cast %18 : vector<32x1xf32> to vector<1x32x1xf32>
    %46 = vector.broadcast %45 : vector<1x32x1xf32> to vector<2x32x31xf32>
    %47 = arith.mulf %44, %46 : vector<2x32x31xf32>
    %48 = vector.shape_cast %20 : vector<32x1xf32> to vector<1x32x1xf32>
    %49 = vector.broadcast %48 : vector<1x32x1xf32> to vector<2x32x31xf32>
    %50 = arith.addf %47, %49 : vector<2x32x31xf32>
    %c0_24 = arith.constant 0 : index
    %c0_25 = arith.constant 0 : index
    %c0_26 = arith.constant 0 : index
    %51 = vector.load %arg6[%c0_24, %c0_25, %c0_26] : memref<4x32x3xf32, #tpu.memory_space<vmem>>, vector<1x32x3xf32>
    %52 = vector.shape_cast %51 : vector<1x32x3xf32> to vector<32x3xf32>
    %cst_27 = arith.constant 0.000000e+00 : f32
    %53 = vector.broadcast %cst_27 : f32 to vector<2x32x1xf32>
    %54 = vector.extract_strided_slice %50 {offsets = [0, 0, 0], sizes = [2, 32, 30], strides = [1, 1, 1]} : vector<2x32x31xf32> to vector<2x32x30xf32>
    %55 = tpu.concatenate %53, %54 in 2 : vector<2x32x1xf32>, vector<2x32x30xf32> -> vector<2x32x31xf32>
    %56 = vector.extract_strided_slice %52 {offsets = [0, 0], sizes = [32, 1], strides = [1, 1]} : vector<32x3xf32> to vector<32x1xf32>
    %57 = vector.shape_cast %56 : vector<32x1xf32> to vector<1x32x1xf32>
    %58 = vector.broadcast %57 : vector<1x32x1xf32> to vector<2x32x31xf32>
    %59 = arith.mulf %55, %58 : vector<2x32x31xf32>
    %60 = vector.extract_strided_slice %52 {offsets = [0, 1], sizes = [32, 1], strides = [1, 1]} : vector<32x3xf32> to vector<32x1xf32>
    %61 = vector.shape_cast %60 : vector<32x1xf32> to vector<1x32x1xf32>
    %62 = vector.broadcast %61 : vector<1x32x1xf32> to vector<2x32x31xf32>
    %63 = arith.mulf %50, %62 : vector<2x32x31xf32>
    %64 = arith.addf %59, %63 : vector<2x32x31xf32>
    %cst_28 = arith.constant 0.000000e+00 : f32
    %65 = vector.broadcast %cst_28 : f32 to vector<2x32x1xf32>
    %66 = vector.extract_strided_slice %50 {offsets = [0, 0, 1], sizes = [2, 32, 30], strides = [1, 1, 1]} : vector<2x32x31xf32> to vector<2x32x30xf32>
    %67 = tpu.concatenate %66, %65 in 2 : vector<2x32x30xf32>, vector<2x32x1xf32> -> vector<2x32x31xf32>
    %68 = vector.extract_strided_slice %52 {offsets = [0, 2], sizes = [32, 1], strides = [1, 1]} : vector<32x3xf32> to vector<32x1xf32>
    %69 = vector.shape_cast %68 : vector<32x1xf32> to vector<1x32x1xf32>
    %70 = vector.broadcast %69 : vector<1x32x1xf32> to vector<2x32x31xf32>
    %71 = arith.mulf %67, %70 : vector<2x32x31xf32>
    %72 = arith.addf %64, %71 : vector<2x32x31xf32>
    %c0_29 = arith.constant 0 : index
    %c0_30 = arith.constant 0 : index
    %c0_31 = arith.constant 0 : index
    %73 = vector.load %arg7[%c0_29, %c0_30, %c0_31] : memref<4x32x1xf32, #tpu.memory_space<vmem>>, vector<1x32x1xf32>
    %74 = vector.shape_cast %73 : vector<1x32x1xf32> to vector<32x1xf32>
    %75 = vector.shape_cast %74 : vector<32x1xf32> to vector<1x32x1xf32>
    %76 = vector.broadcast %75 : vector<1x32x1xf32> to vector<2x32x31xf32>
    %77 = arith.addf %72, %76 : vector<2x32x31xf32>
    %cst_32 = arith.constant 0.000000e+00 : f32
    %78 = vector.broadcast %cst_32 : f32 to vector<2x32x31xf32>
    %79 = arith.cmpf oge, %77, %78 : vector<2x32x31xf32>
    %cst_33 = arith.constant 2.500000e-01 : f32
    %80 = vector.broadcast %cst_33 : f32 to vector<2x32x31xf32>
    %81 = arith.mulf %80, %77 : vector<2x32x31xf32>
    %82 = arith.select %79, %77, %81 : vector<2x32x31xi1>, vector<2x32x31xf32>
    %c0_34 = arith.constant 0 : index
    %c0_35 = arith.constant 0 : index
    %c0_36 = arith.constant 0 : index
    %83 = vector.load %arg8[%c0_34, %c0_35, %c0_36] : memref<4x32x1xf32, #tpu.memory_space<vmem>>, vector<1x32x1xf32>
    %84 = vector.shape_cast %83 : vector<1x32x1xf32> to vector<32x1xf32>
    %c0_37 = arith.constant 0 : index
    %c0_38 = arith.constant 0 : index
    %c0_39 = arith.constant 0 : index
    %85 = vector.load %arg9[%c0_37, %c0_38, %c0_39] : memref<4x32x1xf32, #tpu.memory_space<vmem>>, vector<1x32x1xf32>
    %86 = vector.shape_cast %85 : vector<1x32x1xf32> to vector<32x1xf32>
    %cst_40 = arith.constant dense<0.000000e+00> : vector<2x32xf32>
    %87 = vector.multi_reduction <add>, %82, %cst_40 [2] : vector<2x32x31xf32> to vector<2x32xf32>
    %88 = vector.shape_cast %87 : vector<2x32xf32> to vector<2x32x1xf32>
    %cst_41 = arith.constant dense<0.000000e+00> : vector<2x1xf32>
    %89 = vector.multi_reduction <add>, %88, %cst_41 [1] : vector<2x32x1xf32> to vector<2x1xf32>
    %90 = vector.shape_cast %89 : vector<2x1xf32> to vector<2x1x1xf32>
    %91 = arith.mulf %82, %82 : vector<2x32x31xf32>
    %cst_42 = arith.constant dense<0.000000e+00> : vector<2x32xf32>
    %92 = vector.multi_reduction <add>, %91, %cst_42 [2] : vector<2x32x31xf32> to vector<2x32xf32>
    %93 = vector.shape_cast %92 : vector<2x32xf32> to vector<2x32x1xf32>
    %cst_43 = arith.constant dense<0.000000e+00> : vector<2x1xf32>
    %94 = vector.multi_reduction <add>, %93, %cst_43 [1] : vector<2x32x1xf32> to vector<2x1xf32>
    %95 = vector.shape_cast %94 : vector<2x1xf32> to vector<2x1x1xf32>
    %cst_44 = arith.constant 0.00100806449 : f32
    %96 = vector.broadcast %cst_44 : f32 to vector<2x1x1xf32>
    %97 = arith.mulf %90, %96 : vector<2x1x1xf32>
    %cst_45 = arith.constant 0.00100806449 : f32
    %98 = vector.broadcast %cst_45 : f32 to vector<2x1x1xf32>
    %99 = arith.mulf %95, %98 : vector<2x1x1xf32>
    %100 = arith.mulf %97, %97 : vector<2x1x1xf32>
    %101 = arith.subf %99, %100 : vector<2x1x1xf32>
    %cst_46 = arith.constant 0.000000e+00 : f32
    %102 = vector.broadcast %cst_46 : f32 to vector<2x1x1xf32>
    %103 = arith.maximumf %101, %102 : vector<2x1x1xf32>
    %104 = vector.broadcast %97 : vector<2x1x1xf32> to vector<2x32x31xf32>
    %105 = arith.subf %82, %104 : vector<2x32x31xf32>
    %cst_47 = arith.constant 9.99999993E-9 : f32
    %106 = vector.broadcast %cst_47 : f32 to vector<2x1x1xf32>
    %107 = arith.addf %103, %106 : vector<2x1x1xf32>
    %108 = math.rsqrt %107 : vector<2x1x1xf32>
    %109 = vector.broadcast %108 : vector<2x1x1xf32> to vector<2x32x31xf32>
    %110 = arith.mulf %105, %109 : vector<2x32x31xf32>
    %111 = vector.shape_cast %84 : vector<32x1xf32> to vector<1x32x1xf32>
    %112 = vector.broadcast %111 : vector<1x32x1xf32> to vector<2x32x31xf32>
    %113 = arith.mulf %110, %112 : vector<2x32x31xf32>
    %114 = vector.shape_cast %86 : vector<32x1xf32> to vector<1x32x1xf32>
    %115 = vector.broadcast %114 : vector<1x32x1xf32> to vector<2x32x31xf32>
    %116 = arith.addf %113, %115 : vector<2x32x31xf32>
    %c0_48 = arith.constant 0 : index
    %c0_49 = arith.constant 0 : index
    %c0_50 = arith.constant 0 : index
    %117 = vector.load %arg10[%c0_48, %c0_49, %c0_50] : memref<4x32x32xf32, #tpu.memory_space<vmem>>, vector<1x32x32xf32>
    %118 = vector.shape_cast %117 : vector<1x32x32xf32> to vector<32x32xf32>
    %119 = vector.shape_cast %118 : vector<32x32xf32> to vector<1x32x32xf32>
    %120 = vector.shape_cast %119 : vector<1x32x32xf32> to vector<1x32x32xf32>
    %121 = vector.broadcast %120 : vector<1x32x32xf32> to vector<2x32x32xf32>
    "tpu.trace_start"() <{level = 10 : i32, message = "boc,bct->bot"}> : () -> ()
    %cst_51 = arith.constant dense<0.000000e+00> : vector<2x32x31xf32>
    %122 = tpu.matmul %121, %116, %cst_51 {dimension_numbers = #tpu.dot_dimension_numbers<[2], [1], [1], [2], [0, 0, 0, 1, 1, 2], [0], [0]>} : vector<2x32x32xf32>, vector<2x32x31xf32>, vector<2x32x31xf32> -> vector<2x32x31xf32>
    "tpu.trace_stop"() : () -> ()
    %123 = arith.addf %1, %122 : vector<2x32x31xf32>
    %c0_52 = arith.constant 0 : index
    %c0_53 = arith.constant 0 : index
    %c0_54 = arith.constant 0 : index
    %124 = vector.load %arg11[%c0_52, %c0_53, %c0_54] : memref<4x32x1xf32, #tpu.memory_space<vmem>>, vector<1x32x1xf32>
    %125 = vector.shape_cast %124 : vector<1x32x1xf32> to vector<32x1xf32>
    %126 = vector.shape_cast %125 : vector<32x1xf32> to vector<1x32x1xf32>
    %127 = vector.broadcast %126 : vector<1x32x1xf32> to vector<2x32x31xf32>
    %128 = arith.addf %123, %127 : vector<2x32x31xf32>
    %129 = vector.extract_strided_slice %2 {offsets = [0, 32, 0], sizes = [2, 32, 1], strides = [1, 1, 1]} : vector<2x128x1xf32> to vector<2x32x1xf32>
    %c1 = arith.constant 1 : index
    %c0_55 = arith.constant 0 : index
    %c0_56 = arith.constant 0 : index
    %130 = vector.load %arg3[%c1, %c0_55, %c0_56] : memref<4x32x32xf32, #tpu.memory_space<vmem>>, vector<1x32x32xf32>
    %131 = vector.shape_cast %130 : vector<1x32x32xf32> to vector<32x32xf32>
    %132 = vector.shape_cast %131 : vector<32x32xf32> to vector<1x32x32xf32>
    %133 = vector.shape_cast %132 : vector<1x32x32xf32> to vector<1x32x32xf32>
    %134 = vector.broadcast %133 : vector<1x32x32xf32> to vector<2x32x32xf32>
    "tpu.trace_start"() <{level = 10 : i32, message = "boc,bct->bot"}> : () -> ()
    %cst_57 = arith.constant dense<0.000000e+00> : vector<2x32x31xf32>
    %135 = tpu.matmul %134, %128, %cst_57 {dimension_numbers = #tpu.dot_dimension_numbers<[2], [1], [1], [2], [0, 0, 0, 1, 1, 2], [0], [0]>} : vector<2x32x32xf32>, vector<2x32x31xf32>, vector<2x32x31xf32> -> vector<2x32x31xf32>
    "tpu.trace_stop"() : () -> ()
    %136 = vector.broadcast %129 : vector<2x32x1xf32> to vector<2x32x31xf32>
    %137 = arith.addf %135, %136 : vector<2x32x31xf32>
    %cst_58 = arith.constant 0.000000e+00 : f32
    %138 = vector.broadcast %cst_58 : f32 to vector<2x32x31xf32>
    %139 = arith.cmpf oge, %137, %138 : vector<2x32x31xf32>
    %cst_59 = arith.constant 2.500000e-01 : f32
    %140 = vector.broadcast %cst_59 : f32 to vector<2x32x31xf32>
    %141 = arith.mulf %140, %137 : vector<2x32x31xf32>
    %142 = arith.select %139, %137, %141 : vector<2x32x31xi1>, vector<2x32x31xf32>
    %c1_60 = arith.constant 1 : index
    %c0_61 = arith.constant 0 : index
    %c0_62 = arith.constant 0 : index
    %143 = vector.load %arg4[%c1_60, %c0_61, %c0_62] : memref<4x32x1xf32, #tpu.memory_space<vmem>>, vector<1x32x1xf32>
    %144 = vector.shape_cast %143 : vector<1x32x1xf32> to vector<32x1xf32>
    %c1_63 = arith.constant 1 : index
    %c0_64 = arith.constant 0 : index
    %c0_65 = arith.constant 0 : index
    %145 = vector.load %arg5[%c1_63, %c0_64, %c0_65] : memref<4x32x1xf32, #tpu.memory_space<vmem>>, vector<1x32x1xf32>
    %146 = vector.shape_cast %145 : vector<1x32x1xf32> to vector<32x1xf32>
    %cst_66 = arith.constant dense<0.000000e+00> : vector<2x32xf32>
    %147 = vector.multi_reduction <add>, %142, %cst_66 [2] : vector<2x32x31xf32> to vector<2x32xf32>
    %148 = vector.shape_cast %147 : vector<2x32xf32> to vector<2x32x1xf32>
    %cst_67 = arith.constant dense<0.000000e+00> : vector<2x1xf32>
    %149 = vector.multi_reduction <add>, %148, %cst_67 [1] : vector<2x32x1xf32> to vector<2x1xf32>
    %150 = vector.shape_cast %149 : vector<2x1xf32> to vector<2x1x1xf32>
    %151 = arith.mulf %142, %142 : vector<2x32x31xf32>
    %cst_68 = arith.constant dense<0.000000e+00> : vector<2x32xf32>
    %152 = vector.multi_reduction <add>, %151, %cst_68 [2] : vector<2x32x31xf32> to vector<2x32xf32>
    %153 = vector.shape_cast %152 : vector<2x32xf32> to vector<2x32x1xf32>
    %cst_69 = arith.constant dense<0.000000e+00> : vector<2x1xf32>
    %154 = vector.multi_reduction <add>, %153, %cst_69 [1] : vector<2x32x1xf32> to vector<2x1xf32>
    %155 = vector.shape_cast %154 : vector<2x1xf32> to vector<2x1x1xf32>
    %cst_70 = arith.constant 0.00100806449 : f32
    %156 = vector.broadcast %cst_70 : f32 to vector<2x1x1xf32>
    %157 = arith.mulf %150, %156 : vector<2x1x1xf32>
    %cst_71 = arith.constant 0.00100806449 : f32
    %158 = vector.broadcast %cst_71 : f32 to vector<2x1x1xf32>
    %159 = arith.mulf %155, %158 : vector<2x1x1xf32>
    %160 = arith.mulf %157, %157 : vector<2x1x1xf32>
    %161 = arith.subf %159, %160 : vector<2x1x1xf32>
    %cst_72 = arith.constant 0.000000e+00 : f32
    %162 = vector.broadcast %cst_72 : f32 to vector<2x1x1xf32>
    %163 = arith.maximumf %161, %162 : vector<2x1x1xf32>
    %164 = vector.broadcast %157 : vector<2x1x1xf32> to vector<2x32x31xf32>
    %165 = arith.subf %142, %164 : vector<2x32x31xf32>
    %cst_73 = arith.constant 9.99999993E-9 : f32
    %166 = vector.broadcast %cst_73 : f32 to vector<2x1x1xf32>
    %167 = arith.addf %163, %166 : vector<2x1x1xf32>
    %168 = math.rsqrt %167 : vector<2x1x1xf32>
    %169 = vector.broadcast %168 : vector<2x1x1xf32> to vector<2x32x31xf32>
    %170 = arith.mulf %165, %169 : vector<2x32x31xf32>
    %171 = vector.shape_cast %144 : vector<32x1xf32> to vector<1x32x1xf32>
    %172 = vector.broadcast %171 : vector<1x32x1xf32> to vector<2x32x31xf32>
    %173 = arith.mulf %170, %172 : vector<2x32x31xf32>
    %174 = vector.shape_cast %146 : vector<32x1xf32> to vector<1x32x1xf32>
    %175 = vector.broadcast %174 : vector<1x32x1xf32> to vector<2x32x31xf32>
    %176 = arith.addf %173, %175 : vector<2x32x31xf32>
    %c1_74 = arith.constant 1 : index
    %c0_75 = arith.constant 0 : index
    %c0_76 = arith.constant 0 : index
    %177 = vector.load %arg6[%c1_74, %c0_75, %c0_76] : memref<4x32x3xf32, #tpu.memory_space<vmem>>, vector<1x32x3xf32>
    %178 = vector.shape_cast %177 : vector<1x32x3xf32> to vector<32x3xf32>
    %cst_77 = arith.constant 0.000000e+00 : f32
    %179 = vector.broadcast %cst_77 : f32 to vector<2x32x2xf32>
    %180 = vector.extract_strided_slice %176 {offsets = [0, 0, 0], sizes = [2, 32, 29], strides = [1, 1, 1]} : vector<2x32x31xf32> to vector<2x32x29xf32>
    %181 = tpu.concatenate %179, %180 in 2 : vector<2x32x2xf32>, vector<2x32x29xf32> -> vector<2x32x31xf32>
    %182 = vector.extract_strided_slice %178 {offsets = [0, 0], sizes = [32, 1], strides = [1, 1]} : vector<32x3xf32> to vector<32x1xf32>
    %183 = vector.shape_cast %182 : vector<32x1xf32> to vector<1x32x1xf32>
    %184 = vector.broadcast %183 : vector<1x32x1xf32> to vector<2x32x31xf32>
    %185 = arith.mulf %181, %184 : vector<2x32x31xf32>
    %186 = vector.extract_strided_slice %178 {offsets = [0, 1], sizes = [32, 1], strides = [1, 1]} : vector<32x3xf32> to vector<32x1xf32>
    %187 = vector.shape_cast %186 : vector<32x1xf32> to vector<1x32x1xf32>
    %188 = vector.broadcast %187 : vector<1x32x1xf32> to vector<2x32x31xf32>
    %189 = arith.mulf %176, %188 : vector<2x32x31xf32>
    %190 = arith.addf %185, %189 : vector<2x32x31xf32>
    %cst_78 = arith.constant 0.000000e+00 : f32
    %191 = vector.broadcast %cst_78 : f32 to vector<2x32x2xf32>
    %192 = vector.extract_strided_slice %176 {offsets = [0, 0, 2], sizes = [2, 32, 29], strides = [1, 1, 1]} : vector<2x32x31xf32> to vector<2x32x29xf32>
    %193 = tpu.concatenate %192, %191 in 2 : vector<2x32x29xf32>, vector<2x32x2xf32> -> vector<2x32x31xf32>
    %194 = vector.extract_strided_slice %178 {offsets = [0, 2], sizes = [32, 1], strides = [1, 1]} : vector<32x3xf32> to vector<32x1xf32>
    %195 = vector.shape_cast %194 : vector<32x1xf32> to vector<1x32x1xf32>
    %196 = vector.broadcast %195 : vector<1x32x1xf32> to vector<2x32x31xf32>
    %197 = arith.mulf %193, %196 : vector<2x32x31xf32>
    %198 = arith.addf %190, %197 : vector<2x32x31xf32>
    %c1_79 = arith.constant 1 : index
    %c0_80 = arith.constant 0 : index
    %c0_81 = arith.constant 0 : index
    %199 = vector.load %arg7[%c1_79, %c0_80, %c0_81] : memref<4x32x1xf32, #tpu.memory_space<vmem>>, vector<1x32x1xf32>
    %200 = vector.shape_cast %199 : vector<1x32x1xf32> to vector<32x1xf32>
    %201 = vector.shape_cast %200 : vector<32x1xf32> to vector<1x32x1xf32>
    %202 = vector.broadcast %201 : vector<1x32x1xf32> to vector<2x32x31xf32>
    %203 = arith.addf %198, %202 : vector<2x32x31xf32>
    %cst_82 = arith.constant 0.000000e+00 : f32
    %204 = vector.broadcast %cst_82 : f32 to vector<2x32x31xf32>
    %205 = arith.cmpf oge, %203, %204 : vector<2x32x31xf32>
    %cst_83 = arith.constant 2.500000e-01 : f32
    %206 = vector.broadcast %cst_83 : f32 to vector<2x32x31xf32>
    %207 = arith.mulf %206, %203 : vector<2x32x31xf32>
    %208 = arith.select %205, %203, %207 : vector<2x32x31xi1>, vector<2x32x31xf32>
    %c1_84 = arith.constant 1 : index
    %c0_85 = arith.constant 0 : index
    %c0_86 = arith.constant 0 : index
    %209 = vector.load %arg8[%c1_84, %c0_85, %c0_86] : memref<4x32x1xf32, #tpu.memory_space<vmem>>, vector<1x32x1xf32>
    %210 = vector.shape_cast %209 : vector<1x32x1xf32> to vector<32x1xf32>
    %c1_87 = arith.constant 1 : index
    %c0_88 = arith.constant 0 : index
    %c0_89 = arith.constant 0 : index
    %211 = vector.load %arg9[%c1_87, %c0_88, %c0_89] : memref<4x32x1xf32, #tpu.memory_space<vmem>>, vector<1x32x1xf32>
    %212 = vector.shape_cast %211 : vector<1x32x1xf32> to vector<32x1xf32>
    %cst_90 = arith.constant dense<0.000000e+00> : vector<2x32xf32>
    %213 = vector.multi_reduction <add>, %208, %cst_90 [2] : vector<2x32x31xf32> to vector<2x32xf32>
    %214 = vector.shape_cast %213 : vector<2x32xf32> to vector<2x32x1xf32>
    %cst_91 = arith.constant dense<0.000000e+00> : vector<2x1xf32>
    %215 = vector.multi_reduction <add>, %214, %cst_91 [1] : vector<2x32x1xf32> to vector<2x1xf32>
    %216 = vector.shape_cast %215 : vector<2x1xf32> to vector<2x1x1xf32>
    %217 = arith.mulf %208, %208 : vector<2x32x31xf32>
    %cst_92 = arith.constant dense<0.000000e+00> : vector<2x32xf32>
    %218 = vector.multi_reduction <add>, %217, %cst_92 [2] : vector<2x32x31xf32> to vector<2x32xf32>
    %219 = vector.shape_cast %218 : vector<2x32xf32> to vector<2x32x1xf32>
    %cst_93 = arith.constant dense<0.000000e+00> : vector<2x1xf32>
    %220 = vector.multi_reduction <add>, %219, %cst_93 [1] : vector<2x32x1xf32> to vector<2x1xf32>
    %221 = vector.shape_cast %220 : vector<2x1xf32> to vector<2x1x1xf32>
    %cst_94 = arith.constant 0.00100806449 : f32
    %222 = vector.broadcast %cst_94 : f32 to vector<2x1x1xf32>
    %223 = arith.mulf %216, %222 : vector<2x1x1xf32>
    %cst_95 = arith.constant 0.00100806449 : f32
    %224 = vector.broadcast %cst_95 : f32 to vector<2x1x1xf32>
    %225 = arith.mulf %221, %224 : vector<2x1x1xf32>
    %226 = arith.mulf %223, %223 : vector<2x1x1xf32>
    %227 = arith.subf %225, %226 : vector<2x1x1xf32>
    %cst_96 = arith.constant 0.000000e+00 : f32
    %228 = vector.broadcast %cst_96 : f32 to vector<2x1x1xf32>
    %229 = arith.maximumf %227, %228 : vector<2x1x1xf32>
    %230 = vector.broadcast %223 : vector<2x1x1xf32> to vector<2x32x31xf32>
    %231 = arith.subf %208, %230 : vector<2x32x31xf32>
    %cst_97 = arith.constant 9.99999993E-9 : f32
    %232 = vector.broadcast %cst_97 : f32 to vector<2x1x1xf32>
    %233 = arith.addf %229, %232 : vector<2x1x1xf32>
    %234 = math.rsqrt %233 : vector<2x1x1xf32>
    %235 = vector.broadcast %234 : vector<2x1x1xf32> to vector<2x32x31xf32>
    %236 = arith.mulf %231, %235 : vector<2x32x31xf32>
    %237 = vector.shape_cast %210 : vector<32x1xf32> to vector<1x32x1xf32>
    %238 = vector.broadcast %237 : vector<1x32x1xf32> to vector<2x32x31xf32>
    %239 = arith.mulf %236, %238 : vector<2x32x31xf32>
    %240 = vector.shape_cast %212 : vector<32x1xf32> to vector<1x32x1xf32>
    %241 = vector.broadcast %240 : vector<1x32x1xf32> to vector<2x32x31xf32>
    %242 = arith.addf %239, %241 : vector<2x32x31xf32>
    %c1_98 = arith.constant 1 : index
    %c0_99 = arith.constant 0 : index
    %c0_100 = arith.constant 0 : index
    %243 = vector.load %arg10[%c1_98, %c0_99, %c0_100] : memref<4x32x32xf32, #tpu.memory_space<vmem>>, vector<1x32x32xf32>
    %244 = vector.shape_cast %243 : vector<1x32x32xf32> to vector<32x32xf32>
    %245 = vector.shape_cast %244 : vector<32x32xf32> to vector<1x32x32xf32>
    %246 = vector.shape_cast %245 : vector<1x32x32xf32> to vector<1x32x32xf32>
    %247 = vector.broadcast %246 : vector<1x32x32xf32> to vector<2x32x32xf32>
    "tpu.trace_start"() <{level = 10 : i32, message = "boc,bct->bot"}> : () -> ()
    %cst_101 = arith.constant dense<0.000000e+00> : vector<2x32x31xf32>
    %248 = tpu.matmul %247, %242, %cst_101 {dimension_numbers = #tpu.dot_dimension_numbers<[2], [1], [1], [2], [0, 0, 0, 1, 1, 2], [0], [0]>} : vector<2x32x32xf32>, vector<2x32x31xf32>, vector<2x32x31xf32> -> vector<2x32x31xf32>
    "tpu.trace_stop"() : () -> ()
    %249 = arith.addf %128, %248 : vector<2x32x31xf32>
    %c1_102 = arith.constant 1 : index
    %c0_103 = arith.constant 0 : index
    %c0_104 = arith.constant 0 : index
    %250 = vector.load %arg11[%c1_102, %c0_103, %c0_104] : memref<4x32x1xf32, #tpu.memory_space<vmem>>, vector<1x32x1xf32>
    %251 = vector.shape_cast %250 : vector<1x32x1xf32> to vector<32x1xf32>
    %252 = vector.shape_cast %251 : vector<32x1xf32> to vector<1x32x1xf32>
    %253 = vector.broadcast %252 : vector<1x32x1xf32> to vector<2x32x31xf32>
    %254 = arith.addf %249, %253 : vector<2x32x31xf32>
    %255 = vector.extract_strided_slice %2 {offsets = [0, 64, 0], sizes = [2, 32, 1], strides = [1, 1, 1]} : vector<2x128x1xf32> to vector<2x32x1xf32>
    %c2 = arith.constant 2 : index
    %c0_105 = arith.constant 0 : index
    %c0_106 = arith.constant 0 : index
    %256 = vector.load %arg3[%c2, %c0_105, %c0_106] : memref<4x32x32xf32, #tpu.memory_space<vmem>>, vector<1x32x32xf32>
    %257 = vector.shape_cast %256 : vector<1x32x32xf32> to vector<32x32xf32>
    %258 = vector.shape_cast %257 : vector<32x32xf32> to vector<1x32x32xf32>
    %259 = vector.shape_cast %258 : vector<1x32x32xf32> to vector<1x32x32xf32>
    %260 = vector.broadcast %259 : vector<1x32x32xf32> to vector<2x32x32xf32>
    "tpu.trace_start"() <{level = 10 : i32, message = "boc,bct->bot"}> : () -> ()
    %cst_107 = arith.constant dense<0.000000e+00> : vector<2x32x31xf32>
    %261 = tpu.matmul %260, %254, %cst_107 {dimension_numbers = #tpu.dot_dimension_numbers<[2], [1], [1], [2], [0, 0, 0, 1, 1, 2], [0], [0]>} : vector<2x32x32xf32>, vector<2x32x31xf32>, vector<2x32x31xf32> -> vector<2x32x31xf32>
    "tpu.trace_stop"() : () -> ()
    %262 = vector.broadcast %255 : vector<2x32x1xf32> to vector<2x32x31xf32>
    %263 = arith.addf %261, %262 : vector<2x32x31xf32>
    %cst_108 = arith.constant 0.000000e+00 : f32
    %264 = vector.broadcast %cst_108 : f32 to vector<2x32x31xf32>
    %265 = arith.cmpf oge, %263, %264 : vector<2x32x31xf32>
    %cst_109 = arith.constant 2.500000e-01 : f32
    %266 = vector.broadcast %cst_109 : f32 to vector<2x32x31xf32>
    %267 = arith.mulf %266, %263 : vector<2x32x31xf32>
    %268 = arith.select %265, %263, %267 : vector<2x32x31xi1>, vector<2x32x31xf32>
    %c2_110 = arith.constant 2 : index
    %c0_111 = arith.constant 0 : index
    %c0_112 = arith.constant 0 : index
    %269 = vector.load %arg4[%c2_110, %c0_111, %c0_112] : memref<4x32x1xf32, #tpu.memory_space<vmem>>, vector<1x32x1xf32>
    %270 = vector.shape_cast %269 : vector<1x32x1xf32> to vector<32x1xf32>
    %c2_113 = arith.constant 2 : index
    %c0_114 = arith.constant 0 : index
    %c0_115 = arith.constant 0 : index
    %271 = vector.load %arg5[%c2_113, %c0_114, %c0_115] : memref<4x32x1xf32, #tpu.memory_space<vmem>>, vector<1x32x1xf32>
    %272 = vector.shape_cast %271 : vector<1x32x1xf32> to vector<32x1xf32>
    %cst_116 = arith.constant dense<0.000000e+00> : vector<2x32xf32>
    %273 = vector.multi_reduction <add>, %268, %cst_116 [2] : vector<2x32x31xf32> to vector<2x32xf32>
    %274 = vector.shape_cast %273 : vector<2x32xf32> to vector<2x32x1xf32>
    %cst_117 = arith.constant dense<0.000000e+00> : vector<2x1xf32>
    %275 = vector.multi_reduction <add>, %274, %cst_117 [1] : vector<2x32x1xf32> to vector<2x1xf32>
    %276 = vector.shape_cast %275 : vector<2x1xf32> to vector<2x1x1xf32>
    %277 = arith.mulf %268, %268 : vector<2x32x31xf32>
    %cst_118 = arith.constant dense<0.000000e+00> : vector<2x32xf32>
    %278 = vector.multi_reduction <add>, %277, %cst_118 [2] : vector<2x32x31xf32> to vector<2x32xf32>
    %279 = vector.shape_cast %278 : vector<2x32xf32> to vector<2x32x1xf32>
    %cst_119 = arith.constant dense<0.000000e+00> : vector<2x1xf32>
    %280 = vector.multi_reduction <add>, %279, %cst_119 [1] : vector<2x32x1xf32> to vector<2x1xf32>
    %281 = vector.shape_cast %280 : vector<2x1xf32> to vector<2x1x1xf32>
    %cst_120 = arith.constant 0.00100806449 : f32
    %282 = vector.broadcast %cst_120 : f32 to vector<2x1x1xf32>
    %283 = arith.mulf %276, %282 : vector<2x1x1xf32>
    %cst_121 = arith.constant 0.00100806449 : f32
    %284 = vector.broadcast %cst_121 : f32 to vector<2x1x1xf32>
    %285 = arith.mulf %281, %284 : vector<2x1x1xf32>
    %286 = arith.mulf %283, %283 : vector<2x1x1xf32>
    %287 = arith.subf %285, %286 : vector<2x1x1xf32>
    %cst_122 = arith.constant 0.000000e+00 : f32
    %288 = vector.broadcast %cst_122 : f32 to vector<2x1x1xf32>
    %289 = arith.maximumf %287, %288 : vector<2x1x1xf32>
    %290 = vector.broadcast %283 : vector<2x1x1xf32> to vector<2x32x31xf32>
    %291 = arith.subf %268, %290 : vector<2x32x31xf32>
    %cst_123 = arith.constant 9.99999993E-9 : f32
    %292 = vector.broadcast %cst_123 : f32 to vector<2x1x1xf32>
    %293 = arith.addf %289, %292 : vector<2x1x1xf32>
    %294 = math.rsqrt %293 : vector<2x1x1xf32>
    %295 = vector.broadcast %294 : vector<2x1x1xf32> to vector<2x32x31xf32>
    %296 = arith.mulf %291, %295 : vector<2x32x31xf32>
    %297 = vector.shape_cast %270 : vector<32x1xf32> to vector<1x32x1xf32>
    %298 = vector.broadcast %297 : vector<1x32x1xf32> to vector<2x32x31xf32>
    %299 = arith.mulf %296, %298 : vector<2x32x31xf32>
    %300 = vector.shape_cast %272 : vector<32x1xf32> to vector<1x32x1xf32>
    %301 = vector.broadcast %300 : vector<1x32x1xf32> to vector<2x32x31xf32>
    %302 = arith.addf %299, %301 : vector<2x32x31xf32>
    %c2_124 = arith.constant 2 : index
    %c0_125 = arith.constant 0 : index
    %c0_126 = arith.constant 0 : index
    %303 = vector.load %arg6[%c2_124, %c0_125, %c0_126] : memref<4x32x3xf32, #tpu.memory_space<vmem>>, vector<1x32x3xf32>
    %304 = vector.shape_cast %303 : vector<1x32x3xf32> to vector<32x3xf32>
    %cst_127 = arith.constant 0.000000e+00 : f32
    %305 = vector.broadcast %cst_127 : f32 to vector<2x32x1xf32>
    %306 = vector.extract_strided_slice %302 {offsets = [0, 0, 0], sizes = [2, 32, 30], strides = [1, 1, 1]} : vector<2x32x31xf32> to vector<2x32x30xf32>
    %307 = tpu.concatenate %305, %306 in 2 : vector<2x32x1xf32>, vector<2x32x30xf32> -> vector<2x32x31xf32>
    %308 = vector.extract_strided_slice %304 {offsets = [0, 0], sizes = [32, 1], strides = [1, 1]} : vector<32x3xf32> to vector<32x1xf32>
    %309 = vector.shape_cast %308 : vector<32x1xf32> to vector<1x32x1xf32>
    %310 = vector.broadcast %309 : vector<1x32x1xf32> to vector<2x32x31xf32>
    %311 = arith.mulf %307, %310 : vector<2x32x31xf32>
    %312 = vector.extract_strided_slice %304 {offsets = [0, 1], sizes = [32, 1], strides = [1, 1]} : vector<32x3xf32> to vector<32x1xf32>
    %313 = vector.shape_cast %312 : vector<32x1xf32> to vector<1x32x1xf32>
    %314 = vector.broadcast %313 : vector<1x32x1xf32> to vector<2x32x31xf32>
    %315 = arith.mulf %302, %314 : vector<2x32x31xf32>
    %316 = arith.addf %311, %315 : vector<2x32x31xf32>
    %cst_128 = arith.constant 0.000000e+00 : f32
    %317 = vector.broadcast %cst_128 : f32 to vector<2x32x1xf32>
    %318 = vector.extract_strided_slice %302 {offsets = [0, 0, 1], sizes = [2, 32, 30], strides = [1, 1, 1]} : vector<2x32x31xf32> to vector<2x32x30xf32>
    %319 = tpu.concatenate %318, %317 in 2 : vector<2x32x30xf32>, vector<2x32x1xf32> -> vector<2x32x31xf32>
    %320 = vector.extract_strided_slice %304 {offsets = [0, 2], sizes = [32, 1], strides = [1, 1]} : vector<32x3xf32> to vector<32x1xf32>
    %321 = vector.shape_cast %320 : vector<32x1xf32> to vector<1x32x1xf32>
    %322 = vector.broadcast %321 : vector<1x32x1xf32> to vector<2x32x31xf32>
    %323 = arith.mulf %319, %322 : vector<2x32x31xf32>
    %324 = arith.addf %316, %323 : vector<2x32x31xf32>
    %c2_129 = arith.constant 2 : index
    %c0_130 = arith.constant 0 : index
    %c0_131 = arith.constant 0 : index
    %325 = vector.load %arg7[%c2_129, %c0_130, %c0_131] : memref<4x32x1xf32, #tpu.memory_space<vmem>>, vector<1x32x1xf32>
    %326 = vector.shape_cast %325 : vector<1x32x1xf32> to vector<32x1xf32>
    %327 = vector.shape_cast %326 : vector<32x1xf32> to vector<1x32x1xf32>
    %328 = vector.broadcast %327 : vector<1x32x1xf32> to vector<2x32x31xf32>
    %329 = arith.addf %324, %328 : vector<2x32x31xf32>
    %cst_132 = arith.constant 0.000000e+00 : f32
    %330 = vector.broadcast %cst_132 : f32 to vector<2x32x31xf32>
    %331 = arith.cmpf oge, %329, %330 : vector<2x32x31xf32>
    %cst_133 = arith.constant 2.500000e-01 : f32
    %332 = vector.broadcast %cst_133 : f32 to vector<2x32x31xf32>
    %333 = arith.mulf %332, %329 : vector<2x32x31xf32>
    %334 = arith.select %331, %329, %333 : vector<2x32x31xi1>, vector<2x32x31xf32>
    %c2_134 = arith.constant 2 : index
    %c0_135 = arith.constant 0 : index
    %c0_136 = arith.constant 0 : index
    %335 = vector.load %arg8[%c2_134, %c0_135, %c0_136] : memref<4x32x1xf32, #tpu.memory_space<vmem>>, vector<1x32x1xf32>
    %336 = vector.shape_cast %335 : vector<1x32x1xf32> to vector<32x1xf32>
    %c2_137 = arith.constant 2 : index
    %c0_138 = arith.constant 0 : index
    %c0_139 = arith.constant 0 : index
    %337 = vector.load %arg9[%c2_137, %c0_138, %c0_139] : memref<4x32x1xf32, #tpu.memory_space<vmem>>, vector<1x32x1xf32>
    %338 = vector.shape_cast %337 : vector<1x32x1xf32> to vector<32x1xf32>
    %cst_140 = arith.constant dense<0.000000e+00> : vector<2x32xf32>
    %339 = vector.multi_reduction <add>, %334, %cst_140 [2] : vector<2x32x31xf32> to vector<2x32xf32>
    %340 = vector.shape_cast %339 : vector<2x32xf32> to vector<2x32x1xf32>
    %cst_141 = arith.constant dense<0.000000e+00> : vector<2x1xf32>
    %341 = vector.multi_reduction <add>, %340, %cst_141 [1] : vector<2x32x1xf32> to vector<2x1xf32>
    %342 = vector.shape_cast %341 : vector<2x1xf32> to vector<2x1x1xf32>
    %343 = arith.mulf %334, %334 : vector<2x32x31xf32>
    %cst_142 = arith.constant dense<0.000000e+00> : vector<2x32xf32>
    %344 = vector.multi_reduction <add>, %343, %cst_142 [2] : vector<2x32x31xf32> to vector<2x32xf32>
    %345 = vector.shape_cast %344 : vector<2x32xf32> to vector<2x32x1xf32>
    %cst_143 = arith.constant dense<0.000000e+00> : vector<2x1xf32>
    %346 = vector.multi_reduction <add>, %345, %cst_143 [1] : vector<2x32x1xf32> to vector<2x1xf32>
    %347 = vector.shape_cast %346 : vector<2x1xf32> to vector<2x1x1xf32>
    %cst_144 = arith.constant 0.00100806449 : f32
    %348 = vector.broadcast %cst_144 : f32 to vector<2x1x1xf32>
    %349 = arith.mulf %342, %348 : vector<2x1x1xf32>
    %cst_145 = arith.constant 0.00100806449 : f32
    %350 = vector.broadcast %cst_145 : f32 to vector<2x1x1xf32>
    %351 = arith.mulf %347, %350 : vector<2x1x1xf32>
    %352 = arith.mulf %349, %349 : vector<2x1x1xf32>
    %353 = arith.subf %351, %352 : vector<2x1x1xf32>
    %cst_146 = arith.constant 0.000000e+00 : f32
    %354 = vector.broadcast %cst_146 : f32 to vector<2x1x1xf32>
    %355 = arith.maximumf %353, %354 : vector<2x1x1xf32>
    %356 = vector.broadcast %349 : vector<2x1x1xf32> to vector<2x32x31xf32>
    %357 = arith.subf %334, %356 : vector<2x32x31xf32>
    %cst_147 = arith.constant 9.99999993E-9 : f32
    %358 = vector.broadcast %cst_147 : f32 to vector<2x1x1xf32>
    %359 = arith.addf %355, %358 : vector<2x1x1xf32>
    %360 = math.rsqrt %359 : vector<2x1x1xf32>
    %361 = vector.broadcast %360 : vector<2x1x1xf32> to vector<2x32x31xf32>
    %362 = arith.mulf %357, %361 : vector<2x32x31xf32>
    %363 = vector.shape_cast %336 : vector<32x1xf32> to vector<1x32x1xf32>
    %364 = vector.broadcast %363 : vector<1x32x1xf32> to vector<2x32x31xf32>
    %365 = arith.mulf %362, %364 : vector<2x32x31xf32>
    %366 = vector.shape_cast %338 : vector<32x1xf32> to vector<1x32x1xf32>
    %367 = vector.broadcast %366 : vector<1x32x1xf32> to vector<2x32x31xf32>
    %368 = arith.addf %365, %367 : vector<2x32x31xf32>
    %c2_148 = arith.constant 2 : index
    %c0_149 = arith.constant 0 : index
    %c0_150 = arith.constant 0 : index
    %369 = vector.load %arg10[%c2_148, %c0_149, %c0_150] : memref<4x32x32xf32, #tpu.memory_space<vmem>>, vector<1x32x32xf32>
    %370 = vector.shape_cast %369 : vector<1x32x32xf32> to vector<32x32xf32>
    %371 = vector.shape_cast %370 : vector<32x32xf32> to vector<1x32x32xf32>
    %372 = vector.shape_cast %371 : vector<1x32x32xf32> to vector<1x32x32xf32>
    %373 = vector.broadcast %372 : vector<1x32x32xf32> to vector<2x32x32xf32>
    "tpu.trace_start"() <{level = 10 : i32, message = "boc,bct->bot"}> : () -> ()
    %cst_151 = arith.constant dense<0.000000e+00> : vector<2x32x31xf32>
    %374 = tpu.matmul %373, %368, %cst_151 {dimension_numbers = #tpu.dot_dimension_numbers<[2], [1], [1], [2], [0, 0, 0, 1, 1, 2], [0], [0]>} : vector<2x32x32xf32>, vector<2x32x31xf32>, vector<2x32x31xf32> -> vector<2x32x31xf32>
    "tpu.trace_stop"() : () -> ()
    %375 = arith.addf %254, %374 : vector<2x32x31xf32>
    %c2_152 = arith.constant 2 : index
    %c0_153 = arith.constant 0 : index
    %c0_154 = arith.constant 0 : index
    %376 = vector.load %arg11[%c2_152, %c0_153, %c0_154] : memref<4x32x1xf32, #tpu.memory_space<vmem>>, vector<1x32x1xf32>
    %377 = vector.shape_cast %376 : vector<1x32x1xf32> to vector<32x1xf32>
    %378 = vector.shape_cast %377 : vector<32x1xf32> to vector<1x32x1xf32>
    %379 = vector.broadcast %378 : vector<1x32x1xf32> to vector<2x32x31xf32>
    %380 = arith.addf %375, %379 : vector<2x32x31xf32>
    %381 = vector.extract_strided_slice %2 {offsets = [0, 96, 0], sizes = [2, 32, 1], strides = [1, 1, 1]} : vector<2x128x1xf32> to vector<2x32x1xf32>
    %c3 = arith.constant 3 : index
    %c0_155 = arith.constant 0 : index
    %c0_156 = arith.constant 0 : index
    %382 = vector.load %arg3[%c3, %c0_155, %c0_156] : memref<4x32x32xf32, #tpu.memory_space<vmem>>, vector<1x32x32xf32>
    %383 = vector.shape_cast %382 : vector<1x32x32xf32> to vector<32x32xf32>
    %384 = vector.shape_cast %383 : vector<32x32xf32> to vector<1x32x32xf32>
    %385 = vector.shape_cast %384 : vector<1x32x32xf32> to vector<1x32x32xf32>
    %386 = vector.broadcast %385 : vector<1x32x32xf32> to vector<2x32x32xf32>
    "tpu.trace_start"() <{level = 10 : i32, message = "boc,bct->bot"}> : () -> ()
    %cst_157 = arith.constant dense<0.000000e+00> : vector<2x32x31xf32>
    %387 = tpu.matmul %386, %380, %cst_157 {dimension_numbers = #tpu.dot_dimension_numbers<[2], [1], [1], [2], [0, 0, 0, 1, 1, 2], [0], [0]>} : vector<2x32x32xf32>, vector<2x32x31xf32>, vector<2x32x31xf32> -> vector<2x32x31xf32>
    "tpu.trace_stop"() : () -> ()
    %388 = vector.broadcast %381 : vector<2x32x1xf32> to vector<2x32x31xf32>
    %389 = arith.addf %387, %388 : vector<2x32x31xf32>
    %cst_158 = arith.constant 0.000000e+00 : f32
    %390 = vector.broadcast %cst_158 : f32 to vector<2x32x31xf32>
    %391 = arith.cmpf oge, %389, %390 : vector<2x32x31xf32>
    %cst_159 = arith.constant 2.500000e-01 : f32
    %392 = vector.broadcast %cst_159 : f32 to vector<2x32x31xf32>
    %393 = arith.mulf %392, %389 : vector<2x32x31xf32>
    %394 = arith.select %391, %389, %393 : vector<2x32x31xi1>, vector<2x32x31xf32>
    %c3_160 = arith.constant 3 : index
    %c0_161 = arith.constant 0 : index
    %c0_162 = arith.constant 0 : index
    %395 = vector.load %arg4[%c3_160, %c0_161, %c0_162] : memref<4x32x1xf32, #tpu.memory_space<vmem>>, vector<1x32x1xf32>
    %396 = vector.shape_cast %395 : vector<1x32x1xf32> to vector<32x1xf32>
    %c3_163 = arith.constant 3 : index
    %c0_164 = arith.constant 0 : index
    %c0_165 = arith.constant 0 : index
    %397 = vector.load %arg5[%c3_163, %c0_164, %c0_165] : memref<4x32x1xf32, #tpu.memory_space<vmem>>, vector<1x32x1xf32>
    %398 = vector.shape_cast %397 : vector<1x32x1xf32> to vector<32x1xf32>
    %cst_166 = arith.constant dense<0.000000e+00> : vector<2x32xf32>
    %399 = vector.multi_reduction <add>, %394, %cst_166 [2] : vector<2x32x31xf32> to vector<2x32xf32>
    %400 = vector.shape_cast %399 : vector<2x32xf32> to vector<2x32x1xf32>
    %cst_167 = arith.constant dense<0.000000e+00> : vector<2x1xf32>
    %401 = vector.multi_reduction <add>, %400, %cst_167 [1] : vector<2x32x1xf32> to vector<2x1xf32>
    %402 = vector.shape_cast %401 : vector<2x1xf32> to vector<2x1x1xf32>
    %403 = arith.mulf %394, %394 : vector<2x32x31xf32>
    %cst_168 = arith.constant dense<0.000000e+00> : vector<2x32xf32>
    %404 = vector.multi_reduction <add>, %403, %cst_168 [2] : vector<2x32x31xf32> to vector<2x32xf32>
    %405 = vector.shape_cast %404 : vector<2x32xf32> to vector<2x32x1xf32>
    %cst_169 = arith.constant dense<0.000000e+00> : vector<2x1xf32>
    %406 = vector.multi_reduction <add>, %405, %cst_169 [1] : vector<2x32x1xf32> to vector<2x1xf32>
    %407 = vector.shape_cast %406 : vector<2x1xf32> to vector<2x1x1xf32>
    %cst_170 = arith.constant 0.00100806449 : f32
    %408 = vector.broadcast %cst_170 : f32 to vector<2x1x1xf32>
    %409 = arith.mulf %402, %408 : vector<2x1x1xf32>
    %cst_171 = arith.constant 0.00100806449 : f32
    %410 = vector.broadcast %cst_171 : f32 to vector<2x1x1xf32>
    %411 = arith.mulf %407, %410 : vector<2x1x1xf32>
    %412 = arith.mulf %409, %409 : vector<2x1x1xf32>
    %413 = arith.subf %411, %412 : vector<2x1x1xf32>
    %cst_172 = arith.constant 0.000000e+00 : f32
    %414 = vector.broadcast %cst_172 : f32 to vector<2x1x1xf32>
    %415 = arith.maximumf %413, %414 : vector<2x1x1xf32>
    %416 = vector.broadcast %409 : vector<2x1x1xf32> to vector<2x32x31xf32>
    %417 = arith.subf %394, %416 : vector<2x32x31xf32>
    %cst_173 = arith.constant 9.99999993E-9 : f32
    %418 = vector.broadcast %cst_173 : f32 to vector<2x1x1xf32>
    %419 = arith.addf %415, %418 : vector<2x1x1xf32>
    %420 = math.rsqrt %419 : vector<2x1x1xf32>
    %421 = vector.broadcast %420 : vector<2x1x1xf32> to vector<2x32x31xf32>
    %422 = arith.mulf %417, %421 : vector<2x32x31xf32>
    %423 = vector.shape_cast %396 : vector<32x1xf32> to vector<1x32x1xf32>
    %424 = vector.broadcast %423 : vector<1x32x1xf32> to vector<2x32x31xf32>
    %425 = arith.mulf %422, %424 : vector<2x32x31xf32>
    %426 = vector.shape_cast %398 : vector<32x1xf32> to vector<1x32x1xf32>
    %427 = vector.broadcast %426 : vector<1x32x1xf32> to vector<2x32x31xf32>
    %428 = arith.addf %425, %427 : vector<2x32x31xf32>
    %c3_174 = arith.constant 3 : index
    %c0_175 = arith.constant 0 : index
    %c0_176 = arith.constant 0 : index
    %429 = vector.load %arg6[%c3_174, %c0_175, %c0_176] : memref<4x32x3xf32, #tpu.memory_space<vmem>>, vector<1x32x3xf32>
    %430 = vector.shape_cast %429 : vector<1x32x3xf32> to vector<32x3xf32>
    %cst_177 = arith.constant 0.000000e+00 : f32
    %431 = vector.broadcast %cst_177 : f32 to vector<2x32x2xf32>
    %432 = vector.extract_strided_slice %428 {offsets = [0, 0, 0], sizes = [2, 32, 29], strides = [1, 1, 1]} : vector<2x32x31xf32> to vector<2x32x29xf32>
    %433 = tpu.concatenate %431, %432 in 2 : vector<2x32x2xf32>, vector<2x32x29xf32> -> vector<2x32x31xf32>
    %434 = vector.extract_strided_slice %430 {offsets = [0, 0], sizes = [32, 1], strides = [1, 1]} : vector<32x3xf32> to vector<32x1xf32>
    %435 = vector.shape_cast %434 : vector<32x1xf32> to vector<1x32x1xf32>
    %436 = vector.broadcast %435 : vector<1x32x1xf32> to vector<2x32x31xf32>
    %437 = arith.mulf %433, %436 : vector<2x32x31xf32>
    %438 = vector.extract_strided_slice %430 {offsets = [0, 1], sizes = [32, 1], strides = [1, 1]} : vector<32x3xf32> to vector<32x1xf32>
    %439 = vector.shape_cast %438 : vector<32x1xf32> to vector<1x32x1xf32>
    %440 = vector.broadcast %439 : vector<1x32x1xf32> to vector<2x32x31xf32>
    %441 = arith.mulf %428, %440 : vector<2x32x31xf32>
    %442 = arith.addf %437, %441 : vector<2x32x31xf32>
    %cst_178 = arith.constant 0.000000e+00 : f32
    %443 = vector.broadcast %cst_178 : f32 to vector<2x32x2xf32>
    %444 = vector.extract_strided_slice %428 {offsets = [0, 0, 2], sizes = [2, 32, 29], strides = [1, 1, 1]} : vector<2x32x31xf32> to vector<2x32x29xf32>
    %445 = tpu.concatenate %444, %443 in 2 : vector<2x32x29xf32>, vector<2x32x2xf32> -> vector<2x32x31xf32>
    %446 = vector.extract_strided_slice %430 {offsets = [0, 2], sizes = [32, 1], strides = [1, 1]} : vector<32x3xf32> to vector<32x1xf32>
    %447 = vector.shape_cast %446 : vector<32x1xf32> to vector<1x32x1xf32>
    %448 = vector.broadcast %447 : vector<1x32x1xf32> to vector<2x32x31xf32>
    %449 = arith.mulf %445, %448 : vector<2x32x31xf32>
    %450 = arith.addf %442, %449 : vector<2x32x31xf32>
    %c3_179 = arith.constant 3 : index
    %c0_180 = arith.constant 0 : index
    %c0_181 = arith.constant 0 : index
    %451 = vector.load %arg7[%c3_179, %c0_180, %c0_181] : memref<4x32x1xf32, #tpu.memory_space<vmem>>, vector<1x32x1xf32>
    %452 = vector.shape_cast %451 : vector<1x32x1xf32> to vector<32x1xf32>
    %453 = vector.shape_cast %452 : vector<32x1xf32> to vector<1x32x1xf32>
    %454 = vector.broadcast %453 : vector<1x32x1xf32> to vector<2x32x31xf32>
    %455 = arith.addf %450, %454 : vector<2x32x31xf32>
    %cst_182 = arith.constant 0.000000e+00 : f32
    %456 = vector.broadcast %cst_182 : f32 to vector<2x32x31xf32>
    %457 = arith.cmpf oge, %455, %456 : vector<2x32x31xf32>
    %cst_183 = arith.constant 2.500000e-01 : f32
    %458 = vector.broadcast %cst_183 : f32 to vector<2x32x31xf32>
    %459 = arith.mulf %458, %455 : vector<2x32x31xf32>
    %460 = arith.select %457, %455, %459 : vector<2x32x31xi1>, vector<2x32x31xf32>
    %c3_184 = arith.constant 3 : index
    %c0_185 = arith.constant 0 : index
    %c0_186 = arith.constant 0 : index
    %461 = vector.load %arg8[%c3_184, %c0_185, %c0_186] : memref<4x32x1xf32, #tpu.memory_space<vmem>>, vector<1x32x1xf32>
    %462 = vector.shape_cast %461 : vector<1x32x1xf32> to vector<32x1xf32>
    %c3_187 = arith.constant 3 : index
    %c0_188 = arith.constant 0 : index
    %c0_189 = arith.constant 0 : index
    %463 = vector.load %arg9[%c3_187, %c0_188, %c0_189] : memref<4x32x1xf32, #tpu.memory_space<vmem>>, vector<1x32x1xf32>
    %464 = vector.shape_cast %463 : vector<1x32x1xf32> to vector<32x1xf32>
    %cst_190 = arith.constant dense<0.000000e+00> : vector<2x32xf32>
    %465 = vector.multi_reduction <add>, %460, %cst_190 [2] : vector<2x32x31xf32> to vector<2x32xf32>
    %466 = vector.shape_cast %465 : vector<2x32xf32> to vector<2x32x1xf32>
    %cst_191 = arith.constant dense<0.000000e+00> : vector<2x1xf32>
    %467 = vector.multi_reduction <add>, %466, %cst_191 [1] : vector<2x32x1xf32> to vector<2x1xf32>
    %468 = vector.shape_cast %467 : vector<2x1xf32> to vector<2x1x1xf32>
    %469 = arith.mulf %460, %460 : vector<2x32x31xf32>
    %cst_192 = arith.constant dense<0.000000e+00> : vector<2x32xf32>
    %470 = vector.multi_reduction <add>, %469, %cst_192 [2] : vector<2x32x31xf32> to vector<2x32xf32>
    %471 = vector.shape_cast %470 : vector<2x32xf32> to vector<2x32x1xf32>
    %cst_193 = arith.constant dense<0.000000e+00> : vector<2x1xf32>
    %472 = vector.multi_reduction <add>, %471, %cst_193 [1] : vector<2x32x1xf32> to vector<2x1xf32>
    %473 = vector.shape_cast %472 : vector<2x1xf32> to vector<2x1x1xf32>
    %cst_194 = arith.constant 0.00100806449 : f32
    %474 = vector.broadcast %cst_194 : f32 to vector<2x1x1xf32>
    %475 = arith.mulf %468, %474 : vector<2x1x1xf32>
    %cst_195 = arith.constant 0.00100806449 : f32
    %476 = vector.broadcast %cst_195 : f32 to vector<2x1x1xf32>
    %477 = arith.mulf %473, %476 : vector<2x1x1xf32>
    %478 = arith.mulf %475, %475 : vector<2x1x1xf32>
    %479 = arith.subf %477, %478 : vector<2x1x1xf32>
    %cst_196 = arith.constant 0.000000e+00 : f32
    %480 = vector.broadcast %cst_196 : f32 to vector<2x1x1xf32>
    %481 = arith.maximumf %479, %480 : vector<2x1x1xf32>
    %482 = vector.broadcast %475 : vector<2x1x1xf32> to vector<2x32x31xf32>
    %483 = arith.subf %460, %482 : vector<2x32x31xf32>
    %cst_197 = arith.constant 9.99999993E-9 : f32
    %484 = vector.broadcast %cst_197 : f32 to vector<2x1x1xf32>
    %485 = arith.addf %481, %484 : vector<2x1x1xf32>
    %486 = math.rsqrt %485 : vector<2x1x1xf32>
    %487 = vector.broadcast %486 : vector<2x1x1xf32> to vector<2x32x31xf32>
    %488 = arith.mulf %483, %487 : vector<2x32x31xf32>
    %489 = vector.shape_cast %462 : vector<32x1xf32> to vector<1x32x1xf32>
    %490 = vector.broadcast %489 : vector<1x32x1xf32> to vector<2x32x31xf32>
    %491 = arith.mulf %488, %490 : vector<2x32x31xf32>
    %492 = vector.shape_cast %464 : vector<32x1xf32> to vector<1x32x1xf32>
    %493 = vector.broadcast %492 : vector<1x32x1xf32> to vector<2x32x31xf32>
    %494 = arith.addf %491, %493 : vector<2x32x31xf32>
    %c3_198 = arith.constant 3 : index
    %c0_199 = arith.constant 0 : index
    %c0_200 = arith.constant 0 : index
    %495 = vector.load %arg10[%c3_198, %c0_199, %c0_200] : memref<4x32x32xf32, #tpu.memory_space<vmem>>, vector<1x32x32xf32>
    %496 = vector.shape_cast %495 : vector<1x32x32xf32> to vector<32x32xf32>
    %497 = vector.shape_cast %496 : vector<32x32xf32> to vector<1x32x32xf32>
    %498 = vector.shape_cast %497 : vector<1x32x32xf32> to vector<1x32x32xf32>
    %499 = vector.broadcast %498 : vector<1x32x32xf32> to vector<2x32x32xf32>
    "tpu.trace_start"() <{level = 10 : i32, message = "boc,bct->bot"}> : () -> ()
    %cst_201 = arith.constant dense<0.000000e+00> : vector<2x32x31xf32>
    %500 = tpu.matmul %499, %494, %cst_201 {dimension_numbers = #tpu.dot_dimension_numbers<[2], [1], [1], [2], [0, 0, 0, 1, 1, 2], [0], [0]>} : vector<2x32x32xf32>, vector<2x32x31xf32>, vector<2x32x31xf32> -> vector<2x32x31xf32>
    "tpu.trace_stop"() : () -> ()
    %501 = arith.addf %380, %500 : vector<2x32x31xf32>
    %c3_202 = arith.constant 3 : index
    %c0_203 = arith.constant 0 : index
    %c0_204 = arith.constant 0 : index
    %502 = vector.load %arg11[%c3_202, %c0_203, %c0_204] : memref<4x32x1xf32, #tpu.memory_space<vmem>>, vector<1x32x1xf32>
    %503 = vector.shape_cast %502 : vector<1x32x1xf32> to vector<32x1xf32>
    %504 = vector.shape_cast %503 : vector<32x1xf32> to vector<1x32x1xf32>
    %505 = vector.broadcast %504 : vector<1x32x1xf32> to vector<2x32x31xf32>
    %506 = arith.addf %501, %505 : vector<2x32x31xf32>
    %507 = arith.addf %506, %1 : vector<2x32x31xf32>
    %508 = arith.truncf %507 : vector<2x32x31xf32> to vector<2x32x31xbf16>
    %c0_205 = arith.constant 0 : index
    %c0_206 = arith.constant 0 : index
    %c0_207 = arith.constant 0 : index
    %509 = vector.load %arg12[%c0_205, %c0_206, %c0_207] : memref<2x32x31xbf16, #tpu.memory_space<vmem>>, vector<2x32x31xbf16>
    tpu.vector_store %arg12[%c0_205, %c0_206, %c0_207], %508 {strides = array<i32>} : memref<2x32x31xbf16, #tpu.memory_space<vmem>>, vector<2x32x31xbf16>,
    return
  }
  func.func @transform_0(%arg0: i32) -> (i32, i32, i32) {
    %c0_i32 = arith.constant 0 : i32
    %c0_i32_0 = arith.constant 0 : i32
    %c0_i32_1 = arith.constant 0 : i32
    return %arg0, %c0_i32, %c0_i32_0 : i32, i32, i32
  }
  func.func @transform_1(%arg0: i32) -> (i32, i32, i32) {
    %c0_i32 = arith.constant 0 : i32
    %c0_i32_0 = arith.constant 0 : i32
    %c0_i32_1 = arith.constant 0 : i32
    return %arg0, %c0_i32, %c0_i32_0 : i32, i32, i32
  }
  func.func @transform_2(%arg0: i32) -> (i32, i32, i32) {
    %c0_i32 = arith.constant 0 : i32
    %c0_i32_0 = arith.constant 0 : i32
    %c0_i32_1 = arith.constant 0 : i32
    %c0_i32_2 = arith.constant 0 : i32
    return %c0_i32, %c0_i32_0, %c0_i32_1 : i32, i32, i32
  }
  func.func @transform_3(%arg0: i32) -> (i32, i32, i32) {
    %c0_i32 = arith.constant 0 : i32
    %c0_i32_0 = arith.constant 0 : i32
    %c0_i32_1 = arith.constant 0 : i32
    %c0_i32_2 = arith.constant 0 : i32
    return %c0_i32, %c0_i32_0, %c0_i32_1 : i32, i32, i32
  }
  func.func @transform_4(%arg0: i32) -> (i32, i32, i32) {
    %c0_i32 = arith.constant 0 : i32
    %c0_i32_0 = arith.constant 0 : i32
    %c0_i32_1 = arith.constant 0 : i32
    %c0_i32_2 = arith.constant 0 : i32
    return %c0_i32, %c0_i32_0, %c0_i32_1 : i32, i32, i32
  }
  func.func @transform_5(%arg0: i32) -> (i32, i32, i32) {
    %c0_i32 = arith.constant 0 : i32
    %c0_i32_0 = arith.constant 0 : i32
    %c0_i32_1 = arith.constant 0 : i32
    %c0_i32_2 = arith.constant 0 : i32
    return %c0_i32, %c0_i32_0, %c0_i32_1 : i32, i32, i32
  }
  func.func @transform_6(%arg0: i32) -> (i32, i32, i32) {
    %c0_i32 = arith.constant 0 : i32
    %c0_i32_0 = arith.constant 0 : i32
    %c0_i32_1 = arith.constant 0 : i32
    %c0_i32_2 = arith.constant 0 : i32
    return %c0_i32, %c0_i32_0, %c0_i32_1 : i32, i32, i32
  }
  func.func @transform_7(%arg0: i32) -> (i32, i32, i32) {
    %c0_i32 = arith.constant 0 : i32
    %c0_i32_0 = arith.constant 0 : i32
    %c0_i32_1 = arith.constant 0 : i32
    %c0_i32_2 = arith.constant 0 : i32
    return %c0_i32, %c0_i32_0, %c0_i32_1 : i32, i32, i32
  }
  func.func @transform_8(%arg0: i32) -> (i32, i32, i32) {
    %c0_i32 = arith.constant 0 : i32
    %c0_i32_0 = arith.constant 0 : i32
    %c0_i32_1 = arith.constant 0 : i32
    %c0_i32_2 = arith.constant 0 : i32
    return %c0_i32, %c0_i32_0, %c0_i32_1 : i32, i32, i32
  }
  func.func @transform_9(%arg0: i32) -> (i32, i32, i32) {
    %c0_i32 = arith.constant 0 : i32
    %c0_i32_0 = arith.constant 0 : i32
    %c0_i32_1 = arith.constant 0 : i32
    %c0_i32_2 = arith.constant 0 : i32
    return %c0_i32, %c0_i32_0, %c0_i32_1 : i32, i32, i32
  }
  func.func @transform_10(%arg0: i32) -> (i32, i32, i32) {
    %c0_i32 = arith.constant 0 : i32
    %c0_i32_0 = arith.constant 0 : i32
    %c0_i32_1 = arith.constant 0 : i32
    %c0_i32_2 = arith.constant 0 : i32
    return %c0_i32, %c0_i32_0, %c0_i32_1 : i32, i32, i32
  }
  func.func @transform_11(%arg0: i32) -> (i32, i32, i32) {
    %c0_i32 = arith.constant 0 : i32
    %c0_i32_0 = arith.constant 0 : i32
    %c0_i32_1 = arith.constant 0 : i32
    return %arg0, %c0_i32, %c0_i32_0 : i32, i32, i32
  }
}

module attributes {stable_mosaic.version = 11 : i64} {
  func.func @_mask_decode_kernel(%arg0: i32, %arg1: memref<2x32x31xbf16, #tpu.memory_space<vmem>>, %arg2: memref<2x48x31xbf16, #tpu.memory_space<vmem>>, %arg3: memref<48x32xf32, #tpu.memory_space<vmem>>, %arg4: memref<48x1xf32, #tpu.memory_space<vmem>>, %arg5: memref<28x48xf32, #tpu.memory_space<vmem>>, %arg6: memref<2x2x32xf32, #tpu.memory_space<vmem>>, %arg7: memref<2x2x34xf32, #tpu.memory_space<vmem>>, %arg8: memref<2x2x38xf32, #tpu.memory_space<vmem>>) attributes {dimension_semantics = [#tpu.dimension_semantics<parallel>], iteration_bounds = array<i64: 1>, scalar_prefetch = 0 : i64, scratch_operands = 0 : i64, tpu.core_type = #tpu.core_type<tc>, window_params = [{transform_indices = @transform_0, window_bounds = array<i64: 2, 32, 31>}, {transform_indices = @transform_1, window_bounds = array<i64: 2, 48, 31>}, {pipeline_mode = #tpu.pipeline_mode<synchronous>, transform_indices = @transform_2, window_bounds = array<i64: 48, 32>}, {pipeline_mode = #tpu.pipeline_mode<synchronous>, transform_indices = @transform_3, window_bounds = array<i64: 48, 1>}, {pipeline_mode = #tpu.pipeline_mode<synchronous>, transform_indices = @transform_4, window_bounds = array<i64: 28, 48>}, {transform_indices = @transform_5, window_bounds = array<i64: 2, 2, 32>}, {transform_indices = @transform_6, window_bounds = array<i64: 2, 2, 34>}, {transform_indices = @transform_7, window_bounds = array<i64: 2, 2, 38>}]} {
    %c0 = arith.constant 0 : index
    %c0_0 = arith.constant 0 : index
    %c0_1 = arith.constant 0 : index
    %0 = vector.load %arg1[%c0, %c0_0, %c0_1] : memref<2x32x31xbf16, #tpu.memory_space<vmem>>, vector<2x32x31xbf16>
    %1 = arith.extf %0 : vector<2x32x31xbf16> to vector<2x32x31xf32>
    %c0_2 = arith.constant 0 : index
    %c0_3 = arith.constant 0 : index
    %2 = vector.load %arg3[%c0_2, %c0_3] : memref<48x32xf32, #tpu.memory_space<vmem>>, vector<48x32xf32>
    %3 = vector.shape_cast %2 : vector<48x32xf32> to vector<1x48x32xf32>
    %4 = vector.shape_cast %3 : vector<1x48x32xf32> to vector<1x48x32xf32>
    %5 = vector.broadcast %4 : vector<1x48x32xf32> to vector<2x48x32xf32>
    "tpu.trace_start"() <{level = 10 : i32, message = "boc,bct->bot"}> : () -> ()
    %cst = arith.constant dense<0.000000e+00> : vector<2x48x31xf32>
    %6 = tpu.matmul %5, %1, %cst {dimension_numbers = #tpu.dot_dimension_numbers<[2], [1], [1], [2], [0, 0, 0, 1, 1, 2], [0], [0]>} : vector<2x48x32xf32>, vector<2x32x31xf32>, vector<2x48x31xf32> -> vector<2x48x31xf32>
    "tpu.trace_stop"() : () -> ()
    %c0_4 = arith.constant 0 : index
    %c0_5 = arith.constant 0 : index
    %7 = vector.load %arg4[%c0_4, %c0_5] : memref<48x1xf32, #tpu.memory_space<vmem>>, vector<48x1xf32>
    %8 = vector.shape_cast %7 : vector<48x1xf32> to vector<1x48x1xf32>
    %9 = vector.broadcast %8 : vector<1x48x1xf32> to vector<2x48x31xf32>
    %10 = arith.addf %6, %9 : vector<2x48x31xf32>
    %cst_6 = arith.constant 0.000000e+00 : f32
    %11 = vector.broadcast %cst_6 : f32 to vector<2x48x31xf32>
    %12 = arith.maximumf %10, %11 : vector<2x48x31xf32>
    %c0_7 = arith.constant 0 : index
    %c0_8 = arith.constant 0 : index
    %c0_9 = arith.constant 0 : index
    %13 = vector.load %arg2[%c0_7, %c0_8, %c0_9] : memref<2x48x31xbf16, #tpu.memory_space<vmem>>, vector<2x48x31xbf16>
    %14 = arith.extf %13 : vector<2x48x31xbf16> to vector<2x48x31xf32>
    %15 = arith.mulf %12, %14 : vector<2x48x31xf32>
    %c0_10 = arith.constant 0 : index
    %c0_11 = arith.constant 0 : index
    %16 = vector.load %arg5[%c0_10, %c0_11] : memref<28x48xf32, #tpu.memory_space<vmem>>, vector<28x48xf32>
    %17 = vector.shape_cast %16 : vector<28x48xf32> to vector<1x28x48xf32>
    %18 = vector.shape_cast %17 : vector<1x28x48xf32> to vector<1x28x48xf32>
    %19 = vector.broadcast %18 : vector<1x28x48xf32> to vector<2x28x48xf32>
    "tpu.trace_start"() <{level = 10 : i32, message = "boc,bct->bot"}> : () -> ()
    %cst_12 = arith.constant dense<0.000000e+00> : vector<2x28x31xf32>
    %20 = tpu.matmul %19, %15, %cst_12 {dimension_numbers = #tpu.dot_dimension_numbers<[2], [1], [1], [2], [0, 0, 0, 1, 1, 2], [0], [0]>} : vector<2x28x48xf32>, vector<2x48x31xf32>, vector<2x28x31xf32> -> vector<2x28x31xf32>
    %cst_13 = arith.constant 0.000000e+00 : f32
    "tpu.trace_stop"() : () -> ()
    %21 = vector.broadcast %cst_13 : f32 to vector<2x1x32xf32>
    %22 = vector.extract_strided_slice %20 {offsets = [0, 0, 0], sizes = [2, 1, 31], strides = [1, 1, 1]} : vector<2x28x31xf32> to vector<2x1x31xf32>
    %cst_14 = arith.constant 0.000000e+00 : f32
    %23 = vector.broadcast %cst_14 : f32 to vector<2x1x1xf32>
    %24 = tpu.concatenate %22, %23 in 2 : vector<2x1x31xf32>, vector<2x1x1xf32> -> vector<2x1x32xf32>
    %25 = arith.addf %21, %24 : vector<2x1x32xf32>
    %26 = vector.extract_strided_slice %20 {offsets = [0, 2, 0], sizes = [2, 1, 31], strides = [1, 1, 1]} : vector<2x28x31xf32> to vector<2x1x31xf32>
    %cst_15 = arith.constant 0.000000e+00 : f32
    %27 = vector.broadcast %cst_15 : f32 to vector<2x1x1xf32>
    %28 = tpu.concatenate %27, %26 in 2 : vector<2x1x1xf32>, vector<2x1x31xf32> -> vector<2x1x32xf32>
    %29 = arith.addf %25, %28 : vector<2x1x32xf32>
    %c0_16 = arith.constant 0 : index
    %c0_17 = arith.constant 0 : index
    %c0_18 = arith.constant 0 : index
    %30 = vector.load %arg6[%c0_16, %c0_17, %c0_18] : memref<2x2x32xf32, #tpu.memory_space<vmem>>, vector<2x1x32xf32>
    tpu.vector_store %arg6[%c0_16, %c0_17, %c0_18], %29 {strides = array<i32>} : memref<2x2x32xf32, #tpu.memory_space<vmem>>, vector<2x1x32xf32>,
    %cst_19 = arith.constant 0.000000e+00 : f32
    %31 = vector.broadcast %cst_19 : f32 to vector<2x1x32xf32>
    %32 = vector.extract_strided_slice %20 {offsets = [0, 1, 0], sizes = [2, 1, 31], strides = [1, 1, 1]} : vector<2x28x31xf32> to vector<2x1x31xf32>
    %cst_20 = arith.constant 0.000000e+00 : f32
    %33 = vector.broadcast %cst_20 : f32 to vector<2x1x1xf32>
    %34 = tpu.concatenate %32, %33 in 2 : vector<2x1x31xf32>, vector<2x1x1xf32> -> vector<2x1x32xf32>
    %35 = arith.addf %31, %34 : vector<2x1x32xf32>
    %36 = vector.extract_strided_slice %20 {offsets = [0, 3, 0], sizes = [2, 1, 31], strides = [1, 1, 1]} : vector<2x28x31xf32> to vector<2x1x31xf32>
    %cst_21 = arith.constant 0.000000e+00 : f32
    %37 = vector.broadcast %cst_21 : f32 to vector<2x1x1xf32>
    %38 = tpu.concatenate %37, %36 in 2 : vector<2x1x1xf32>, vector<2x1x31xf32> -> vector<2x1x32xf32>
    %39 = arith.addf %35, %38 : vector<2x1x32xf32>
    %c0_22 = arith.constant 0 : index
    %c1 = arith.constant 1 : index
    %c0_23 = arith.constant 0 : index
    %40 = vector.load %arg6[%c0_22, %c1, %c0_23] : memref<2x2x32xf32, #tpu.memory_space<vmem>>, vector<2x1x32xf32>
    tpu.vector_store %arg6[%c0_22, %c1, %c0_23], %39 {strides = array<i32>} : memref<2x2x32xf32, #tpu.memory_space<vmem>>, vector<2x1x32xf32>,
    %cst_24 = arith.constant 0.000000e+00 : f32
    %41 = vector.broadcast %cst_24 : f32 to vector<2x1x34xf32>
    %42 = vector.extract_strided_slice %20 {offsets = [0, 4, 0], sizes = [2, 1, 31], strides = [1, 1, 1]} : vector<2x28x31xf32> to vector<2x1x31xf32>
    %cst_25 = arith.constant 0.000000e+00 : f32
    %43 = vector.broadcast %cst_25 : f32 to vector<2x1x3xf32>
    %44 = tpu.concatenate %42, %43 in 2 : vector<2x1x31xf32>, vector<2x1x3xf32> -> vector<2x1x34xf32>
    %45 = arith.addf %41, %44 : vector<2x1x34xf32>
    %46 = vector.extract_strided_slice %20 {offsets = [0, 6, 0], sizes = [2, 1, 31], strides = [1, 1, 1]} : vector<2x28x31xf32> to vector<2x1x31xf32>
    %cst_26 = arith.constant 0.000000e+00 : f32
    %47 = vector.broadcast %cst_26 : f32 to vector<2x1x1xf32>
    %cst_27 = arith.constant 0.000000e+00 : f32
    %48 = vector.broadcast %cst_27 : f32 to vector<2x1x2xf32>
    %49 = tpu.concatenate %47, %46, %48 in 2 : vector<2x1x1xf32>, vector<2x1x31xf32>, vector<2x1x2xf32> -> vector<2x1x34xf32>
    %50 = arith.addf %45, %49 : vector<2x1x34xf32>
    %51 = vector.extract_strided_slice %20 {offsets = [0, 8, 0], sizes = [2, 1, 31], strides = [1, 1, 1]} : vector<2x28x31xf32> to vector<2x1x31xf32>
    %cst_28 = arith.constant 0.000000e+00 : f32
    %52 = vector.broadcast %cst_28 : f32 to vector<2x1x2xf32>
    %cst_29 = arith.constant 0.000000e+00 : f32
    %53 = vector.broadcast %cst_29 : f32 to vector<2x1x1xf32>
    %54 = tpu.concatenate %52, %51, %53 in 2 : vector<2x1x2xf32>, vector<2x1x31xf32>, vector<2x1x1xf32> -> vector<2x1x34xf32>
    %55 = arith.addf %50, %54 : vector<2x1x34xf32>
    %56 = vector.extract_strided_slice %20 {offsets = [0, 10, 0], sizes = [2, 1, 31], strides = [1, 1, 1]} : vector<2x28x31xf32> to vector<2x1x31xf32>
    %cst_30 = arith.constant 0.000000e+00 : f32
    %57 = vector.broadcast %cst_30 : f32 to vector<2x1x3xf32>
    %58 = tpu.concatenate %57, %56 in 2 : vector<2x1x3xf32>, vector<2x1x31xf32> -> vector<2x1x34xf32>
    %59 = arith.addf %55, %58 : vector<2x1x34xf32>
    %c0_31 = arith.constant 0 : index
    %c0_32 = arith.constant 0 : index
    %c0_33 = arith.constant 0 : index
    %60 = vector.load %arg7[%c0_31, %c0_32, %c0_33] : memref<2x2x34xf32, #tpu.memory_space<vmem>>, vector<2x1x34xf32>
    tpu.vector_store %arg7[%c0_31, %c0_32, %c0_33], %59 {strides = array<i32>} : memref<2x2x34xf32, #tpu.memory_space<vmem>>, vector<2x1x34xf32>,
    %cst_34 = arith.constant 0.000000e+00 : f32
    %61 = vector.broadcast %cst_34 : f32 to vector<2x1x34xf32>
    %62 = vector.extract_strided_slice %20 {offsets = [0, 5, 0], sizes = [2, 1, 31], strides = [1, 1, 1]} : vector<2x28x31xf32> to vector<2x1x31xf32>
    %cst_35 = arith.constant 0.000000e+00 : f32
    %63 = vector.broadcast %cst_35 : f32 to vector<2x1x3xf32>
    %64 = tpu.concatenate %62, %63 in 2 : vector<2x1x31xf32>, vector<2x1x3xf32> -> vector<2x1x34xf32>
    %65 = arith.addf %61, %64 : vector<2x1x34xf32>
    %66 = vector.extract_strided_slice %20 {offsets = [0, 7, 0], sizes = [2, 1, 31], strides = [1, 1, 1]} : vector<2x28x31xf32> to vector<2x1x31xf32>
    %cst_36 = arith.constant 0.000000e+00 : f32
    %67 = vector.broadcast %cst_36 : f32 to vector<2x1x1xf32>
    %cst_37 = arith.constant 0.000000e+00 : f32
    %68 = vector.broadcast %cst_37 : f32 to vector<2x1x2xf32>
    %69 = tpu.concatenate %67, %66, %68 in 2 : vector<2x1x1xf32>, vector<2x1x31xf32>, vector<2x1x2xf32> -> vector<2x1x34xf32>
    %70 = arith.addf %65, %69 : vector<2x1x34xf32>
    %71 = vector.extract_strided_slice %20 {offsets = [0, 9, 0], sizes = [2, 1, 31], strides = [1, 1, 1]} : vector<2x28x31xf32> to vector<2x1x31xf32>
    %cst_38 = arith.constant 0.000000e+00 : f32
    %72 = vector.broadcast %cst_38 : f32 to vector<2x1x2xf32>
    %cst_39 = arith.constant 0.000000e+00 : f32
    %73 = vector.broadcast %cst_39 : f32 to vector<2x1x1xf32>
    %74 = tpu.concatenate %72, %71, %73 in 2 : vector<2x1x2xf32>, vector<2x1x31xf32>, vector<2x1x1xf32> -> vector<2x1x34xf32>
    %75 = arith.addf %70, %74 : vector<2x1x34xf32>
    %76 = vector.extract_strided_slice %20 {offsets = [0, 11, 0], sizes = [2, 1, 31], strides = [1, 1, 1]} : vector<2x28x31xf32> to vector<2x1x31xf32>
    %cst_40 = arith.constant 0.000000e+00 : f32
    %77 = vector.broadcast %cst_40 : f32 to vector<2x1x3xf32>
    %78 = tpu.concatenate %77, %76 in 2 : vector<2x1x3xf32>, vector<2x1x31xf32> -> vector<2x1x34xf32>
    %79 = arith.addf %75, %78 : vector<2x1x34xf32>
    %c0_41 = arith.constant 0 : index
    %c1_42 = arith.constant 1 : index
    %c0_43 = arith.constant 0 : index
    %80 = vector.load %arg7[%c0_41, %c1_42, %c0_43] : memref<2x2x34xf32, #tpu.memory_space<vmem>>, vector<2x1x34xf32>
    tpu.vector_store %arg7[%c0_41, %c1_42, %c0_43], %79 {strides = array<i32>} : memref<2x2x34xf32, #tpu.memory_space<vmem>>, vector<2x1x34xf32>,
    %cst_44 = arith.constant 0.000000e+00 : f32
    %81 = vector.broadcast %cst_44 : f32 to vector<2x1x38xf32>
    %82 = vector.extract_strided_slice %20 {offsets = [0, 12, 0], sizes = [2, 1, 31], strides = [1, 1, 1]} : vector<2x28x31xf32> to vector<2x1x31xf32>
    %cst_45 = arith.constant 0.000000e+00 : f32
    %83 = vector.broadcast %cst_45 : f32 to vector<2x1x7xf32>
    %84 = tpu.concatenate %82, %83 in 2 : vector<2x1x31xf32>, vector<2x1x7xf32> -> vector<2x1x38xf32>
    %85 = arith.addf %81, %84 : vector<2x1x38xf32>
    %86 = vector.extract_strided_slice %20 {offsets = [0, 14, 0], sizes = [2, 1, 31], strides = [1, 1, 1]} : vector<2x28x31xf32> to vector<2x1x31xf32>
    %cst_46 = arith.constant 0.000000e+00 : f32
    %87 = vector.broadcast %cst_46 : f32 to vector<2x1x1xf32>
    %cst_47 = arith.constant 0.000000e+00 : f32
    %88 = vector.broadcast %cst_47 : f32 to vector<2x1x6xf32>
    %89 = tpu.concatenate %87, %86, %88 in 2 : vector<2x1x1xf32>, vector<2x1x31xf32>, vector<2x1x6xf32> -> vector<2x1x38xf32>
    %90 = arith.addf %85, %89 : vector<2x1x38xf32>
    %91 = vector.extract_strided_slice %20 {offsets = [0, 16, 0], sizes = [2, 1, 31], strides = [1, 1, 1]} : vector<2x28x31xf32> to vector<2x1x31xf32>
    %cst_48 = arith.constant 0.000000e+00 : f32
    %92 = vector.broadcast %cst_48 : f32 to vector<2x1x2xf32>
    %cst_49 = arith.constant 0.000000e+00 : f32
    %93 = vector.broadcast %cst_49 : f32 to vector<2x1x5xf32>
    %94 = tpu.concatenate %92, %91, %93 in 2 : vector<2x1x2xf32>, vector<2x1x31xf32>, vector<2x1x5xf32> -> vector<2x1x38xf32>
    %95 = arith.addf %90, %94 : vector<2x1x38xf32>
    %96 = vector.extract_strided_slice %20 {offsets = [0, 18, 0], sizes = [2, 1, 31], strides = [1, 1, 1]} : vector<2x28x31xf32> to vector<2x1x31xf32>
    %cst_50 = arith.constant 0.000000e+00 : f32
    %97 = vector.broadcast %cst_50 : f32 to vector<2x1x3xf32>
    %cst_51 = arith.constant 0.000000e+00 : f32
    %98 = vector.broadcast %cst_51 : f32 to vector<2x1x4xf32>
    %99 = tpu.concatenate %97, %96, %98 in 2 : vector<2x1x3xf32>, vector<2x1x31xf32>, vector<2x1x4xf32> -> vector<2x1x38xf32>
    %100 = arith.addf %95, %99 : vector<2x1x38xf32>
    %101 = vector.extract_strided_slice %20 {offsets = [0, 20, 0], sizes = [2, 1, 31], strides = [1, 1, 1]} : vector<2x28x31xf32> to vector<2x1x31xf32>
    %cst_52 = arith.constant 0.000000e+00 : f32
    %102 = vector.broadcast %cst_52 : f32 to vector<2x1x4xf32>
    %cst_53 = arith.constant 0.000000e+00 : f32
    %103 = vector.broadcast %cst_53 : f32 to vector<2x1x3xf32>
    %104 = tpu.concatenate %102, %101, %103 in 2 : vector<2x1x4xf32>, vector<2x1x31xf32>, vector<2x1x3xf32> -> vector<2x1x38xf32>
    %105 = arith.addf %100, %104 : vector<2x1x38xf32>
    %106 = vector.extract_strided_slice %20 {offsets = [0, 22, 0], sizes = [2, 1, 31], strides = [1, 1, 1]} : vector<2x28x31xf32> to vector<2x1x31xf32>
    %cst_54 = arith.constant 0.000000e+00 : f32
    %107 = vector.broadcast %cst_54 : f32 to vector<2x1x5xf32>
    %cst_55 = arith.constant 0.000000e+00 : f32
    %108 = vector.broadcast %cst_55 : f32 to vector<2x1x2xf32>
    %109 = tpu.concatenate %107, %106, %108 in 2 : vector<2x1x5xf32>, vector<2x1x31xf32>, vector<2x1x2xf32> -> vector<2x1x38xf32>
    %110 = arith.addf %105, %109 : vector<2x1x38xf32>
    %111 = vector.extract_strided_slice %20 {offsets = [0, 24, 0], sizes = [2, 1, 31], strides = [1, 1, 1]} : vector<2x28x31xf32> to vector<2x1x31xf32>
    %cst_56 = arith.constant 0.000000e+00 : f32
    %112 = vector.broadcast %cst_56 : f32 to vector<2x1x6xf32>
    %cst_57 = arith.constant 0.000000e+00 : f32
    %113 = vector.broadcast %cst_57 : f32 to vector<2x1x1xf32>
    %114 = tpu.concatenate %112, %111, %113 in 2 : vector<2x1x6xf32>, vector<2x1x31xf32>, vector<2x1x1xf32> -> vector<2x1x38xf32>
    %115 = arith.addf %110, %114 : vector<2x1x38xf32>
    %116 = vector.extract_strided_slice %20 {offsets = [0, 26, 0], sizes = [2, 1, 31], strides = [1, 1, 1]} : vector<2x28x31xf32> to vector<2x1x31xf32>
    %cst_58 = arith.constant 0.000000e+00 : f32
    %117 = vector.broadcast %cst_58 : f32 to vector<2x1x7xf32>
    %118 = tpu.concatenate %117, %116 in 2 : vector<2x1x7xf32>, vector<2x1x31xf32> -> vector<2x1x38xf32>
    %119 = arith.addf %115, %118 : vector<2x1x38xf32>
    %c0_59 = arith.constant 0 : index
    %c0_60 = arith.constant 0 : index
    %c0_61 = arith.constant 0 : index
    %120 = vector.load %arg8[%c0_59, %c0_60, %c0_61] : memref<2x2x38xf32, #tpu.memory_space<vmem>>, vector<2x1x38xf32>
    tpu.vector_store %arg8[%c0_59, %c0_60, %c0_61], %119 {strides = array<i32>} : memref<2x2x38xf32, #tpu.memory_space<vmem>>, vector<2x1x38xf32>,
    %cst_62 = arith.constant 0.000000e+00 : f32
    %121 = vector.broadcast %cst_62 : f32 to vector<2x1x38xf32>
    %122 = vector.extract_strided_slice %20 {offsets = [0, 13, 0], sizes = [2, 1, 31], strides = [1, 1, 1]} : vector<2x28x31xf32> to vector<2x1x31xf32>
    %cst_63 = arith.constant 0.000000e+00 : f32
    %123 = vector.broadcast %cst_63 : f32 to vector<2x1x7xf32>
    %124 = tpu.concatenate %122, %123 in 2 : vector<2x1x31xf32>, vector<2x1x7xf32> -> vector<2x1x38xf32>
    %125 = arith.addf %121, %124 : vector<2x1x38xf32>
    %126 = vector.extract_strided_slice %20 {offsets = [0, 15, 0], sizes = [2, 1, 31], strides = [1, 1, 1]} : vector<2x28x31xf32> to vector<2x1x31xf32>
    %cst_64 = arith.constant 0.000000e+00 : f32
    %127 = vector.broadcast %cst_64 : f32 to vector<2x1x1xf32>
    %cst_65 = arith.constant 0.000000e+00 : f32
    %128 = vector.broadcast %cst_65 : f32 to vector<2x1x6xf32>
    %129 = tpu.concatenate %127, %126, %128 in 2 : vector<2x1x1xf32>, vector<2x1x31xf32>, vector<2x1x6xf32> -> vector<2x1x38xf32>
    %130 = arith.addf %125, %129 : vector<2x1x38xf32>
    %131 = vector.extract_strided_slice %20 {offsets = [0, 17, 0], sizes = [2, 1, 31], strides = [1, 1, 1]} : vector<2x28x31xf32> to vector<2x1x31xf32>
    %cst_66 = arith.constant 0.000000e+00 : f32
    %132 = vector.broadcast %cst_66 : f32 to vector<2x1x2xf32>
    %cst_67 = arith.constant 0.000000e+00 : f32
    %133 = vector.broadcast %cst_67 : f32 to vector<2x1x5xf32>
    %134 = tpu.concatenate %132, %131, %133 in 2 : vector<2x1x2xf32>, vector<2x1x31xf32>, vector<2x1x5xf32> -> vector<2x1x38xf32>
    %135 = arith.addf %130, %134 : vector<2x1x38xf32>
    %136 = vector.extract_strided_slice %20 {offsets = [0, 19, 0], sizes = [2, 1, 31], strides = [1, 1, 1]} : vector<2x28x31xf32> to vector<2x1x31xf32>
    %cst_68 = arith.constant 0.000000e+00 : f32
    %137 = vector.broadcast %cst_68 : f32 to vector<2x1x3xf32>
    %cst_69 = arith.constant 0.000000e+00 : f32
    %138 = vector.broadcast %cst_69 : f32 to vector<2x1x4xf32>
    %139 = tpu.concatenate %137, %136, %138 in 2 : vector<2x1x3xf32>, vector<2x1x31xf32>, vector<2x1x4xf32> -> vector<2x1x38xf32>
    %140 = arith.addf %135, %139 : vector<2x1x38xf32>
    %141 = vector.extract_strided_slice %20 {offsets = [0, 21, 0], sizes = [2, 1, 31], strides = [1, 1, 1]} : vector<2x28x31xf32> to vector<2x1x31xf32>
    %cst_70 = arith.constant 0.000000e+00 : f32
    %142 = vector.broadcast %cst_70 : f32 to vector<2x1x4xf32>
    %cst_71 = arith.constant 0.000000e+00 : f32
    %143 = vector.broadcast %cst_71 : f32 to vector<2x1x3xf32>
    %144 = tpu.concatenate %142, %141, %143 in 2 : vector<2x1x4xf32>, vector<2x1x31xf32>, vector<2x1x3xf32> -> vector<2x1x38xf32>
    %145 = arith.addf %140, %144 : vector<2x1x38xf32>
    %146 = vector.extract_strided_slice %20 {offsets = [0, 23, 0], sizes = [2, 1, 31], strides = [1, 1, 1]} : vector<2x28x31xf32> to vector<2x1x31xf32>
    %cst_72 = arith.constant 0.000000e+00 : f32
    %147 = vector.broadcast %cst_72 : f32 to vector<2x1x5xf32>
    %cst_73 = arith.constant 0.000000e+00 : f32
    %148 = vector.broadcast %cst_73 : f32 to vector<2x1x2xf32>
    %149 = tpu.concatenate %147, %146, %148 in 2 : vector<2x1x5xf32>, vector<2x1x31xf32>, vector<2x1x2xf32> -> vector<2x1x38xf32>
    %150 = arith.addf %145, %149 : vector<2x1x38xf32>
    %151 = vector.extract_strided_slice %20 {offsets = [0, 25, 0], sizes = [2, 1, 31], strides = [1, 1, 1]} : vector<2x28x31xf32> to vector<2x1x31xf32>
    %cst_74 = arith.constant 0.000000e+00 : f32
    %152 = vector.broadcast %cst_74 : f32 to vector<2x1x6xf32>
    %cst_75 = arith.constant 0.000000e+00 : f32
    %153 = vector.broadcast %cst_75 : f32 to vector<2x1x1xf32>
    %154 = tpu.concatenate %152, %151, %153 in 2 : vector<2x1x6xf32>, vector<2x1x31xf32>, vector<2x1x1xf32> -> vector<2x1x38xf32>
    %155 = arith.addf %150, %154 : vector<2x1x38xf32>
    %156 = vector.extract_strided_slice %20 {offsets = [0, 27, 0], sizes = [2, 1, 31], strides = [1, 1, 1]} : vector<2x28x31xf32> to vector<2x1x31xf32>
    %cst_76 = arith.constant 0.000000e+00 : f32
    %157 = vector.broadcast %cst_76 : f32 to vector<2x1x7xf32>
    %158 = tpu.concatenate %157, %156 in 2 : vector<2x1x7xf32>, vector<2x1x31xf32> -> vector<2x1x38xf32>
    %159 = arith.addf %155, %158 : vector<2x1x38xf32>
    %c0_77 = arith.constant 0 : index
    %c1_78 = arith.constant 1 : index
    %c0_79 = arith.constant 0 : index
    %160 = vector.load %arg8[%c0_77, %c1_78, %c0_79] : memref<2x2x38xf32, #tpu.memory_space<vmem>>, vector<2x1x38xf32>
    tpu.vector_store %arg8[%c0_77, %c1_78, %c0_79], %159 {strides = array<i32>} : memref<2x2x38xf32, #tpu.memory_space<vmem>>, vector<2x1x38xf32>,
    return
  }
  func.func @transform_0(%arg0: i32) -> (i32, i32, i32) {
    %c0_i32 = arith.constant 0 : i32
    %c0_i32_0 = arith.constant 0 : i32
    %c0_i32_1 = arith.constant 0 : i32
    return %arg0, %c0_i32, %c0_i32_0 : i32, i32, i32
  }
  func.func @transform_1(%arg0: i32) -> (i32, i32, i32) {
    %c0_i32 = arith.constant 0 : i32
    %c0_i32_0 = arith.constant 0 : i32
    %c0_i32_1 = arith.constant 0 : i32
    return %arg0, %c0_i32, %c0_i32_0 : i32, i32, i32
  }
  func.func @transform_2(%arg0: i32) -> (i32, i32) {
    %c0_i32 = arith.constant 0 : i32
    %c0_i32_0 = arith.constant 0 : i32
    %c0_i32_1 = arith.constant 0 : i32
    return %c0_i32, %c0_i32_0 : i32, i32
  }
  func.func @transform_3(%arg0: i32) -> (i32, i32) {
    %c0_i32 = arith.constant 0 : i32
    %c0_i32_0 = arith.constant 0 : i32
    %c0_i32_1 = arith.constant 0 : i32
    return %c0_i32, %c0_i32_0 : i32, i32
  }
  func.func @transform_4(%arg0: i32) -> (i32, i32) {
    %c0_i32 = arith.constant 0 : i32
    %c0_i32_0 = arith.constant 0 : i32
    %c0_i32_1 = arith.constant 0 : i32
    return %c0_i32, %c0_i32_0 : i32, i32
  }
  func.func @transform_5(%arg0: i32) -> (i32, i32, i32) {
    %c0_i32 = arith.constant 0 : i32
    %c0_i32_0 = arith.constant 0 : i32
    %c0_i32_1 = arith.constant 0 : i32
    return %arg0, %c0_i32, %c0_i32_0 : i32, i32, i32
  }
  func.func @transform_6(%arg0: i32) -> (i32, i32, i32) {
    %c0_i32 = arith.constant 0 : i32
    %c0_i32_0 = arith.constant 0 : i32
    %c0_i32_1 = arith.constant 0 : i32
    return %arg0, %c0_i32, %c0_i32_0 : i32, i32, i32
  }
  func.func @transform_7(%arg0: i32) -> (i32, i32, i32) {
    %c0_i32 = arith.constant 0 : i32
    %c0_i32_0 = arith.constant 0 : i32
    %c0_i32_1 = arith.constant 0 : i32
    return %arg0, %c0_i32, %c0_i32_0 : i32, i32, i32
  }
}

</mosaic_0001>

<bundles_post_ra>
// kernel: spex_plus_forward.6
= control target key start
LH: loop header
LB: loop body
LE: loop exit
PB: predicated region body
PF: predicated region fallthrough
CT: control target
= control target key end

     0   :  { %s1155_s29 = smov 126   ;;  %s1156_s30 = smov 127   ;;  %vm31_vm0 = vcmask 245760   ;;  %vm34_vm1 = vcmask 246785   ;;  %s1559_s0 = inlined_call_operand.vmem [shape: f32[2,2,38], index: 0, kind: input, shape index: {}]   ;;  %s1560_s1 = inlined_call_operand.vmem [shape: f32[48,16], index: 1, kind: input, shape index: {}]   ;;  %s1561_s2 = inlined_call_operand.vmem [shape: f32[48,1], index: 2, kind: input, shape index: {}]   ;;  %s1562_s3 = inlined_call_operand.vmem [shape: f32[48,1], index: 3, kind: input, shape index: {}]   ;;  %s1563_s4 = inlined_call_operand.vmem [shape: f32[48,1], index: 4, kind: input, shape index: {}]   ;;  %s1564_s5 = inlined_call_operand.vmem [shape: f32[32,48], index: 5, kind: input, shape index: {}]   ;;  %s1565_s6 = inlined_call_operand.vmem [shape: f32[32,1], index: 6, kind: input, shape index: {}]   ;;  %s1566_s7 = inlined_call_operand.hbm [shape: bf16[2,48,31], index: 7, kind: output, shape index: {0}]   ;;  %s1567_s8 = inlined_call_operand.vmem [shape: bf16[2,32,31], index: 8, kind: output, shape index: {1}]  }
   0x1   :  { %v29_v0 = vld [vmem:[%s1559_s0] sm:$0x3]  ;;  %v30_v1 = vld [vmem:[%s1559_s0 + $0x2] sm:$0x3] }
   0x2   :  { %49 = vrot.lane.b32.xlu1 %v29_v0, %s1155_s29  ;;  %39 = vrot.lane.b32.xlu0 %v29_v0, %s1156_s30 }
   0x3   :  { %14 = vsyncpa [#allocation4], 0  ;;  %32 = vst.msk [vmem:[#allocation2] sm:$0x1] %vm31_vm0, %v29_v0  ;;  %s1157_s11 = smov 125   ;;  %s1158_s12 = smov 124  }
   0x4   :  { %33 = vst.msk [vmem:[#allocation2 + $0x10] sm:$0x1] %vm31_vm0, %v30_v1  ;;  %s1159_s0 = smov 123   ;;  %s1160_s13 = smov 122   ;;  %v109_v2 = vld [vmem:[%s1560_s1] sm:$0xff]  ;;  %vm155_vm2 = vcmask 130048  }
   0x5   :  { %35 = vst.msk [vmem:[#allocation2] sm:$0x2] %vm34_vm1, %v29_v0  ;;  %36 = vst.msk [vmem:[#allocation2 + $0x10] sm:$0x2] %vm34_vm1, %v30_v1  ;;  %1024 = vmatprep.mubr.msk.f32.mxu0 %vm155_vm2, %v109_v2  ;;  %1037 = vmatprep.mubr.msk.f32.mxu1 %vm155_vm2, %v109_v2  ;;  %s1161_s16 = smov 121   ;;  %v120_v3 = vld [vmem:[%s1561_s2 + $0x8] sm:$0xff] }
   0x6   :  { %51 = vrot.lane.b32.xlu1 %v30_v1, %s1155_s29  ;;  %41 = vrot.lane.b32.xlu0 %v30_v1, %s1156_s30  ;;  %v119_v4 = vld [vmem:[%s1561_s2] sm:$0xff]  ;;  %v1162_v5 = vmov 0   ;;  %v121_v6 = vld [vmem:[%s1561_s2 + $0x10] sm:$0xff]  ;;  %vm681_vm3 = vcmask 392192   ;;  %vm437_vm4 = vcmask 252928   ;;  %vm424_vm5 = vcmask 248832  }
   0x7   :  { %1126 = vset.pattern.permute.xlu1 %v1162_v5  ;;  %1125 = vset.pattern.permute.xlu0 %v1162_v5  ;;  %v122_v7 = vld [vmem:[%s1561_s2 + $0x18] sm:$0xff]  ;;  %v123_v8 = vld [vmem:[%s1561_s2 + $0x20] sm:$0xff]  ;;  %v124_v9 = vld [vmem:[%s1561_s2 + $0x28] sm:$0xff]  ;;  %s1163_s27 = smov [#allocation3]  }
   0x8   :  { %v557_v10 = vld [vmem:[%s1562_s3] sm:$0xff]  ;;  %v558_v11 = vld [vmem:[%s1562_s3 + $0x8] sm:$0xff]  ;;  %v559_v14 = vld [vmem:[%s1562_s3 + $0x10] sm:$0xff]  ;;  %s909_s28 = sshll.u32 %s1163_s27, 4  ;;  %s910_s28 = int_to_ptr.vmem [resolvable:$true] %s909_s28 }
   0x9   :  { %v605_v12 = vld [vmem:[%s1563_s4] sm:$0xff]  ;;  %v606_v13 = vld [vmem:[%s1563_s4 + $0x8] sm:$0xff]  ;;  %v560_v15 = vld [vmem:[%s1562_s3 + $0x18] sm:$0xff]  ;;  %s1131_s29 = scalar_lea.vmem %s910_s28, 768  ;;  %p1136_p1 = scmp.lt.s32.totalorder %s910_s28, %s910_s28 }
   0xa   :  { %61 = vrot.lane.b32.xlu1 %v30_v1, %s1157_s11  ;;  %59 = vrot.lane.b32.xlu0 %v29_v0, %s1157_s11  ;;  %v607_v16 = vld [vmem:[%s1563_s4 + $0x10] sm:$0xff]  ;;  %v608_v17 = vld [vmem:[%s1563_s4 + $0x18] sm:$0xff]  ;;  %p1132_p0 = scmp.ne.s32.totalorder %s910_s28, %s1131_s29  ;;  %p1137_p2 = scmp.lt.s32.totalorder %s1131_s29, %s1131_s29 }
   0xb   :  { %v561_v18 = vld [vmem:[%s1562_s3 + $0x20] sm:$0xff]  ;;  %v562_v19 = vld [vmem:[%s1562_s3 + $0x28] sm:$0xff]  ;;  %v659_v24 = vld [vmem:[%s1565_s6 + $0x10] sm:$0xff] }
   0xc   :  { %v609_v20 = vld [vmem:[%s1563_s4 + $0x20] sm:$0xff]  ;;  %v610_v21 = vld [vmem:[%s1563_s4 + $0x28] sm:$0xff]  ;;  %v660_v25 = vld [vmem:[%s1565_s6 + $0x18] sm:$0xff]  ;;  %p1138_p3 = por %p1137_p2, %p1136_p1 }
   0xd   :  { %v657_v22 = vld [vmem:[%s1565_s6] sm:$0xff]  ;;  %v658_v23 = vld [vmem:[%s1565_s6 + $0x8] sm:$0xff]  ;;  %v111_v47 = vld [vmem:[%s1560_s1 + $0x10] sm:$0xff] }
   0xe   :  { %71 = vrot.lane.b32.xlu1 %v30_v1, %s1158_s12  ;;  %69 = vrot.lane.b32.xlu0 %v29_v0, %s1158_s12  ;;  %v110_v46 = vld [vmem:[%s1560_s1 + $0x8] sm:$0xff]  ;;  %v112_v48 = vld [vmem:[%s1560_s1 + $0x18] sm:$0xff]  ;;  %p1139_p4 = pnand %p1138_p3, %p1132_p0 }
   0xf   :  { %v113_v49 = vld [vmem:[%s1560_s1 + $0x20] sm:$0xff]  ;;  %v114_v50 = vld [vmem:[%s1560_s1 + $0x28] sm:$0xff] }
  0x10   :  { %v653_v51 = vld [vmem:[%s1564_s5] sm:$0xff] }
  0x12   :  { %81 = vrot.lane.b32.xlu1 %v30_v1, %s1159_s0  ;;  %79 = vrot.lane.b32.xlu0 %v29_v0, %s1159_s0 }
  0x16   :  { %91 = vrot.lane.b32.xlu1 %v30_v1, %s1160_s13  ;;  %89 = vrot.lane.b32.xlu0 %v29_v0, %s1160_s13 }
  0x1a   :  { %101 = vrot.lane.b32.xlu1 %v30_v1, %s1161_s16  ;;  %99 = vrot.lane.b32.xlu0 %v29_v0, %s1161_s16 }
  0x1e   :  { %132 = vperm.xlu1 %1126, %v120_v3   ;;  %127 = vperm.xlu0 %1125, %v119_v4  }
  0x22   :  { %137 = vperm.xlu1 %1126, %v121_v6   ;;  %142 = vperm.xlu0 %1125, %v122_v7  }
  0x26   :  { %147 = vperm.xlu1 %1126, %v123_v8   ;;  %152 = vperm.xlu0 %1125, %v124_v9  }
  0x2a   :  { %565 = vperm.xlu1 %1126, %v557_v10   ;;  %570 = vperm.xlu0 %1125, %v558_v11  }
  0x2e   :  { %613 = vperm.xlu1 %1126, %v605_v12   ;;  %618 = vperm.xlu0 %1125, %v606_v13  }
  0x32   :  { %575 = vperm.xlu1 %1126, %v559_v14   ;;  %580 = vperm.xlu0 %1125, %v560_v15  }
  0x36   :  { %623 = vperm.xlu1 %1126, %v607_v16   ;;  %628 = vperm.xlu0 %1125, %v608_v17  }
  0x3a   :  { %585 = vperm.xlu1 %1126, %v561_v18   ;;  %590 = vperm.xlu0 %1125, %v562_v19  }
  0x3e   :  { %633 = vperm.xlu1 %1126, %v609_v20   ;;  %638 = vperm.xlu0 %1125, %v610_v21  }
  0x42   :  { %663 = vperm.xlu1 %1126, %v657_v22   ;;  %668 = vperm.xlu0 %1125, %v658_v23  }
  0x46   :  { %673 = vperm.xlu1 %1126, %v659_v24   ;;  %678 = vperm.xlu0 %1125, %v660_v25  }
  0x74   :  { %v50_v26 = vpop.permute.xlu1 %49  ;;  %v40_v27 = vpop.permute.xlu0 %39 }
  0x75   :  { %55 = vst.msk [vmem:[#allocation2 + $0x4] sm:$0x1] %vm31_vm0, %v50_v26  ;;  %45 = vst.msk [vmem:[#allocation2 + $0x2] sm:$0x1] %vm31_vm0, %v40_v27 }
  0x76   :  { %57 = vst.msk [vmem:[#allocation2 + $0x4] sm:$0x2] %vm34_vm1, %v50_v26  ;;  %47 = vst.msk [vmem:[#allocation2 + $0x2] sm:$0x2] %vm34_vm1, %v40_v27 }
  0x78   :  { %v52_v28 = vpop.permute.xlu1 %51  ;;  %v42_v29 = vpop.permute.xlu0 %41 }
  0x79   :  { %56 = vst.msk [vmem:[#allocation2 + $0x14] sm:$0x1] %vm31_vm0, %v52_v28  ;;  %46 = vst.msk [vmem:[#allocation2 + $0x12] sm:$0x1] %vm31_vm0, %v42_v29 }
  0x7a   :  { %58 = vst.msk [vmem:[#allocation2 + $0x14] sm:$0x2] %vm34_vm1, %v52_v28  ;;  %48 = vst.msk [vmem:[#allocation2 + $0x12] sm:$0x2] %vm34_vm1, %v42_v29 }
  0x7c   :  { %v62_v30 = vpop.permute.xlu1 %61  ;;  %v60_v31 = vpop.permute.xlu0 %59 }
  0x7d   :  { %66 = vst.msk [vmem:[#allocation2 + $0x16] sm:$0x1] %vm31_vm0, %v62_v30  ;;  %65 = vst.msk [vmem:[#allocation2 + $0x6] sm:$0x1] %vm31_vm0, %v60_v31 }
  0x7e   :  { %68 = vst.msk [vmem:[#allocation2 + $0x16] sm:$0x2] %vm34_vm1, %v62_v30  ;;  %67 = vst.msk [vmem:[#allocation2 + $0x6] sm:$0x2] %vm34_vm1, %v60_v31 }
  0x80   :  { %v72_v32 = vpop.permute.xlu1 %71  ;;  %v70_v33 = vpop.permute.xlu0 %69 }
  0x81   :  { %76 = vst.msk [vmem:[#allocation2 + $0x18] sm:$0x1] %vm31_vm0, %v72_v32  ;;  %75 = vst.msk [vmem:[#allocation2 + $0x8] sm:$0x1] %vm31_vm0, %v70_v33 }
  0x82   :  { %78 = vst.msk [vmem:[#allocation2 + $0x18] sm:$0x2] %vm34_vm1, %v72_v32  ;;  %77 = vst.msk [vmem:[#allocation2 + $0x8] sm:$0x2] %vm34_vm1, %v70_v33 }
  0x84   :  { %v82_v34 = vpop.permute.xlu1 %81  ;;  %v80_v35 = vpop.permute.xlu0 %79 }
  0x85   :  { %86 = vst.msk [vmem:[#allocation2 + $0x1a] sm:$0x1] %vm31_vm0, %v82_v34  ;;  %85 = vst.msk [vmem:[#allocation2 + $0xa] sm:$0x1] %vm31_vm0, %v80_v35  ;;  %v115_v40 = vld [vmem:[#allocation2] sm:$0xff]  ;;  %v117_v42 = vld [vmem:[#allocation2 + $0x10] sm:$0xff] }
  0x86   :  { %88 = vst.msk [vmem:[#allocation2 + $0x1a] sm:$0x2] %vm34_vm1, %v82_v34  ;;  %87 = vst.msk [vmem:[#allocation2 + $0xa] sm:$0x2] %vm34_vm1, %v80_v35 }
  0x88   :  { %v92_v36 = vpop.permute.xlu1 %91  ;;  %v90_v37 = vpop.permute.xlu0 %89 }
  0x89   :  { %96 = vst.msk [vmem:[#allocation2 + $0x1c] sm:$0x1] %vm31_vm0, %v92_v36  ;;  %95 = vst.msk [vmem:[#allocation2 + $0xc] sm:$0x1] %vm31_vm0, %v90_v37 }
  0x8a   :  { %98 = vst.msk [vmem:[#allocation2 + $0x1c] sm:$0x2] %vm34_vm1, %v92_v36  ;;  %97 = vst.msk [vmem:[#allocation2 + $0xc] sm:$0x2] %vm34_vm1, %v90_v37 }
  0x8c   :  { %v102_v38 = vpop.permute.xlu1 %101  ;;  %v100_v39 = vpop.permute.xlu0 %99 }
  0x8d   :  { %106 = vst.msk [vmem:[#allocation2 + $0x1e] sm:$0x1] %vm31_vm0, %v102_v38  ;;  %105 = vst.msk [vmem:[#allocation2 + $0xe] sm:$0x1] %vm31_vm0, %v100_v39 }
  0x8e   :  { %108 = vst.msk [vmem:[#allocation2 + $0x1e] sm:$0x2] %vm34_vm1, %v102_v38  ;;  %107 = vst.msk [vmem:[#allocation2 + $0xe] sm:$0x2] %vm34_vm1, %v100_v39 }
  0x95   :  { %v116_v41 = vld [vmem:[#allocation2 + $0x8] sm:$0xff]  ;;  %v118_v43 = vld [vmem:[#allocation2 + $0x18] sm:$0xff] }
  0x96   :  { %v1082_v44 = vpack.c.bf16 %v116_v41, %v115_v40  ;;  %v1086_v45 = vpack.c.bf16 %v118_v43, %v117_v42 }
  0x98   :  { %1083 = vmatprep.subr.bf16.mxu0 %v1082_v44  ;;  %1087 = vmatprep.subr.bf16.mxu1 %v1086_v45 }
  0x99   :  { %1085 = vmatpush3.bf16.msra.mxu0 %v1082_v44  ;;  %1089 = vmatpush3.bf16.msra.mxu1 %v1086_v45 }
  0x9c   :  { %1025 = vmatmul.mubr.msk.f32.vlgmr.msra.gmra.mrb[0].mxu0 %vm155_vm2, %v110_v46  ;;  %1038 = vmatmul.mubr.msk.f32.vlgmr.msra.gmra.mrb[0].mxu1 %vm155_vm2, %v110_v46 }
  0x9d   :  { %1027 = vmatprep.mubr.msk.f32.mxu0 %vm155_vm2, %v111_v47  ;;  %1040 = vmatprep.mubr.msk.f32.mxu1 %vm155_vm2, %v111_v47  ;;  %v128_v52 = vpop.permute.xlu0 %127  ;;  %v133_v53 = vpop.permute.xlu1 %132 }
  0xa0   :  { %1028 = vmatmul.mubr.msk.f32.gmra.mrb[2].mxu0 %vm155_vm2, %v112_v48  ;;  %1041 = vmatmul.mubr.msk.f32.gmra.mrb[2].mxu1 %vm155_vm2, %v112_v48 }
  0xa1   :  { %1030 = vmatprep.mubr.msk.f32.mxu0 %vm155_vm2, %v113_v49  ;;  %1043 = vmatprep.mubr.msk.f32.mxu1 %vm155_vm2, %v113_v49  ;;  %v143_v62 = vpop.permute.xlu0 %142  ;;  %v138_v15 = vpop.permute.xlu1 %137 }
  0xa4   :  { %1031 = vmatmul.mubr.msk.f32.gmra.mrb[4].mxu0 %vm155_vm2, %v114_v50  ;;  %1044 = vmatmul.mubr.msk.f32.gmra.mrb[4].mxu1 %vm155_vm2, %v114_v50 }
  0xa5   :  { %1058 = vmatprep.mubr.msk.f32.mxu0 %vm681_vm3, %v653_v51  ;;  %1076 = vmatprep.mubr.msk.f32.mxu1 %vm681_vm3, %v653_v51  ;;  %v153_v36 = vpop.permute.xlu0 %152 }
 0x16f   :  { %v1026_v54 = vpop.f32.mrb[0].mxu0  ;;  %v1039_v55 = vpop.f32.mrb[0].mxu1 }
 0x170   :  { %v246_v56 = vadd.f32 %v1026_v54, %v133_v53  ;;  %v341_v57 = vadd.f32 %v1039_v55, %v133_v53  ;;  %v240_v58 = vpop.f32.mrb[1].mxu0  ;;  %v335_v59 = vpop.f32.mrb[1].mxu1 }
 0x171   :  { %v241_v60 = vadd.f32 %v240_v58, %v128_v52  ;;  %v336_v61 = vadd.f32 %v335_v59, %v128_v52  ;;  %v148_v55 = vpop.permute.xlu1 %147 }
 0x172   :  { %v1350_v63 = vmax.f32 %v246_v56, 0.0  ;;  %v1352_v0 = vmax.f32 %v341_v57, 0.0 }
 0x173   :  { %v1354_v1 = vmax.f32 %v241_v60, 0.0  ;;  %v1356_v2 = vmax.f32 %v336_v61, 0.0  ;;  %v1029_v3 = vpop.f32.mrb[2].mxu0  ;;  %v1042_v4 = vpop.f32.mrb[2].mxu1 }
 0x174   :  { %v965_v5 = vpack.c.bf16 %v1350_v63, %v1350_v63  ;;  %v439_v6 = vsel %vm437_vm4, %v1350_v63, 0.0  ;;  %v476_v7 = vmul.f32 %v1350_v63, %v1350_v63  ;;  %v971_v8 = vpack.c.bf16 %v1352_v0, %v1352_v0  ;;  %v250_v9 = vpop.f32.mrb[3].mxu0  ;;  %v345_v10 = vpop.f32.mrb[3].mxu1 }
 0x175   :  { %v456_v11 = vsel %vm437_vm4, %v1352_v0, 0.0  ;;  %v482_v12 = vmul.f32 %v1352_v0, %v1352_v0  ;;  %v964_v13 = vpack.c.bf16 %v1354_v1, %v1354_v1  ;;  %v438_v14 = vsel %vm437_vm4, %v1354_v1, 0.0 }
 0x176   :  { %426 = vst.msk [vmem:[#allocation3 + $0x4] sm:$0xf] %vm424_vm5, %v965_v5  ;;  %v488_v16 = vsel %vm437_vm4, %v476_v7, 0.0  ;;  %432 = vst.msk [vmem:[#allocation3 + $0x1c] sm:$0xf] %vm424_vm5, %v971_v8  ;;  %v440_v17 = vadd.f32 %v439_v6, %v438_v14  ;;  %v475_v18 = vmul.f32 %v1354_v1, %v1354_v1  ;;  %v970_v19 = vpack.c.bf16 %v1356_v2, %v1356_v2 }
 0x177   :  { %v505_v20 = vsel %vm437_vm4, %v482_v12, 0.0  ;;  %425 = vst.msk [vmem:[#allocation3] sm:$0xf] %vm424_vm5, %v964_v13  ;;  %v455_v21 = vsel %vm437_vm4, %v1356_v2, 0.0  ;;  %v481_v22 = vmul.f32 %v1356_v2, %v1356_v2  ;;  %v256_v23 = vadd.f32 %v1029_v3, %v143_v62  ;;  %v1032_v24 = vpop.f32.mrb[4].mxu0  ;;  %v1045_v25 = vpop.f32.mrb[4].mxu1 }
 0x178   :  { %v487_v26 = vsel %vm437_vm4, %v475_v18, 0.0  ;;  %431 = vst.msk [vmem:[#allocation3 + $0x18] sm:$0xf] %vm424_vm5, %v970_v19  ;;  %v457_v27 = vadd.f32 %v456_v11, %v455_v21  ;;  %v351_v28 = vadd.f32 %v1042_v4, %v143_v62  ;;  %v251_v29 = vadd.f32 %v250_v9, %v138_v15  ;;  %v260_v30 = vpop.f32.mrb[5].mxu0  ;;  %v355_v31 = vpop.f32.mrb[5].mxu1 }
 0x179   :  { %v489_v32 = vadd.f32 %v488_v16, %v487_v26  ;;  %v504_v33 = vsel %vm437_vm4, %v481_v22, 0.0  ;;  %v1390_v34 = vmax.f32 %v256_v23, 0.0  ;;  %v346_v35 = vadd.f32 %v345_v10, %v138_v15 }
 0x17a   :  { %v506_v37 = vadd.f32 %v505_v20, %v504_v33  ;;  %v1392_v38 = vmax.f32 %v351_v28, 0.0  ;;  %v1394_v39 = vmax.f32 %v251_v29, 0.0  ;;  %v266_v42 = vadd.f32 %v1032_v24, %v153_v36 }
 0x17b   :  { %v967_v40 = vpack.c.bf16 %v1390_v34, %v1390_v34  ;;  %v1398_v41 = vmax.f32 %v346_v35, 0.0  ;;  %v443_v43 = vsel %vm437_vm4, %v1390_v34, 0.0  ;;  %v478_v44 = vmul.f32 %v1390_v34, %v1390_v34 }
 0x17c   :  { %v973_v45 = vpack.c.bf16 %v1392_v38, %v1392_v38  ;;  %v966_v46 = vpack.c.bf16 %v1394_v39, %v1394_v39  ;;  %v484_v47 = vmul.f32 %v1392_v38, %v1392_v38  ;;  %v441_v48 = vsel %vm437_vm4, %v1394_v39, 0.0 }
 0x17d   :  { %428 = vst.msk [vmem:[#allocation3 + $0xc] sm:$0xf] %vm424_vm5, %v967_v40  ;;  %v477_v49 = vmul.f32 %v1394_v39, %v1394_v39  ;;  %v972_v50 = vpack.c.bf16 %v1398_v41, %v1398_v41  ;;  %v460_v51 = vsel %vm437_vm4, %v1392_v38, 0.0  ;;  %v442_v52 = vadd.f32 %v441_v48, %v440_v17 }
 0x17e   :  { %434 = vst.msk [vmem:[#allocation3 + $0x24] sm:$0xf] %vm424_vm5, %v973_v45  ;;  %427 = vst.msk [vmem:[#allocation3 + $0x8] sm:$0xf] %vm424_vm5, %v966_v46  ;;  %v458_v53 = vsel %vm437_vm4, %v1398_v41, 0.0  ;;  %v483_v54 = vmul.f32 %v1398_v41, %v1398_v41  ;;  %v1427_v58 = vmax.f32 %v266_v42, 0.0  ;;  %v361_v59 = vadd.f32 %v1045_v25, %v153_v36 }
 0x17f   :  { %v490_v56 = vsel %vm437_vm4, %v477_v49, 0.0  ;;  %433 = vst.msk [vmem:[#allocation3 + $0x20] sm:$0xf] %vm424_vm5, %v972_v50  ;;  %v459_v57 = vadd.f32 %v458_v53, %v457_v27  ;;  %v261_v62 = vadd.f32 %v260_v30, %v148_v55  ;;  %v444_v3 = vadd.f32 %v443_v43, %v442_v52 }
 0x180   :  { %v491_v60 = vadd.f32 %v490_v56, %v489_v32  ;;  %v507_v61 = vsel %vm437_vm4, %v483_v54, 0.0  ;;  %v492_v4 = vsel %vm437_vm4, %v478_v44, 0.0  ;;  %v509_v5 = vsel %vm437_vm4, %v484_v47, 0.0 }
 0x181   :  { %v508_v6 = vadd.f32 %v507_v61, %v506_v37  ;;  %v969_v7 = vpack.c.bf16 %v1427_v58, %v1427_v58  ;;  %v1434_v8 = vmax.f32 %v361_v59, 0.0  ;;  %v1436_v9 = vmax.f32 %v261_v62, 0.0  ;;  %v1470_v59 = vpop.permute.xlu1 %565 }
 0x182   :  { %v493_v10 = vadd.f32 %v492_v4, %v491_v60  ;;  %v356_v11 = vadd.f32 %v355_v31, %v148_v55  ;;  %v461_v12 = vadd.f32 %v460_v51, %v459_v57  ;;  %v480_v16 = vmul.f32 %v1427_v58, %v1427_v58  ;;  %v1472_v60 = vpop.permute.xlu0 %570 }
 0x183   :  { %430 = vst.msk [vmem:[#allocation3 + $0x14] sm:$0xf] %vm424_vm5, %v969_v7  ;;  %v510_v13 = vadd.f32 %v509_v5, %v508_v6  ;;  %v975_v14 = vpack.c.bf16 %v1434_v8, %v1434_v8  ;;  %v968_v15 = vpack.c.bf16 %v1436_v9, %v1436_v9  ;;  %v445_v17 = vsel %vm437_vm4, %v1436_v9, 0.0 }
 0x184   :  { %v479_v18 = vmul.f32 %v1436_v9, %v1436_v9  ;;  %v1449_v19 = vmax.f32 %v356_v11, 0.0  ;;  %v447_v20 = vsel %vm437_vm4, %v1427_v58, 0.0  ;;  %v486_v21 = vmul.f32 %v1434_v8, %v1434_v8 }
 0x185   :  { %436 = vst.msk [vmem:[#allocation3 + $0x2c] sm:$0xf] %vm424_vm5, %v975_v14  ;;  %429 = vst.msk [vmem:[#allocation3 + $0x10] sm:$0xf] %vm424_vm5, %v968_v15  ;;  %v446_v22 = vadd.f32 %v445_v17, %v444_v3  ;;  %v496_v30 = vsel %vm437_vm4, %v480_v16, 0.0  ;;  %v464_v31 = vsel %vm437_vm4, %v1434_v8, 0.0 }
 0x186   :  { %v494_v23 = vsel %vm437_vm4, %v479_v18, 0.0  ;;  %v974_v24 = vpack.c.bf16 %v1449_v19, %v1449_v19  ;;  %v462_v25 = vsel %vm437_vm4, %v1449_v19, 0.0  ;;  %v485_v26 = vmul.f32 %v1449_v19, %v1449_v19 }
 0x187   :  { %v448_v27 = vadd.f32 %v447_v20, %v446_v22  ;;  %v495_v28 = vadd.f32 %v494_v23, %v493_v10  ;;  %v463_v29 = vadd.f32 %v462_v25, %v461_v12  ;;  %v513_v40 = vsel %vm437_vm4, %v486_v21, 0.0  ;;  %v614_v20 = vpop.permute.xlu1 %613  ;;  %v619_v21 = vpop.permute.xlu0 %618 }
 0x188   :  { %435 = vst.msk [vmem:[#allocation3 + $0x28] sm:$0xf] %vm424_vm5, %v974_v24  ;;  %v511_v32 = vsel %vm437_vm4, %v485_v26, 0.0 }
 0x189   :  { %v449_v33 = vrot.slane %v448_v27, 4  ;;  %v497_v35 = vadd.f32 %v496_v30, %v495_v28  ;;  %v465_v36 = vadd.f32 %v464_v31, %v463_v29  ;;  %v512_v37 = vadd.f32 %v511_v32, %v510_v13 }
 0x18b   :  { %v450_v42 = vadd.f32 %v449_v33, %v448_v27  ;;  %v498_v43 = vrot.slane %v497_v35, 4  ;;  %v466_v44 = vrot.slane %v465_v36, 4  ;;  %v514_v45 = vadd.f32 %v513_v40, %v512_v37  ;;  %v576_v31 = vpop.permute.xlu1 %575  ;;  %v581_v32 = vpop.permute.xlu0 %580 }
 0x18d   :  { %v451_v46 = vrot.slane %v450_v42, 2  ;;  %v499_v47 = vadd.f32 %v498_v43, %v497_v35  ;;  %v467_v48 = vadd.f32 %v466_v44, %v465_v36  ;;  %v515_v49 = vrot.slane %v514_v45, 4 }
 0x18f   :  { %v452_v50 = vadd.f32 %v451_v46, %v450_v42  ;;  %v500_v51 = vrot.slane %v499_v47, 2  ;;  %v468_v52 = vrot.slane %v467_v48, 2  ;;  %v516_v53 = vadd.f32 %v515_v49, %v514_v45  ;;  %v629_v33 = vpop.permute.xlu0 %628 }
 0x191   :  { %v453_v54 = vrot.slane %v452_v50, 1  ;;  %v501_v55 = vadd.f32 %v500_v51, %v499_v47  ;;  %v469_v56 = vadd.f32 %v468_v52, %v467_v48  ;;  %v517_v57 = vrot.slane %v516_v53, 2 }
 0x193   :  { %v454_v61 = vadd.f32 %v453_v54, %v452_v50  ;;  %v502_v62 = vrot.slane %v501_v55, 1  ;;  %v470_v3 = vrot.slane %v469_v56, 1  ;;  %v518_v4 = vadd.f32 %v517_v57, %v516_v53 }
 0x195   :  { %v473_v5 = vmul.f32 0.020833334, %v454_v61  ;;  %v503_v6 = vadd.f32 %v502_v62, %v501_v55  ;;  %v471_v7 = vadd.f32 %v470_v3, %v469_v56  ;;  %v519_v10 = vrot.slane %v518_v4, 1 }
 0x197   :  { %v521_v11 = vmul.f32 0.020833334, %v503_v6  ;;  %v523_v12 = vmul.f32 %v473_v5, %v473_v5  ;;  %v533_v13 = vsub.f32 %v1436_v9, %v473_v5  ;;  %v1475_v14 = vmul.f32 0.020833334, %v471_v7 }
 0x198   :  { %v520_v15 = vadd.f32 %v519_v10, %v518_v4  ;;  %v529_v16 = vsub.f32 %v1354_v1, %v473_v5  ;;  %v530_v17 = vsub.f32 %v1350_v63, %v473_v5  ;;  %v531_v18 = vsub.f32 %v1394_v39, %v473_v5 }
 0x199   :  { %v525_v22 = vsub.f32 %v521_v11, %v523_v12  ;;  %v524_v23 = vmul.f32 %v1475_v14, %v1475_v14  ;;  %v539_v24 = vsub.f32 %v1449_v19, %v1475_v14  ;;  %v535_v9 = vsub.f32 %v1356_v2, %v1475_v14 }
 0x19a   :  { %v522_v25 = vmul.f32 0.020833334, %v520_v15  ;;  %v536_v1 = vsub.f32 %v1352_v0, %v1475_v14  ;;  %v532_v63 = vsub.f32 %v1390_v34, %v473_v5  ;;  %v537_v39 = vsub.f32 %v1398_v41, %v1475_v14  ;;  %v624_v34 = vpop.permute.xlu1 %623 }
 0x19b   :  { %v527_v26 = vmax.f32 %v525_v22, 0.0  ;;  %v538_v27 = vsub.f32 %v1392_v38, %v1475_v14  ;;  %v534_v28 = vsub.f32 %v1427_v58, %v473_v5  ;;  %v540_v19 = vsub.f32 %v1434_v8, %v1475_v14  ;;  %v591_v58 = vpop.permute.xlu0 %590 }
 0x19c   :  { %v526_v29 = vsub.f32 %v522_v25, %v524_v23 }
 0x19d   :  { %v541_v2 = vadd.f32 1e-05, %v527_v26 }
 0x19e   :  { %v528_v30 = vmax.f32 %v526_v29, 0.0  ;;  %v586_v40 = vpop.permute.xlu1 %585 }
 0x19f   :  { %1127 = vrsqrt.f32 %v541_v2  ;;  %v639_v10 = vpop.permute.xlu0 %638 }
 0x1a0   :  { %v542_v0 = vadd.f32 1e-05, %v528_v30 }
 0x1a2   :  { %1129 = vrsqrt.f32 %v542_v0  ;;  %v634_v7 = vpop.permute.xlu1 %633 }
 0x1a9   :  { %v1128_v41 = vpop.eup %1127 }
 0x1aa   :  { %v545_v35 = vmul.f32 %v1128_v41, %v529_v16  ;;  %v546_v36 = vmul.f32 %v1128_v41, %v530_v17  ;;  %v547_v37 = vmul.f32 %v1128_v41, %v531_v18  ;;  %v548_v38 = vmul.f32 %v1128_v41, %v532_v63  ;;  %v656_v63 = vld [vmem:[%s1564_s5 + $0x18] sm:$0xff] }
 0x1ab   :  { %v549_v42 = vmul.f32 %v1128_v41, %v533_v13  ;;  %v550_v43 = vmul.f32 %v1128_v41, %v534_v28 }
 0x1ac   :  { %v1130_v8 = vpop.eup %1129  ;;  %v593_v44 = vmul.f32 %v1470_v59, %v545_v35  ;;  %v594_v45 = vmul.f32 %v1472_v60, %v546_v36  ;;  %v595_v46 = vmul.f32 %v576_v31, %v547_v37  ;;  %v596_v47 = vmul.f32 %v581_v32, %v548_v38 }
 0x1ad   :  { %v551_v48 = vmul.f32 %v1130_v8, %v535_v9  ;;  %v552_v49 = vmul.f32 %v1130_v8, %v536_v1  ;;  %v553_v50 = vmul.f32 %v1130_v8, %v537_v39  ;;  %v554_v51 = vmul.f32 %v1130_v8, %v538_v27 }
 0x1ae   :  { %v641_v52 = vadd.f32 %v614_v20, %v593_v44  ;;  %v642_v53 = vadd.f32 %v619_v21, %v594_v45  ;;  %v643_v54 = vadd.f32 %v624_v34, %v595_v46  ;;  %v644_v55 = vadd.f32 %v629_v33, %v596_v47 }
 0x1af   :  { %v599_v56 = vmul.f32 %v1470_v59, %v551_v48  ;;  %v600_v57 = vmul.f32 %v1472_v60, %v552_v49  ;;  %v601_v61 = vmul.f32 %v576_v31, %v553_v50  ;;  %v602_v62 = vmul.f32 %v581_v32, %v554_v51 }
 0x1b0   :  { %v1090_v3 = vpack.c.bf16 %v642_v53, %v641_v52  ;;  %v1094_v4 = vpack.c.bf16 %v644_v55, %v643_v54  ;;  %v597_v5 = vmul.f32 %v586_v40, %v549_v42  ;;  %v598_v6 = vmul.f32 %v591_v58, %v550_v43 }
 0x1b1   :  { %v647_v11 = vadd.f32 %v614_v20, %v599_v56  ;;  %v648_v12 = vadd.f32 %v619_v21, %v600_v57  ;;  %v649_v13 = vadd.f32 %v624_v34, %v601_v61  ;;  %v650_v14 = vadd.f32 %v629_v33, %v602_v62  ;;  %v654_v21 = vld [vmem:[%s1564_s5 + $0x8] sm:$0xff] }
 0x1b2   :  { %1091 = vmatprep.subr.bf16.mxu0 %v1090_v3  ;;  %v645_v15 = vadd.f32 %v634_v7, %v597_v5  ;;  %v646_v16 = vadd.f32 %v639_v10, %v598_v6  ;;  %v555_v17 = vmul.f32 %v1130_v8, %v539_v24  ;;  %v556_v18 = vmul.f32 %v1130_v8, %v540_v19  ;;  %v655_v24 = vld [vmem:[%s1564_s5 + $0x10] sm:$0xff] }
 0x1b3   :  { %v1102_v59 = vpack.c.bf16 %v648_v12, %v647_v11  ;;  %1093 = vmatpush3.bf16.msra.mxu0 %v1090_v3  ;;  %v1106_v60 = vpack.c.bf16 %v650_v14, %v649_v13 }
 0x1b4   :  { %1095 = vmatprep.subr.bf16.mxu0 %v1094_v4  ;;  %v1098_v22 = vpack.c.bf16 %v646_v16, %v645_v15  ;;  %v603_v23 = vmul.f32 %v586_v40, %v555_v17  ;;  %v604_v9 = vmul.f32 %v591_v58, %v556_v18 }
 0x1b5   :  { %1103 = vmatprep.subr.bf16.mxu1 %v1102_v59 }
 0x1b6   :  { %1105 = vmatpush3.bf16.msra.mxu1 %v1102_v59  ;;  %v651_v25 = vadd.f32 %v634_v7, %v603_v23  ;;  %v652_v1 = vadd.f32 %v639_v10, %v604_v9 }
 0x1b7   :  { %1107 = vmatprep.subr.bf16.mxu1 %v1106_v60  ;;  %1097 = vmatpush3.bf16.msra.mxu0 %v1094_v4 }
 0x1b8   :  { %1099 = vmatprep.subr.bf16.mxu0 %v1098_v22  ;;  %v1110_v20 = vpack.c.bf16 %v652_v1, %v651_v25 }
 0x1ba   :  { %1109 = vmatpush3.bf16.msra.mxu1 %v1106_v60 }
 0x1bb   :  { %1111 = vmatprep.subr.bf16.mxu1 %v1110_v20  ;;  %1101 = vmatpush3.bf16.msra.mxu0 %v1098_v22 }
 0x1be   :  { %1113 = vmatpush3.bf16.msra.mxu1 %v1110_v20  ;;  %1059 = vmatmul.mubr.msk.f32.vlgmr.msra.gmra.mrb[6].mxu0 %vm681_vm3, %v654_v21 }
 0x1bf   :  { %1061 = vmatprep.mubr.msk.f32.mxu0 %vm681_vm3, %v655_v24 }
 0x1c1   :  { %1077 = vmatmul.mubr.msk.f32.vlgmr.msra.gmra.mrb[6].mxu1 %vm681_vm3, %v654_v21 }
 0x1c2   :  { %1079 = vmatprep.mubr.msk.f32.mxu1 %vm681_vm3, %v655_v24  ;;  %1062 = vmatmul.mubr.msk.f32.gmra.mrb[8].mxu0 %vm681_vm3, %v656_v63 }
 0x1c5   :  { %1080 = vmatmul.mubr.msk.f32.gmra.mrb[8].mxu1 %vm681_vm3, %v656_v63 }
 0x1c6   :  { %1142 = shalt.err (!%p1139_p4)
}
 0x1c7   :  { %s1143_s9 = scalar_lea.hbm %s1566_s7, 768 }
 0x1c8   :  { %p1144_p5 = scmp.ne.s32.totalorder %s1566_s7, %s1143_s9  ;;  %p1147_p6 = scmp.lt.u32.totalorder %s1143_s9, %s1566_s7 }
 0x1ca   :  { %p1149_p7 = pnand %p1147_p6, %p1144_p5 }
 0x1cc   :  { %1152 = shalt.err (!%p1149_p7)
}
 0x1cd   :  { %s1164_s0 = smov 64   ;;  %s1165_s4 = smov 4   ;;  %v669_v39 = vpop.permute.xlu0 %668  ;;  %v664_v26 = vpop.permute.xlu1 %663 }
 0x1ce   :  { %915 = dma.vmem_to_hbm [thread:$0]  %s910_s28, 768, %s1566_s7, [#allocation4], %s1164_s0, %s1164_s0, %s1165_s4  }
 0x1d1   :  { %v679_v2 = vpop.permute.xlu0 %678  ;;  %v674_v41 = vpop.permute.xlu1 %673 }
 0x291   :  { %v1060_v27 = vpop.f32.mrb[6].mxu0 }
 0x292   :  { %v766_v28 = vadd.f32 %v1060_v27, %v669_v39  ;;  %v760_v19 = vpop.f32.mrb[7].mxu0 }
 0x293   :  { %v761_v29 = vadd.f32 %v760_v19, %v664_v26 }
 0x294   :  { %v977_v30 = vpack.c.bf16 %v766_v28, %v766_v28  ;;  %v1078_v31 = vpop.f32.mrb[6].mxu1 }
 0x295   :  { %v851_v32 = vadd.f32 %v1078_v31, %v669_v39  ;;  %v976_v0 = vpack.c.bf16 %v761_v29, %v761_v29  ;;  %v845_v34 = vpop.f32.mrb[7].mxu1  ;;  %v1063_v33 = vpop.f32.mrb[8].mxu0 }
 0x296   :  { %897 = vst.msk [vmem:[%s1567_s8 + $0x4] sm:$0xf] %vm424_vm5, %v977_v30  ;;  %v846_v35 = vadd.f32 %v845_v34, %v664_v26  ;;  %v776_v36 = vadd.f32 %v1063_v33, %v679_v2  ;;  %v770_v37 = vpop.f32.mrb[9].mxu0 }
 0x297   :  { %v981_v38 = vpack.c.bf16 %v851_v32, %v851_v32  ;;  %896 = vst.msk [vmem:[%s1567_s8] sm:$0xf] %vm424_vm5, %v976_v0  ;;  %v771_v40 = vadd.f32 %v770_v37, %v674_v41 }
 0x298   :  { %v980_v58 = vpack.c.bf16 %v846_v35, %v846_v35  ;;  %v979_v42 = vpack.c.bf16 %v776_v36, %v776_v36  ;;  %v1081_v43 = vpop.f32.mrb[8].mxu1 }
 0x299   :  { %901 = vst.msk [vmem:[%s1567_s8 + $0x14] sm:$0xf] %vm424_vm5, %v981_v38  ;;  %v861_v8 = vadd.f32 %v1081_v43, %v679_v2  ;;  %v978_v44 = vpack.c.bf16 %v771_v40, %v771_v40  ;;  %v855_v45 = vpop.f32.mrb[9].mxu1 }
 0x29a   :  { %900 = vst.msk [vmem:[%s1567_s8 + $0x10] sm:$0xf] %vm424_vm5, %v980_v58  ;;  %899 = vst.msk [vmem:[%s1567_s8 + $0xc] sm:$0xf] %vm424_vm5, %v979_v42  ;;  %v856_v46 = vadd.f32 %v855_v45, %v674_v41 }
 0x29b   :  { %v983_v47 = vpack.c.bf16 %v861_v8, %v861_v8  ;;  %898 = vst.msk [vmem:[%s1567_s8 + $0x8] sm:$0xf] %vm424_vm5, %v978_v44 }
 0x29c   :  { %v982_v48 = vpack.c.bf16 %v856_v46, %v856_v46 }
 0x29d   :  { %903 = vst.msk [vmem:[%s1567_s8 + $0x1c] sm:$0xf] %vm424_vm5, %v983_v47 }
 0x29e   :  { %902 = vst.msk [vmem:[%s1567_s8 + $0x18] sm:$0xf] %vm424_vm5, %v982_v48 }
 0x29f   :  { %1153 = dma.done.wait [#allocation4], 768  }
 0x2a0   :  { %1154 = vsyncadd [#allocation4], 4294966528 }
 0x2a1   :  { %923 = vsyncpa [#allocation4], 1 }

// kernel: spex_plus_forward.5
= control target key start
LH: loop header
LB: loop body
LE: loop exit
PB: predicated region body
PF: predicated region fallthrough
CT: control target
= control target key end

     0   :  { %vm30_vm0 = vcmask 245760   ;;  %vm33_vm1 = vcmask 246785   ;;  %s1115_s9 = smov 126   ;;  %s1116_s10 = smov 127   ;;  %vm154_vm2 = vcmask 130048   ;;  %v1122_v3 = vmov 0   ;;  %s1540_s0 = inlined_call_operand.vmem [shape: f32[2,2,38], index: 0, kind: input, shape index: {}]   ;;  %s1541_s1 = inlined_call_operand.vmem [shape: f32[48,16], index: 1, kind: input, shape index: {}]   ;;  %s1542_s2 = inlined_call_operand.vmem [shape: f32[48,1], index: 2, kind: input, shape index: {}]   ;;  %s1543_s3 = inlined_call_operand.vmem [shape: f32[48,1], index: 3, kind: input, shape index: {}]   ;;  %s1544_s4 = inlined_call_operand.vmem [shape: f32[48,1], index: 4, kind: input, shape index: {}]   ;;  %s1545_s6 = inlined_call_operand.vmem [shape: f32[32,1], index: 6, kind: input, shape index: {}]   ;;  %s1546_s5 = inlined_call_operand.vmem [shape: f32[32,48], index: 5, kind: input, shape index: {}]   ;;  %s1547_s7 = inlined_call_operand.vmem [shape: bf16[2,48,31], index: 7, kind: output, shape index: {0}]   ;;  %s1548_s8 = inlined_call_operand.vmem [shape: bf16[2,32,31], index: 8, kind: output, shape index: {1}]  }
   0x1   :  { %v28_v0 = vld [vmem:[%s1540_s0] sm:$0x3]  ;;  %v29_v1 = vld [vmem:[%s1540_s0 + $0x2] sm:$0x3]  ;;  %s1117_s11 = smov 125   ;;  %s1118_s0 = smov 124   ;;  %1110 = vset.pattern.permute.xlu1 %v1122_v3  ;;  %1109 = vset.pattern.permute.xlu0 %v1122_v3 }
   0x2   :  { %48 = vrot.lane.b32.xlu1 %v28_v0, %s1115_s9  ;;  %38 = vrot.lane.b32.xlu0 %v28_v0, %s1116_s10  ;;  %31 = vst.msk [vmem:[#allocation2] sm:$0x1] %vm30_vm0, %v28_v0  ;;  %32 = vst.msk [vmem:[#allocation2 + $0x10] sm:$0x1] %vm30_vm0, %v29_v1  ;;  %s1119_s12 = smov 123   ;;  %s1120_s13 = smov 122  }
   0x3   :  { %34 = vst.msk [vmem:[#allocation2] sm:$0x2] %vm33_vm1, %v28_v0  ;;  %35 = vst.msk [vmem:[#allocation2 + $0x10] sm:$0x2] %vm33_vm1, %v29_v1  ;;  %v108_v2 = vld [vmem:[%s1541_s1] sm:$0xff]  ;;  %s1121_s16 = smov 121  }
   0x4   :  { %1011 = vmatprep.mubr.msk.f32.mxu0 %vm154_vm2, %v108_v2  ;;  %1024 = vmatprep.mubr.msk.f32.mxu1 %vm154_vm2, %v108_v2  ;;  %v119_v4 = vld [vmem:[%s1542_s2 + $0x8] sm:$0xff]  ;;  %v118_v5 = vld [vmem:[%s1542_s2] sm:$0xff]  ;;  %v120_v6 = vld [vmem:[%s1542_s2 + $0x10] sm:$0xff]  ;;  %vm680_vm3 = vcmask 392192   ;;  %vm436_vm4 = vcmask 252928   ;;  %vm423_vm5 = vcmask 248832  }
   0x5   :  { %v121_v7 = vld [vmem:[%s1542_s2 + $0x18] sm:$0xff]  ;;  %v122_v8 = vld [vmem:[%s1542_s2 + $0x20] sm:$0xff]  ;;  %v123_v9 = vld [vmem:[%s1542_s2 + $0x28] sm:$0xff] }
   0x6   :  { %50 = vrot.lane.b32.xlu1 %v29_v1, %s1115_s9  ;;  %40 = vrot.lane.b32.xlu0 %v29_v1, %s1116_s10  ;;  %v556_v10 = vld [vmem:[%s1543_s3] sm:$0xff]  ;;  %v557_v11 = vld [vmem:[%s1543_s3 + $0x8] sm:$0xff] }
   0x7   :  { %v604_v12 = vld [vmem:[%s1544_s4] sm:$0xff]  ;;  %v605_v13 = vld [vmem:[%s1544_s4 + $0x8] sm:$0xff]  ;;  %v558_v14 = vld [vmem:[%s1543_s3 + $0x10] sm:$0xff] }
   0x8   :  { %v559_v15 = vld [vmem:[%s1543_s3 + $0x18] sm:$0xff]  ;;  %v606_v16 = vld [vmem:[%s1544_s4 + $0x10] sm:$0xff]  ;;  %v560_v18 = vld [vmem:[%s1543_s3 + $0x20] sm:$0xff] }
   0x9   :  { %v607_v17 = vld [vmem:[%s1544_s4 + $0x18] sm:$0xff]  ;;  %v561_v19 = vld [vmem:[%s1543_s3 + $0x28] sm:$0xff]  ;;  %v608_v20 = vld [vmem:[%s1544_s4 + $0x20] sm:$0xff] }
   0xa   :  { %60 = vrot.lane.b32.xlu1 %v29_v1, %s1117_s11  ;;  %58 = vrot.lane.b32.xlu0 %v28_v0, %s1117_s11  ;;  %v609_v21 = vld [vmem:[%s1544_s4 + $0x28] sm:$0xff]  ;;  %v656_v22 = vld [vmem:[%s1545_s6] sm:$0xff] }
   0xb   :  { %v657_v23 = vld [vmem:[%s1545_s6 + $0x8] sm:$0xff]  ;;  %v658_v24 = vld [vmem:[%s1545_s6 + $0x10] sm:$0xff]  ;;  %v659_v25 = vld [vmem:[%s1545_s6 + $0x18] sm:$0xff] }
   0xc   :  { %v109_v46 = vld [vmem:[%s1541_s1 + $0x8] sm:$0xff]  ;;  %v110_v47 = vld [vmem:[%s1541_s1 + $0x10] sm:$0xff]  ;;  %v111_v48 = vld [vmem:[%s1541_s1 + $0x18] sm:$0xff] }
   0xd   :  { %v112_v49 = vld [vmem:[%s1541_s1 + $0x20] sm:$0xff]  ;;  %v113_v50 = vld [vmem:[%s1541_s1 + $0x28] sm:$0xff] }
   0xe   :  { %70 = vrot.lane.b32.xlu1 %v29_v1, %s1118_s0  ;;  %68 = vrot.lane.b32.xlu0 %v28_v0, %s1118_s0  ;;  %v652_v51 = vld [vmem:[%s1546_s5] sm:$0xff] }
  0x12   :  { %80 = vrot.lane.b32.xlu1 %v29_v1, %s1119_s12  ;;  %78 = vrot.lane.b32.xlu0 %v28_v0, %s1119_s12 }
  0x16   :  { %90 = vrot.lane.b32.xlu1 %v29_v1, %s1120_s13  ;;  %88 = vrot.lane.b32.xlu0 %v28_v0, %s1120_s13 }
  0x1a   :  { %100 = vrot.lane.b32.xlu1 %v29_v1, %s1121_s16  ;;  %98 = vrot.lane.b32.xlu0 %v28_v0, %s1121_s16 }
  0x1e   :  { %131 = vperm.xlu1 %1110, %v119_v4   ;;  %126 = vperm.xlu0 %1109, %v118_v5  }
  0x22   :  { %136 = vperm.xlu1 %1110, %v120_v6   ;;  %141 = vperm.xlu0 %1109, %v121_v7  }
  0x26   :  { %146 = vperm.xlu1 %1110, %v122_v8   ;;  %151 = vperm.xlu0 %1109, %v123_v9  }
  0x2a   :  { %564 = vperm.xlu1 %1110, %v556_v10   ;;  %569 = vperm.xlu0 %1109, %v557_v11  }
  0x2e   :  { %612 = vperm.xlu1 %1110, %v604_v12   ;;  %617 = vperm.xlu0 %1109, %v605_v13  }
  0x32   :  { %574 = vperm.xlu1 %1110, %v558_v14   ;;  %579 = vperm.xlu0 %1109, %v559_v15  }
  0x36   :  { %622 = vperm.xlu1 %1110, %v606_v16   ;;  %627 = vperm.xlu0 %1109, %v607_v17  }
  0x3a   :  { %584 = vperm.xlu1 %1110, %v560_v18   ;;  %589 = vperm.xlu0 %1109, %v561_v19  }
  0x3e   :  { %632 = vperm.xlu1 %1110, %v608_v20   ;;  %637 = vperm.xlu0 %1109, %v609_v21  }
  0x42   :  { %662 = vperm.xlu1 %1110, %v656_v22   ;;  %667 = vperm.xlu0 %1109, %v657_v23  }
  0x46   :  { %672 = vperm.xlu1 %1110, %v658_v24   ;;  %677 = vperm.xlu0 %1109, %v659_v25  }
  0x74   :  { %v49_v26 = vpop.permute.xlu1 %48  ;;  %v39_v27 = vpop.permute.xlu0 %38 }
  0x75   :  { %54 = vst.msk [vmem:[#allocation2 + $0x4] sm:$0x1] %vm30_vm0, %v49_v26  ;;  %44 = vst.msk [vmem:[#allocation2 + $0x2] sm:$0x1] %vm30_vm0, %v39_v27 }
  0x76   :  { %56 = vst.msk [vmem:[#allocation2 + $0x4] sm:$0x2] %vm33_vm1, %v49_v26  ;;  %46 = vst.msk [vmem:[#allocation2 + $0x2] sm:$0x2] %vm33_vm1, %v39_v27 }
  0x78   :  { %v51_v28 = vpop.permute.xlu1 %50  ;;  %v41_v29 = vpop.permute.xlu0 %40 }
  0x79   :  { %55 = vst.msk [vmem:[#allocation2 + $0x14] sm:$0x1] %vm30_vm0, %v51_v28  ;;  %45 = vst.msk [vmem:[#allocation2 + $0x12] sm:$0x1] %vm30_vm0, %v41_v29 }
  0x7a   :  { %57 = vst.msk [vmem:[#allocation2 + $0x14] sm:$0x2] %vm33_vm1, %v51_v28  ;;  %47 = vst.msk [vmem:[#allocation2 + $0x12] sm:$0x2] %vm33_vm1, %v41_v29 }
  0x7c   :  { %v61_v30 = vpop.permute.xlu1 %60  ;;  %v59_v31 = vpop.permute.xlu0 %58 }
  0x7d   :  { %65 = vst.msk [vmem:[#allocation2 + $0x16] sm:$0x1] %vm30_vm0, %v61_v30  ;;  %64 = vst.msk [vmem:[#allocation2 + $0x6] sm:$0x1] %vm30_vm0, %v59_v31 }
  0x7e   :  { %67 = vst.msk [vmem:[#allocation2 + $0x16] sm:$0x2] %vm33_vm1, %v61_v30  ;;  %66 = vst.msk [vmem:[#allocation2 + $0x6] sm:$0x2] %vm33_vm1, %v59_v31 }
  0x80   :  { %v71_v32 = vpop.permute.xlu1 %70  ;;  %v69_v33 = vpop.permute.xlu0 %68 }
  0x81   :  { %75 = vst.msk [vmem:[#allocation2 + $0x18] sm:$0x1] %vm30_vm0, %v71_v32  ;;  %74 = vst.msk [vmem:[#allocation2 + $0x8] sm:$0x1] %vm30_vm0, %v69_v33 }
  0x82   :  { %77 = vst.msk [vmem:[#allocation2 + $0x18] sm:$0x2] %vm33_vm1, %v71_v32  ;;  %76 = vst.msk [vmem:[#allocation2 + $0x8] sm:$0x2] %vm33_vm1, %v69_v33 }
  0x84   :  { %v81_v34 = vpop.permute.xlu1 %80  ;;  %v79_v35 = vpop.permute.xlu0 %78 }
  0x85   :  { %85 = vst.msk [vmem:[#allocation2 + $0x1a] sm:$0x1] %vm30_vm0, %v81_v34  ;;  %84 = vst.msk [vmem:[#allocation2 + $0xa] sm:$0x1] %vm30_vm0, %v79_v35  ;;  %v114_v40 = vld [vmem:[#allocation2] sm:$0xff]  ;;  %v116_v42 = vld [vmem:[#allocation2 + $0x10] sm:$0xff] }
  0x86   :  { %87 = vst.msk [vmem:[#allocation2 + $0x1a] sm:$0x2] %vm33_vm1, %v81_v34  ;;  %86 = vst.msk [vmem:[#allocation2 + $0xa] sm:$0x2] %vm33_vm1, %v79_v35 }
  0x88   :  { %v91_v36 = vpop.permute.xlu1 %90  ;;  %v89_v37 = vpop.permute.xlu0 %88 }
  0x89   :  { %95 = vst.msk [vmem:[#allocation2 + $0x1c] sm:$0x1] %vm30_vm0, %v91_v36  ;;  %94 = vst.msk [vmem:[#allocation2 + $0xc] sm:$0x1] %vm30_vm0, %v89_v37 }
  0x8a   :  { %97 = vst.msk [vmem:[#allocation2 + $0x1c] sm:$0x2] %vm33_vm1, %v91_v36  ;;  %96 = vst.msk [vmem:[#allocation2 + $0xc] sm:$0x2] %vm33_vm1, %v89_v37 }
  0x8c   :  { %v101_v38 = vpop.permute.xlu1 %100  ;;  %v99_v39 = vpop.permute.xlu0 %98 }
  0x8d   :  { %105 = vst.msk [vmem:[#allocation2 + $0x1e] sm:$0x1] %vm30_vm0, %v101_v38  ;;  %104 = vst.msk [vmem:[#allocation2 + $0xe] sm:$0x1] %vm30_vm0, %v99_v39 }
  0x8e   :  { %107 = vst.msk [vmem:[#allocation2 + $0x1e] sm:$0x2] %vm33_vm1, %v101_v38  ;;  %106 = vst.msk [vmem:[#allocation2 + $0xe] sm:$0x2] %vm33_vm1, %v99_v39 }
  0x95   :  { %v115_v41 = vld [vmem:[#allocation2 + $0x8] sm:$0xff]  ;;  %v117_v43 = vld [vmem:[#allocation2 + $0x18] sm:$0xff] }
  0x96   :  { %v1069_v44 = vpack.c.bf16 %v115_v41, %v114_v40  ;;  %v1073_v45 = vpack.c.bf16 %v117_v43, %v116_v42 }
  0x98   :  { %1070 = vmatprep.subr.bf16.mxu0 %v1069_v44  ;;  %1074 = vmatprep.subr.bf16.mxu1 %v1073_v45 }
  0x99   :  { %1072 = vmatpush3.bf16.msra.mxu0 %v1069_v44  ;;  %1076 = vmatpush3.bf16.msra.mxu1 %v1073_v45 }
  0x9c   :  { %1012 = vmatmul.mubr.msk.f32.vlgmr.msra.gmra.mrb[0].mxu0 %vm154_vm2, %v109_v46  ;;  %1025 = vmatmul.mubr.msk.f32.vlgmr.msra.gmra.mrb[0].mxu1 %vm154_vm2, %v109_v46 }
  0x9d   :  { %1014 = vmatprep.mubr.msk.f32.mxu0 %vm154_vm2, %v110_v47  ;;  %1027 = vmatprep.mubr.msk.f32.mxu1 %vm154_vm2, %v110_v47  ;;  %v127_v52 = vpop.permute.xlu0 %126  ;;  %v132_v53 = vpop.permute.xlu1 %131 }
  0xa0   :  { %1015 = vmatmul.mubr.msk.f32.gmra.mrb[2].mxu0 %vm154_vm2, %v111_v48  ;;  %1028 = vmatmul.mubr.msk.f32.gmra.mrb[2].mxu1 %vm154_vm2, %v111_v48 }
  0xa1   :  { %1017 = vmatprep.mubr.msk.f32.mxu0 %vm154_vm2, %v112_v49  ;;  %1030 = vmatprep.mubr.msk.f32.mxu1 %vm154_vm2, %v112_v49  ;;  %v142_v62 = vpop.permute.xlu0 %141  ;;  %v137_v15 = vpop.permute.xlu1 %136 }
  0xa4   :  { %1018 = vmatmul.mubr.msk.f32.gmra.mrb[4].mxu0 %vm154_vm2, %v113_v50  ;;  %1031 = vmatmul.mubr.msk.f32.gmra.mrb[4].mxu1 %vm154_vm2, %v113_v50 }
  0xa5   :  { %1045 = vmatprep.mubr.msk.f32.mxu0 %vm680_vm3, %v652_v51  ;;  %1063 = vmatprep.mubr.msk.f32.mxu1 %vm680_vm3, %v652_v51  ;;  %v152_v36 = vpop.permute.xlu0 %151 }
 0x16f   :  { %v1013_v54 = vpop.f32.mrb[0].mxu0  ;;  %v1026_v55 = vpop.f32.mrb[0].mxu1 }
 0x170   :  { %v245_v56 = vadd.f32 %v1013_v54, %v132_v53  ;;  %v340_v57 = vadd.f32 %v1026_v55, %v132_v53  ;;  %v239_v58 = vpop.f32.mrb[1].mxu0  ;;  %v334_v59 = vpop.f32.mrb[1].mxu1 }
 0x171   :  { %v240_v60 = vadd.f32 %v239_v58, %v127_v52  ;;  %v335_v61 = vadd.f32 %v334_v59, %v127_v52  ;;  %v147_v55 = vpop.permute.xlu1 %146 }
 0x172   :  { %v1307_v63 = vmax.f32 %v245_v56, 0.0  ;;  %v1309_v0 = vmax.f32 %v340_v57, 0.0 }
 0x173   :  { %v1311_v1 = vmax.f32 %v240_v60, 0.0  ;;  %v1313_v2 = vmax.f32 %v335_v61, 0.0  ;;  %v1016_v3 = vpop.f32.mrb[2].mxu0  ;;  %v1029_v4 = vpop.f32.mrb[2].mxu1 }
 0x174   :  { %v952_v5 = vpack.c.bf16 %v1307_v63, %v1307_v63  ;;  %v438_v6 = vsel %vm436_vm4, %v1307_v63, 0.0  ;;  %v475_v7 = vmul.f32 %v1307_v63, %v1307_v63  ;;  %v958_v8 = vpack.c.bf16 %v1309_v0, %v1309_v0  ;;  %v249_v9 = vpop.f32.mrb[3].mxu0  ;;  %v344_v10 = vpop.f32.mrb[3].mxu1 }
 0x175   :  { %v455_v11 = vsel %vm436_vm4, %v1309_v0, 0.0  ;;  %v481_v12 = vmul.f32 %v1309_v0, %v1309_v0  ;;  %v951_v13 = vpack.c.bf16 %v1311_v1, %v1311_v1  ;;  %v437_v14 = vsel %vm436_vm4, %v1311_v1, 0.0 }
 0x176   :  { %425 = vst.msk [vmem:[%s1547_s7 + $0x4] sm:$0xf] %vm423_vm5, %v952_v5  ;;  %v487_v16 = vsel %vm436_vm4, %v475_v7, 0.0  ;;  %431 = vst.msk [vmem:[%s1547_s7 + $0x1c] sm:$0xf] %vm423_vm5, %v958_v8  ;;  %v439_v17 = vadd.f32 %v438_v6, %v437_v14  ;;  %v474_v18 = vmul.f32 %v1311_v1, %v1311_v1  ;;  %v957_v19 = vpack.c.bf16 %v1313_v2, %v1313_v2 }
 0x177   :  { %v504_v20 = vsel %vm436_vm4, %v481_v12, 0.0  ;;  %424 = vst.msk [vmem:[%s1547_s7] sm:$0xf] %vm423_vm5, %v951_v13  ;;  %v454_v21 = vsel %vm436_vm4, %v1313_v2, 0.0  ;;  %v480_v22 = vmul.f32 %v1313_v2, %v1313_v2  ;;  %v255_v23 = vadd.f32 %v1016_v3, %v142_v62  ;;  %v1019_v24 = vpop.f32.mrb[4].mxu0  ;;  %v1032_v25 = vpop.f32.mrb[4].mxu1 }
 0x178   :  { %v486_v26 = vsel %vm436_vm4, %v474_v18, 0.0  ;;  %430 = vst.msk [vmem:[%s1547_s7 + $0x18] sm:$0xf] %vm423_vm5, %v957_v19  ;;  %v456_v27 = vadd.f32 %v455_v11, %v454_v21  ;;  %v350_v28 = vadd.f32 %v1029_v4, %v142_v62  ;;  %v250_v29 = vadd.f32 %v249_v9, %v137_v15  ;;  %v259_v30 = vpop.f32.mrb[5].mxu0  ;;  %v354_v31 = vpop.f32.mrb[5].mxu1 }
 0x179   :  { %v488_v32 = vadd.f32 %v487_v16, %v486_v26  ;;  %v503_v33 = vsel %vm436_vm4, %v480_v22, 0.0  ;;  %v1359_v34 = vmax.f32 %v255_v23, 0.0  ;;  %v345_v35 = vadd.f32 %v344_v10, %v137_v15 }
 0x17a   :  { %v505_v37 = vadd.f32 %v504_v20, %v503_v33  ;;  %v1361_v38 = vmax.f32 %v350_v28, 0.0  ;;  %v1363_v39 = vmax.f32 %v250_v29, 0.0  ;;  %v265_v42 = vadd.f32 %v1019_v24, %v152_v36 }
 0x17b   :  { %v954_v40 = vpack.c.bf16 %v1359_v34, %v1359_v34  ;;  %v1367_v41 = vmax.f32 %v345_v35, 0.0  ;;  %v442_v43 = vsel %vm436_vm4, %v1359_v34, 0.0  ;;  %v477_v44 = vmul.f32 %v1359_v34, %v1359_v34 }
 0x17c   :  { %v960_v45 = vpack.c.bf16 %v1361_v38, %v1361_v38  ;;  %v953_v46 = vpack.c.bf16 %v1363_v39, %v1363_v39  ;;  %v483_v47 = vmul.f32 %v1361_v38, %v1361_v38  ;;  %v440_v48 = vsel %vm436_vm4, %v1363_v39, 0.0 }
 0x17d   :  { %427 = vst.msk [vmem:[%s1547_s7 + $0xc] sm:$0xf] %vm423_vm5, %v954_v40  ;;  %v476_v49 = vmul.f32 %v1363_v39, %v1363_v39  ;;  %v959_v50 = vpack.c.bf16 %v1367_v41, %v1367_v41  ;;  %v459_v51 = vsel %vm436_vm4, %v1361_v38, 0.0  ;;  %v441_v52 = vadd.f32 %v440_v48, %v439_v17 }
 0x17e   :  { %433 = vst.msk [vmem:[%s1547_s7 + $0x24] sm:$0xf] %vm423_vm5, %v960_v45  ;;  %426 = vst.msk [vmem:[%s1547_s7 + $0x8] sm:$0xf] %vm423_vm5, %v953_v46  ;;  %v457_v53 = vsel %vm436_vm4, %v1367_v41, 0.0  ;;  %v482_v54 = vmul.f32 %v1367_v41, %v1367_v41  ;;  %v1408_v58 = vmax.f32 %v265_v42, 0.0  ;;  %v360_v59 = vadd.f32 %v1032_v25, %v152_v36 }
 0x17f   :  { %v489_v56 = vsel %vm436_vm4, %v476_v49, 0.0  ;;  %432 = vst.msk [vmem:[%s1547_s7 + $0x20] sm:$0xf] %vm423_vm5, %v959_v50  ;;  %v458_v57 = vadd.f32 %v457_v53, %v456_v27  ;;  %v260_v62 = vadd.f32 %v259_v30, %v147_v55  ;;  %v443_v3 = vadd.f32 %v442_v43, %v441_v52 }
 0x180   :  { %v490_v60 = vadd.f32 %v489_v56, %v488_v32  ;;  %v506_v61 = vsel %vm436_vm4, %v482_v54, 0.0  ;;  %v491_v4 = vsel %vm436_vm4, %v477_v44, 0.0  ;;  %v508_v5 = vsel %vm436_vm4, %v483_v47, 0.0 }
 0x181   :  { %v507_v6 = vadd.f32 %v506_v61, %v505_v37  ;;  %v956_v7 = vpack.c.bf16 %v1408_v58, %v1408_v58  ;;  %v1415_v8 = vmax.f32 %v360_v59, 0.0  ;;  %v1417_v9 = vmax.f32 %v260_v62, 0.0  ;;  %v1463_v59 = vpop.permute.xlu1 %564 }
 0x182   :  { %v492_v10 = vadd.f32 %v491_v4, %v490_v60  ;;  %v355_v11 = vadd.f32 %v354_v31, %v147_v55  ;;  %v460_v12 = vadd.f32 %v459_v51, %v458_v57  ;;  %v479_v16 = vmul.f32 %v1408_v58, %v1408_v58  ;;  %v1465_v60 = vpop.permute.xlu0 %569 }
 0x183   :  { %429 = vst.msk [vmem:[%s1547_s7 + $0x14] sm:$0xf] %vm423_vm5, %v956_v7  ;;  %v509_v13 = vadd.f32 %v508_v5, %v507_v6  ;;  %v962_v14 = vpack.c.bf16 %v1415_v8, %v1415_v8  ;;  %v955_v15 = vpack.c.bf16 %v1417_v9, %v1417_v9  ;;  %v444_v17 = vsel %vm436_vm4, %v1417_v9, 0.0 }
 0x184   :  { %v478_v18 = vmul.f32 %v1417_v9, %v1417_v9  ;;  %v1433_v19 = vmax.f32 %v355_v11, 0.0  ;;  %v446_v20 = vsel %vm436_vm4, %v1408_v58, 0.0  ;;  %v485_v21 = vmul.f32 %v1415_v8, %v1415_v8 }
 0x185   :  { %435 = vst.msk [vmem:[%s1547_s7 + $0x2c] sm:$0xf] %vm423_vm5, %v962_v14  ;;  %428 = vst.msk [vmem:[%s1547_s7 + $0x10] sm:$0xf] %vm423_vm5, %v955_v15  ;;  %v445_v22 = vadd.f32 %v444_v17, %v443_v3  ;;  %v495_v30 = vsel %vm436_vm4, %v479_v16, 0.0  ;;  %v463_v31 = vsel %vm436_vm4, %v1415_v8, 0.0 }
 0x186   :  { %v493_v23 = vsel %vm436_vm4, %v478_v18, 0.0  ;;  %v961_v24 = vpack.c.bf16 %v1433_v19, %v1433_v19  ;;  %v461_v25 = vsel %vm436_vm4, %v1433_v19, 0.0  ;;  %v484_v26 = vmul.f32 %v1433_v19, %v1433_v19 }
 0x187   :  { %v447_v27 = vadd.f32 %v446_v20, %v445_v22  ;;  %v494_v28 = vadd.f32 %v493_v23, %v492_v10  ;;  %v462_v29 = vadd.f32 %v461_v25, %v460_v12  ;;  %v512_v40 = vsel %vm436_vm4, %v485_v21, 0.0  ;;  %v613_v20 = vpop.permute.xlu1 %612  ;;  %v618_v21 = vpop.permute.xlu0 %617 }
 0x188   :  { %434 = vst.msk [vmem:[%s1547_s7 + $0x28] sm:$0xf] %vm423_vm5, %v961_v24  ;;  %v510_v32 = vsel %vm436_vm4, %v484_v26, 0.0 }
 0x189   :  { %v448_v33 = vrot.slane %v447_v27, 4  ;;  %v496_v35 = vadd.f32 %v495_v30, %v494_v28  ;;  %v464_v36 = vadd.f32 %v463_v31, %v462_v29  ;;  %v511_v37 = vadd.f32 %v510_v32, %v509_v13 }
 0x18b   :  { %v449_v42 = vadd.f32 %v448_v33, %v447_v27  ;;  %v497_v43 = vrot.slane %v496_v35, 4  ;;  %v465_v44 = vrot.slane %v464_v36, 4  ;;  %v513_v45 = vadd.f32 %v512_v40, %v511_v37  ;;  %v575_v31 = vpop.permute.xlu1 %574  ;;  %v580_v32 = vpop.permute.xlu0 %579 }
 0x18d   :  { %v450_v46 = vrot.slane %v449_v42, 2  ;;  %v498_v47 = vadd.f32 %v497_v43, %v496_v35  ;;  %v466_v48 = vadd.f32 %v465_v44, %v464_v36  ;;  %v514_v49 = vrot.slane %v513_v45, 4 }
 0x18f   :  { %v451_v50 = vadd.f32 %v450_v46, %v449_v42  ;;  %v499_v51 = vrot.slane %v498_v47, 2  ;;  %v467_v52 = vrot.slane %v466_v48, 2  ;;  %v515_v53 = vadd.f32 %v514_v49, %v513_v45  ;;  %v628_v33 = vpop.permute.xlu0 %627 }
 0x191   :  { %v452_v54 = vrot.slane %v451_v50, 1  ;;  %v500_v55 = vadd.f32 %v499_v51, %v498_v47  ;;  %v468_v56 = vadd.f32 %v467_v52, %v466_v48  ;;  %v516_v57 = vrot.slane %v515_v53, 2 }
 0x193   :  { %v453_v61 = vadd.f32 %v452_v54, %v451_v50  ;;  %v501_v62 = vrot.slane %v500_v55, 1  ;;  %v469_v3 = vrot.slane %v468_v56, 1  ;;  %v517_v4 = vadd.f32 %v516_v57, %v515_v53 }
 0x195   :  { %v472_v5 = vmul.f32 0.020833334, %v453_v61  ;;  %v502_v6 = vadd.f32 %v501_v62, %v500_v55  ;;  %v470_v7 = vadd.f32 %v469_v3, %v468_v56  ;;  %v518_v10 = vrot.slane %v517_v4, 1 }
 0x197   :  { %v520_v11 = vmul.f32 0.020833334, %v502_v6  ;;  %v522_v12 = vmul.f32 %v472_v5, %v472_v5  ;;  %v532_v13 = vsub.f32 %v1417_v9, %v472_v5  ;;  %v1468_v14 = vmul.f32 0.020833334, %v470_v7 }
 0x198   :  { %v519_v15 = vadd.f32 %v518_v10, %v517_v4  ;;  %v528_v16 = vsub.f32 %v1311_v1, %v472_v5  ;;  %v529_v17 = vsub.f32 %v1307_v63, %v472_v5  ;;  %v530_v18 = vsub.f32 %v1363_v39, %v472_v5 }
 0x199   :  { %v524_v22 = vsub.f32 %v520_v11, %v522_v12  ;;  %v523_v23 = vmul.f32 %v1468_v14, %v1468_v14  ;;  %v538_v24 = vsub.f32 %v1433_v19, %v1468_v14  ;;  %v534_v9 = vsub.f32 %v1313_v2, %v1468_v14 }
 0x19a   :  { %v521_v25 = vmul.f32 0.020833334, %v519_v15  ;;  %v535_v1 = vsub.f32 %v1309_v0, %v1468_v14  ;;  %v531_v63 = vsub.f32 %v1359_v34, %v472_v5  ;;  %v536_v39 = vsub.f32 %v1367_v41, %v1468_v14  ;;  %v623_v34 = vpop.permute.xlu1 %622 }
 0x19b   :  { %v526_v26 = vmax.f32 %v524_v22, 0.0  ;;  %v537_v27 = vsub.f32 %v1361_v38, %v1468_v14  ;;  %v533_v28 = vsub.f32 %v1408_v58, %v472_v5  ;;  %v539_v19 = vsub.f32 %v1415_v8, %v1468_v14  ;;  %v590_v58 = vpop.permute.xlu0 %589 }
 0x19c   :  { %v525_v29 = vsub.f32 %v521_v25, %v523_v23 }
 0x19d   :  { %v540_v2 = vadd.f32 1e-05, %v526_v26 }
 0x19e   :  { %v527_v30 = vmax.f32 %v525_v29, 0.0  ;;  %v585_v40 = vpop.permute.xlu1 %584 }
 0x19f   :  { %1111 = vrsqrt.f32 %v540_v2  ;;  %v638_v10 = vpop.permute.xlu0 %637 }
 0x1a0   :  { %v541_v0 = vadd.f32 1e-05, %v527_v30 }
 0x1a2   :  { %1113 = vrsqrt.f32 %v541_v0  ;;  %v633_v7 = vpop.permute.xlu1 %632 }
 0x1a6   :  { %v663_v26 = vpop.permute.xlu1 %662 }
 0x1a9   :  { %v1112_v41 = vpop.eup %1111 }
 0x1aa   :  { %v544_v35 = vmul.f32 %v1112_v41, %v528_v16  ;;  %v545_v36 = vmul.f32 %v1112_v41, %v529_v17  ;;  %v546_v37 = vmul.f32 %v1112_v41, %v530_v18  ;;  %v547_v38 = vmul.f32 %v1112_v41, %v531_v63  ;;  %v655_v63 = vld [vmem:[%s1546_s5 + $0x18] sm:$0xff] }
 0x1ab   :  { %v548_v42 = vmul.f32 %v1112_v41, %v532_v13  ;;  %v549_v43 = vmul.f32 %v1112_v41, %v533_v28  ;;  %v673_v41 = vpop.permute.xlu1 %672 }
 0x1ac   :  { %v1114_v8 = vpop.eup %1113  ;;  %v592_v44 = vmul.f32 %v1463_v59, %v544_v35  ;;  %v593_v45 = vmul.f32 %v1465_v60, %v545_v36  ;;  %v594_v46 = vmul.f32 %v575_v31, %v546_v37  ;;  %v595_v47 = vmul.f32 %v580_v32, %v547_v38 }
 0x1ad   :  { %v550_v48 = vmul.f32 %v1114_v8, %v534_v9  ;;  %v551_v49 = vmul.f32 %v1114_v8, %v535_v1  ;;  %v552_v50 = vmul.f32 %v1114_v8, %v536_v39  ;;  %v553_v51 = vmul.f32 %v1114_v8, %v537_v27  ;;  %v668_v39 = vpop.permute.xlu0 %667 }
 0x1ae   :  { %v640_v52 = vadd.f32 %v613_v20, %v592_v44  ;;  %v641_v53 = vadd.f32 %v618_v21, %v593_v45  ;;  %v642_v54 = vadd.f32 %v623_v34, %v594_v46  ;;  %v643_v55 = vadd.f32 %v628_v33, %v595_v47 }
 0x1af   :  { %v598_v56 = vmul.f32 %v1463_v59, %v550_v48  ;;  %v599_v57 = vmul.f32 %v1465_v60, %v551_v49  ;;  %v600_v61 = vmul.f32 %v575_v31, %v552_v50  ;;  %v601_v62 = vmul.f32 %v580_v32, %v553_v51 }
 0x1b0   :  { %v1077_v3 = vpack.c.bf16 %v641_v53, %v640_v52  ;;  %v1081_v4 = vpack.c.bf16 %v643_v55, %v642_v54  ;;  %v596_v5 = vmul.f32 %v585_v40, %v548_v42  ;;  %v597_v6 = vmul.f32 %v590_v58, %v549_v43 }
 0x1b1   :  { %v646_v11 = vadd.f32 %v613_v20, %v598_v56  ;;  %v647_v12 = vadd.f32 %v618_v21, %v599_v57  ;;  %v648_v13 = vadd.f32 %v623_v34, %v600_v61  ;;  %v649_v14 = vadd.f32 %v628_v33, %v601_v62  ;;  %v653_v21 = vld [vmem:[%s1546_s5 + $0x8] sm:$0xff]  ;;  %v678_v2 = vpop.permute.xlu0 %677 }
 0x1b2   :  { %1078 = vmatprep.subr.bf16.mxu0 %v1077_v3  ;;  %v644_v15 = vadd.f32 %v633_v7, %v596_v5  ;;  %v645_v16 = vadd.f32 %v638_v10, %v597_v6  ;;  %v554_v17 = vmul.f32 %v1114_v8, %v538_v24  ;;  %v555_v18 = vmul.f32 %v1114_v8, %v539_v19  ;;  %v654_v24 = vld [vmem:[%s1546_s5 + $0x10] sm:$0xff] }
 0x1b3   :  { %v1089_v59 = vpack.c.bf16 %v647_v12, %v646_v11  ;;  %1080 = vmatpush3.bf16.msra.mxu0 %v1077_v3  ;;  %v1093_v60 = vpack.c.bf16 %v649_v14, %v648_v13 }
 0x1b4   :  { %1082 = vmatprep.subr.bf16.mxu0 %v1081_v4  ;;  %v1085_v22 = vpack.c.bf16 %v645_v16, %v644_v15  ;;  %v602_v23 = vmul.f32 %v585_v40, %v554_v17  ;;  %v603_v9 = vmul.f32 %v590_v58, %v555_v18 }
 0x1b5   :  { %1090 = vmatprep.subr.bf16.mxu1 %v1089_v59 }
 0x1b6   :  { %1092 = vmatpush3.bf16.msra.mxu1 %v1089_v59  ;;  %v650_v25 = vadd.f32 %v633_v7, %v602_v23  ;;  %v651_v1 = vadd.f32 %v638_v10, %v603_v9 }
 0x1b7   :  { %1094 = vmatprep.subr.bf16.mxu1 %v1093_v60  ;;  %1084 = vmatpush3.bf16.msra.mxu0 %v1081_v4 }
 0x1b8   :  { %1086 = vmatprep.subr.bf16.mxu0 %v1085_v22  ;;  %v1097_v20 = vpack.c.bf16 %v651_v1, %v650_v25 }
 0x1ba   :  { %1096 = vmatpush3.bf16.msra.mxu1 %v1093_v60 }
 0x1bb   :  { %1098 = vmatprep.subr.bf16.mxu1 %v1097_v20  ;;  %1088 = vmatpush3.bf16.msra.mxu0 %v1085_v22 }
 0x1be   :  { %1100 = vmatpush3.bf16.msra.mxu1 %v1097_v20  ;;  %1046 = vmatmul.mubr.msk.f32.vlgmr.msra.gmra.mrb[6].mxu0 %vm680_vm3, %v653_v21 }
 0x1bf   :  { %1048 = vmatprep.mubr.msk.f32.mxu0 %vm680_vm3, %v654_v24 }
 0x1c1   :  { %1064 = vmatmul.mubr.msk.f32.vlgmr.msra.gmra.mrb[6].mxu1 %vm680_vm3, %v653_v21 }
 0x1c2   :  { %1066 = vmatprep.mubr.msk.f32.mxu1 %vm680_vm3, %v654_v24  ;;  %1049 = vmatmul.mubr.msk.f32.gmra.mrb[8].mxu0 %vm680_vm3, %v655_v63 }
 0x1c5   :  { %1067 = vmatmul.mubr.msk.f32.gmra.mrb[8].mxu1 %vm680_vm3, %v655_v63 }
 0x291   :  { %v1047_v27 = vpop.f32.mrb[6].mxu0 }
 0x292   :  { %v765_v28 = vadd.f32 %v1047_v27, %v668_v39  ;;  %v759_v19 = vpop.f32.mrb[7].mxu0 }
 0x293   :  { %v760_v29 = vadd.f32 %v759_v19, %v663_v26 }
 0x294   :  { %v964_v30 = vpack.c.bf16 %v765_v28, %v765_v28  ;;  %v1065_v31 = vpop.f32.mrb[6].mxu1 }
 0x295   :  { %v850_v32 = vadd.f32 %v1065_v31, %v668_v39  ;;  %v963_v0 = vpack.c.bf16 %v760_v29, %v760_v29  ;;  %v844_v34 = vpop.f32.mrb[7].mxu1  ;;  %v1050_v33 = vpop.f32.mrb[8].mxu0 }
 0x296   :  { %896 = vst.msk [vmem:[%s1548_s8 + $0x4] sm:$0xf] %vm423_vm5, %v964_v30  ;;  %v845_v35 = vadd.f32 %v844_v34, %v663_v26  ;;  %v775_v36 = vadd.f32 %v1050_v33, %v678_v2  ;;  %v769_v37 = vpop.f32.mrb[9].mxu0 }
 0x297   :  { %v968_v38 = vpack.c.bf16 %v850_v32, %v850_v32  ;;  %895 = vst.msk [vmem:[%s1548_s8] sm:$0xf] %vm423_vm5, %v963_v0  ;;  %v770_v40 = vadd.f32 %v769_v37, %v673_v41 }
 0x298   :  { %v967_v58 = vpack.c.bf16 %v845_v35, %v845_v35  ;;  %v966_v42 = vpack.c.bf16 %v775_v36, %v775_v36  ;;  %v1068_v43 = vpop.f32.mrb[8].mxu1 }
 0x299   :  { %900 = vst.msk [vmem:[%s1548_s8 + $0x14] sm:$0xf] %vm423_vm5, %v968_v38  ;;  %v860_v8 = vadd.f32 %v1068_v43, %v678_v2  ;;  %v965_v44 = vpack.c.bf16 %v770_v40, %v770_v40  ;;  %v854_v45 = vpop.f32.mrb[9].mxu1 }
 0x29a   :  { %899 = vst.msk [vmem:[%s1548_s8 + $0x10] sm:$0xf] %vm423_vm5, %v967_v58  ;;  %898 = vst.msk [vmem:[%s1548_s8 + $0xc] sm:$0xf] %vm423_vm5, %v966_v42  ;;  %v855_v46 = vadd.f32 %v854_v45, %v673_v41 }
 0x29b   :  { %v970_v47 = vpack.c.bf16 %v860_v8, %v860_v8  ;;  %897 = vst.msk [vmem:[%s1548_s8 + $0x8] sm:$0xf] %vm423_vm5, %v965_v44 }
 0x29c   :  { %v969_v48 = vpack.c.bf16 %v855_v46, %v855_v46 }
 0x29d   :  { %902 = vst.msk [vmem:[%s1548_s8 + $0x1c] sm:$0xf] %vm423_vm5, %v970_v47 }
 0x29e   :  { %901 = vst.msk [vmem:[%s1548_s8 + $0x18] sm:$0xf] %vm423_vm5, %v969_v48 }

// kernel: spex_plus_forward.7
= control target key start
LH: loop header
LB: loop body
LE: loop exit
PB: predicated region body
PF: predicated region fallthrough
CT: control target
= control target key end

     0   :  { %v2655_v3 = vmov 0   ;;  %vm70_vm0 = vcmask 261120   ;;  %s2656_s16 = smov 127   ;;  %s2657_s17 = smov 126   ;;  %s3282_s0 = inlined_call_operand.vmem [shape: bf16[2,32,31], index: 0, kind: input, shape index: {}]   ;;  %s3283_s1 = inlined_call_operand.vmem [shape: f32[3,32,32], index: 1, kind: input, shape index: {}]   ;;  %s3284_s2 = inlined_call_operand.vmem [shape: f32[3,32,1], index: 2, kind: input, shape index: {}]   ;;  %s3285_s4 = inlined_call_operand.vmem [shape: f32[3,32,1], index: 4, kind: input, shape index: {}]   ;;  %s3286_s3 = inlined_call_operand.vmem [shape: f32[3,32,32], index: 3, kind: input, shape index: {}]   ;;  %s3287_s5 = inlined_call_operand.vmem [shape: f32[32,32], index: 5, kind: input, shape index: {}]   ;;  %s3288_s6 = inlined_call_operand.vmem [shape: f32[32,1], index: 6, kind: input, shape index: {}]   ;;  %s3289_s7 = inlined_call_operand.vmem [shape: f32[2,32,1], index: 7, kind: output, shape index: {}]  }
   0x1   :  { %v2705_v0 = vld [vmem:[%s3282_s0] sm:$0xff]   ;;  %v2710_v1 = vld [vmem:[%s3282_s0 + $0x10] sm:$0xff]   ;;  %v2715_v2 = vld [vmem:[%s3282_s0 + $0x8] sm:$0xff]   ;;  %2613 = vset.pattern.permute.xlu0 %v2655_v3  ;;  %2614 = vset.pattern.permute.xlu1 %v2655_v3  ;;  %s2658_s26 = smov 125   ;;  %s2659_s27 = smov 122  }
   0x2   :  { %2493 = vmatprep.subr.bf16.mxu0 %v2705_v0  ;;  %2501 = vmatprep.subr.bf16.mxu1 %v2710_v1  ;;  %v2724_v4 = vld [vmem:[%s3282_s0 + $0x18] sm:$0xff]   ;;  %v42_v5 = vld [vmem:[%s3283_s1] sm:$0xff]  ;;  %v48_v7 = vld [vmem:[%s3284_s2 + $0x10] sm:$0xff]  ;;  %s2661_s10 = smov 110  }
   0x3   :  { %2495 = vmatpush3.bf16.msra.mxu0 %v2705_v0  ;;  %2503 = vmatpush3.bf16.msra.mxu1 %v2710_v1  ;;  %v46_v6 = vld [vmem:[%s3284_s2] sm:$0xff]  ;;  %v43_v8 = vld [vmem:[%s3283_s1 + $0x8] sm:$0xff]  ;;  %v44_v9 = vld [vmem:[%s3283_s1 + $0x10] sm:$0xff] }
   0x4   :  { %2497 = vmatprep.subr.bf16.mxu0 %v2715_v2  ;;  %2505 = vmatprep.subr.bf16.mxu1 %v2724_v4  ;;  %v47_v10 = vld [vmem:[%s3284_s2 + $0x8] sm:$0xff]  ;;  %v49_v11 = vld [vmem:[%s3284_s2 + $0x18] sm:$0xff]  ;;  %v289_v13 = vld [vmem:[%s3285_s4] sm:$0xff] }
   0x5   :  { %2304 = vmatprep.mubr.msk.f32.mxu0 %vm70_vm0, %v42_v5  ;;  %2318 = vmatprep.mubr.msk.f32.mxu1 %vm70_vm0, %v42_v5  ;;  %v45_v12 = vld [vmem:[%s3283_s1 + $0x18] sm:$0xff]  ;;  %v290_v14 = vld [vmem:[%s3285_s4 + $0x8] sm:$0xff]  ;;  %v291_v15 = vld [vmem:[%s3285_s4 + $0x10] sm:$0xff] }
   0x6   :  { %52 = vperm.xlu0 %2613, %v46_v6   ;;  %62 = vperm.xlu1 %2614, %v48_v7   ;;  %v292_v16 = vld [vmem:[%s3285_s4 + $0x18] sm:$0xff]  ;;  %v285_v17 = vld [vmem:[%s3286_s3] sm:$0xff]  ;;  %v286_v7 = vld [vmem:[%s3286_s3 + $0x8] sm:$0xff] }
   0x7   :  { %2499 = vmatpush3.bf16.msra.mxu0 %v2715_v2  ;;  %2507 = vmatpush3.bf16.msra.mxu1 %v2724_v4 }
   0xa   :  { %2305 = vmatmul.mubr.msk.f32.vlgmr.msra.gmra.mrb[0].mxu0 %vm70_vm0, %v43_v8  ;;  %2319 = vmatmul.mubr.msk.f32.vlgmr.msra.gmra.mrb[0].mxu1 %vm70_vm0, %v43_v8  ;;  %v287_v8 = vld [vmem:[%s3286_s3 + $0x10] sm:$0xff] }
   0xb   :  { %2307 = vmatprep.mubr.msk.f32.mxu0 %vm70_vm0, %v44_v9  ;;  %2321 = vmatprep.mubr.msk.f32.mxu1 %vm70_vm0, %v44_v9  ;;  %v288_v9 = vld [vmem:[%s3286_s3 + $0x18] sm:$0xff] }
   0xc   :  { %57 = vperm.xlu0 %2613, %v47_v10   ;;  %67 = vperm.xlu1 %2614, %v49_v11  }
   0xe   :  { %2308 = vmatmul.mubr.msk.f32.gmra.mrb[2].mxu0 %vm70_vm0, %v45_v12  ;;  %2322 = vmatmul.mubr.msk.f32.gmra.mrb[2].mxu1 %vm70_vm0, %v45_v12 }
   0xf   :  { %2332 = vmatprep.mubr.msk.f32.mxu0 %vm70_vm0, %v285_v17  ;;  %2346 = vmatprep.mubr.msk.f32.mxu1 %vm70_vm0, %v285_v17 }
  0x10   :  { %295 = vperm.xlu0 %2613, %v289_v13   ;;  %300 = vperm.xlu1 %2614, %v290_v14   ;;  %v2168_v14 = vunpack.c.h.bf16 %v2705_v0 }
  0x14   :  { %305 = vperm.xlu0 %2613, %v291_v15   ;;  %310 = vperm.xlu1 %2614, %v292_v16  }
  0x85   :  { %v53_v18 = vpop.permute.xlu0 %52  ;;  %v63_v19 = vpop.permute.xlu1 %62 }
  0x8b   :  { %v58_v20 = vpop.permute.xlu0 %57  ;;  %v68_v39 = vpop.permute.xlu1 %67 }
  0x8f   :  { %v296_v10 = vpop.permute.xlu0 %295  ;;  %v301_v11 = vpop.permute.xlu1 %300 }
  0xdd   :  { %v2306_v21 = vpop.f32.mrb[0].mxu0  ;;  %v2320_v22 = vpop.f32.mrb[0].mxu1 }
  0xde   :  { %v155_v23 = vadd.f32 %v2306_v21, %v58_v20  ;;  %v240_v24 = vadd.f32 %v2320_v22, %v58_v20  ;;  %v149_v25 = vpop.f32.mrb[1].mxu0  ;;  %v234_v26 = vpop.f32.mrb[1].mxu1  ;;  %v2167_v20 = vunpack.c.l.bf16 %v2705_v0 }
  0xdf   :  { %v150_v27 = vadd.f32 %v149_v25, %v53_v18  ;;  %v235_v28 = vadd.f32 %v234_v26, %v53_v18  ;;  %v2175_v25 = vunpack.c.l.bf16 %v2710_v1 }
  0xe0   :  { %v254_v29 = vmul.f32 0.999995, %v155_v23  ;;  %v258_v30 = vmul.f32 0.999995, %v240_v24 }
  0xe1   :  { %v253_v31 = vmul.f32 0.999995, %v150_v27  ;;  %v257_v32 = vmul.f32 0.999995, %v235_v28  ;;  %v2309_v33 = vpop.f32.mrb[2].mxu0  ;;  %v2323_v34 = vpop.f32.mrb[2].mxu1 }
  0xe2   :  { %vm262_vm1 = vcmp.ge.f32.partialorder %v254_v29, 0.0  ;;  %v270_v35 = vmul.f32 0.25, %v254_v29  ;;  %vm266_vm2 = vcmp.ge.f32.partialorder %v258_v30, 0.0  ;;  %v274_v36 = vmul.f32 0.25, %v258_v30  ;;  %v159_v37 = vpop.f32.mrb[3].mxu0  ;;  %v244_v38 = vpop.f32.mrb[3].mxu1 }
  0xe3   :  { %vm261_vm3 = vcmp.ge.f32.partialorder %v253_v31, 0.0  ;;  %v269_v40 = vmul.f32 0.25, %v253_v31  ;;  %vm265_vm4 = vcmp.ge.f32.partialorder %v257_v32, 0.0  ;;  %v273_v41 = vmul.f32 0.25, %v257_v32 }
  0xe4   :  { %v165_v42 = vadd.f32 %v2309_v33, %v68_v39  ;;  %v250_v43 = vadd.f32 %v2323_v34, %v68_v39  ;;  %v160_v44 = vadd.f32 %v159_v37, %v63_v19  ;;  %v245_v45 = vadd.f32 %v244_v38, %v63_v19  ;;  %v311_v37 = vpop.permute.xlu1 %310  ;;  %v306_v38 = vpop.permute.xlu0 %305 }
  0xe5   :  { %v277_v46 = vsel %vm261_vm3, %v253_v31, %v269_v40  ;;  %v278_v47 = vsel %vm262_vm1, %v254_v29, %v270_v35  ;;  %v281_v48 = vsel %vm265_vm4, %v257_v32, %v273_v41  ;;  %v282_v49 = vsel %vm266_vm2, %v258_v30, %v274_v36 }
  0xe6   :  { %v256_v50 = vmul.f32 0.999995, %v165_v42  ;;  %v260_v51 = vmul.f32 0.999995, %v250_v43  ;;  %v255_v52 = vmul.f32 0.999995, %v160_v44  ;;  %v2508_v53 = vpack.c.bf16 %v278_v47, %v277_v46 }
  0xe7   :  { %v259_v54 = vmul.f32 0.999995, %v245_v45  ;;  %v2516_v55 = vpack.c.bf16 %v282_v49, %v281_v48  ;;  %v2176_v19 = vunpack.c.h.bf16 %v2710_v1  ;;  %v2172_v44 = vunpack.c.h.bf16 %v2715_v2 }
  0xe8   :  { %vm264_vm5 = vcmp.ge.f32.partialorder %v256_v50, 0.0  ;;  %v272_v56 = vmul.f32 0.25, %v256_v50  ;;  %vm268_vm6 = vcmp.ge.f32.partialorder %v260_v51, 0.0  ;;  %v276_v57 = vmul.f32 0.25, %v260_v51  ;;  %2509 = vmatprep.subr.bf16.mxu0 %v2508_v53 }
  0xe9   :  { %vm263_vm7 = vcmp.ge.f32.partialorder %v255_v52, 0.0  ;;  %v271_v58 = vmul.f32 0.25, %v255_v52  ;;  %vm267_vm8 = vcmp.ge.f32.partialorder %v259_v54, 0.0  ;;  %v275_v59 = vmul.f32 0.25, %v259_v54  ;;  %2517 = vmatprep.subr.bf16.mxu1 %v2516_v55  ;;  %2511 = vmatpush3.bf16.msra.mxu0 %v2508_v53 }
  0xea   :  { %2519 = vmatpush3.bf16.msra.mxu1 %v2516_v55  ;;  %v280_v60 = vsel %vm264_vm5, %v256_v50, %v272_v56  ;;  %v284_v61 = vsel %vm268_vm6, %v260_v51, %v276_v57  ;;  %v2171_v48 = vunpack.c.l.bf16 %v2715_v2  ;;  %v2180_v53 = vunpack.c.h.bf16 %v2724_v4 }
  0xeb   :  { %v279_v62 = vsel %vm263_vm7, %v255_v52, %v271_v58  ;;  %v283_v63 = vsel %vm267_vm8, %v259_v54, %v275_v59  ;;  %v2179_v56 = vunpack.c.l.bf16 %v2724_v4  ;;  %vm567_vm2 = vcmask 244736  }
  0xec   :  { %v2512_v5 = vpack.c.bf16 %v280_v60, %v279_v62  ;;  %v2520_v6 = vpack.c.bf16 %v284_v61, %v283_v63  ;;  %vm608_vm3 = vcmask 236544  }
  0xee   :  { %2513 = vmatprep.subr.bf16.mxu0 %v2512_v5  ;;  %2521 = vmatprep.subr.bf16.mxu1 %v2520_v6 }
  0xef   :  { %2515 = vmatpush3.bf16.msra.mxu0 %v2512_v5  ;;  %2523 = vmatpush3.bf16.msra.mxu1 %v2520_v6  ;;  %v2093_v6 = vld [vmem:[%s3283_s1 + $0x20] sm:$0xff] }
  0xf2   :  { %2333 = vmatmul.mubr.msk.f32.vlgmr.msra.gmra.mrb[4].mxu0 %vm70_vm0, %v286_v7  ;;  %2347 = vmatmul.mubr.msk.f32.vlgmr.msra.gmra.mrb[4].mxu1 %vm70_vm0, %v286_v7 }
  0xf3   :  { %2335 = vmatprep.mubr.msk.f32.mxu0 %vm70_vm0, %v287_v8  ;;  %2349 = vmatprep.mubr.msk.f32.mxu1 %vm70_vm0, %v287_v8  ;;  %v2098_v8 = vld [vmem:[%s3284_s2 + $0x28] sm:$0xff] }
  0xf6   :  { %2336 = vmatmul.mubr.msk.f32.gmra.mrb[6].mxu0 %vm70_vm0, %v288_v9  ;;  %2350 = vmatmul.mubr.msk.f32.gmra.mrb[6].mxu1 %vm70_vm0, %v288_v9  ;;  %v2097_v9 = vld [vmem:[%s3284_s2 + $0x20] sm:$0xff] }
  0xf7   :  { %2360 = vmatprep.mubr.msk.f32.mxu0 %vm70_vm0, %v2093_v6  ;;  %2374 = vmatprep.mubr.msk.f32.mxu1 %vm70_vm0, %v2093_v6  ;;  %v2095_v6 = vld [vmem:[%s3283_s1 + $0x30] sm:$0xff] }
 0x1c5   :  { %v2334_v12 = vpop.f32.mrb[4].mxu0  ;;  %v2348_v13 = vpop.f32.mrb[4].mxu1 }
 0x1c6   :  { %v397_v15 = vadd.f32 %v2334_v12, %v301_v11  ;;  %v482_v16 = vadd.f32 %v2348_v13, %v301_v11  ;;  %v391_v17 = vpop.f32.mrb[5].mxu0  ;;  %v476_v18 = vpop.f32.mrb[5].mxu1  ;;  %v2099_v11 = vld [vmem:[%s3284_s2 + $0x30] sm:$0xff]  ;;  %v2114_v12 = vld [vmem:[%s3285_s4 + $0x28] sm:$0xff]  ;;  %v2113_v13 = vld [vmem:[%s3285_s4 + $0x20] sm:$0xff] }
 0x1c7   :  { %v392_v21 = vadd.f32 %v391_v17, %v296_v10  ;;  %v477_v22 = vadd.f32 %v476_v18, %v296_v10  ;;  %v2100_v10 = vld [vmem:[%s3284_s2 + $0x38] sm:$0xff] }
 0x1c8   :  { %v496_v23 = vmul.f32 0.999995, %v397_v15  ;;  %v500_v24 = vmul.f32 0.999995, %v482_v16  ;;  %v2115_v15 = vld [vmem:[%s3285_s4 + $0x30] sm:$0xff] }
 0x1c9   :  { %v495_v26 = vmul.f32 0.999995, %v392_v21  ;;  %v499_v27 = vmul.f32 0.999995, %v477_v22  ;;  %v2337_v28 = vpop.f32.mrb[6].mxu0  ;;  %v2351_v29 = vpop.f32.mrb[6].mxu1 }
 0x1ca   :  { %v504_v30 = vadd.f32 %v2168_v14, %v496_v23  ;;  %v401_v31 = vpop.f32.mrb[7].mxu0  ;;  %v486_v32 = vpop.f32.mrb[7].mxu1  ;;  %v508_v33 = vadd.f32 %v2176_v19, %v500_v24  ;;  %v407_v39 = vadd.f32 %v2337_v28, %v311_v37  ;;  %v492_v46 = vadd.f32 %v2351_v29, %v311_v37  ;;  %v2116_v14 = vld [vmem:[%s3285_s4 + $0x38] sm:$0xff] }
 0x1cb   :  { %v503_v34 = vadd.f32 %v2167_v20, %v495_v26  ;;  %v507_v35 = vadd.f32 %v2175_v25, %v499_v27  ;;  %v402_v1 = vadd.f32 %v401_v31, %v306_v38  ;;  %v487_v50 = vadd.f32 %v486_v32, %v306_v38 }
 0x1cc   :  { %vm512_vm9 = vcmp.ge.f32.partialorder %v504_v30, 0.0  ;;  %v520_v36 = vmul.f32 0.25, %v504_v30  ;;  %vm516_vm11 = vcmp.ge.f32.partialorder %v508_v33, 0.0  ;;  %v524_v42 = vmul.f32 0.25, %v508_v33 }
 0x1cd   :  { %vm511_vm10 = vcmp.ge.f32.partialorder %v503_v34, 0.0  ;;  %v519_v0 = vmul.f32 0.25, %v503_v34  ;;  %vm515_vm12 = vcmp.ge.f32.partialorder %v507_v35, 0.0  ;;  %v523_v43 = vmul.f32 0.25, %v507_v35 }
 0x1ce   :  { %v2802_v40 = vsel %vm512_vm9, %v504_v30, %v520_v36  ;;  %v498_v45 = vmul.f32 0.999995, %v407_v39  ;;  %v2811_v47 = vsel %vm516_vm11, %v508_v33, %v524_v42  ;;  %v497_v49 = vmul.f32 0.999995, %v402_v1 }
 0x1cf   :  { %545 = vrot.lane.b32.xlu1 %v2802_v40, %s2656_s16  ;;  %v2806_v41 = vsel %vm511_vm10, %v503_v34, %v519_v0  ;;  %v2816_v51 = vsel %vm515_vm12, %v507_v35, %v523_v43  ;;  %v502_v54 = vmul.f32 0.999995, %v492_v46  ;;  %v501_v57 = vmul.f32 0.999995, %v487_v50 }
 0x1d0   :  { %543 = vrot.lane.b32.xlu0 %v2806_v41, %s2656_s16  ;;  %v506_v52 = vadd.f32 %v2172_v44, %v498_v45  ;;  %v505_v55 = vadd.f32 %v2171_v48, %v497_v49 }
 0x1d1   :  { %v510_v2 = vadd.f32 %v2180_v53, %v502_v54  ;;  %v509_v59 = vadd.f32 %v2179_v56, %v501_v57 }
 0x1d2   :  { %v522_v58 = vmul.f32 0.25, %v506_v52  ;;  %vm514_vm13 = vcmp.ge.f32.partialorder %v506_v52, 0.0  ;;  %v521_v60 = vmul.f32 0.25, %v505_v55  ;;  %vm513_vm14 = vcmp.ge.f32.partialorder %v505_v55, 0.0 }
 0x1d3   :  { %553 = vrot.lane.b32.xlu1 %v2811_v47, %s2656_s16  ;;  %v526_v62 = vmul.f32 0.25, %v510_v2  ;;  %vm518_vm15 = vcmp.ge.f32.partialorder %v510_v2, 0.0  ;;  %v525_v63 = vmul.f32 0.25, %v509_v59  ;;  %vm517_vm1 = vcmp.ge.f32.partialorder %v509_v59, 0.0 }
 0x1d4   :  { %551 = vrot.lane.b32.xlu0 %v2816_v51, %s2656_s16  ;;  %v2826_v61 = vsel %vm514_vm13, %v506_v52, %v522_v58  ;;  %v2830_v4 = vsel %vm513_vm14, %v505_v55, %v521_v60 }
 0x1d5   :  { %v2834_v5 = vsel %vm518_vm15, %v510_v2, %v526_v62  ;;  %v2841_v7 = vsel %vm517_vm1, %v509_v59, %v525_v63  ;;  %v2094_v63 = vld [vmem:[%s3283_s1 + $0x28] sm:$0xff] }
 0x1d7   :  { %586 = vrot.lane.b32.xlu1 %v2802_v40, %s2657_s17 }
 0x1d8   :  { %584 = vrot.lane.b32.xlu0 %v2806_v41, %s2657_s17 }
 0x1db   :  { %594 = vrot.lane.b32.xlu1 %v2811_v47, %s2657_s17 }
 0x1dc   :  { %592 = vrot.lane.b32.xlu0 %v2816_v51, %s2657_s17 }
 0x1df   :  { %549 = vrot.lane.b32.xlu1 %v2826_v61, %s2656_s16 }
 0x1e0   :  { %547 = vrot.lane.b32.xlu0 %v2830_v4, %s2656_s16 }
 0x1e3   :  { %557 = vrot.lane.b32.xlu1 %v2834_v5, %s2656_s16 }
 0x1e4   :  { %555 = vrot.lane.b32.xlu0 %v2841_v7, %s2656_s16 }
 0x1e7   :  { %590 = vrot.lane.b32.xlu1 %v2826_v61, %s2657_s17 }
 0x1e8   :  { %588 = vrot.lane.b32.xlu0 %v2830_v4, %s2657_s17 }
 0x1eb   :  { %598 = vrot.lane.b32.xlu1 %v2834_v5, %s2657_s17 }
 0x1ec   :  { %596 = vrot.lane.b32.xlu0 %v2841_v7, %s2657_s17 }
 0x1ef   :  { %642 = vperm.xlu1 %2614, %v2098_v8   ;;  %v2109_v8 = vld [vmem:[%s3286_s3 + $0x20] sm:$0xff] }
 0x1f0   :  { %637 = vperm.xlu0 %2613, %v2097_v9  }
 0x1f3   :  { %652 = vperm.xlu1 %2614, %v2100_v10  }
 0x1f4   :  { %647 = vperm.xlu0 %2613, %v2099_v11  }
 0x1f7   :  { %886 = vperm.xlu1 %2614, %v2114_v12  }
 0x1f8   :  { %881 = vperm.xlu0 %2613, %v2113_v13  }
 0x1fb   :  { %896 = vperm.xlu1 %2614, %v2116_v14  }
 0x1fc   :  { %891 = vperm.xlu0 %2613, %v2115_v15  }
 0x241   :  { %v546_v16 = vpop.permute.xlu1 %545 }
 0x242   :  { %v544_v17 = vpop.permute.xlu0 %543  ;;  %v569_v19 = vsel %vm567_vm2, %v546_v16, 0.0 }
 0x243   :  { %v568_v21 = vsel %vm567_vm2, %v544_v17, 0.0  ;;  %v577_v22 = vmax.f32 %v2802_v40, %v569_v19 }
 0x244   :  { %v576_v24 = vmax.f32 %v2806_v41, %v568_v21 }
 0x245   :  { %v554_v18 = vpop.permute.xlu1 %553 }
 0x246   :  { %v552_v20 = vpop.permute.xlu0 %551  ;;  %v573_v25 = vsel %vm567_vm2, %v554_v18, 0.0 }
 0x247   :  { %v572_v28 = vsel %vm567_vm2, %v552_v20, 0.0  ;;  %v581_v32 = vmax.f32 %v2811_v47, %v573_v25 }
 0x248   :  { %v580_v34 = vmax.f32 %v2816_v51, %v572_v28 }
 0x249   :  { %v587_v23 = vpop.permute.xlu1 %586 }
 0x24a   :  { %v610_v26 = vsel %vm608_vm3, %v587_v23, 0.0  ;;  %v585_v27 = vpop.permute.xlu0 %584 }
 0x24b   :  { %v2882_v29 = vmax.f32 %v577_v22, %v610_v26  ;;  %v609_v30 = vsel %vm608_vm3, %v585_v27, 0.0 }
 0x24c   :  { %v2885_v31 = vmax.f32 %v576_v24, %v609_v30 }
 0x24d   :  { %v595_v33 = vpop.permute.xlu1 %594 }
 0x24e   :  { %v2524_v35 = vpack.c.bf16 %v2882_v29, %v2885_v31  ;;  %v614_v36 = vsel %vm608_vm3, %v595_v33, 0.0  ;;  %v593_v37 = vpop.permute.xlu0 %592 }
 0x24f   :  { %v2892_v0 = vmax.f32 %v581_v32, %v614_v36  ;;  %v613_v38 = vsel %vm608_vm3, %v593_v37, 0.0 }
 0x250   :  { %v2895_v39 = vmax.f32 %v580_v34, %v613_v38  ;;  %2525 = vmatprep.subr.bf16.mxu0 %v2524_v35 }
 0x251   :  { %v550_v40 = vpop.permute.xlu1 %549  ;;  %2527 = vmatpush3.bf16.msra.mxu0 %v2524_v35 }
 0x252   :  { %v2532_v1 = vpack.c.bf16 %v2892_v0, %v2895_v39  ;;  %v548_v41 = vpop.permute.xlu0 %547  ;;  %v571_v43 = vsel %vm567_vm2, %v550_v40, 0.0 }
 0x253   :  { %v570_v45 = vsel %vm567_vm2, %v548_v41, 0.0  ;;  %v579_v46 = vmax.f32 %v2826_v61, %v571_v43 }
 0x254   :  { %2533 = vmatprep.subr.bf16.mxu1 %v2532_v1  ;;  %v578_v48 = vmax.f32 %v2830_v4, %v570_v45 }
 0x255   :  { %v558_v42 = vpop.permute.xlu1 %557  ;;  %2535 = vmatpush3.bf16.msra.mxu1 %v2532_v1 }
 0x256   :  { %v556_v44 = vpop.permute.xlu0 %555  ;;  %v575_v49 = vsel %vm567_vm2, %v558_v42, 0.0 }
 0x257   :  { %v574_v52 = vsel %vm567_vm2, %v556_v44, 0.0  ;;  %v583_v56 = vmax.f32 %v2834_v5, %v575_v49 }
 0x258   :  { %v582_v2 = vmax.f32 %v2841_v7, %v574_v52  ;;  %v2096_v7 = vld [vmem:[%s3283_s1 + $0x38] sm:$0xff] }
 0x259   :  { %v591_v47 = vpop.permute.xlu1 %590 }
 0x25a   :  { %v612_v50 = vsel %vm608_vm3, %v591_v47, 0.0  ;;  %v589_v51 = vpop.permute.xlu0 %588 }
 0x25b   :  { %v2906_v53 = vmax.f32 %v579_v46, %v612_v50  ;;  %v611_v54 = vsel %vm608_vm3, %v589_v51, 0.0 }
 0x25c   :  { %v2909_v55 = vmax.f32 %v578_v48, %v611_v54 }
 0x25d   :  { %v599_v57 = vpop.permute.xlu1 %598 }
 0x25e   :  { %v2528_v58 = vpack.c.bf16 %v2906_v53, %v2909_v55  ;;  %v616_v59 = vsel %vm608_vm3, %v599_v57, 0.0  ;;  %v597_v60 = vpop.permute.xlu0 %596 }
 0x25f   :  { %v2916_v61 = vmax.f32 %v583_v56, %v616_v59  ;;  %v615_v62 = vsel %vm608_vm3, %v597_v60, 0.0  ;;  %v2110_v59 = vld [vmem:[%s3286_s3 + $0x28] sm:$0xff] }
 0x260   :  { %v2919_v4 = vmax.f32 %v582_v2, %v615_v62  ;;  %2529 = vmatprep.subr.bf16.mxu0 %v2528_v58  ;;  %v2111_v62 = vld [vmem:[%s3286_s3 + $0x30] sm:$0xff] }
 0x261   :  { %2531 = vmatpush3.bf16.msra.mxu0 %v2528_v58 }
 0x262   :  { %v2536_v5 = vpack.c.bf16 %v2916_v61, %v2919_v4 }
 0x264   :  { %2361 = vmatmul.mubr.msk.f32.vlgmr.msra.gmra.mrb[8].mxu0 %vm70_vm0, %v2094_v63  ;;  %2537 = vmatprep.subr.bf16.mxu1 %v2536_v5 }
 0x265   :  { %2539 = vmatpush3.bf16.msra.mxu1 %v2536_v5  ;;  %2363 = vmatprep.mubr.msk.f32.mxu0 %vm70_vm0, %v2095_v6 }
 0x268   :  { %2364 = vmatmul.mubr.msk.f32.gmra.mrb[10].mxu0 %vm70_vm0, %v2096_v7  ;;  %2375 = vmatmul.mubr.msk.f32.vlgmr.msra.gmra.mrb[8].mxu1 %vm70_vm0, %v2094_v63  ;;  %v2112_v63 = vld [vmem:[%s3286_s3 + $0x38] sm:$0xff] }
 0x269   :  { %2377 = vmatprep.mubr.msk.f32.mxu1 %vm70_vm0, %v2095_v6  ;;  %2388 = vmatprep.mubr.msk.f32.mxu0 %vm70_vm0, %v2109_v8 }
 0x26c   :  { %2378 = vmatmul.mubr.msk.f32.gmra.mrb[10].mxu1 %vm70_vm0, %v2096_v7 }
 0x26d   :  { %2402 = vmatprep.mubr.msk.f32.mxu1 %vm70_vm0, %v2109_v8 }
 0x26e   :  { %v643_v9 = vpop.permute.xlu1 %642 }
 0x26f   :  { %v638_v10 = vpop.permute.xlu0 %637 }
 0x272   :  { %v653_v15 = vpop.permute.xlu1 %652 }
 0x273   :  { %v648_v16 = vpop.permute.xlu0 %647 }
 0x276   :  { %v887_v5 = vpop.permute.xlu1 %886 }
 0x277   :  { %v882_v7 = vpop.permute.xlu0 %881 }
 0x337   :  { %v2362_v11 = vpop.f32.mrb[8].mxu0 }
 0x338   :  { %v739_v12 = vadd.f32 %v2362_v11, %v643_v9  ;;  %v733_v13 = vpop.f32.mrb[9].mxu0 }
 0x339   :  { %v734_v14 = vadd.f32 %v733_v13, %v638_v10 }
 0x33a   :  { %v838_v17 = vmul.f32 0.999995, %v739_v12 }
 0x33b   :  { %v837_v18 = vmul.f32 0.999995, %v734_v14  ;;  %v2365_v19 = vpop.f32.mrb[10].mxu0  ;;  %v2376_v20 = vpop.f32.mrb[8].mxu1 }
 0x33c   :  { %vm846_vm4 = vcmp.ge.f32.partialorder %v838_v17, 0.0  ;;  %v854_v21 = vmul.f32 0.25, %v838_v17  ;;  %v749_v22 = vadd.f32 %v2365_v19, %v653_v15  ;;  %v824_v23 = vadd.f32 %v2376_v20, %v643_v9  ;;  %v743_v24 = vpop.f32.mrb[11].mxu0  ;;  %v818_v25 = vpop.f32.mrb[9].mxu1 }
 0x33d   :  { %vm845_vm5 = vcmp.ge.f32.partialorder %v837_v18, 0.0  ;;  %v853_v26 = vmul.f32 0.25, %v837_v18  ;;  %v744_v27 = vadd.f32 %v743_v24, %v648_v16  ;;  %v819_v28 = vadd.f32 %v818_v25, %v638_v10 }
 0x33e   :  { %v840_v30 = vmul.f32 0.999995, %v749_v22  ;;  %v842_v32 = vmul.f32 0.999995, %v824_v23  ;;  %v862_v37 = vsel %vm846_vm4, %v838_v17, %v854_v21 }
 0x33f   :  { %v839_v33 = vmul.f32 0.999995, %v744_v27  ;;  %v841_v34 = vmul.f32 0.999995, %v819_v28  ;;  %v2379_v35 = vpop.f32.mrb[10].mxu1  ;;  %v861_v36 = vsel %vm845_vm5, %v837_v18, %v853_v26  ;;  %v897_v27 = vpop.permute.xlu1 %896  ;;  %vm1153_vm5 = vcmask 228352  }
 0x340   :  { %vm848_vm6 = vcmp.ge.f32.partialorder %v840_v30, 0.0  ;;  %v856_v38 = vmul.f32 0.25, %v840_v30  ;;  %vm850_vm7 = vcmp.ge.f32.partialorder %v842_v32, 0.0  ;;  %v858_v40 = vmul.f32 0.25, %v842_v32  ;;  %v828_v1 = vpop.f32.mrb[11].mxu1 }
 0x341   :  { %vm847_vm8 = vcmp.ge.f32.partialorder %v839_v33, 0.0  ;;  %v855_v41 = vmul.f32 0.25, %v839_v33  ;;  %vm849_vm9 = vcmp.ge.f32.partialorder %v841_v34, 0.0  ;;  %v857_v42 = vmul.f32 0.25, %v841_v34 }
 0x342   :  { %v834_v43 = vadd.f32 %v2379_v35, %v653_v15  ;;  %v829_v44 = vadd.f32 %v828_v1, %v648_v16  ;;  %v2540_v45 = vpack.c.bf16 %v862_v37, %v861_v36  ;;  %v864_v46 = vsel %vm848_vm6, %v840_v30, %v856_v38 }
 0x343   :  { %v863_v47 = vsel %vm847_vm8, %v839_v33, %v855_v41  ;;  %v865_v48 = vsel %vm849_vm9, %v841_v34, %v857_v42  ;;  %v866_v49 = vsel %vm850_vm7, %v842_v32, %v858_v40  ;;  %v892_v33 = vpop.permute.xlu0 %891  ;;  %vm1194_vm6 = vcmask 203776  }
 0x344   :  { %v844_v50 = vmul.f32 0.999995, %v834_v43  ;;  %v843_v51 = vmul.f32 0.999995, %v829_v44  ;;  %2541 = vmatprep.subr.bf16.mxu0 %v2540_v45  ;;  %v2544_v52 = vpack.c.bf16 %v864_v46, %v863_v47  ;;  %v2548_v54 = vpack.c.bf16 %v866_v49, %v865_v48 }
 0x345   :  { %2543 = vmatpush3.bf16.msra.mxu0 %v2540_v45 }
 0x346   :  { %vm852_vm10 = vcmp.ge.f32.partialorder %v844_v50, 0.0  ;;  %v860_v56 = vmul.f32 0.25, %v844_v50  ;;  %vm851_vm11 = vcmp.ge.f32.partialorder %v843_v51, 0.0  ;;  %v859_v57 = vmul.f32 0.25, %v843_v51  ;;  %2545 = vmatprep.subr.bf16.mxu0 %v2544_v52  ;;  %2549 = vmatprep.subr.bf16.mxu1 %v2548_v54 }
 0x347   :  { %2551 = vmatpush3.bf16.msra.mxu1 %v2548_v54  ;;  %v2129_v54 = vld [vmem:[%s3284_s2 + $0x40] sm:$0xff] }
 0x348   :  { %v867_v2 = vsel %vm851_vm11, %v843_v51, %v859_v57  ;;  %v868_v58 = vsel %vm852_vm10, %v844_v50, %v860_v56  ;;  %v2125_v50 = vld [vmem:[%s3283_s1 + $0x40] sm:$0xff]  ;;  %v2132_v56 = vld [vmem:[%s3284_s2 + $0x58] sm:$0xff]  ;;  %v2131_v57 = vld [vmem:[%s3284_s2 + $0x50] sm:$0xff] }
 0x349   :  { %2547 = vmatpush3.bf16.msra.mxu0 %v2544_v52  ;;  %v2552_v60 = vpack.c.bf16 %v868_v58, %v867_v2  ;;  %v2130_v52 = vld [vmem:[%s3284_s2 + $0x48] sm:$0xff]  ;;  %v2145_v58 = vld [vmem:[%s3285_s4 + $0x40] sm:$0xff] }
 0x34a   :  { %v2146_v2 = vld [vmem:[%s3285_s4 + $0x48] sm:$0xff] }
 0x34b   :  { %2553 = vmatprep.subr.bf16.mxu1 %v2552_v60 }
 0x34c   :  { %2389 = vmatmul.mubr.msk.f32.vlgmr.msra.gmra.mrb[12].mxu0 %vm70_vm0, %v2110_v59  ;;  %2555 = vmatpush3.bf16.msra.mxu1 %v2552_v60  ;;  %v2147_v60 = vld [vmem:[%s3285_s4 + $0x50] sm:$0xff] }
 0x34d   :  { %2391 = vmatprep.mubr.msk.f32.mxu0 %vm70_vm0, %v2111_v62 }
 0x34f   :  { %2403 = vmatmul.mubr.msk.f32.vlgmr.msra.gmra.mrb[12].mxu1 %vm70_vm0, %v2110_v59  ;;  %v2148_v59 = vld [vmem:[%s3285_s4 + $0x58] sm:$0xff] }
 0x350   :  { %2392 = vmatmul.mubr.msk.f32.gmra.mrb[14].mxu0 %vm70_vm0, %v2112_v63  ;;  %2405 = vmatprep.mubr.msk.f32.mxu1 %vm70_vm0, %v2111_v62 }
 0x351   :  { %2416 = vmatprep.mubr.msk.f32.mxu0 %vm70_vm0, %v2125_v50 }
 0x353   :  { %2406 = vmatmul.mubr.msk.f32.gmra.mrb[14].mxu1 %vm70_vm0, %v2112_v63 }
 0x354   :  { %2430 = vmatprep.mubr.msk.f32.mxu1 %vm70_vm0, %v2125_v50  ;;  %v2127_v50 = vld [vmem:[%s3283_s1 + $0x50] sm:$0xff] }
 0x41f   :  { %v2390_v6 = vpop.f32.mrb[12].mxu0 }
 0x420   :  { %v983_v8 = vadd.f32 %v2390_v6, %v887_v5  ;;  %v977_v9 = vpop.f32.mrb[13].mxu0 }
 0x421   :  { %v978_v10 = vadd.f32 %v977_v9, %v882_v7 }
 0x422   :  { %v1082_v11 = vmul.f32 0.999995, %v983_v8  ;;  %v2404_v12 = vpop.f32.mrb[12].mxu1 }
 0x423   :  { %v1081_v13 = vmul.f32 0.999995, %v978_v10  ;;  %v2393_v14 = vpop.f32.mrb[14].mxu0  ;;  %v1068_v15 = vadd.f32 %v2404_v12, %v887_v5  ;;  %v1062_v16 = vpop.f32.mrb[13].mxu1 }
 0x424   :  { %v1090_v17 = vadd.f32 %v1082_v11, %v2882_v29  ;;  %v987_v18 = vpop.f32.mrb[15].mxu0  ;;  %v1063_v19 = vadd.f32 %v1062_v16, %v882_v7  ;;  %v993_v30 = vadd.f32 %v2393_v14, %v897_v27 }
 0x425   :  { %v1089_v20 = vadd.f32 %v1081_v13, %v2885_v31  ;;  %v1086_v21 = vmul.f32 0.999995, %v1068_v15  ;;  %v988_v34 = vadd.f32 %v987_v18, %v892_v33 }
 0x426   :  { %v1085_v22 = vmul.f32 0.999995, %v1063_v19  ;;  %v2407_v23 = vpop.f32.mrb[14].mxu1  ;;  %vm1098_vm12 = vcmp.ge.f32.partialorder %v1090_v17, 0.0  ;;  %v1106_v26 = vmul.f32 0.25, %v1090_v17 }
 0x427   :  { %v1094_v24 = vadd.f32 %v1086_v21, %v2892_v0  ;;  %v1072_v25 = vpop.f32.mrb[15].mxu1  ;;  %vm1097_vm13 = vcmp.ge.f32.partialorder %v1089_v20, 0.0  ;;  %v1105_v29 = vmul.f32 0.25, %v1089_v20  ;;  %v1084_v36 = vmul.f32 0.999995, %v993_v30 }
 0x428   :  { %v1093_v28 = vadd.f32 %v1085_v22, %v2895_v39  ;;  %v2963_v32 = vsel %vm1098_vm12, %v1090_v17, %v1106_v26  ;;  %v1078_v37 = vadd.f32 %v2407_v23, %v897_v27  ;;  %v1083_v40 = vmul.f32 0.999995, %v988_v34 }
 0x429   :  { %1131 = vrot.lane.b32.xlu1 %v2963_v32, %s2658_s26  ;;  %vm1102_vm14 = vcmp.ge.f32.partialorder %v1094_v24, 0.0  ;;  %v1110_v31 = vmul.f32 0.25, %v1094_v24  ;;  %v2967_v0 = vsel %vm1097_vm13, %v1089_v20, %v1105_v29  ;;  %v1073_v1 = vadd.f32 %v1072_v25, %v892_v33 }
 0x42a   :  { %vm1101_vm15 = vcmp.ge.f32.partialorder %v1093_v28, 0.0  ;;  %v1109_v35 = vmul.f32 0.25, %v1093_v28  ;;  %1129 = vrot.lane.b32.xlu0 %v2967_v0, %s2658_s26  ;;  %v1092_v41 = vadd.f32 %v1084_v36, %v2906_v53  ;;  %v1088_v42 = vmul.f32 0.999995, %v1078_v37 }
 0x42b   :  { %v2971_v39 = vsel %vm1102_vm14, %v1094_v24, %v1110_v31  ;;  %v1091_v43 = vadd.f32 %v1083_v40, %v2909_v55  ;;  %v1087_v44 = vmul.f32 0.999995, %v1073_v1 }
 0x42c   :  { %v2973_v38 = vsel %vm1101_vm15, %v1093_v28, %v1109_v35  ;;  %v1096_v45 = vadd.f32 %v1088_v42, %v2916_v61  ;;  %v1108_v46 = vmul.f32 0.25, %v1092_v41  ;;  %vm1100_vm1 = vcmp.ge.f32.partialorder %v1092_v41, 0.0 }
 0x42d   :  { %1139 = vrot.lane.b32.xlu1 %v2971_v39, %s2658_s26  ;;  %v1095_v53 = vadd.f32 %v1087_v44, %v2919_v4  ;;  %v1107_v47 = vmul.f32 0.25, %v1091_v43  ;;  %vm1099_vm2 = vcmp.ge.f32.partialorder %v1091_v43, 0.0 }
 0x42e   :  { %1137 = vrot.lane.b32.xlu0 %v2973_v38, %s2658_s26  ;;  %v2991_v48 = vsel %vm1100_vm1, %v1092_v41, %v1108_v46  ;;  %v1112_v55 = vmul.f32 0.25, %v1096_v45  ;;  %vm1104_vm3 = vcmp.ge.f32.partialorder %v1096_v45, 0.0 }
 0x42f   :  { %v2995_v61 = vsel %vm1099_vm2, %v1091_v43, %v1107_v47  ;;  %v1111_v49 = vmul.f32 0.25, %v1095_v53  ;;  %vm1103_vm4 = vcmp.ge.f32.partialorder %v1095_v53, 0.0 }
 0x430   :  { %v2999_v4 = vsel %vm1104_vm3, %v1096_v45, %v1112_v55 }
 0x431   :  { %1172 = vrot.lane.b32.xlu1 %v2963_v32, %s2659_s27  ;;  %v3006_v51 = vsel %vm1103_vm4, %v1095_v53, %v1111_v49  ;;  %v2126_v49 = vld [vmem:[%s3283_s1 + $0x48] sm:$0xff] }
 0x432   :  { %1170 = vrot.lane.b32.xlu0 %v2967_v0, %s2659_s27 }
 0x435   :  { %1180 = vrot.lane.b32.xlu1 %v2971_v39, %s2659_s27 }
 0x436   :  { %1178 = vrot.lane.b32.xlu0 %v2973_v38, %s2659_s27 }
 0x439   :  { %1135 = vrot.lane.b32.xlu1 %v2991_v48, %s2658_s26 }
 0x43a   :  { %1133 = vrot.lane.b32.xlu0 %v2995_v61, %s2658_s26 }
 0x43d   :  { %1143 = vrot.lane.b32.xlu1 %v2999_v4, %s2658_s26 }
 0x43e   :  { %1141 = vrot.lane.b32.xlu0 %v3006_v51, %s2658_s26 }
 0x441   :  { %1176 = vrot.lane.b32.xlu1 %v2991_v48, %s2659_s27 }
 0x442   :  { %1174 = vrot.lane.b32.xlu0 %v2995_v61, %s2659_s27 }
 0x445   :  { %1184 = vrot.lane.b32.xlu1 %v2999_v4, %s2659_s27 }
 0x446   :  { %1182 = vrot.lane.b32.xlu0 %v3006_v51, %s2659_s27 }
 0x449   :  { %1228 = vperm.xlu1 %2614, %v2130_v52   ;;  %v2141_v52 = vld [vmem:[%s3286_s3 + $0x40] sm:$0xff] }
 0x44a   :  { %1223 = vperm.xlu0 %2613, %v2129_v54  }
 0x44d   :  { %1238 = vperm.xlu1 %2614, %v2132_v56  }
 0x44e   :  { %1233 = vperm.xlu0 %2613, %v2131_v57  }
 0x451   :  { %1472 = vperm.xlu1 %2614, %v2146_v2  }
 0x452   :  { %1467 = vperm.xlu0 %2613, %v2145_v58  }
 0x455   :  { %1482 = vperm.xlu1 %2614, %v2148_v59  }
 0x456   :  { %1477 = vperm.xlu0 %2613, %v2147_v60  }
 0x49b   :  { %v1132_v62 = vpop.permute.xlu1 %1131 }
 0x49c   :  { %v1130_v63 = vpop.permute.xlu0 %1129  ;;  %v1155_v6 = vsel %vm1153_vm5, %v1132_v62, 0.0 }
 0x49d   :  { %v1154_v8 = vsel %vm1153_vm5, %v1130_v63, 0.0  ;;  %v1163_v9 = vmax.f32 %v2963_v32, %v1155_v6 }
 0x49e   :  { %v1162_v13 = vmax.f32 %v2967_v0, %v1154_v8 }
 0x49f   :  { %v1140_v5 = vpop.permute.xlu1 %1139 }
 0x4a0   :  { %v1138_v7 = vpop.permute.xlu0 %1137  ;;  %v1159_v11 = vsel %vm1153_vm5, %v1140_v5, 0.0 }
 0x4a1   :  { %v1158_v16 = vsel %vm1153_vm5, %v1138_v7, 0.0  ;;  %v1167_v18 = vmax.f32 %v2971_v39, %v1159_v11 }
 0x4a2   :  { %v1166_v22 = vmax.f32 %v2973_v38, %v1158_v16 }
 0x4a3   :  { %v1173_v10 = vpop.permute.xlu1 %1172 }
 0x4a4   :  { %v1196_v12 = vsel %vm1194_vm6, %v1173_v10, 0.0  ;;  %v1171_v15 = vpop.permute.xlu0 %1170 }
 0x4a5   :  { %v3050_v14 = vmax.f32 %v1163_v9, %v1196_v12  ;;  %v1195_v17 = vsel %vm1194_vm6, %v1171_v15, 0.0 }
 0x4a6   :  { %v3055_v19 = vmax.f32 %v1162_v13, %v1195_v17 }
 0x4a7   :  { %v1181_v20 = vpop.permute.xlu1 %1180 }
 0x4a8   :  { %v1200_v21 = vsel %vm1194_vm6, %v1181_v20, 0.0  ;;  %v2556_v23 = vpack.c.bf16 %v3050_v14, %v3055_v19  ;;  %v1179_v25 = vpop.permute.xlu0 %1178 }
 0x4a9   :  { %v3061_v24 = vmax.f32 %v1167_v18, %v1200_v21  ;;  %v1199_v26 = vsel %vm1194_vm6, %v1179_v25, 0.0 }
 0x4aa   :  { %v3064_v27 = vmax.f32 %v1166_v22, %v1199_v26  ;;  %2557 = vmatprep.subr.bf16.mxu0 %v2556_v23 }
 0x4ab   :  { %v1136_v28 = vpop.permute.xlu1 %1135  ;;  %2559 = vmatpush3.bf16.msra.mxu0 %v2556_v23 }
 0x4ac   :  { %v2564_v30 = vpack.c.bf16 %v3061_v24, %v3064_v27  ;;  %v1134_v32 = vpop.permute.xlu0 %1133  ;;  %v1157_v33 = vsel %vm1153_vm5, %v1136_v28, 0.0 }
 0x4ad   :  { %v1156_v34 = vsel %vm1153_vm5, %v1134_v32, 0.0  ;;  %v1165_v0 = vmax.f32 %v2991_v48, %v1157_v33 }
 0x4ae   :  { %2565 = vmatprep.subr.bf16.mxu1 %v2564_v30  ;;  %v1164_v37 = vmax.f32 %v2995_v61, %v1156_v34 }
 0x4af   :  { %v1144_v29 = vpop.permute.xlu1 %1143  ;;  %2567 = vmatpush3.bf16.msra.mxu1 %v2564_v30 }
 0x4b0   :  { %v1142_v31 = vpop.permute.xlu0 %1141  ;;  %v1161_v39 = vsel %vm1153_vm5, %v1144_v29, 0.0 }
 0x4b1   :  { %v1160_v1 = vsel %vm1153_vm5, %v1142_v31, 0.0  ;;  %v1169_v42 = vmax.f32 %v2999_v4, %v1161_v39 }
 0x4b2   :  { %v1168_v46 = vmax.f32 %v3006_v51, %v1160_v1  ;;  %v2128_v51 = vld [vmem:[%s3283_s1 + $0x58] sm:$0xff] }
 0x4b3   :  { %v1177_v35 = vpop.permute.xlu1 %1176 }
 0x4b4   :  { %v1198_v36 = vsel %vm1194_vm6, %v1177_v35, 0.0  ;;  %v1175_v40 = vpop.permute.xlu0 %1174 }
 0x4b5   :  { %v3074_v38 = vmax.f32 %v1165_v0, %v1198_v36  ;;  %v1197_v41 = vsel %vm1194_vm6, %v1175_v40, 0.0 }
 0x4b6   :  { %v3079_v43 = vmax.f32 %v1164_v37, %v1197_v41 }
 0x4b7   :  { %v1185_v44 = vpop.permute.xlu1 %1184 }
 0x4b8   :  { %v1202_v45 = vsel %vm1194_vm6, %v1185_v44, 0.0  ;;  %v2560_v53 = vpack.c.bf16 %v3074_v38, %v3079_v43  ;;  %v1183_v48 = vpop.permute.xlu0 %1182 }
 0x4b9   :  { %v3085_v47 = vmax.f32 %v1169_v42, %v1202_v45  ;;  %v1201_v55 = vsel %vm1194_vm6, %v1183_v48, 0.0 }
 0x4ba   :  { %v3088_v61 = vmax.f32 %v1168_v46, %v1201_v55  ;;  %2561 = vmatprep.subr.bf16.mxu0 %v2560_v53  ;;  %v2143_v55 = vld [vmem:[%s3286_s3 + $0x50] sm:$0xff] }
 0x4bb   :  { %2563 = vmatpush3.bf16.msra.mxu0 %v2560_v53  ;;  %v2142_v53 = vld [vmem:[%s3286_s3 + $0x48] sm:$0xff] }
 0x4bc   :  { %v2568_v4 = vpack.c.bf16 %v3085_v47, %v3088_v61 }
 0x4be   :  { %2417 = vmatmul.mubr.msk.f32.vlgmr.msra.gmra.mrb[16].mxu0 %vm70_vm0, %v2126_v49  ;;  %2569 = vmatprep.subr.bf16.mxu1 %v2568_v4 }
 0x4bf   :  { %2571 = vmatpush3.bf16.msra.mxu1 %v2568_v4  ;;  %2419 = vmatprep.mubr.msk.f32.mxu0 %vm70_vm0, %v2127_v50 }
 0x4c2   :  { %2420 = vmatmul.mubr.msk.f32.gmra.mrb[18].mxu0 %vm70_vm0, %v2128_v51  ;;  %2431 = vmatmul.mubr.msk.f32.vlgmr.msra.gmra.mrb[16].mxu1 %vm70_vm0, %v2126_v49  ;;  %v2144_v49 = vld [vmem:[%s3286_s3 + $0x58] sm:$0xff]  ;;  %s2660_s3 = smov 119  }
 0x4c3   :  { %2433 = vmatprep.mubr.msk.f32.mxu1 %vm70_vm0, %v2127_v50  ;;  %2444 = vmatprep.mubr.msk.f32.mxu0 %vm70_vm0, %v2141_v52 }
 0x4c6   :  { %2434 = vmatmul.mubr.msk.f32.gmra.mrb[18].mxu1 %vm70_vm0, %v2128_v51 }
 0x4c7   :  { %2458 = vmatprep.mubr.msk.f32.mxu1 %vm70_vm0, %v2141_v52 }
 0x4c8   :  { %v1229_v54 = vpop.permute.xlu1 %1228 }
 0x4c9   :  { %v1224_v56 = vpop.permute.xlu0 %1223 }
 0x4cc   :  { %v1239_v60 = vpop.permute.xlu1 %1238 }
 0x4cd   :  { %v1234_v62 = vpop.permute.xlu0 %1233 }
 0x4d0   :  { %v1473_v4 = vpop.permute.xlu1 %1472 }
 0x4d1   :  { %v1468_v50 = vpop.permute.xlu0 %1467 }
 0x591   :  { %v2418_v57 = vpop.f32.mrb[16].mxu0 }
 0x592   :  { %v1325_v2 = vadd.f32 %v2418_v57, %v1229_v54  ;;  %v1319_v58 = vpop.f32.mrb[17].mxu0  ;;  %v1483_v57 = vpop.permute.xlu1 %1482 }
 0x593   :  { %v1320_v59 = vadd.f32 %v1319_v58, %v1224_v56 }
 0x594   :  { %v1424_v63 = vmul.f32 0.999995, %v1325_v2 }
 0x595   :  { %v1423_v5 = vmul.f32 0.999995, %v1320_v59  ;;  %v2421_v6 = vpop.f32.mrb[18].mxu0  ;;  %v2432_v7 = vpop.f32.mrb[16].mxu1 }
 0x596   :  { %vm1432_vm7 = vcmp.ge.f32.partialorder %v1424_v63, 0.0  ;;  %v1440_v8 = vmul.f32 0.25, %v1424_v63  ;;  %v1335_v9 = vadd.f32 %v2421_v6, %v1239_v60  ;;  %v1410_v10 = vadd.f32 %v2432_v7, %v1229_v54  ;;  %v1329_v11 = vpop.f32.mrb[19].mxu0  ;;  %v1404_v12 = vpop.f32.mrb[17].mxu1 }
 0x597   :  { %vm1431_vm8 = vcmp.ge.f32.partialorder %v1423_v5, 0.0  ;;  %v1439_v13 = vmul.f32 0.25, %v1423_v5  ;;  %v1330_v15 = vadd.f32 %v1329_v11, %v1234_v62  ;;  %v1405_v16 = vadd.f32 %v1404_v12, %v1224_v56 }
 0x598   :  { %v1426_v17 = vmul.f32 0.999995, %v1335_v9  ;;  %v1428_v18 = vmul.f32 0.999995, %v1410_v10  ;;  %v1448_v25 = vsel %vm1432_vm7, %v1424_v63, %v1440_v8 }
 0x599   :  { %v1425_v20 = vmul.f32 0.999995, %v1330_v15  ;;  %v1427_v21 = vmul.f32 0.999995, %v1405_v16  ;;  %v2435_v22 = vpop.f32.mrb[18].mxu1  ;;  %v1447_v23 = vsel %vm1431_vm8, %v1423_v5, %v1439_v13  ;;  %v1478_v5 = vpop.permute.xlu0 %1477  ;;  %vm1739_vm8 = vcmask 179200  }
 0x59a   :  { %vm1434_vm9 = vcmp.ge.f32.partialorder %v1426_v17, 0.0  ;;  %v1442_v26 = vmul.f32 0.25, %v1426_v17  ;;  %vm1436_vm10 = vcmp.ge.f32.partialorder %v1428_v18, 0.0  ;;  %v1444_v28 = vmul.f32 0.25, %v1428_v18  ;;  %v1414_v30 = vpop.f32.mrb[19].mxu1 }
 0x59b   :  { %vm1433_vm11 = vcmp.ge.f32.partialorder %v1425_v20, 0.0  ;;  %v1441_v32 = vmul.f32 0.25, %v1425_v20  ;;  %vm1435_vm12 = vcmp.ge.f32.partialorder %v1427_v21, 0.0  ;;  %v1443_v29 = vmul.f32 0.25, %v1427_v21 }
 0x59c   :  { %v1420_v33 = vadd.f32 %v2435_v22, %v1239_v60  ;;  %v1415_v31 = vadd.f32 %v1414_v30, %v1234_v62  ;;  %v2572_v34 = vpack.c.bf16 %v1448_v25, %v1447_v23  ;;  %v1450_v0 = vsel %vm1434_vm9, %v1426_v17, %v1442_v26 }
 0x59d   :  { %v1449_v35 = vsel %vm1433_vm11, %v1425_v20, %v1441_v32  ;;  %v1451_v39 = vsel %vm1435_vm12, %v1427_v21, %v1443_v29  ;;  %v1452_v36 = vsel %vm1436_vm10, %v1428_v18, %v1444_v28  ;;  %vm1780_vm9 = vcmask 105472  }
 0x59e   :  { %v1430_v37 = vmul.f32 0.999995, %v1420_v33  ;;  %v1429_v40 = vmul.f32 0.999995, %v1415_v31  ;;  %2573 = vmatprep.subr.bf16.mxu0 %v2572_v34  ;;  %v2576_v1 = vpack.c.bf16 %v1450_v0, %v1449_v35  ;;  %v2580_v41 = vpack.c.bf16 %v1452_v36, %v1451_v39 }
 0x59f   :  { %2575 = vmatpush3.bf16.msra.mxu0 %v2572_v34 }
 0x5a0   :  { %vm1438_vm13 = vcmp.ge.f32.partialorder %v1430_v37, 0.0  ;;  %v1446_v42 = vmul.f32 0.25, %v1430_v37  ;;  %vm1437_vm14 = vcmp.ge.f32.partialorder %v1429_v40, 0.0  ;;  %v1445_v44 = vmul.f32 0.25, %v1429_v40  ;;  %2577 = vmatprep.subr.bf16.mxu0 %v2576_v1  ;;  %2581 = vmatprep.subr.bf16.mxu1 %v2580_v41 }
 0x5a1   :  { %2583 = vmatpush3.bf16.msra.mxu1 %v2580_v41 }
 0x5a2   :  { %v1453_v45 = vsel %vm1437_vm14, %v1429_v40, %v1445_v44  ;;  %v1454_v46 = vsel %vm1438_vm13, %v1430_v37, %v1446_v42  ;;  %v1797_v44 = vld [vmem:[%s3287_s5] sm:$0xff] }
 0x5a3   :  { %2579 = vmatpush3.bf16.msra.mxu0 %v2576_v1  ;;  %v2584_v48 = vpack.c.bf16 %v1454_v46, %v1453_v45  ;;  %v1801_v45 = vld [vmem:[%s3288_s6] sm:$0xff]  ;;  %v1802_v46 = vld [vmem:[%s3288_s6 + $0x8] sm:$0xff] }
 0x5a5   :  { %2585 = vmatprep.subr.bf16.mxu1 %v2584_v48 }
 0x5a6   :  { %2445 = vmatmul.mubr.msk.f32.vlgmr.msra.gmra.mrb[20].mxu0 %vm70_vm0, %v2142_v53  ;;  %2587 = vmatpush3.bf16.msra.mxu1 %v2584_v48  ;;  %v1804_v48 = vld [vmem:[%s3288_s6 + $0x18] sm:$0xff] }
 0x5a7   :  { %2447 = vmatprep.mubr.msk.f32.mxu0 %vm70_vm0, %v2143_v55 }
 0x5a9   :  { %2459 = vmatmul.mubr.msk.f32.vlgmr.msra.gmra.mrb[20].mxu1 %vm70_vm0, %v2142_v53  ;;  %v1803_v53 = vld [vmem:[%s3288_s6 + $0x10] sm:$0xff] }
 0x5aa   :  { %2448 = vmatmul.mubr.msk.f32.gmra.mrb[22].mxu0 %vm70_vm0, %v2144_v49  ;;  %2461 = vmatprep.mubr.msk.f32.mxu1 %vm70_vm0, %v2143_v55 }
 0x5ab   :  { %2472 = vmatprep.mubr.msk.f32.mxu0 %vm70_vm0, %v1797_v44 }
 0x5ad   :  { %2462 = vmatmul.mubr.msk.f32.gmra.mrb[22].mxu1 %vm70_vm0, %v2144_v49 }
 0x5ae   :  { %2486 = vmatprep.mubr.msk.f32.mxu1 %vm70_vm0, %v1797_v44 }
 0x679   :  { %v2446_v51 = vpop.f32.mrb[20].mxu0 }
 0x67a   :  { %v1569_v52 = vadd.f32 %v2446_v51, %v1473_v4  ;;  %v1563_v54 = vpop.f32.mrb[21].mxu0 }
 0x67b   :  { %v1564_v56 = vadd.f32 %v1563_v54, %v1468_v50 }
 0x67c   :  { %v1668_v2 = vmul.f32 0.999995, %v1569_v52  ;;  %v2460_v58 = vpop.f32.mrb[20].mxu1 }
 0x67d   :  { %v1667_v59 = vmul.f32 0.999995, %v1564_v56  ;;  %v2449_v60 = vpop.f32.mrb[22].mxu0  ;;  %v1654_v62 = vadd.f32 %v2460_v58, %v1473_v4  ;;  %v1648_v63 = vpop.f32.mrb[21].mxu1 }
 0x67e   :  { %v1676_v6 = vadd.f32 %v1668_v2, %v3050_v14  ;;  %v1579_v7 = vadd.f32 %v2449_v60, %v1483_v57  ;;  %v1573_v8 = vpop.f32.mrb[23].mxu0  ;;  %v1649_v9 = vadd.f32 %v1648_v63, %v1468_v50 }
 0x67f   :  { %v1675_v10 = vadd.f32 %v1667_v59, %v3055_v19  ;;  %v1672_v11 = vmul.f32 0.999995, %v1654_v62  ;;  %v1574_v12 = vadd.f32 %v1573_v8, %v1478_v5 }
 0x680   :  { %v1692_v13 = vmul.f32 0.25, %v1676_v6  ;;  %v1670_v15 = vmul.f32 0.999995, %v1579_v7  ;;  %v1671_v16 = vmul.f32 0.999995, %v1649_v9  ;;  %vm1684_vm15 = vcmp.ge.f32.partialorder %v1676_v6, 0.0 }
 0x681   :  { %v1680_v17 = vadd.f32 %v1672_v11, %v3061_v24  ;;  %v1669_v18 = vmul.f32 0.999995, %v1574_v12  ;;  %v2463_v20 = vpop.f32.mrb[22].mxu1  ;;  %vm1683_vm1 = vcmp.ge.f32.partialorder %v1675_v10, 0.0  ;;  %v1691_v21 = vmul.f32 0.25, %v1675_v10 }
 0x682   :  { %v1679_v22 = vadd.f32 %v1671_v16, %v3064_v27  ;;  %v1664_v14 = vadd.f32 %v2463_v20, %v1483_v57  ;;  %v1658_v23 = vpop.f32.mrb[23].mxu1  ;;  %v1678_v25 = vadd.f32 %v1670_v15, %v3074_v38  ;;  %v3135_v32 = vsel %vm1684_vm15, %v1676_v6, %v1692_v13 }
 0x683   :  { %vm1688_vm2 = vcmp.ge.f32.partialorder %v1680_v17, 0.0  ;;  %v1696_v19 = vmul.f32 0.25, %v1680_v17  ;;  %v1659_v26 = vadd.f32 %v1658_v23, %v1478_v5  ;;  %v1677_v28 = vadd.f32 %v1669_v18, %v3079_v43 }
 0x684   :  { %vm1687_vm3 = vcmp.ge.f32.partialorder %v1679_v22, 0.0  ;;  %v1695_v30 = vmul.f32 0.25, %v1679_v22  ;;  %v1674_v24 = vmul.f32 0.999995, %v1664_v14  ;;  %v3137_v33 = vsel %vm1683_vm1, %v1675_v10, %v1691_v21 }
 0x685   :  { %v1673_v29 = vmul.f32 0.999995, %v1659_v26  ;;  %v3141_v27 = vsel %vm1688_vm2, %v1680_v17, %v1696_v19  ;;  %v2615_v43 = vpack.i.bf16 %v3135_v32, %v3137_v33  ;;  %vm1686_vm4 = vcmp.ge.f32.partialorder %v1678_v25, 0.0 }
 0x686   :  { %v3139_v31 = vsel %vm1687_vm3, %v1679_v22, %v1695_v30  ;;  %v1682_v38 = vadd.f32 %v1674_v24, %v3085_v47  ;;  %v1694_v35 = vmul.f32 0.25, %v1678_v25  ;;  %vm1685_vm5 = vcmp.ge.f32.partialorder %v1677_v28, 0.0 }
 0x687   :  { %v1681_v34 = vadd.f32 %v1673_v29, %v3088_v61  ;;  %v2620_v0 = vpack.i.bf16 %v3141_v27, %v3139_v31  ;;  %v1693_v39 = vmul.f32 0.25, %v1677_v28  ;;  %2616 = vrot.lane.b32.xlu0 %v2615_v43, %s2660_s3  ;;  %vm2039_vm1 = vcmask 252928  }
 0x688   :  { %vm1690_vm6 = vcmp.ge.f32.partialorder %v1682_v38, 0.0  ;;  %v1698_v36 = vmul.f32 0.25, %v1682_v38  ;;  %v3151_v61 = vsel %vm1686_vm4, %v1678_v25, %v1694_v35  ;;  %vm2064_vm2 = vcmask 7168  }
 0x689   :  { %vm1689_vm7 = vcmp.ge.f32.partialorder %v1681_v34, 0.0  ;;  %v1697_v37 = vmul.f32 0.25, %v1681_v34  ;;  %2621 = vrot.lane.b32.xlu1 %v2620_v0, %s2660_s3  ;;  %v3149_v47 = vsel %vm1685_vm5, %v1677_v28, %v1693_v39 }
 0x68a   :  { %v3155_v1 = vsel %vm1690_vm6, %v1682_v38, %v1698_v36  ;;  %v2635_v41 = vpack.i.bf16 %v3151_v61, %v3149_v47 }
 0x68b   :  { %v3153_v40 = vsel %vm1689_vm7, %v1681_v34, %v1697_v37  ;;  %2626 = vrot.lane.b32.xlu0 %v2615_v43, %s2661_s10 }
 0x68c   :  { %v2640_v42 = vpack.i.bf16 %v3155_v1, %v3153_v40 }
 0x68d   :  { %2631 = vrot.lane.b32.xlu1 %v2620_v0, %s2661_s10 }
 0x68f   :  { %2636 = vrot.lane.b32.xlu0 %v2635_v41, %s2660_s3 }
 0x691   :  { %2641 = vrot.lane.b32.xlu1 %v2640_v42, %s2660_s3 }
 0x693   :  { %2646 = vrot.lane.b32.xlu0 %v2635_v41, %s2661_s10 }
 0x695   :  { %2651 = vrot.lane.b32.xlu1 %v2640_v42, %s2661_s10 }
 0x697   :  { %1807 = vperm.xlu0 %2613, %v1801_v45  }
 0x699   :  { %1812 = vperm.xlu1 %2614, %v1802_v46  }
 0x69b   :  { %1817 = vperm.xlu0 %2613, %v1803_v53  }
 0x69d   :  { %1822 = vperm.xlu1 %2614, %v1804_v48  }
 0x6f9   :  { %v2617_v55 = vpop.permute.xlu0 %2616 }
 0x6fa   :  { %v2619_v4 = vunpack.i.h.bf16 %v2617_v55  ;;  %v2618_v50 = vunpack.i.l.bf16 %v2617_v55  ;;  %v2007_v55 = vlaneseq }
 0x6fb   :  { %v2622_v49 = vpop.permute.xlu1 %2621 }
 0x6fc   :  { %v2624_v51 = vunpack.i.h.bf16 %v2622_v49  ;;  %v2623_v52 = vunpack.i.l.bf16 %v2622_v49  ;;  %v1741_v54 = vsel %vm1739_vm8, %v2619_v4, 0.0  ;;  %v1740_v56 = vsel %vm1739_vm8, %v2618_v50, 0.0 }
 0x6fd   :  { %v2627_v58 = vpop.permute.xlu0 %2626  ;;  %v1749_v6 = vmax.f32 %v3135_v32, %v1741_v54  ;;  %v1748_v7 = vmax.f32 %v3137_v33, %v1740_v56  ;;  %v2008_v49 = vand.u32 127, %v2007_v55 }
 0x6fe   :  { %v1745_v57 = vsel %vm1739_vm8, %v2624_v51, 0.0  ;;  %v1744_v2 = vsel %vm1739_vm8, %v2623_v52, 0.0  ;;  %v2629_v60 = vunpack.i.h.bf16 %v2627_v58  ;;  %v2628_v62 = vunpack.i.l.bf16 %v2627_v58 }
 0x6ff   :  { %v2632_v59 = vpop.permute.xlu1 %2631  ;;  %v1753_v8 = vmax.f32 %v3141_v27, %v1745_v57  ;;  %v1752_v9 = vmax.f32 %v3139_v31, %v1744_v2  ;;  %v3217_v4 = vmul.u32.u64.low 2545165805, %v2008_v49  ;;  %v3218_v50 = vmul.u32.u64.high 2545165805, %v2008_v49, %v3217_v4 }
 0x700   :  { %v2634_v63 = vunpack.i.h.bf16 %v2632_v59  ;;  %v2633_v5 = vunpack.i.l.bf16 %v2632_v59  ;;  %v1782_v10 = vsel %vm1780_vm9, %v2629_v60, 0.0  ;;  %v1781_v11 = vsel %vm1780_vm9, %v2628_v62, 0.0 }
 0x701   :  { %v1789_v15 = vmax.f32 %v1748_v7, %v1781_v11  ;;  %v1790_v16 = vmax.f32 %v1749_v6, %v1782_v10  ;;  %v2637_v20 = vpop.permute.xlu0 %2636  ;;  %vm2015_vm10 = vc.u32 %v3217_v4, 2545165805  ;;  %vm2029_vm14 = vcmp.lt.s32.totalorder %v2008_v49, 27 }
 0x702   :  { %v1786_v12 = vsel %vm1780_vm9, %v2634_v63, 0.0  ;;  %v1785_v13 = vsel %vm1780_vm9, %v2633_v5, 0.0  ;;  %v2639_v22 = vunpack.i.h.bf16 %v2637_v20  ;;  %v2638_v14 = vunpack.i.l.bf16 %v2637_v20 }
 0x703   :  { %v1793_v17 = vmax.f32 %v1752_v9, %v1785_v13  ;;  %v1794_v18 = vmax.f32 %v1753_v8, %v1786_v12  ;;  %v2642_v21 = vpop.permute.xlu1 %2641  ;;  %v2588_v19 = vpack.c.bf16 %v1790_v16, %v1789_v15  ;;  %v2016_v51 = vsel %vm2015_vm10, 1, %v2655_v3 }
 0x704   :  { %v2644_v23 = vunpack.i.h.bf16 %v2642_v21  ;;  %v2643_v25 = vunpack.i.l.bf16 %v2642_v21  ;;  %v1743_v28 = vsel %vm1739_vm8, %v2639_v22, 0.0  ;;  %v1742_v30 = vsel %vm1739_vm8, %v2638_v14, 0.0 }
 0x705   :  { %v2596_v26 = vpack.c.bf16 %v1794_v18, %v1793_v17  ;;  %v2647_v29 = vpop.permute.xlu0 %2646  ;;  %2589 = vmatprep.subr.bf16.mxu0 %v2588_v19  ;;  %v1751_v43 = vmax.f32 %v3151_v61, %v1743_v28  ;;  %v1750_v0 = vmax.f32 %v3149_v47, %v1742_v30  ;;  %v1798_v47 = vld [vmem:[%s3287_s5 + $0x8] sm:$0xff]  ;;  %v2017_v52 = vadd.s32 %v3218_v50, %v2016_v51 }
 0x706   :  { %v1747_v32 = vsel %vm1739_vm8, %v2644_v23, 0.0  ;;  %v1746_v24 = vsel %vm1739_vm8, %v2643_v25, 0.0  ;;  %v2649_v31 = vunpack.i.h.bf16 %v2647_v29  ;;  %v2648_v27 = vunpack.i.l.bf16 %v2647_v29  ;;  %2591 = vmatpush3.bf16.msra.mxu0 %v2588_v19 }
 0x707   :  { %v2652_v33 = vpop.permute.xlu1 %2651  ;;  %2597 = vmatprep.subr.bf16.mxu1 %v2596_v26  ;;  %v1755_v35 = vmax.f32 %v3155_v1, %v1747_v32  ;;  %v1754_v39 = vmax.f32 %v3153_v40, %v1746_v24  ;;  %v1799_v40 = vld [vmem:[%s3287_s5 + $0x10] sm:$0xff]  ;;  %v1800_v1 = vld [vmem:[%s3287_s5 + $0x18] sm:$0xff]  ;;  %v2018_v54 = vshrl.u32 %v2017_v52, 4 }
 0x708   :  { %v2654_v38 = vunpack.i.h.bf16 %v2652_v33  ;;  %v2653_v34 = vunpack.i.l.bf16 %v2652_v33  ;;  %2599 = vmatpush3.bf16.msra.mxu1 %v2596_v26  ;;  %v1784_v36 = vsel %vm1780_vm9, %v2649_v31, 0.0  ;;  %v1783_v37 = vsel %vm1780_vm9, %v2648_v27, 0.0 }
 0x709   :  { %v1791_v44 = vmax.f32 %v1750_v0, %v1783_v37  ;;  %v1792_v45 = vmax.f32 %v1751_v43, %v1784_v36  ;;  %v2019_v56 = vmul.u32 27, %v2018_v54 }
 0x70a   :  { %v1788_v41 = vsel %vm1780_vm9, %v2654_v38, 0.0  ;;  %v1787_v42 = vsel %vm1780_vm9, %v2653_v34, 0.0 }
 0x70b   :  { %v1795_v46 = vmax.f32 %v1754_v39, %v1787_v42  ;;  %v1796_v53 = vmax.f32 %v1755_v35, %v1788_v41  ;;  %v2592_v61 = vpack.c.bf16 %v1792_v45, %v1791_v44  ;;  %v2020_v57 = vsub.s32 %v2008_v49, %v2019_v56 }
 0x70d   :  { %v2600_v48 = vpack.c.bf16 %v1796_v53, %v1795_v46  ;;  %2593 = vmatprep.subr.bf16.mxu0 %v2592_v61  ;;  %vm2023_vm11 = vcmp.ne.s32.totalorder %v2020_v57, 0  ;;  %vm2024_vm12 = vcmp.lt.s32.totalorder %v2020_v57, 0  ;;  %v2026_v2 = vadd.s32 27, %v2020_v57 }
 0x70e   :  { %2595 = vmatpush3.bf16.msra.mxu0 %v2592_v61  ;;  %vm2025_vm13 = vmand %vm2024_vm12, %vm2023_vm11 }
 0x70f   :  { %2601 = vmatprep.subr.bf16.mxu1 %v2600_v48  ;;  %v2027_v58 = vsel %vm2025_vm13, %v2026_v2, %v2020_v57 }
 0x710   :  { %2603 = vmatpush3.bf16.msra.mxu1 %v2600_v48 }
 0x711   :  { %2473 = vmatmul.mubr.msk.f32.vlgmr.msra.gmra.mrb[24].mxu0 %vm70_vm0, %v1798_v47 }
 0x712   :  { %2475 = vmatprep.mubr.msk.f32.mxu0 %vm70_vm0, %v1799_v40 }
 0x713   :  { %2487 = vmatmul.mubr.msk.f32.vlgmr.msra.gmra.mrb[24].mxu1 %vm70_vm0, %v1798_v47 }
 0x714   :  { %2489 = vmatprep.mubr.msk.f32.mxu1 %vm70_vm0, %v1799_v40 }
 0x715   :  { %2476 = vmatmul.mubr.msk.f32.gmra.mrb[26].mxu0 %vm70_vm0, %v1800_v1 }
 0x716   :  { %v1808_v59 = vpop.permute.xlu0 %1807 }
 0x717   :  { %2490 = vmatmul.mubr.msk.f32.gmra.mrb[26].mxu1 %vm70_vm0, %v1800_v1  ;;  %vm2028_vm0 = vcmp.eq.s32.totalorder %v2027_v58, 0 }
 0x718   :  { %v1813_v60 = vpop.permute.xlu1 %1812  ;;  %vm3222_vm15 = vmand %vm2028_vm0, %vm2029_vm14 }
 0x71a   :  { %v1818_v11 = vpop.permute.xlu0 %1817 }
 0x71c   :  { %v1823_v12 = vpop.permute.xlu1 %1822 }
 0x7e4   :  { %v2474_v63 = vpop.f32.mrb[24].mxu0 }
 0x7e5   :  { %v1909_v5 = vadd.f32 %v2474_v63, %v1813_v60  ;;  %v1903_v6 = vpop.f32.mrb[25].mxu0 }
 0x7e6   :  { %v2488_v3 = vpop.f32.mrb[24].mxu1  ;;  %v1904_v9 = vadd.f32 %v1903_v6, %v1808_v59 }
 0x7e7   :  { %v1994_v7 = vadd.f32 %v2488_v3, %v1813_v60  ;;  %v1988_v8 = vpop.f32.mrb[25].mxu1  ;;  %v2032_v13 = vsel %vm3222_vm15, %v1909_v5, 0.0 }
 0x7e8   :  { %v1989_v10 = vadd.f32 %v1988_v8, %v1808_v59  ;;  %v2477_v16 = vpop.f32.mrb[26].mxu0  ;;  %v2043_v17 = vsel %vm2039_vm1, %v2032_v13, 0.0  ;;  %v2031_v22 = vsel %vm3222_vm15, %v1904_v9, 0.0 }
 0x7e9   :  { %v2036_v15 = vsel %vm3222_vm15, %v1994_v7, 0.0  ;;  %v1919_v14 = vadd.f32 %v2477_v16, %v1823_v12  ;;  %2044 = vadd.xlane.f32.xlu1 %v2043_v17  ;;  %v1913_v23 = vpop.f32.mrb[27].mxu0  ;;  %v2040_v29 = vsel %vm2039_vm1, %v2031_v22, 0.0 }
 0x7ea   :  { %v2491_v18 = vpop.f32.mrb[26].mxu1  ;;  %v2055_v20 = vsel %vm2039_vm1, %v2036_v15, 0.0  ;;  %v2035_v21 = vsel %vm3222_vm15, %v1989_v10, 0.0  ;;  %v1914_v26 = vadd.f32 %v1913_v23, %v1818_v11 }
 0x7eb   :  { %v2004_v25 = vadd.f32 %v2491_v18, %v1823_v12  ;;  %v1998_v19 = vpop.f32.mrb[27].mxu1  ;;  %2056 = vadd.xlane.f32.xlu0 %v2055_v20  ;;  %v2052_v30 = vsel %vm2039_vm1, %v2035_v21, 0.0  ;;  %v2034_v32 = vsel %vm3222_vm15, %v1919_v14, 0.0 }
 0x7ec   :  { %v1999_v28 = vadd.f32 %v1998_v19, %v1818_v11  ;;  %v2033_v31 = vsel %vm3222_vm15, %v1914_v26, 0.0  ;;  %v2049_v38 = vsel %vm2039_vm1, %v2034_v32, 0.0 }
 0x7ed   :  { %v2038_v24 = vsel %vm3222_vm15, %v2004_v25, 0.0  ;;  %2053 = vadd.xlane.f32.xlu1 %v2052_v30  ;;  %v2046_v34 = vsel %vm2039_vm1, %v2033_v31, 0.0 }
 0x7ee   :  { %v2037_v33 = vsel %vm3222_vm15, %v1999_v28, 0.0  ;;  %v2061_v43 = vsel %vm2039_vm1, %v2038_v24, 0.0 }
 0x7ef   :  { %2041 = vadd.xlane.f32.xlu0 %v2040_v29  ;;  %v2058_v27 = vsel %vm2039_vm1, %v2037_v33, 0.0 }
 0x7f1   :  { %2059 = vadd.xlane.f32.xlu1 %v2058_v27 }
 0x7f3   :  { %2050 = vadd.xlane.f32.xlu0 %v2049_v38 }
 0x7f7   :  { %2047 = vadd.xlane.f32.xlu0 %v2046_v34 }
 0x7fb   :  { %2062 = vadd.xlane.f32.xlu0 %v2061_v43 }
 0x876   :  { %v2045_v0 = vpop.xlane.xlu1 %2044 }
 0x877   :  { %2066 = vst.msk [vmem:[%s3289_s7 + $0x8] sm:$0xff] %vm2064_vm2, %v2045_v0 }
 0x878   :  { %v2057_v35 = vpop.xlane.xlu0 %2056 }
 0x879   :  { %2070 = vst.msk [vmem:[%s3289_s7 + $0x28] sm:$0xff] %vm2064_vm2, %v2057_v35 }
 0x87a   :  { %v2054_v39 = vpop.xlane.xlu1 %2053 }
 0x87b   :  { %2069 = vst.msk [vmem:[%s3289_s7 + $0x20] sm:$0xff] %vm2064_vm2, %v2054_v39 }
 0x87c   :  { %v2042_v36 = vpop.xlane.xlu0 %2041 }
 0x87d   :  { %2065 = vst.msk [vmem:[%s3289_s7] sm:$0xff] %vm2064_vm2, %v2042_v36 }
 0x87e   :  { %v2060_v37 = vpop.xlane.xlu1 %2059 }
 0x87f   :  { %2071 = vst.msk [vmem:[%s3289_s7 + $0x30] sm:$0xff] %vm2064_vm2, %v2060_v37 }
 0x880   :  { %v2051_v41 = vpop.xlane.xlu0 %2050 }
 0x881   :  { %2068 = vst.msk [vmem:[%s3289_s7 + $0x18] sm:$0xff] %vm2064_vm2, %v2051_v41 }
 0x884   :  { %v2048_v42 = vpop.xlane.xlu0 %2047 }
 0x885   :  { %2067 = vst.msk [vmem:[%s3289_s7 + $0x10] sm:$0xff] %vm2064_vm2, %v2048_v42 }
 0x888   :  { %v2063_v44 = vpop.xlane.xlu0 %2062 }
 0x889   :  { %2072 = vst.msk [vmem:[%s3289_s7 + $0x38] sm:$0xff] %vm2064_vm2, %v2063_v44 }

// kernel: spex_plus_forward.9
= control target key start
LH: loop header
LB: loop body
LE: loop exit
PB: predicated region body
PF: predicated region fallthrough
CT: control target
= control target key end

     0   :  { %v1228_v3 = vmov 0   ;;  %vm81_vm0 = vcmask 261120   ;;  %vm342_vm1 = vcmask 392192   ;;  %s1229_s25 = smov 2   ;;  %s1231_s26 = smov 3   ;;  %vm525_vm2 = vcmask 252928   ;;  %s1626_s0 = inlined_call_operand.vmem [shape: bf16[2,32,31], index: 0, kind: input, shape index: {}]   ;;  %s1627_s2 = inlined_call_operand.vmem [shape: f32[48,32], index: 2, kind: input, shape index: {}]   ;;  %s1628_s3 = inlined_call_operand.vmem [shape: f32[48,1], index: 3, kind: input, shape index: {}]   ;;  %s1629_s4 = inlined_call_operand.vmem [shape: f32[28,48], index: 4, kind: input, shape index: {}]   ;;  %s1630_s1 = inlined_call_operand.vmem [shape: bf16[2,48,31], index: 1, kind: input, shape index: {}]   ;;  %s1631_s5 = inlined_call_operand.vmem [shape: f32[2,2,32], index: 5, kind: output, shape index: {0}]   ;;  %s1632_s6 = inlined_call_operand.vmem [shape: f32[2,2,34], index: 6, kind: output, shape index: {1}]   ;;  %s1633_s7 = inlined_call_operand.vmem [shape: f32[2,2,38], index: 7, kind: output, shape index: {2}]  }
   0x1   :  { %v1021_v0 = vld [vmem:[%s1626_s0] sm:$0xff]   ;;  %v1061_v1 = vld [vmem:[%s1626_s0 + $0x10] sm:$0xff]   ;;  %v1060_v2 = vld [vmem:[%s1626_s0 + $0x8] sm:$0xff]   ;;  %1226 = vset.pattern.permute.xlu0 %v1228_v3  ;;  %1227 = vset.pattern.permute.xlu1 %v1228_v3  ;;  %s1232_s27 = smov 6   ;;  %s1233_s28 = smov 4   ;;  %vm540_vm3 = vcmask 7168  }
   0x2   :  { %1179 = vmatprep.subr.bf16.mxu0 %v1021_v0  ;;  %1187 = vmatprep.subr.bf16.mxu1 %v1061_v1  ;;  %v1062_v4 = vld [vmem:[%s1626_s0 + $0x18] sm:$0xff]   ;;  %v39_v5 = vld [vmem:[%s1627_s2] sm:$0xff]  ;;  %v47_v7 = vld [vmem:[%s1628_s3 + $0x10] sm:$0xff]  ;;  %s1234_s29 = smov 5   ;;  %s1235_s30 = smov 7   ;;  %vm545_vm4 = vcmask 253952  }
   0x3   :  { %1181 = vmatpush3.bf16.msra.mxu0 %v1021_v0  ;;  %1189 = vmatpush3.bf16.msra.mxu1 %v1061_v1  ;;  %v45_v6 = vld [vmem:[%s1628_s3] sm:$0xff]  ;;  %v40_v8 = vld [vmem:[%s1627_s2 + $0x8] sm:$0xff]  ;;  %v41_v9 = vld [vmem:[%s1627_s2 + $0x10] sm:$0xff]  ;;  %vm597_vm5 = vcmask 15360   ;;  %vm600_vm6 = vcmask 269312   ;;  %vm566_vm7 = vcmask 254977  }
   0x4   :  { %1183 = vmatprep.subr.bf16.mxu0 %v1060_v2  ;;  %1191 = vmatprep.subr.bf16.mxu1 %v1062_v4  ;;  %v46_v10 = vld [vmem:[%s1628_s3 + $0x8] sm:$0xff]  ;;  %v48_v11 = vld [vmem:[%s1628_s3 + $0x18] sm:$0xff]  ;;  %v43_v13 = vld [vmem:[%s1627_s2 + $0x20] sm:$0xff]  ;;  %vm619_vm8 = vcmask 23552   ;;  %vm630_vm9 = vcmask 274436   ;;  %vm691_vm10 = vcmask 275461  }
   0x5   :  { %1116 = vmatprep.mubr.msk.f32.mxu0 %vm81_vm0, %v39_v5  ;;  %1133 = vmatprep.mubr.msk.f32.mxu1 %vm81_vm0, %v39_v5  ;;  %v42_v12 = vld [vmem:[%s1627_s2 + $0x18] sm:$0xff]  ;;  %v49_v14 = vld [vmem:[%s1628_s3 + $0x20] sm:$0xff]  ;;  %v50_v15 = vld [vmem:[%s1628_s3 + $0x28] sm:$0xff]  ;;  %vm811_vm11 = vcmask 48128   ;;  %vm814_vm12 = vcmask 302080   ;;  %vm748_vm13 = vcmask 277504  }
   0x6   :  { %53 = vperm.xlu0 %1226, %v45_v6   ;;  %63 = vperm.xlu1 %1227, %v47_v7   ;;  %v44_v16 = vld [vmem:[%s1627_s2 + $0x28] sm:$0xff]  ;;  %v338_v17 = vld [vmem:[%s1629_s4] sm:$0xff]  ;;  %v1065_v21 = vld [vmem:[%s1630_s1 + $0x18] sm:$0xff]   ;;  %vm767_vm14 = vcmask 31744   ;;  %vm770_vm15 = vcmask 285696  }
   0x7   :  { %1185 = vmatpush3.bf16.msra.mxu0 %v1060_v2  ;;  %1193 = vmatpush3.bf16.msra.mxu1 %v1062_v4  ;;  %v1037_v20 = vld [vmem:[%s1630_s1] sm:$0xff]   ;;  %v1063_v24 = vld [vmem:[%s1630_s1 + $0x8] sm:$0xff]   ;;  %v1051_v29 = vunpack.c.h.bf16 %v1065_v21  ;;  %v1050_v35 = vunpack.c.l.bf16 %v1065_v21  ;;  %v1064_v36 = vld [vmem:[%s1630_s1 + $0x10] sm:$0xff]  }
   0x8   :  { %v1066_v25 = vld [vmem:[%s1630_s1 + $0x20] sm:$0xff]   ;;  %v1039_v27 = vunpack.c.h.bf16 %v1037_v20  ;;  %v1038_v33 = vunpack.c.l.bf16 %v1037_v20  ;;  %v1067_v37 = vld [vmem:[%s1630_s1 + $0x28] sm:$0xff]   ;;  %v1043_v40 = vunpack.c.h.bf16 %v1063_v24  ;;  %v1042_v44 = vunpack.c.l.bf16 %v1063_v24 }
   0x9   :  { %v1055_v41 = vunpack.c.h.bf16 %v1066_v25  ;;  %v1054_v45 = vunpack.c.l.bf16 %v1066_v25  ;;  %v1047_v50 = vunpack.c.h.bf16 %v1064_v36  ;;  %v1059_v51 = vunpack.c.h.bf16 %v1067_v37 }
   0xa   :  { %1117 = vmatmul.mubr.msk.f32.vlgmr.msra.gmra.mrb[0].mxu0 %vm81_vm0, %v40_v8  ;;  %1134 = vmatmul.mubr.msk.f32.vlgmr.msra.gmra.mrb[0].mxu1 %vm81_vm0, %v40_v8  ;;  %v1046_v2 = vunpack.c.l.bf16 %v1064_v36  ;;  %v1058_v3 = vunpack.c.l.bf16 %v1067_v37 }
   0xb   :  { %1119 = vmatprep.mubr.msk.f32.mxu0 %vm81_vm0, %v41_v9  ;;  %1136 = vmatprep.mubr.msk.f32.mxu1 %vm81_vm0, %v41_v9 }
   0xc   :  { %58 = vperm.xlu0 %1226, %v46_v10   ;;  %68 = vperm.xlu1 %1227, %v48_v11  }
   0xe   :  { %1120 = vmatmul.mubr.msk.f32.gmra.mrb[2].mxu0 %vm81_vm0, %v42_v12  ;;  %1137 = vmatmul.mubr.msk.f32.gmra.mrb[2].mxu1 %vm81_vm0, %v42_v12 }
   0xf   :  { %1122 = vmatprep.mubr.msk.f32.mxu0 %vm81_vm0, %v43_v13  ;;  %1139 = vmatprep.mubr.msk.f32.mxu1 %vm81_vm0, %v43_v13 }
  0x10   :  { %73 = vperm.xlu0 %1226, %v49_v14   ;;  %78 = vperm.xlu1 %1227, %v50_v15  }
  0x12   :  { %1123 = vmatmul.mubr.msk.f32.gmra.mrb[4].mxu0 %vm81_vm0, %v44_v16  ;;  %1140 = vmatmul.mubr.msk.f32.gmra.mrb[4].mxu1 %vm81_vm0, %v44_v16 }
  0x13   :  { %1154 = vmatprep.mubr.msk.f32.mxu0 %vm342_vm1, %v338_v17  ;;  %1172 = vmatprep.mubr.msk.f32.mxu1 %vm342_vm1, %v338_v17 }
  0x85   :  { %v54_v18 = vpop.permute.xlu0 %53  ;;  %v64_v19 = vpop.permute.xlu1 %63 }
  0x8b   :  { %v59_v22 = vpop.permute.xlu0 %58  ;;  %v69_v23 = vpop.permute.xlu1 %68 }
  0x8f   :  { %v74_v62 = vpop.permute.xlu0 %73  ;;  %v79_v63 = vpop.permute.xlu1 %78 }
  0xdd   :  { %v1118_v26 = vpop.f32.mrb[0].mxu0  ;;  %v1135_v28 = vpop.f32.mrb[0].mxu1 }
  0xde   :  { %v172_v30 = vadd.f32 %v1118_v26, %v59_v22  ;;  %v267_v31 = vadd.f32 %v1135_v28, %v59_v22  ;;  %v166_v32 = vpop.f32.mrb[1].mxu0  ;;  %v261_v34 = vpop.f32.mrb[1].mxu1 }
  0xdf   :  { %v167_v38 = vadd.f32 %v166_v32, %v54_v18  ;;  %v262_v39 = vadd.f32 %v261_v34, %v54_v18  ;;  %v339_v32 = vld [vmem:[%s1629_s4 + $0x8] sm:$0xff]  ;;  %v341_v34 = vld [vmem:[%s1629_s4 + $0x18] sm:$0xf] }
  0xe0   :  { %v291_v42 = vmax.f32 %v172_v30, 0.0  ;;  %v297_v43 = vmax.f32 %v267_v31, 0.0 }
  0xe1   :  { %v290_v46 = vmax.f32 %v167_v38, 0.0  ;;  %v296_v47 = vmax.f32 %v262_v39, 0.0  ;;  %v1121_v48 = vpop.f32.mrb[2].mxu0  ;;  %v1138_v49 = vpop.f32.mrb[2].mxu1 }
  0xe2   :  { %v327_v52 = vmul.f32 %v1039_v27, %v291_v42  ;;  %v333_v53 = vmul.f32 %v1051_v29, %v297_v43  ;;  %v182_v54 = vadd.f32 %v1121_v48, %v69_v23  ;;  %v277_v55 = vadd.f32 %v1138_v49, %v69_v23  ;;  %v176_v56 = vpop.f32.mrb[3].mxu0  ;;  %v271_v57 = vpop.f32.mrb[3].mxu1 }
  0xe3   :  { %v326_v58 = vmul.f32 %v1038_v33, %v290_v46  ;;  %v332_v59 = vmul.f32 %v1050_v35, %v296_v47  ;;  %v177_v60 = vadd.f32 %v176_v56, %v64_v19  ;;  %v272_v61 = vadd.f32 %v271_v57, %v64_v19  ;;  %v340_v33 = vld [vmem:[%s1629_s4 + $0x10] sm:$0xff]  ;;  %s1230_s4 = smov 1  }
  0xe4   :  { %v293_v0 = vmax.f32 %v182_v54, 0.0  ;;  %v299_v1 = vmax.f32 %v277_v55, 0.0 }
  0xe5   :  { %v292_v4 = vmax.f32 %v177_v60, 0.0  ;;  %v298_v5 = vmax.f32 %v272_v61, 0.0  ;;  %v1124_v6 = vpop.f32.mrb[4].mxu0  ;;  %v1141_v7 = vpop.f32.mrb[4].mxu1  ;;  %v1194_v8 = vpack.c.bf16 %v327_v52, %v326_v58  ;;  %v1206_v9 = vpack.c.bf16 %v333_v53, %v332_v59 }
  0xe6   :  { %v329_v10 = vmul.f32 %v1043_v40, %v293_v0  ;;  %v335_v11 = vmul.f32 %v1055_v41, %v299_v1  ;;  %v192_v12 = vadd.f32 %v1124_v6, %v79_v63  ;;  %v287_v13 = vadd.f32 %v1141_v7, %v79_v63  ;;  %v186_v14 = vpop.f32.mrb[5].mxu0  ;;  %v281_v15 = vpop.f32.mrb[5].mxu1 }
  0xe7   :  { %v328_v16 = vmul.f32 %v1042_v44, %v292_v4  ;;  %v334_v17 = vmul.f32 %v1054_v45, %v298_v5  ;;  %v187_v18 = vadd.f32 %v186_v14, %v74_v62  ;;  %v282_v19 = vadd.f32 %v281_v15, %v74_v62  ;;  %1195 = vmatprep.subr.bf16.mxu0 %v1194_v8 }
  0xe8   :  { %v295_v20 = vmax.f32 %v192_v12, 0.0  ;;  %v301_v21 = vmax.f32 %v287_v13, 0.0  ;;  %1207 = vmatprep.subr.bf16.mxu1 %v1206_v9  ;;  %1197 = vmatpush3.bf16.msra.mxu0 %v1194_v8 }
  0xe9   :  { %v294_v22 = vmax.f32 %v187_v18, 0.0  ;;  %v300_v23 = vmax.f32 %v282_v19, 0.0  ;;  %1209 = vmatpush3.bf16.msra.mxu1 %v1206_v9  ;;  %v1198_v24 = vpack.c.bf16 %v329_v10, %v328_v16  ;;  %v1210_v25 = vpack.c.bf16 %v335_v11, %v334_v17 }
  0xea   :  { %v331_v26 = vmul.f32 %v1047_v50, %v295_v20  ;;  %v337_v27 = vmul.f32 %v1059_v51, %v301_v21 }
  0xeb   :  { %v330_v28 = vmul.f32 %v1046_v2, %v294_v22  ;;  %v336_v29 = vmul.f32 %v1058_v3, %v300_v23  ;;  %1199 = vmatprep.subr.bf16.mxu0 %v1198_v24  ;;  %1211 = vmatprep.subr.bf16.mxu1 %v1210_v25 }
  0xec   :  { %1201 = vmatpush3.bf16.msra.mxu0 %v1198_v24 }
  0xed   :  { %1213 = vmatpush3.bf16.msra.mxu1 %v1210_v25  ;;  %v1202_v30 = vpack.c.bf16 %v331_v26, %v330_v28  ;;  %v1214_v31 = vpack.c.bf16 %v337_v27, %v336_v29 }
  0xef   :  { %1203 = vmatprep.subr.bf16.mxu0 %v1202_v30  ;;  %1215 = vmatprep.subr.bf16.mxu1 %v1214_v31 }
  0xf0   :  { %1205 = vmatpush3.bf16.msra.mxu0 %v1202_v30 }
  0xf1   :  { %1217 = vmatpush3.bf16.msra.mxu1 %v1214_v31 }
  0xf3   :  { %1155 = vmatmul.mubr.msk.f32.vlgmr.msra.gmra.mrb[6].mxu0 %vm342_vm1, %v339_v32 }
  0xf4   :  { %1173 = vmatmul.mubr.msk.f32.vlgmr.msra.gmra.mrb[6].mxu1 %vm342_vm1, %v339_v32  ;;  %1157 = vmatprep.mubr.msk.f32.mxu0 %vm342_vm1, %v340_v33 }
  0xf5   :  { %1175 = vmatprep.mubr.msk.f32.mxu1 %vm342_vm1, %v340_v33 }
  0xf7   :  { %1158 = vmatmul.mubr.msk.f32.gmra.mrb[8].mxu0 %vm342_vm1, %v341_v34 }
  0xf8   :  { %1176 = vmatmul.mubr.msk.f32.gmra.mrb[8].mxu1 %vm342_vm1, %v341_v34  ;;  %vm789_vm1 = vcmask 39936  }
 0x1c6   :  { %v1374_v35 = vpop.f32.mrb[6].mxu0 }
 0x1c7   :  { %v1376_v36 = vpop.f32.mrb[6].mxu1  ;;  %591 = vrot.lane.b32.xlu0 %v1374_v35, %s1229_s25  ;;  %v1380_v37 = vpop.f32.mrb[7].mxu0  ;;  %v698_v39 = vrot.slane %v1374_v35, 6  ;;  %v847_v45 = vrot.slane %v1374_v35, 7  ;;  %v653_v47 = vrot.slane %v1374_v35, 1  ;;  %v611_v49 = vrot.slane %v1374_v35, 2 }
 0x1c8   :  { %593 = vrot.lane.b32.xlu1 %v1376_v36, %s1229_s25  ;;  %v1384_v38 = vpop.f32.mrb[7].mxu1  ;;  %v699_v40 = vrot.slane %v1376_v36, 6  ;;  %v848_v46 = vrot.slane %v1376_v36, 7  ;;  %v654_v48 = vrot.slane %v1376_v36, 1  ;;  %v612_v50 = vrot.slane %v1376_v36, 2 }
 0x1c9   :  { %v673_v51 = vrot.slane %v1374_v35, 3  ;;  %v674_v52 = vrot.slane %v1376_v36, 3  ;;  %v532_v53 = vrot.slane %v1380_v37, 2  ;;  %v533_v54 = vrot.slane %v1384_v38, 2 }
 0x1ca   :  { %v1388_v41 = vpop.f32.mrb[8].mxu0  ;;  %v548_v55 = vrot.slane %v1380_v37, 3  ;;  %v549_v56 = vrot.slane %v1384_v38, 3  ;;  %v569_v57 = vrot.slane %v1380_v37, 6  ;;  %v570_v58 = vrot.slane %v1384_v38, 6 }
 0x1cb   :  { %700 = vrot.lane.b32.xlu0 %v698_v39, %s1230_s4  ;;  %v1391_v42 = vpop.f32.mrb[8].mxu1  ;;  %v1393_v43 = vpop.f32.mrb[9].mxu0  ;;  %v633_v59 = vrot.slane %v1380_v37, 7  ;;  %v634_v60 = vrot.slane %v1384_v38, 7  ;;  %v947_v61 = vrot.slane %v1388_v41, 1  ;;  %v825_v13 = vrot.slane %v1388_v41, 2 }
 0x1cc   :  { %702 = vrot.lane.b32.xlu1 %v699_v40, %s1230_s4  ;;  %v1396_v44 = vpop.f32.mrb[9].mxu1  ;;  %v948_v62 = vrot.slane %v1391_v42, 1  ;;  %v867_v63 = vrot.slane %v1393_v43, 1  ;;  %v738_v1 = vrot.slane %v1393_v43, 2  ;;  %v887_v3 = vrot.slane %v1393_v43, 3 }
 0x1cd   :  { %v868_v0 = vrot.slane %v1396_v44, 1  ;;  %v739_v2 = vrot.slane %v1396_v44, 2  ;;  %v888_v4 = vrot.slane %v1396_v44, 3  ;;  %v759_v5 = vrot.slane %v1393_v43, 4 }
 0x1ce   :  { %v760_v6 = vrot.slane %v1396_v44, 4  ;;  %v907_v7 = vrot.slane %v1393_v43, 5  ;;  %v908_v8 = vrot.slane %v1396_v44, 5  ;;  %v781_v9 = vrot.slane %v1393_v43, 6 }
 0x1cf   :  { %849 = vrot.lane.b32.xlu0 %v847_v45, %s1230_s4  ;;  %v782_v10 = vrot.slane %v1396_v44, 6  ;;  %v927_v11 = vrot.slane %v1393_v43, 7  ;;  %v928_v12 = vrot.slane %v1396_v44, 7  ;;  %v826_v14 = vrot.slane %v1391_v42, 2 }
 0x1d0   :  { %851 = vrot.lane.b32.xlu1 %v848_v46, %s1230_s4  ;;  %v967_v15 = vrot.slane %v1388_v41, 3  ;;  %v968_v16 = vrot.slane %v1391_v42, 3  ;;  %v1476_v31 = vsel %vm525_vm2, %v1380_v37, 0.0  ;;  %v1481_v33 = vsel %vm525_vm2, %v1384_v38, 0.0 }
 0x1d3   :  { %655 = vrot.lane.b32.xlu0 %v653_v47, %s1229_s25 }
 0x1d4   :  { %657 = vrot.lane.b32.xlu1 %v654_v48, %s1229_s25 }
 0x1d7   :  { %613 = vrot.lane.b32.xlu0 %v611_v49, %s1231_s26 }
 0x1d8   :  { %615 = vrot.lane.b32.xlu1 %v612_v50, %s1231_s26 }
 0x1db   :  { %675 = vrot.lane.b32.xlu0 %v673_v51, %s1231_s26 }
 0x1dc   :  { %677 = vrot.lane.b32.xlu1 %v674_v52, %s1231_s26 }
 0x1df   :  { %534 = vrot.lane.b32.xlu0 %v532_v53, %s1230_s4 }
 0x1e0   :  { %536 = vrot.lane.b32.xlu1 %v533_v54, %s1230_s4 }
 0x1e3   :  { %550 = vrot.lane.b32.xlu0 %v548_v55, %s1230_s4 }
 0x1e4   :  { %552 = vrot.lane.b32.xlu1 %v549_v56, %s1230_s4 }
 0x1e7   :  { %571 = vrot.lane.b32.xlu0 %v569_v57, %s1230_s4 }
 0x1e8   :  { %573 = vrot.lane.b32.xlu1 %v570_v58, %s1230_s4 }
 0x1eb   :  { %635 = vrot.lane.b32.xlu0 %v633_v59, %s1230_s4 }
 0x1ec   :  { %637 = vrot.lane.b32.xlu1 %v634_v60, %s1230_s4 }
 0x1ef   :  { %805 = vrot.lane.b32.xlu0 %v1388_v41, %s1232_s27 }
 0x1f0   :  { %807 = vrot.lane.b32.xlu1 %v1391_v42, %s1232_s27 }
 0x1f3   :  { %720 = vrot.lane.b32.xlu0 %v1393_v43, %s1229_s25 }
 0x1f4   :  { %722 = vrot.lane.b32.xlu1 %v1396_v44, %s1229_s25 }
 0x1f7   :  { %949 = vrot.lane.b32.xlu0 %v947_v61, %s1232_s27 }
 0x1f8   :  { %951 = vrot.lane.b32.xlu1 %v948_v62, %s1232_s27 }
 0x1fb   :  { %869 = vrot.lane.b32.xlu0 %v867_v63, %s1229_s25 }
 0x1fc   :  { %871 = vrot.lane.b32.xlu1 %v868_v0, %s1229_s25 }
 0x1ff   :  { %740 = vrot.lane.b32.xlu0 %v738_v1, %s1231_s26 }
 0x200   :  { %742 = vrot.lane.b32.xlu1 %v739_v2, %s1231_s26 }
 0x203   :  { %889 = vrot.lane.b32.xlu0 %v887_v3, %s1231_s26 }
 0x204   :  { %891 = vrot.lane.b32.xlu1 %v888_v4, %s1231_s26 }
 0x207   :  { %761 = vrot.lane.b32.xlu0 %v759_v5, %s1233_s28 }
 0x208   :  { %763 = vrot.lane.b32.xlu1 %v760_v6, %s1233_s28 }
 0x20b   :  { %909 = vrot.lane.b32.xlu0 %v907_v7, %s1233_s28 }
 0x20c   :  { %911 = vrot.lane.b32.xlu1 %v908_v8, %s1233_s28 }
 0x20f   :  { %783 = vrot.lane.b32.xlu0 %v781_v9, %s1234_s29 }
 0x210   :  { %785 = vrot.lane.b32.xlu1 %v782_v10, %s1234_s29 }
 0x213   :  { %929 = vrot.lane.b32.xlu0 %v927_v11, %s1234_s29 }
 0x214   :  { %931 = vrot.lane.b32.xlu1 %v928_v12, %s1234_s29 }
 0x217   :  { %827 = vrot.lane.b32.xlu0 %v825_v13, %s1235_s30 }
 0x218   :  { %829 = vrot.lane.b32.xlu1 %v826_v14, %s1235_s30 }
 0x21b   :  { %969 = vrot.lane.b32.xlu0 %v967_v15, %s1235_s30 }
 0x21c   :  { %971 = vrot.lane.b32.xlu1 %v968_v16, %s1235_s30 }
 0x239   :  { %v592_v17 = vpop.permute.xlu0 %591 }
 0x23a   :  { %v594_v18 = vpop.permute.xlu1 %593  ;;  %v598_v43 = vsel %vm597_vm5, 0.0, %v592_v17 }
 0x23b   :  { %v599_v42 = vsel %vm597_vm5, 0.0, %v594_v18  ;;  %v601_v50 = vsel %vm600_vm6, %v598_v43, 0.0 }
 0x23c   :  { %v602_v49 = vsel %vm600_vm6, %v599_v42, 0.0  ;;  %v605_v61 = vrot.slane %v601_v50, 4 }
 0x23d   :  { %v1462_v19 = vpop.permute.xlu0 %700  ;;  %v606_v60 = vrot.slane %v602_v49, 4 }
 0x23e   :  { %v1464_v20 = vpop.permute.xlu1 %702 }
 0x241   :  { %v1466_v21 = vpop.permute.xlu0 %849 }
 0x242   :  { %v1468_v22 = vpop.permute.xlu1 %851 }
 0x243   :  { %v856_v50 = vsel %vm540_vm3, 0.0, %v1468_v22 }
 0x245   :  { %v656_v23 = vpop.permute.xlu0 %655 }
 0x246   :  { %v658_v24 = vpop.permute.xlu1 %657  ;;  %v661_v54 = vsel %vm597_vm5, 0.0, %v656_v23 }
 0x247   :  { %v662_v57 = vsel %vm597_vm5, 0.0, %v658_v24  ;;  %v663_v1 = vsel %vm600_vm6, %v661_v54, 0.0 }
 0x248   :  { %v664_v6 = vsel %vm600_vm6, %v662_v57, 0.0  ;;  %v667_v23 = vrot.slane %v663_v1, 3 }
 0x249   :  { %v614_v25 = vpop.permute.xlu0 %613 }
 0x24a   :  { %v616_v26 = vpop.permute.xlu1 %615  ;;  %v620_v62 = vsel %vm619_vm8, 0.0, %v614_v25 }
 0x24b   :  { %v621_v2 = vsel %vm619_vm8, 0.0, %v616_v26  ;;  %v624_v10 = vrot.slane %v620_v62, 4 }
 0x24c   :  { %v625_v14 = vrot.slane %v621_v2, 4 }
 0x24d   :  { %v1470_v27 = vpop.permute.xlu0 %675 }
 0x24e   :  { %v1472_v28 = vpop.permute.xlu1 %677  ;;  %v681_v15 = vsel %vm619_vm8, 0.0, %v1470_v27 }
 0x24f   :  { %v682_v24 = vsel %vm619_vm8, 0.0, %v1472_v28 }
 0x251   :  { %v535_v29 = vpop.permute.xlu0 %534 }
 0x252   :  { %v537_v30 = vpop.permute.xlu1 %536  ;;  %v541_v32 = vsel %vm540_vm3, 0.0, %v535_v29 }
 0x253   :  { %v542_v34 = vsel %vm540_vm3, 0.0, %v537_v30  ;;  %v543_v39 = vadd.f32 %v541_v32, %v1476_v31  ;;  %v668_v30 = vrot.slane %v664_v6, 3 }
 0x254   :  { %v544_v40 = vadd.f32 %v542_v34, %v1481_v33 }
 0x255   :  { %546 = vst.msk [vmem:[%s1631_s5] sm:$0x1] %vm545_vm4, %v543_v39  ;;  %v551_v41 = vpop.permute.xlu0 %550  ;;  %v685_v39 = vrot.slane %v681_v15, 3 }
 0x256   :  { %547 = vst.msk [vmem:[%s1631_s5 + $0x2] sm:$0x1] %vm545_vm4, %v544_v40  ;;  %v553_v37 = vpop.permute.xlu1 %552  ;;  %v556_v38 = vsel %vm540_vm3, 0.0, %v551_v41  ;;  %v686_v40 = vrot.slane %v682_v24, 3  ;;  %vm985_vm4 = vcmask 308229  }
 0x257   :  { %v557_v44 = vsel %vm540_vm3, 0.0, %v553_v37  ;;  %v560_v45 = vrot.slane %v556_v38, 7 }
 0x258   :  { %v561_v46 = vrot.slane %v557_v44, 7 }
 0x259   :  { %v564_v47 = vadd.f32 %v560_v45, %v1476_v31  ;;  %v572_v48 = vpop.permute.xlu0 %571  ;;  %v706_v45 = vsel %vm540_vm3, 0.0, %v1462_v19  ;;  %v695_v19 = vsel %vm525_vm2, %v1376_v36, 0.0 }
 0x25a   :  { %v565_v51 = vadd.f32 %v561_v46, %v1481_v33  ;;  %v574_v52 = vpop.permute.xlu1 %573  ;;  %v577_v53 = vsel %vm540_vm3, 0.0, %v572_v48  ;;  %v707_v46 = vsel %vm540_vm3, 0.0, %v1464_v20  ;;  %v708_v49 = vsel %vm81_vm0, %v706_v45, 0.0 }
 0x25b   :  { %567 = vst.msk [vmem:[%s1631_s5] sm:$0x2] %vm566_vm7, %v564_v47  ;;  %v578_v55 = vsel %vm540_vm3, 0.0, %v574_v52  ;;  %v579_v56 = vsel %vm81_vm0, %v577_v53, 0.0  ;;  %v855_v47 = vsel %vm540_vm3, 0.0, %v1466_v21  ;;  %v709_v52 = vsel %vm81_vm0, %v707_v46, 0.0 }
 0x25c   :  { %568 = vst.msk [vmem:[%s1631_s5 + $0x2] sm:$0x2] %vm566_vm7, %v565_v51  ;;  %v580_v58 = vsel %vm81_vm0, %v578_v55, 0.0  ;;  %v583_v59 = vrot.slane %v579_v56, 4  ;;  %v857_v53 = vsel %vm81_vm0, %v855_v47, 0.0  ;;  %v694_v20 = vsel %vm525_vm2, %v1374_v35, 0.0 }
 0x25d   :  { %v584_v63 = vrot.slane %v580_v58, 4  ;;  %v636_v0 = vpop.permute.xlu0 %635  ;;  %v712_v21 = vrot.slane %v708_v49, 4  ;;  %v858_v55 = vsel %vm81_vm0, %v856_v50, 0.0  ;;  %v713_v57 = vrot.slane %v709_v52, 4 }
 0x25e   :  { %v587_v3 = vadd.f32 %v583_v59, %v1476_v31  ;;  %v638_v4 = vpop.permute.xlu1 %637  ;;  %v641_v5 = vsel %vm540_vm3, 0.0, %v636_v0  ;;  %v861_v58 = vrot.slane %v857_v53, 3  ;;  %v862_v36 = vrot.slane %v858_v55, 3 }
 0x25f   :  { %v588_v7 = vadd.f32 %v584_v63, %v1481_v33  ;;  %v642_v8 = vsel %vm540_vm3, 0.0, %v638_v4  ;;  %v643_v9 = vsel %vm81_vm0, %v641_v5, 0.0  ;;  %v716_v62 = vadd.f32 %v712_v21, %v694_v20 }
 0x260   :  { %v609_v11 = vadd.f32 %v605_v61, %v587_v3  ;;  %v644_v12 = vsel %vm81_vm0, %v642_v8, 0.0  ;;  %v647_v13 = vrot.slane %v643_v9, 3  ;;  %vm792_vm0 = vcmask 293888  }
 0x261   :  { %v610_v16 = vadd.f32 %v606_v60, %v588_v7  ;;  %v648_v17 = vrot.slane %v644_v12, 3  ;;  %v806_v18 = vpop.permute.xlu0 %805  ;;  %v717_v3 = vadd.f32 %v713_v57, %v695_v19  ;;  %v865_v4 = vadd.f32 %v861_v58, %v694_v20 }
 0x262   :  { %v628_v25 = vadd.f32 %v624_v10, %v609_v11  ;;  %v651_v26 = vadd.f32 %v647_v13, %v1476_v31  ;;  %v808_v29 = vpop.permute.xlu1 %807  ;;  %v812_v0 = vsel %vm811_vm11, 0.0, %v806_v18  ;;  %v866_v12 = vadd.f32 %v862_v36, %v695_v19 }
 0x263   :  { %v629_v32 = vadd.f32 %v625_v14, %v610_v16  ;;  %v652_v34 = vadd.f32 %v648_v17, %v1481_v33  ;;  %v813_v63 = vsel %vm811_vm11, 0.0, %v808_v29  ;;  %v1578_v14 = vsel %vm814_vm12, %v812_v0, 0.0 }
 0x264   :  { %631 = vst.msk [vmem:[%s1632_s6 - $0x4] sm:$0x10] %vm630_vm9, %v628_v25  ;;  %v671_v27 = vadd.f32 %v667_v23, %v651_v26  ;;  %v1575_v13 = vsel %vm814_vm12, %v813_v63, 0.0  ;;  %vm833_vm2 = vcmask 56320   ;;  %vm844_vm3 = vcmask 307204  }
 0x265   :  { %632 = vst.msk [vmem:[%s1632_s6 - $0x2] sm:$0x10] %vm630_vm9, %v629_v32  ;;  %v672_v28 = vadd.f32 %v668_v30, %v652_v34  ;;  %v721_v31 = vpop.permute.xlu0 %720 }
 0x266   :  { %v689_v41 = vadd.f32 %v685_v39, %v671_v27  ;;  %v723_v37 = vpop.permute.xlu1 %722  ;;  %v726_v54 = vsel %vm597_vm5, 0.0, %v721_v31 }
 0x267   :  { %v690_v38 = vadd.f32 %v686_v40, %v672_v28  ;;  %v727_v56 = vsel %vm597_vm5, 0.0, %v723_v37  ;;  %v728_v59 = vsel %vm600_vm6, %v726_v54, 0.0 }
 0x268   :  { %692 = vst.msk [vmem:[%s1632_s6 - $0x4] sm:$0x20] %vm691_vm10, %v689_v41  ;;  %v729_v35 = vsel %vm600_vm6, %v727_v56, 0.0  ;;  %v732_v1 = vrot.slane %v728_v59, 4 }
 0x269   :  { %693 = vst.msk [vmem:[%s1632_s6 - $0x2] sm:$0x20] %vm691_vm10, %v690_v38  ;;  %v1542_v33 = vpop.permute.xlu0 %949  ;;  %v733_v8 = vrot.slane %v729_v35, 4 }
 0x26a   :  { %v1544_v42 = vpop.permute.xlu1 %951  ;;  %v736_v16 = vadd.f32 %v732_v1, %v716_v62  ;;  %v955_v39 = vsel %vm811_vm11, 0.0, %v1542_v33 }
 0x26b   :  { %v737_v34 = vadd.f32 %v733_v8, %v717_v3  ;;  %v956_v28 = vsel %vm811_vm11, 0.0, %v1544_v42 }
 0x26d   :  { %v870_v43 = vpop.permute.xlu0 %869 }
 0x26e   :  { %v872_v44 = vpop.permute.xlu1 %871  ;;  %v875_v5 = vsel %vm597_vm5, 0.0, %v870_v43 }
 0x26f   :  { %v876_v9 = vsel %vm597_vm5, 0.0, %v872_v44  ;;  %v877_v17 = vsel %vm600_vm6, %v875_v5, 0.0 }
 0x270   :  { %v878_v25 = vsel %vm600_vm6, %v876_v9, 0.0  ;;  %v881_v43 = vrot.slane %v877_v17, 3 }
 0x271   :  { %v741_v48 = vpop.permute.xlu0 %740  ;;  %v882_v38 = vrot.slane %v878_v25, 3 }
 0x272   :  { %v743_v51 = vpop.permute.xlu1 %742  ;;  %v746_v61 = vsel %vm619_vm8, 0.0, %v741_v48  ;;  %v885_v55 = vadd.f32 %v881_v43, %v865_v4 }
 0x273   :  { %v747_v6 = vsel %vm619_vm8, 0.0, %v743_v51  ;;  %v749_v10 = vsel %vm748_vm13, %v746_v61, 0.0  ;;  %v886_v59 = vadd.f32 %v882_v38, %v866_v12  ;;  %v957_v12 = vsel %vm814_vm12, %v955_v39, 0.0 }
 0x274   :  { %v750_v18 = vsel %vm748_vm13, %v747_v6, 0.0  ;;  %v753_v26 = vrot.slane %v749_v10, 4  ;;  %v820_v6 = vrot.slane %v1575_v13, 4 }
 0x275   :  { %v890_v22 = vpop.permute.xlu0 %889  ;;  %v754_v31 = vrot.slane %v750_v18, 4 }
 0x276   :  { %v892_v60 = vpop.permute.xlu1 %891  ;;  %v895_v23 = vsel %vm619_vm8, 0.0, %v890_v22  ;;  %v757_v33 = vadd.f32 %v753_v26, %v736_v16 }
 0x277   :  { %v896_v29 = vsel %vm619_vm8, 0.0, %v892_v60  ;;  %v897_v41 = vsel %vm748_vm13, %v895_v23, 0.0  ;;  %v758_v54 = vadd.f32 %v754_v31, %v737_v34 }
 0x278   :  { %v898_v44 = vsel %vm748_vm13, %v896_v29, 0.0  ;;  %v901_v51 = vrot.slane %v897_v41, 3  ;;  %v961_v29 = vrot.slane %v957_v12, 3 }
 0x279   :  { %v762_v2 = vpop.permute.xlu0 %761  ;;  %v902_v19 = vrot.slane %v898_v44, 3 }
 0x27a   :  { %v764_v7 = vpop.permute.xlu1 %763  ;;  %v768_v11 = vsel %vm767_vm14, 0.0, %v762_v2  ;;  %v905_v62 = vadd.f32 %v901_v51, %v885_v55 }
 0x27b   :  { %v769_v15 = vsel %vm767_vm14, 0.0, %v764_v7  ;;  %v771_v30 = vsel %vm770_vm15, %v768_v11, 0.0  ;;  %v906_v2 = vadd.f32 %v902_v19, %v886_v59  ;;  %v819_v7 = vrot.slane %v1578_v14, 4 }
 0x27c   :  { %v772_v27 = vsel %vm770_vm15, %v769_v15, 0.0  ;;  %v775_v45 = vrot.slane %v771_v30, 4  ;;  %v958_v11 = vsel %vm814_vm12, %v956_v28, 0.0 }
 0x27d   :  { %v910_v24 = vpop.permute.xlu0 %909  ;;  %v776_v47 = vrot.slane %v772_v27, 4  ;;  %v962_v34 = vrot.slane %v958_v11, 3 }
 0x27e   :  { %v912_v32 = vpop.permute.xlu1 %911  ;;  %v915_v40 = vsel %vm767_vm14, 0.0, %v910_v24  ;;  %v779_v56 = vadd.f32 %v775_v45, %v757_v33 }
 0x27f   :  { %v916_v37 = vsel %vm767_vm14, 0.0, %v912_v32  ;;  %v917_v48 = vsel %vm770_vm15, %v915_v40, 0.0  ;;  %v780_v60 = vadd.f32 %v776_v47, %v758_v54 }
 0x280   :  { %v918_v42 = vsel %vm770_vm15, %v916_v37, 0.0  ;;  %v921_v22 = vrot.slane %v917_v48, 3 }
 0x281   :  { %v784_v46 = vpop.permute.xlu0 %783  ;;  %v922_v36 = vrot.slane %v918_v42, 3 }
 0x282   :  { %v786_v49 = vpop.permute.xlu1 %785  ;;  %v790_v50 = vsel %vm789_vm1, 0.0, %v784_v46  ;;  %v925_v8 = vadd.f32 %v921_v22, %v905_v62 }
 0x283   :  { %v791_v52 = vsel %vm789_vm1, 0.0, %v786_v49  ;;  %v793_v53 = vsel %vm792_vm0, %v790_v50, 0.0  ;;  %v926_v15 = vadd.f32 %v922_v36, %v906_v2 }
 0x284   :  { %v794_v20 = vsel %vm792_vm0, %v791_v52, 0.0  ;;  %v797_v21 = vrot.slane %v793_v53, 4 }
 0x285   :  { %v798_v57 = vrot.slane %v794_v20, 4  ;;  %v930_v58 = vpop.permute.xlu0 %929 }
 0x286   :  { %v932_v35 = vpop.permute.xlu1 %931  ;;  %v935_v61 = vsel %vm789_vm1, 0.0, %v930_v58  ;;  %v801_v63 = vadd.f32 %v797_v21, %v779_v56 }
 0x287   :  { %v936_v0 = vsel %vm789_vm1, 0.0, %v932_v35  ;;  %v937_v1 = vsel %vm792_vm0, %v935_v61, 0.0  ;;  %v802_v3 = vadd.f32 %v798_v57, %v780_v60 }
 0x288   :  { %v938_v4 = vsel %vm792_vm0, %v936_v0, 0.0  ;;  %v941_v5 = vrot.slane %v937_v1, 3  ;;  %v823_v24 = vadd.f32 %v819_v7, %v801_v63 }
 0x289   :  { %v942_v9 = vrot.slane %v938_v4, 3  ;;  %v828_v10 = vpop.permute.xlu0 %827  ;;  %v824_v13 = vadd.f32 %v820_v6, %v802_v3 }
 0x28a   :  { %v830_v16 = vpop.permute.xlu1 %829  ;;  %v834_v17 = vsel %vm833_vm2, 0.0, %v828_v10  ;;  %v945_v18 = vadd.f32 %v941_v5, %v925_v8 }
 0x28b   :  { %v835_v23 = vsel %vm833_vm2, 0.0, %v830_v16  ;;  %v838_v25 = vrot.slane %v834_v17, 4  ;;  %v946_v26 = vadd.f32 %v942_v9, %v926_v15 }
 0x28c   :  { %v839_v14 = vrot.slane %v835_v23, 4  ;;  %v965_v31 = vadd.f32 %v961_v29, %v945_v18 }
 0x28d   :  { %v842_v30 = vadd.f32 %v838_v25, %v823_v24  ;;  %v970_v32 = vpop.permute.xlu0 %969  ;;  %v966_v37 = vadd.f32 %v962_v34, %v946_v26 }
 0x28e   :  { %v843_v27 = vadd.f32 %v839_v14, %v824_v13  ;;  %v972_v40 = vpop.permute.xlu1 %971  ;;  %v975_v39 = vsel %vm833_vm2, 0.0, %v970_v32 }
 0x28f   :  { %845 = vst.msk [vmem:[%s1633_s7 - $0x4] sm:$0x10] %vm844_vm3, %v842_v30  ;;  %v976_v28 = vsel %vm833_vm2, 0.0, %v972_v40  ;;  %v979_v41 = vrot.slane %v975_v39, 3 }
 0x290   :  { %846 = vst.msk [vmem:[%s1633_s7 - $0x2] sm:$0x10] %vm844_vm3, %v843_v27  ;;  %v980_v38 = vrot.slane %v976_v28, 3 }
 0x291   :  { %v983_v43 = vadd.f32 %v979_v41, %v965_v31 }
 0x292   :  { %v984_v44 = vadd.f32 %v980_v38, %v966_v37 }
 0x293   :  { %986 = vst.msk [vmem:[%s1633_s7 - $0x4] sm:$0x20] %vm985_vm4, %v983_v43 }
 0x294   :  { %987 = vst.msk [vmem:[%s1633_s7 - $0x2] sm:$0x20] %vm985_vm4, %v984_v44 }

// kernel: spex_plus_forward.8
= control target key start
LH: loop header
LB: loop body
LE: loop exit
PB: predicated region body
PF: predicated region fallthrough
CT: control target
= control target key end

     0   :  { %v5232_v3 = vmov 0   ;;  %vm130_vm0 = vcmask 261120   ;;  %vm345_vm1 = vcmask 252928   ;;  %s5235_s24 = smov 1   ;;  %s5236_s25 = smov 127   ;;  %vm560_vm10 = vcmask 7168   ;;  %s7054_s0 = inlined_call_operand.vmem [shape: bf16[2,32,31], index: 0, kind: input, shape index: {}]   ;;  %s7055_s2 = inlined_call_operand.vmem [shape: f32[4,32,32], index: 2, kind: input, shape index: {}]   ;;  %s7056_s1 = inlined_call_operand.vmem [shape: f32[2,128,1], index: 1, kind: input, shape index: {}]   ;;  %s7057_s3 = inlined_call_operand.vmem [shape: f32[4,32,1], index: 3, kind: input, shape index: {}]   ;;  %s7058_s4 = inlined_call_operand.vmem [shape: f32[4,32,1], index: 4, kind: input, shape index: {}]   ;;  %s7059_s5 = inlined_call_operand.vmem [shape: f32[4,32,3], index: 5, kind: input, shape index: {}]   ;;  %s7060_s6 = inlined_call_operand.vmem [shape: f32[4,32,1], index: 6, kind: input, shape index: {}]   ;;  %s7061_s7 = inlined_call_operand.vmem [shape: f32[4,32,1], index: 7, kind: input, shape index: {}]   ;;  %s7062_s8 = inlined_call_operand.vmem [shape: f32[4,32,1], index: 8, kind: input, shape index: {}]   ;;  %s7063_s10 = inlined_call_operand.vmem [shape: f32[4,32,1], index: 10, kind: input, shape index: {}]   ;;  %s7064_s9 = inlined_call_operand.vmem [shape: f32[4,32,32], index: 9, kind: input, shape index: {}]   ;;  %s7065_s11 = inlined_call_operand.vmem [shape: bf16[2,32,31], index: 11, kind: output, shape index: {}]  }
   0x1   :  { %v4649_v0 = vld [vmem:[%s7054_s0] sm:$0xff]   ;;  %v4665_v1 = vld [vmem:[%s7054_s0 + $0x10] sm:$0xff]   ;;  %v4664_v2 = vld [vmem:[%s7054_s0 + $0x8] sm:$0xff]   ;;  %5155 = vset.pattern.permute.xlu1 %v5232_v3  ;;  %5154 = vset.pattern.permute.xlu0 %v5232_v3  ;;  %vm653_vm11 = vcmask 244736   ;;  %s5237_s15 = smov 2   ;;  %s5238_s16 = smov 126  }
   0x2   :  { %5020 = vmatprep.subr.bf16.mxu0 %v4649_v0  ;;  %5028 = vmatprep.subr.bf16.mxu1 %v4665_v1  ;;  %v4666_v4 = vld [vmem:[%s7054_s0 + $0x18] sm:$0xff]   ;;  %v86_v5 = vld [vmem:[%s7055_s2] sm:$0xff]  ;;  %v87_v8 = vld [vmem:[%s7055_s2 + $0x8] sm:$0xff] }
   0x3   :  { %5022 = vmatpush3.bf16.msra.mxu0 %v4649_v0  ;;  %5030 = vmatpush3.bf16.msra.mxu1 %v4665_v1  ;;  %v70_v6 = vld [vmem:[%s7056_s1 + $0x80] sm:$0xff]  ;;  %v88_v9 = vld [vmem:[%s7055_s2 + $0x10] sm:$0xff]  ;;  %v71_v10 = vld [vmem:[%s7056_s1 + $0x88] sm:$0xff] }
   0x4   :  { %5024 = vmatprep.subr.bf16.mxu0 %v4664_v2  ;;  %5032 = vmatprep.subr.bf16.mxu1 %v4666_v4  ;;  %v54_v7 = vld [vmem:[%s7056_s1] sm:$0xff]  ;;  %v55_v11 = vld [vmem:[%s7056_s1 + $0x8] sm:$0xff]  ;;  %v89_v12 = vld [vmem:[%s7055_s2 + $0x18] sm:$0xff] }
   0x5   :  { %4803 = vmatprep.mubr.msk.f32.mxu0 %vm130_vm0, %v86_v5  ;;  %4817 = vmatprep.mubr.msk.f32.mxu1 %vm130_vm0, %v86_v5  ;;  %v72_v13 = vld [vmem:[%s7056_s1 + $0x90] sm:$0xff]  ;;  %v73_v15 = vld [vmem:[%s7056_s1 + $0x98] sm:$0xff] }
   0x6   :  { %112 = vperm.xlu1 %5155, %v70_v6   ;;  %92 = vperm.xlu0 %5154, %v54_v7   ;;  %v56_v14 = vld [vmem:[%s7056_s1 + $0x10] sm:$0xff]  ;;  %v57_v16 = vld [vmem:[%s7056_s1 + $0x18] sm:$0xff] }
   0x7   :  { %5026 = vmatpush3.bf16.msra.mxu0 %v4664_v2  ;;  %5034 = vmatpush3.bf16.msra.mxu1 %v4666_v4 }
   0xa   :  { %4804 = vmatmul.mubr.msk.f32.vlgmr.msra.gmra.mrb[0].mxu0 %vm130_vm0, %v87_v8  ;;  %4818 = vmatmul.mubr.msk.f32.vlgmr.msra.gmra.mrb[0].mxu1 %vm130_vm0, %v87_v8 }
   0xb   :  { %4806 = vmatprep.mubr.msk.f32.mxu0 %vm130_vm0, %v88_v9  ;;  %4820 = vmatprep.mubr.msk.f32.mxu1 %vm130_vm0, %v88_v9 }
   0xc   :  { %117 = vperm.xlu1 %5155, %v71_v10   ;;  %97 = vperm.xlu0 %5154, %v55_v11  }
   0xe   :  { %4807 = vmatmul.mubr.msk.f32.gmra.mrb[2].mxu0 %vm130_vm0, %v89_v12  ;;  %4821 = vmatmul.mubr.msk.f32.gmra.mrb[2].mxu1 %vm130_vm0, %v89_v12 }
  0x10   :  { %122 = vperm.xlu1 %5155, %v72_v13   ;;  %102 = vperm.xlu0 %5154, %v56_v14  }
  0x14   :  { %127 = vperm.xlu1 %5155, %v73_v15   ;;  %107 = vperm.xlu0 %5154, %v57_v16  }
  0x85   :  { %v93_v17 = vpop.permute.xlu0 %92  ;;  %v113_v18 = vpop.permute.xlu1 %112 }
  0x8b   :  { %v98_v19 = vpop.permute.xlu0 %97  ;;  %v118_v20 = vpop.permute.xlu1 %117 }
  0x8f   :  { %v103_v21 = vpop.permute.xlu0 %102  ;;  %v123_v46 = vpop.permute.xlu1 %122 }
  0x93   :  { %v108_v40 = vpop.permute.xlu0 %107  ;;  %v128_v53 = vpop.permute.xlu1 %127 }
  0xdd   :  { %v4805_v22 = vpop.f32.mrb[0].mxu0  ;;  %v4819_v23 = vpop.f32.mrb[0].mxu1 }
  0xde   :  { %v215_v24 = vadd.f32 %v4805_v22, %v98_v19  ;;  %v300_v25 = vadd.f32 %v4819_v23, %v118_v20  ;;  %v209_v26 = vpop.f32.mrb[1].mxu0  ;;  %v294_v27 = vpop.f32.mrb[1].mxu1  ;;  %v339_v19 = vld [vmem:[%s7057_s3 + $0x10] sm:$0xff]  ;;  %v341_v20 = vld [vmem:[%s7058_s4] sm:$0xff]  ;;  %v338_v22 = vld [vmem:[%s7057_s3 + $0x8] sm:$0xff] }
  0xdf   :  { %v210_v28 = vadd.f32 %v209_v26, %v93_v17  ;;  %v295_v29 = vadd.f32 %v294_v27, %v113_v18  ;;  %v337_v18 = vld [vmem:[%s7057_s3] sm:$0xff]  ;;  %v344_v23 = vld [vmem:[%s7058_s4 + $0x18] sm:$0xff]  ;;  %v343_v26 = vld [vmem:[%s7058_s4 + $0x10] sm:$0xff] }
  0xe0   :  { %v322_v30 = vmul.f32 0.25, %v215_v24  ;;  %v326_v31 = vmul.f32 0.25, %v300_v25  ;;  %vm318_vm2 = vcmp.ge.f32.partialorder %v300_v25, 0.0  ;;  %vm314_vm3 = vcmp.ge.f32.partialorder %v215_v24, 0.0  ;;  %v524_v27 = vld [vmem:[%s7059_s5] sm:$0xff] }
  0xe1   :  { %vm313_vm4 = vcmp.ge.f32.partialorder %v210_v28, 0.0  ;;  %v321_v32 = vmul.f32 0.25, %v210_v28  ;;  %vm317_vm5 = vcmp.ge.f32.partialorder %v295_v29, 0.0  ;;  %v325_v33 = vmul.f32 0.25, %v295_v29  ;;  %v4808_v34 = vpop.f32.mrb[2].mxu0  ;;  %v4822_v35 = vpop.f32.mrb[2].mxu1 }
  0xe2   :  { %v219_v36 = vpop.f32.mrb[3].mxu0  ;;  %v304_v37 = vpop.f32.mrb[3].mxu1  ;;  %v5357_v38 = vsel %vm318_vm2, %v300_v25, %v326_v31  ;;  %v5359_v39 = vsel %vm314_vm3, %v215_v24, %v322_v30  ;;  %v225_v43 = vadd.f32 %v4808_v34, %v108_v40  ;;  %v310_v57 = vadd.f32 %v4822_v35, %v128_v53  ;;  %v342_v24 = vld [vmem:[%s7058_s4 + $0x8] sm:$0xff]  ;;  %v527_v31 = vld [vmem:[%s7059_s5 + $0x18] sm:$0xff]  ;;  %v696_v35 = vld [vmem:[%s7060_s6 + $0x10] sm:$0xff] }
  0xe3   :  { %v361_v41 = vsel %vm345_vm1, %v5357_v38, 0.0  ;;  %v349_v42 = vsel %vm345_vm1, %v5359_v39, 0.0  ;;  %v5366_v44 = vsel %vm313_vm4, %v210_v28, %v321_v32  ;;  %v5368_v45 = vsel %vm317_vm5, %v295_v29, %v325_v33  ;;  %v525_v25 = vld [vmem:[%s7059_s5 + $0x8] sm:$0xff]  ;;  %v526_v29 = vld [vmem:[%s7059_s5 + $0x10] sm:$0xff]  ;;  %v694_v32 = vld [vmem:[%s7060_s6] sm:$0xff] }
  0xe4   :  { %362 = vadd.xlane.f32.xlu0 %v361_v41  ;;  %350 = vadd.xlane.f32.xlu1 %v349_v42  ;;  %v388_v47 = vmul.f32 %v5366_v44, %v5366_v44  ;;  %v346_v49 = vsel %vm345_vm1, %v5366_v44, 0.0  ;;  %v392_v50 = vmul.f32 %v5368_v45, %v5368_v45  ;;  %v324_v51 = vmul.f32 0.25, %v225_v43  ;;  %v697_v33 = vld [vmem:[%s7060_s6 + $0x18] sm:$0xff]  ;;  %v695_v34 = vld [vmem:[%s7060_s6 + $0x8] sm:$0xff] }
  0xe5   :  { %v220_v52 = vadd.f32 %v219_v36, %v103_v21  ;;  %vm316_vm6 = vcmp.ge.f32.partialorder %v225_v43, 0.0  ;;  %v358_v55 = vsel %vm345_vm1, %v5368_v45, 0.0  ;;  %v389_v56 = vmul.f32 %v5359_v39, %v5359_v39  ;;  %v340_v21 = vld [vmem:[%s7057_s3 + $0x18] sm:$0xff] }
  0xe6   :  { %v396_v48 = vsel %vm345_vm1, %v388_v47, 0.0  ;;  %v408_v54 = vsel %vm345_vm1, %v392_v50, 0.0  ;;  %v5382_v59 = vsel %vm316_vm6, %v225_v43, %v324_v51  ;;  %v393_v62 = vmul.f32 %v5357_v38, %v5357_v38 }
  0xe7   :  { %v323_v58 = vmul.f32 0.25, %v220_v52  ;;  %vm315_vm7 = vcmp.ge.f32.partialorder %v220_v52, 0.0  ;;  %v355_v60 = vsel %vm345_vm1, %v5382_v59, 0.0  ;;  %v399_v61 = vsel %vm345_vm1, %v389_v56, 0.0 }
  0xe8   :  { %397 = vadd.xlane.f32.xlu1 %v396_v48  ;;  %347 = vadd.xlane.f32.xlu0 %v346_v49  ;;  %v328_v63 = vmul.f32 0.25, %v310_v57  ;;  %v305_v0 = vadd.f32 %v304_v37, %v123_v46  ;;  %vm320_vm8 = vcmp.ge.f32.partialorder %v310_v57, 0.0  ;;  %v411_v4 = vsel %vm345_vm1, %v393_v62, 0.0 }
  0xe9   :  { %v5389_v1 = vsel %vm315_vm7, %v220_v52, %v323_v58  ;;  %v391_v5 = vmul.f32 %v5382_v59, %v5382_v59  ;;  %v5233_v28 = vmov 1   ;;  %v5234_v30 = vmov 2  }
  0xea   :  { %v352_v2 = vsel %vm345_vm1, %v5389_v1, 0.0  ;;  %v327_v6 = vmul.f32 0.25, %v305_v0  ;;  %v5396_v7 = vsel %vm320_vm8, %v310_v57, %v328_v63  ;;  %vm319_vm9 = vcmp.ge.f32.partialorder %v305_v0, 0.0 }
  0xeb   :  { %v405_v8 = vsel %vm345_vm1, %v391_v5, 0.0  ;;  %v367_v9 = vsel %vm345_vm1, %v5396_v7, 0.0  ;;  %v390_v10 = vmul.f32 %v5389_v1, %v5389_v1  ;;  %v395_v16 = vmul.f32 %v5396_v7, %v5396_v7 }
  0xec   :  { %409 = vadd.xlane.f32.xlu1 %v408_v54  ;;  %359 = vadd.xlane.f32.xlu0 %v358_v55  ;;  %v5403_v11 = vsel %vm319_vm9, %v305_v0, %v327_v6 }
  0xed   :  { %v402_v12 = vsel %vm345_vm1, %v390_v10, 0.0  ;;  %v364_v13 = vsel %vm345_vm1, %v5403_v11, 0.0  ;;  %v394_v14 = vmul.f32 %v5403_v11, %v5403_v11  ;;  %v417_v17 = vsel %vm345_vm1, %v395_v16, 0.0 }
  0xef   :  { %v414_v15 = vsel %vm345_vm1, %v394_v14, 0.0 }
  0xf0   :  { %356 = vadd.xlane.f32.xlu1 %v355_v60  ;;  %400 = vadd.xlane.f32.xlu0 %v399_v61 }
  0xf4   :  { %353 = vadd.xlane.f32.xlu1 %v352_v2  ;;  %412 = vadd.xlane.f32.xlu0 %v411_v4 }
  0xf8   :  { %406 = vadd.xlane.f32.xlu1 %v405_v8  ;;  %368 = vadd.xlane.f32.xlu0 %v367_v9 }
  0xfc   :  { %403 = vadd.xlane.f32.xlu1 %v402_v12  ;;  %365 = vadd.xlane.f32.xlu0 %v364_v13 }
 0x100   :  { %415 = vadd.xlane.f32.xlu0 %v414_v15 }
 0x104   :  { %418 = vadd.xlane.f32.xlu0 %v417_v17 }
 0x10d   :  { %470 = vperm.xlu1 %5155, %v337_v18  }
 0x111   :  { %480 = vperm.xlu1 %5155, %v339_v19  }
 0x115   :  { %498 = vperm.xlu1 %5155, %v341_v20  }
 0x119   :  { %485 = vperm.xlu1 %5155, %v340_v21  }
 0x11a   :  { %475 = vperm.xlu0 %5154, %v338_v22  }
 0x11d   :  { %513 = vperm.xlu1 %5155, %v344_v23  }
 0x11e   :  { %503 = vperm.xlu0 %5154, %v342_v24  }
 0x121   :  { %576 = vperm.xlu1 %5155, %v525_v25  }
 0x122   :  { %508 = vperm.xlu0 %5154, %v343_v26  }
 0x125   :  { %5157 = vset.pattern.permute.xlu1 %v5233_v28 }
 0x126   :  { %602 = vperm.xlu1 %5157, %v525_v25   ;;  %5156 = vset.pattern.permute.xlu0 %v5233_v28 }
 0x127   :  { %598 = vperm.xlu0 %5156, %v524_v27  }
 0x12a   :  { %5158 = vset.pattern.permute.xlu1 %v5232_v3 }
 0x12b   :  { %581 = vperm.xlu1 %5158, %v526_v29   ;;  %606 = vperm.xlu0 %5156, %v526_v29  }
 0x12f   :  { %5159 = vset.pattern.permute.xlu1 %v5234_v30  ;;  %5160 = vset.pattern.permute.xlu0 %v5234_v30 }
 0x130   :  { %663 = vperm.xlu1 %5159, %v524_v27   ;;  %667 = vperm.xlu0 %5160, %v525_v25  }
 0x134   :  { %5161 = vset.pattern.permute.xlu1 %v5232_v3  ;;  %671 = vperm.xlu0 %5160, %v526_v29  }
 0x135   :  { %586 = vperm.xlu1 %5161, %v527_v31  }
 0x138   :  { %5163 = vset.pattern.permute.xlu0 %v5232_v3 }
 0x139   :  { %5162 = vset.pattern.permute.xlu1 %v5233_v28  ;;  %571 = vperm.xlu0 %5163, %v524_v27  }
 0x13a   :  { %610 = vperm.xlu1 %5162, %v527_v31  }
 0x13d   :  { %700 = vperm.xlu0 %5163, %v694_v32  }
 0x13e   :  { %5164 = vset.pattern.permute.xlu1 %v5234_v30 }
 0x13f   :  { %675 = vperm.xlu1 %5164, %v527_v31  }
 0x141   :  { %715 = vperm.xlu0 %5163, %v697_v33  }
 0x143   :  { %5165 = vset.pattern.permute.xlu1 %v5232_v3 }
 0x144   :  { %705 = vperm.xlu1 %5165, %v695_v34  }
 0x148   :  { %710 = vperm.xlu1 %5165, %v696_v35  }
 0x171   :  { %v363_v36 = vpop.xlane.xlu0 %362  ;;  %v351_v37 = vpop.xlane.xlu1 %350 }
 0x175   :  { %v398_v40 = vpop.xlane.xlu1 %397  ;;  %v348_v41 = vpop.xlane.xlu0 %347 }
 0x176   :  { %v370_v48 = vadd.f32 %v351_v37, %v348_v41 }
 0x179   :  { %v410_v42 = vpop.xlane.xlu1 %409  ;;  %v360_v43 = vpop.xlane.xlu0 %359 }
 0x17a   :  { %v379_v56 = vadd.f32 %v363_v36, %v360_v43 }
 0x17d   :  { %v357_v46 = vpop.xlane.xlu1 %356  ;;  %v401_v47 = vpop.xlane.xlu0 %400 }
 0x17e   :  { %v420_v57 = vadd.f32 %v401_v47, %v398_v40 }
 0x181   :  { %v354_v49 = vpop.xlane.xlu1 %353  ;;  %v413_v50 = vpop.xlane.xlu0 %412 }
 0x182   :  { %v371_v51 = vadd.f32 %v370_v48, %v354_v49  ;;  %v429_v9 = vadd.f32 %v413_v50, %v410_v42 }
 0x184   :  { %v372_v52 = vadd.f32 %v371_v51, %v357_v46 }
 0x185   :  { %v407_v53 = vpop.xlane.xlu1 %406  ;;  %v369_v54 = vpop.xlane.xlu0 %368 }
 0x186   :  { %v373_v55 = vrot.slane %v372_v52, 4 }
 0x188   :  { %v374_v58 = vadd.f32 %v373_v55, %v372_v52 }
 0x189   :  { %v404_v60 = vpop.xlane.xlu1 %403  ;;  %v366_v61 = vpop.xlane.xlu0 %365 }
 0x18a   :  { %v375_v62 = vrot.slane %v374_v58, 2  ;;  %v421_v63 = vadd.f32 %v420_v57, %v404_v60  ;;  %v380_v0 = vadd.f32 %v379_v56, %v366_v61 }
 0x18c   :  { %v376_v2 = vadd.f32 %v375_v62, %v374_v58  ;;  %v422_v4 = vadd.f32 %v421_v63, %v407_v53  ;;  %v381_v5 = vadd.f32 %v380_v0, %v369_v54 }
 0x18d   :  { %v416_v6 = vpop.xlane.xlu0 %415  ;;  %v471_v49 = vpop.permute.xlu1 %470 }
 0x18e   :  { %v377_v8 = vrot.slane %v376_v2, 1  ;;  %v423_v10 = vrot.slane %v422_v4, 4  ;;  %v382_v12 = vrot.slane %v381_v5, 4  ;;  %v430_v15 = vadd.f32 %v429_v9, %v416_v6 }
 0x190   :  { %v424_v13 = vadd.f32 %v423_v10, %v422_v4  ;;  %v383_v14 = vadd.f32 %v382_v12, %v381_v5  ;;  %v378_v17 = vadd.f32 %v377_v8, %v376_v2 }
 0x191   :  { %v419_v16 = vpop.xlane.xlu0 %418  ;;  %v481_v52 = vpop.permute.xlu1 %480 }
 0x192   :  { %v425_v18 = vrot.slane %v424_v13, 2  ;;  %v384_v19 = vrot.slane %v383_v14, 2  ;;  %v431_v20 = vadd.f32 %v430_v15, %v419_v16  ;;  %v5472_v24 = vmul.f32 0.0010080645, %v378_v17 }
 0x194   :  { %v426_v21 = vadd.f32 %v425_v18, %v424_v13  ;;  %v385_v22 = vadd.f32 %v384_v19, %v383_v14  ;;  %v432_v23 = vrot.slane %v431_v20, 4  ;;  %v442_v34 = vmul.f32 %v5472_v24, %v5472_v24 }
 0x195   :  { %v448_v54 = vsub.f32 %v5366_v44, %v5472_v24  ;;  %v449_v55 = vsub.f32 %v5359_v39, %v5472_v24  ;;  %v499_v62 = vpop.permute.xlu1 %498  ;;  %v450_v4 = vsub.f32 %v5389_v1, %v5472_v24  ;;  %v451_v19 = vsub.f32 %v5382_v59, %v5472_v24 }
 0x196   :  { %v427_v25 = vrot.slane %v426_v21, 1  ;;  %v386_v26 = vrot.slane %v385_v22, 1  ;;  %v433_v27 = vadd.f32 %v432_v23, %v431_v20 }
 0x198   :  { %v428_v29 = vadd.f32 %v427_v25, %v426_v21  ;;  %v387_v31 = vadd.f32 %v386_v26, %v385_v22  ;;  %v434_v32 = vrot.slane %v433_v27, 2 }
 0x199   :  { %v476_v53 = vpop.permute.xlu0 %475  ;;  %v486_v21 = vpop.permute.xlu1 %485 }
 0x19a   :  { %v440_v33 = vmul.f32 0.0010080645, %v428_v29  ;;  %v435_v35 = vadd.f32 %v434_v32, %v433_v27  ;;  %v439_v37 = vmul.f32 0.0010080645, %v387_v31 }
 0x19c   :  { %v444_v36 = vsub.f32 %v440_v33, %v442_v34  ;;  %v436_v40 = vrot.slane %v435_v35, 1  ;;  %v443_v46 = vmul.f32 %v439_v37, %v439_v37  ;;  %v452_v5 = vsub.f32 %v5368_v45, %v439_v37 }
 0x19d   :  { %v504_v63 = vpop.permute.xlu0 %503  ;;  %v453_v44 = vsub.f32 %v5357_v38, %v439_v37  ;;  %v454_v39 = vsub.f32 %v5403_v11, %v439_v37  ;;  %v455_v18 = vsub.f32 %v5396_v7, %v439_v37  ;;  %v514_v25 = vpop.permute.xlu1 %513 }
 0x19e   :  { %v446_v41 = vmax.f32 %v444_v36, 0.0  ;;  %v437_v42 = vadd.f32 %v436_v40, %v435_v35 }
 0x1a0   :  { %v456_v43 = vadd.f32 1e-08, %v446_v41  ;;  %v441_v47 = vmul.f32 0.0010080645, %v437_v42 }
 0x1a1   :  { %v509_v11 = vpop.permute.xlu0 %508  ;;  %v577_v26 = vpop.permute.xlu1 %576 }
 0x1a2   :  { %5196 = vrsqrt.f32 %v456_v43  ;;  %v445_v48 = vsub.f32 %v441_v47, %v443_v46 }
 0x1a4   :  { %v447_v50 = vmax.f32 %v445_v48, 0.0 }
 0x1a5   :  { %v603_v27 = vpop.permute.xlu1 %602 }
 0x1a6   :  { %v457_v51 = vadd.f32 1e-08, %v447_v50  ;;  %v599_v31 = vpop.permute.xlu0 %598 }
 0x1a8   :  { %5198 = vrsqrt.f32 %v457_v51 }
 0x1aa   :  { %v582_v29 = vpop.permute.xlu1 %581  ;;  %v5536_v33 = vpop.permute.xlu0 %606 }
 0x1ac   :  { %v5197_v56 = vpop.eup %5196 }
 0x1ad   :  { %v460_v57 = vmul.f32 %v5197_v56, %v448_v54  ;;  %v461_v58 = vmul.f32 %v5197_v56, %v449_v55  ;;  %v462_v8 = vmul.f32 %v5197_v56, %v450_v4  ;;  %v463_v22 = vmul.f32 %v5197_v56, %v451_v19 }
 0x1af   :  { %v488_v60 = vmul.f32 %v471_v49, %v460_v57  ;;  %v489_v61 = vmul.f32 %v476_v53, %v461_v58  ;;  %v490_v14 = vmul.f32 %v481_v52, %v462_v8  ;;  %v491_v23 = vmul.f32 %v486_v21, %v463_v22  ;;  %v664_v32 = vpop.permute.xlu1 %663  ;;  %v668_v34 = vpop.permute.xlu0 %667 }
 0x1b1   :  { %v5480_v0 = vadd.f32 %v499_v62, %v488_v60  ;;  %v5482_v2 = vadd.f32 %v504_v63, %v489_v61  ;;  %v5501_v16 = vadd.f32 %v509_v11, %v490_v14  ;;  %v5522_v24 = vadd.f32 %v514_v25, %v491_v23 }
 0x1b2   :  { %v5199_v6 = vpop.eup %5198 }
 0x1b3   :  { %536 = vrot.lane.b32.xlu1 %v5480_v0, %s5235_s24  ;;  %538 = vrot.lane.b32.xlu0 %v5482_v2, %s5235_s24  ;;  %v464_v9 = vmul.f32 %v5199_v6, %v452_v5  ;;  %v465_v10 = vmul.f32 %v5199_v6, %v453_v44  ;;  %v466_v12 = vmul.f32 %v5199_v6, %v454_v39  ;;  %v5540_v36 = vpop.permute.xlu0 %671 }
 0x1b4   :  { %v467_v20 = vmul.f32 %v5199_v6, %v455_v18  ;;  %v5538_v35 = vpop.permute.xlu1 %586  ;;  %v613_v60 = vmul.f32 %v599_v31, %v5480_v0 }
 0x1b5   :  { %v492_v13 = vmul.f32 %v471_v49, %v464_v9  ;;  %v493_v1 = vmul.f32 %v476_v53, %v465_v10  ;;  %v494_v15 = vmul.f32 %v481_v52, %v466_v12 }
 0x1b6   :  { %v495_v7 = vmul.f32 %v486_v21, %v467_v20 }
 0x1b7   :  { %v5493_v45 = vadd.f32 %v499_v62, %v492_v13  ;;  %v5495_v38 = vadd.f32 %v504_v63, %v493_v1  ;;  %v5503_v17 = vadd.f32 %v509_v11, %v494_v15  ;;  %v614_v63 = vmul.f32 %v603_v27, %v5482_v2 }
 0x1b8   :  { %v5520_v59 = vadd.f32 %v514_v25, %v495_v7  ;;  %v572_v41 = vpop.permute.xlu0 %571 }
 0x1b9   :  { %544 = vrot.lane.b32.xlu1 %v5493_v45, %s5235_s24  ;;  %546 = vrot.lane.b32.xlu0 %v5495_v38, %s5235_s24  ;;  %v5542_v37 = vpop.permute.xlu1 %610  ;;  %v617_v10 = vmul.f32 %v599_v31, %v5493_v45  ;;  %v618_v1 = vmul.f32 %v603_v27, %v5495_v38 }
 0x1bc   :  { %v701_v43 = vpop.permute.xlu0 %700 }
 0x1bd   :  { %540 = vrot.lane.b32.xlu1 %v5501_v16, %s5235_s24  ;;  %548 = vrot.lane.b32.xlu0 %v5503_v17, %s5235_s24 }
 0x1be   :  { %v5544_v40 = vpop.permute.xlu1 %675 }
 0x1c0   :  { %v5548_v47 = vpop.permute.xlu0 %715 }
 0x1c1   :  { %629 = vrot.lane.b32.xlu1 %v5480_v0, %s5236_s25  ;;  %631 = vrot.lane.b32.xlu0 %v5482_v2, %s5236_s25 }
 0x1c3   :  { %v706_v42 = vpop.permute.xlu1 %705 }
 0x1c5   :  { %637 = vrot.lane.b32.xlu1 %v5493_v45, %s5236_s25  ;;  %639 = vrot.lane.b32.xlu0 %v5495_v38, %s5236_s25  ;;  %v615_v38 = vmul.f32 %v5536_v33, %v5501_v16 }
 0x1c7   :  { %v5546_v46 = vpop.permute.xlu1 %710 }
 0x1c9   :  { %550 = vrot.lane.b32.xlu1 %v5520_v59, %s5235_s24  ;;  %542 = vrot.lane.b32.xlu0 %v5522_v24, %s5235_s24 }
 0x1cd   :  { %641 = vrot.lane.b32.xlu1 %v5503_v17, %s5236_s25  ;;  %633 = vrot.lane.b32.xlu0 %v5501_v16, %s5236_s25 }
 0x1d1   :  { %635 = vrot.lane.b32.xlu1 %v5522_v24, %s5236_s25  ;;  %643 = vrot.lane.b32.xlu0 %v5520_v59, %s5236_s25 }
 0x225   :  { %v537_v48 = vpop.permute.xlu1 %536  ;;  %v539_v49 = vpop.permute.xlu0 %538 }
 0x226   :  { %v561_v52 = vsel %vm560_vm10, 0.0, %v537_v48  ;;  %v562_v53 = vsel %vm560_vm10, 0.0, %v539_v49 }
 0x227   :  { %v589_v56 = vmul.f32 %v572_v41, %v561_v52  ;;  %v590_v58 = vmul.f32 %v577_v26, %v562_v53 }
 0x229   :  { %v621_v6 = vadd.f32 %v613_v60, %v589_v56  ;;  %v622_v12 = vadd.f32 %v614_v63, %v590_v58 }
 0x22b   :  { %v545_v50 = vpop.permute.xlu1 %544  ;;  %v547_v51 = vpop.permute.xlu0 %546 }
 0x22c   :  { %v565_v57 = vsel %vm560_vm10, 0.0, %v545_v50  ;;  %v566_v61 = vsel %vm560_vm10, 0.0, %v547_v51 }
 0x22d   :  { %v593_v4 = vmul.f32 %v572_v41, %v565_v57  ;;  %v594_v13 = vmul.f32 %v577_v26, %v566_v61 }
 0x22f   :  { %v541_v54 = vpop.permute.xlu1 %540  ;;  %v549_v55 = vpop.permute.xlu0 %548  ;;  %v625_v2 = vadd.f32 %v617_v10, %v593_v4  ;;  %v626_v45 = vadd.f32 %v618_v1, %v594_v13  ;;  %v620_v13 = vmul.f32 %v5542_v37, %v5520_v59 }
 0x230   :  { %v563_v39 = vsel %vm560_vm10, 0.0, %v541_v54  ;;  %v567_v21 = vsel %vm560_vm10, 0.0, %v549_v55 }
 0x231   :  { %v591_v11 = vmul.f32 %v582_v29, %v563_v39  ;;  %v595_v48 = vmul.f32 %v582_v29, %v567_v21 }
 0x233   :  { %v630_v62 = vpop.permute.xlu1 %629  ;;  %v632_v44 = vpop.permute.xlu0 %631  ;;  %v623_v52 = vadd.f32 %v615_v38, %v591_v11 }
 0x234   :  { %v654_v5 = vsel %vm653_vm11, %v630_v62, 0.0  ;;  %v655_v9 = vsel %vm653_vm11, %v632_v44, 0.0 }
 0x235   :  { %v678_v8 = vmul.f32 %v664_v32, %v654_v5  ;;  %v679_v0 = vmul.f32 %v668_v34, %v655_v9 }
 0x237   :  { %v686_v14 = vadd.f32 %v678_v8, %v621_v6  ;;  %v638_v15 = vpop.permute.xlu1 %637  ;;  %v687_v18 = vadd.f32 %v679_v0, %v622_v12  ;;  %v640_v20 = vpop.permute.xlu0 %639  ;;  %v616_v8 = vmul.f32 %v5542_v37, %v5522_v24 }
 0x238   :  { %v658_v19 = vsel %vm653_vm11, %v638_v15, 0.0  ;;  %v659_v23 = vsel %vm653_vm11, %v640_v20, 0.0 }
 0x239   :  { %v718_v22 = vadd.f32 %v701_v43, %v686_v14  ;;  %v682_v7 = vmul.f32 %v664_v32, %v658_v19  ;;  %v719_v25 = vadd.f32 %v706_v42, %v687_v18  ;;  %v683_v26 = vmul.f32 %v668_v34, %v659_v23 }
 0x23a   :  { %v619_v32 = vmul.f32 %v5536_v33, %v5503_v17 }
 0x23b   :  { %v690_v27 = vadd.f32 %v682_v7, %v625_v2  ;;  %v551_v31 = vpop.permute.xlu1 %550  ;;  %vm726_vm12 = vcmp.ge.f32.partialorder %v718_v22, 0.0  ;;  %v734_v41 = vmul.f32 0.25, %v718_v22  ;;  %v691_v49 = vadd.f32 %v683_v26, %v626_v45  ;;  %v543_v50 = vpop.permute.xlu0 %542 }
 0x23c   :  { %vm727_vm13 = vcmp.ge.f32.partialorder %v719_v25, 0.0  ;;  %v735_v51 = vmul.f32 0.25, %v719_v25  ;;  %v564_v55 = vsel %vm560_vm10, 0.0, %v543_v50  ;;  %v568_v29 = vsel %vm560_vm10, 0.0, %v551_v31 }
 0x23d   :  { %v722_v53 = vadd.f32 %v701_v43, %v690_v27  ;;  %v5568_v54 = vsel %vm726_vm12, %v718_v22, %v734_v41  ;;  %v723_v34 = vadd.f32 %v706_v42, %v691_v49  ;;  %v627_v33 = vadd.f32 %v619_v32, %v595_v48 }
 0x23e   :  { %v758_v16 = vsel %vm345_vm1, %v5568_v54, 0.0  ;;  %v5573_v56 = vsel %vm727_vm13, %v719_v25, %v735_v51  ;;  %v592_v61 = vmul.f32 %v5538_v35, %v564_v55  ;;  %v596_v5 = vmul.f32 %v5538_v35, %v568_v29 }
 0x23f   :  { %v642_v57 = vpop.permute.xlu1 %641  ;;  %759 = vadd.xlane.f32.xlu1 %v758_v16  ;;  %v761_v58 = vsel %vm345_vm1, %v5573_v56, 0.0  ;;  %vm730_vm14 = vcmp.ge.f32.partialorder %v722_v53, 0.0  ;;  %v738_v17 = vmul.f32 0.25, %v722_v53  ;;  %v634_v42 = vpop.permute.xlu0 %633  ;;  %vm731_vm15 = vcmp.ge.f32.partialorder %v723_v34, 0.0 }
 0x240   :  { %v660_v43 = vsel %vm653_vm11, %v642_v57, 0.0  ;;  %762 = vadd.xlane.f32.xlu0 %v761_v58  ;;  %v739_v60 = vmul.f32 0.25, %v723_v34  ;;  %v656_v63 = vsel %vm653_vm11, %v634_v42, 0.0  ;;  %v624_v1 = vadd.f32 %v616_v8, %v592_v61  ;;  %v750_v42 = vld [vmem:[%s7061_s7] sm:$0xff]  ;;  %v755_v61 = vld [vmem:[%s7062_s8 + $0x8] sm:$0xff] }
 0x241   :  { %v684_v62 = vmul.f32 %v5540_v36, %v660_v43  ;;  %v5582_v4 = vsel %vm730_vm14, %v722_v53, %v738_v17  ;;  %v680_v44 = vmul.f32 %v5540_v36, %v656_v63  ;;  %v628_v2 = vadd.f32 %v620_v13, %v596_v5  ;;  %v754_v43 = vld [vmem:[%s7062_s8] sm:$0xff]  ;;  %v753_v63 = vld [vmem:[%s7061_s7 + $0x18] sm:$0xff]  ;;  %v1131_v8 = vld [vmem:[%s7063_s10 + $0x8] sm:$0xff] }
 0x242   :  { %v770_v6 = vsel %vm345_vm1, %v5582_v4, 0.0  ;;  %v5588_v39 = vsel %vm731_vm15, %v723_v34, %v739_v60  ;;  %v800_v31 = vmul.f32 %v5568_v54, %v5568_v54  ;;  %v801_v41 = vmul.f32 %v5573_v56, %v5573_v56  ;;  %v752_v60 = vld [vmem:[%s7061_s7 + $0x10] sm:$0xff]  ;;  %v1130_v5 = vld [vmem:[%s7063_s10] sm:$0xff]  ;;  %v59_v13 = vld [vmem:[%s7056_s1 + $0x28] sm:$0xff] }
 0x243   :  { %v692_v9 = vadd.f32 %v684_v62, %v627_v33  ;;  %v636_v10 = vpop.permute.xlu1 %635  ;;  %v773_v12 = vsel %vm345_vm1, %v5588_v39, 0.0  ;;  %v688_v0 = vadd.f32 %v680_v44, %v623_v52  ;;  %v644_v36 = vpop.permute.xlu0 %643  ;;  %v804_v50 = vmul.f32 %v5582_v4, %v5582_v4  ;;  %v751_v33 = vld [vmem:[%s7061_s7 + $0x8] sm:$0xff]  ;;  %v756_v62 = vld [vmem:[%s7062_s8 + $0x10] sm:$0xff]  ;;  %v757_v44 = vld [vmem:[%s7062_s8 + $0x18] sm:$0xff] }
 0x244   :  { %v657_v35 = vsel %vm653_vm11, %v636_v10, 0.0  ;;  %771 = vadd.xlane.f32.xlu0 %v770_v6  ;;  %774 = vadd.xlane.f32.xlu1 %v773_v12  ;;  %v661_v24 = vsel %vm653_vm11, %v644_v36, 0.0  ;;  %v808_v48 = vsel %vm345_vm1, %v800_v31, 0.0  ;;  %v811_v49 = vsel %vm345_vm1, %v801_v41, 0.0  ;;  %v1132_v6 = vld [vmem:[%s7063_s10 + $0x10] sm:$0xff]  ;;  %v1133_v10 = vld [vmem:[%s7063_s10 + $0x18] sm:$0xff] }
 0x245   :  { %v724_v14 = vadd.f32 %v5546_v46, %v692_v9  ;;  %v681_v15 = vmul.f32 %v5544_v40, %v657_v35  ;;  %v720_v11 = vadd.f32 %v5546_v46, %v688_v0  ;;  %v685_v18 = vmul.f32 %v5544_v40, %v661_v24  ;;  %v58_v9 = vld [vmem:[%s7056_s1 + $0x20] sm:$0xff]  ;;  %v60_v0 = vld [vmem:[%s7056_s1 + $0x30] sm:$0xff]  ;;  %v75_v35 = vld [vmem:[%s7056_s1 + $0xa8] sm:$0xff] }
 0x246   :  { %v805_v51 = vmul.f32 %v5588_v39, %v5588_v39  ;;  %v820_v32 = vsel %vm345_vm1, %v804_v50, 0.0  ;;  %v74_v12 = vld [vmem:[%s7056_s1 + $0xa0] sm:$0xff]  ;;  %v61_v36 = vld [vmem:[%s7056_s1 + $0x38] sm:$0xff] }
 0x247   :  { %v689_v19 = vadd.f32 %v681_v15, %v624_v1  ;;  %vm732_vm2 = vcmp.ge.f32.partialorder %v724_v14, 0.0  ;;  %v740_v59 = vmul.f32 0.25, %v724_v14  ;;  %v693_v37 = vadd.f32 %v685_v18, %v628_v2  ;;  %v76_v1 = vld [vmem:[%s7056_s1 + $0xb0] sm:$0xff]  ;;  %v936_v15 = vld [vmem:[%s7064_s9] sm:$0xff] }
 0x248   :  { %vm728_vm3 = vcmp.ge.f32.partialorder %v720_v11, 0.0  ;;  %v736_v20 = vmul.f32 0.25, %v720_v11  ;;  %v823_v52 = vsel %vm345_vm1, %v805_v51, 0.0  ;;  %4831 = vmatprep.mubr.msk.f32.mxu0 %vm130_vm0, %v936_v15  ;;  %4845 = vmatprep.mubr.msk.f32.mxu1 %vm130_vm0, %v936_v15 }
 0x249   :  { %v721_v21 = vadd.f32 %v5548_v47, %v689_v19  ;;  %v5603_v22 = vsel %vm732_vm2, %v724_v14, %v740_v59  ;;  %v725_v7 = vadd.f32 %v5548_v47, %v693_v37  ;;  %v77_v14 = vld [vmem:[%s7056_s1 + $0xb8] sm:$0xff]  ;;  %vm1638_vm2 = vcmask 15360  }
 0x24a   :  { %v776_v23 = vsel %vm345_vm1, %v5603_v22, 0.0  ;;  %v5608_v45 = vsel %vm728_vm3, %v720_v11, %v736_v20  ;;  %v806_v34 = vmul.f32 %v5603_v22, %v5603_v22  ;;  %vm1731_vm3 = vcmask 236544  }
 0x24b   :  { %777 = vadd.xlane.f32.xlu1 %v776_v23  ;;  %v764_v40 = vsel %vm345_vm1, %v5608_v45, 0.0  ;;  %vm729_vm4 = vcmp.ge.f32.partialorder %v721_v21, 0.0  ;;  %v737_v46 = vmul.f32 0.25, %v721_v21  ;;  %vm733_vm5 = vcmp.ge.f32.partialorder %v725_v7, 0.0 }
 0x24c   :  { %765 = vadd.xlane.f32.xlu0 %v764_v40  ;;  %v741_v25 = vmul.f32 0.25, %v725_v7  ;;  %v802_v53 = vmul.f32 %v5608_v45, %v5608_v45  ;;  %v826_v16 = vsel %vm345_vm1, %v806_v34, 0.0 }
 0x24d   :  { %v5612_v26 = vsel %vm729_vm4, %v721_v21, %v737_v46 }
 0x24e   :  { %v767_v38 = vsel %vm345_vm1, %v5612_v26, 0.0  ;;  %v5616_v47 = vsel %vm733_vm5, %v725_v7, %v741_v25  ;;  %v814_v55 = vsel %vm345_vm1, %v802_v53, 0.0  ;;  %v803_v29 = vmul.f32 %v5612_v26, %v5612_v26 }
 0x24f   :  { %v779_v27 = vsel %vm345_vm1, %v5616_v47, 0.0  ;;  %v807_v57 = vmul.f32 %v5616_v47, %v5616_v47 }
 0x250   :  { %768 = vadd.xlane.f32.xlu0 %v767_v38  ;;  %780 = vadd.xlane.f32.xlu1 %v779_v27  ;;  %v817_v58 = vsel %vm345_vm1, %v803_v29, 0.0 }
 0x251   :  { %v829_v17 = vsel %vm345_vm1, %v807_v57, 0.0 }
 0x254   :  { %809 = vadd.xlane.f32.xlu0 %v808_v48  ;;  %812 = vadd.xlane.f32.xlu1 %v811_v49 }
 0x258   :  { %821 = vadd.xlane.f32.xlu0 %v820_v32  ;;  %824 = vadd.xlane.f32.xlu1 %v823_v52 }
 0x25c   :  { %815 = vadd.xlane.f32.xlu0 %v814_v55  ;;  %827 = vadd.xlane.f32.xlu1 %v826_v16 }
 0x260   :  { %818 = vadd.xlane.f32.xlu0 %v817_v58  ;;  %830 = vadd.xlane.f32.xlu1 %v829_v17 }
 0x271   :  { %887 = vperm.xlu1 %5165, %v751_v33  }
 0x275   :  { %910 = vperm.xlu1 %5165, %v754_v43  }
 0x276   :  { %882 = vperm.xlu0 %5163, %v750_v42  }
 0x279   :  { %892 = vperm.xlu1 %5165, %v752_v60  }
 0x27a   :  { %915 = vperm.xlu0 %5163, %v755_v61  }
 0x27d   :  { %920 = vperm.xlu1 %5165, %v756_v62  }
 0x27e   :  { %897 = vperm.xlu0 %5163, %v753_v63  }
 0x281   :  { %1136 = vperm.xlu1 %5165, %v1130_v5  }
 0x282   :  { %925 = vperm.xlu0 %5163, %v757_v44  }
 0x285   :  { %1146 = vperm.xlu1 %5165, %v1132_v6  }
 0x286   :  { %1141 = vperm.xlu0 %5163, %v1131_v8  }
 0x289   :  { %1169 = vperm.xlu1 %5165, %v58_v9  }
 0x28a   :  { %1151 = vperm.xlu0 %5163, %v1133_v10  }
 0x28d   :  { %1189 = vperm.xlu1 %5165, %v74_v12  }
 0x28e   :  { %1174 = vperm.xlu0 %5163, %v59_v13  }
 0x291   :  { %1179 = vperm.xlu1 %5165, %v60_v0  }
 0x292   :  { %1194 = vperm.xlu0 %5163, %v75_v35  }
 0x295   :  { %1184 = vperm.xlu1 %5165, %v61_v36  }
 0x296   :  { %1199 = vperm.xlu0 %5163, %v76_v1  }
 0x29a   :  { %1204 = vperm.xlu0 %5163, %v77_v14  }
 0x2cc   :  { %v760_v24 = vpop.xlane.xlu1 %759 }
 0x2cd   :  { %v763_v2 = vpop.xlane.xlu0 %762 }
 0x2ce   :  { %v782_v37 = vadd.f32 %v763_v2, %v760_v24 }
 0x2d1   :  { %v775_v11 = vpop.xlane.xlu1 %774  ;;  %v772_v18 = vpop.xlane.xlu0 %771 }
 0x2d2   :  { %v791_v20 = vadd.f32 %v775_v11, %v772_v18 }
 0x2d8   :  { %v778_v19 = vpop.xlane.xlu1 %777 }
 0x2d9   :  { %v766_v59 = vpop.xlane.xlu0 %765  ;;  %v792_v21 = vadd.f32 %v791_v20, %v778_v19 }
 0x2da   :  { %v783_v7 = vadd.f32 %v782_v37, %v766_v59 }
 0x2dd   :  { %v781_v23 = vpop.xlane.xlu1 %780  ;;  %v769_v40 = vpop.xlane.xlu0 %768 }
 0x2de   :  { %v793_v46 = vadd.f32 %v792_v21, %v781_v23  ;;  %v784_v25 = vadd.f32 %v783_v7, %v769_v40 }
 0x2e0   :  { %v794_v38 = vrot.slane %v793_v46, 4  ;;  %v785_v27 = vrot.slane %v784_v25, 4 }
 0x2e1   :  { %v813_v31 = vpop.xlane.xlu1 %812  ;;  %v810_v41 = vpop.xlane.xlu0 %809 }
 0x2e2   :  { %v795_v48 = vadd.f32 %v794_v38, %v793_v46  ;;  %v786_v49 = vadd.f32 %v785_v27, %v784_v25  ;;  %v832_v55 = vadd.f32 %v813_v31, %v810_v41 }
 0x2e4   :  { %v796_v32 = vrot.slane %v795_v48, 2  ;;  %v787_v52 = vrot.slane %v786_v49, 2 }
 0x2e5   :  { %v825_v50 = vpop.xlane.xlu1 %824  ;;  %v822_v51 = vpop.xlane.xlu0 %821 }
 0x2e6   :  { %v841_v16 = vadd.f32 %v825_v50, %v822_v51  ;;  %v797_v29 = vadd.f32 %v796_v32, %v795_v48  ;;  %v788_v57 = vadd.f32 %v787_v52, %v786_v49 }
 0x2e8   :  { %v798_v61 = vrot.slane %v797_v29, 1  ;;  %v789_v62 = vrot.slane %v788_v57, 1 }
 0x2e9   :  { %v828_v53 = vpop.xlane.xlu1 %827  ;;  %v816_v34 = vpop.xlane.xlu0 %815 }
 0x2ea   :  { %v842_v58 = vadd.f32 %v841_v16, %v828_v53  ;;  %v833_v17 = vadd.f32 %v832_v55, %v816_v34  ;;  %v799_v8 = vadd.f32 %v798_v61, %v797_v29  ;;  %v790_v9 = vadd.f32 %v789_v62, %v788_v57 }
 0x2ec   :  { %v851_v35 = vmul.f32 0.0010080645, %v799_v8  ;;  %v850_v36 = vmul.f32 0.0010080645, %v790_v9 }
 0x2ed   :  { %v831_v33 = vpop.xlane.xlu1 %830  ;;  %v819_v43 = vpop.xlane.xlu0 %818 }
 0x2ee   :  { %v843_v42 = vadd.f32 %v842_v58, %v831_v33  ;;  %v834_v60 = vadd.f32 %v833_v17, %v819_v43  ;;  %v855_v11 = vmul.f32 %v851_v35, %v851_v35  ;;  %v854_v18 = vmul.f32 %v850_v36, %v850_v36 }
 0x2ef   :  { %v865_v41 = vsub.f32 %v5588_v39, %v851_v35  ;;  %v864_v48 = vsub.f32 %v5582_v4, %v851_v35  ;;  %v866_v49 = vsub.f32 %v5603_v22, %v851_v35  ;;  %v867_v50 = vsub.f32 %v5616_v47, %v851_v35 }
 0x2f0   :  { %v844_v63 = vrot.slane %v843_v42, 4  ;;  %v835_v5 = vrot.slane %v834_v60, 4  ;;  %v861_v32 = vsub.f32 %v5573_v56, %v850_v36  ;;  %v860_v52 = vsub.f32 %v5568_v54, %v850_v36 }
 0x2f1   :  { %v888_v7 = vpop.permute.xlu1 %887  ;;  %v862_v53 = vsub.f32 %v5608_v45, %v850_v36  ;;  %v863_v34 = vsub.f32 %v5612_v26, %v850_v36  ;;  %v937_v36 = vld [vmem:[%s7064_s9 + $0x8] sm:$0xff] }
 0x2f2   :  { %v845_v44 = vadd.f32 %v844_v63, %v843_v42  ;;  %v836_v6 = vadd.f32 %v835_v5, %v834_v60 }
 0x2f4   :  { %v846_v10 = vrot.slane %v845_v44, 2  ;;  %v837_v12 = vrot.slane %v836_v6, 2 }
 0x2f5   :  { %v883_v23 = vpop.permute.xlu0 %882  ;;  %v911_v25 = vpop.permute.xlu1 %910 }
 0x2f6   :  { %v847_v13 = vadd.f32 %v846_v10, %v845_v44  ;;  %v838_v0 = vadd.f32 %v837_v12, %v836_v6 }
 0x2f8   :  { %v848_v1 = vrot.slane %v847_v13, 1  ;;  %v839_v14 = vrot.slane %v838_v0, 1 }
 0x2f9   :  { %v916_v38 = vpop.permute.xlu0 %915  ;;  %v893_v27 = vpop.permute.xlu1 %892 }
 0x2fa   :  { %v849_v15 = vadd.f32 %v848_v1, %v847_v13  ;;  %v840_v24 = vadd.f32 %v839_v14, %v838_v0  ;;  %v938_v1 = vld [vmem:[%s7064_s9 + $0x10] sm:$0xff]  ;;  %v939_v14 = vld [vmem:[%s7064_s9 + $0x18] sm:$0xff] }
 0x2fc   :  { %v853_v2 = vmul.f32 0.0010080645, %v849_v15  ;;  %v852_v19 = vmul.f32 0.0010080645, %v840_v24  ;;  %v4476_v15 = vld [vmem:[%s7055_s2 + $0x20] sm:$0xff]  ;;  %v5740_v24 = vld [vmem:[%s7054_s0 + $0x10] sm:$0xff]  }
 0x2fd   :  { %v898_v31 = vpop.permute.xlu0 %897  ;;  %v921_v61 = vpop.permute.xlu1 %920 }
 0x2fe   :  { %v857_v59 = vsub.f32 %v853_v2, %v855_v11  ;;  %v856_v37 = vsub.f32 %v852_v19, %v854_v18  ;;  %v4659_v2 = vunpack.c.h.bf16 %v5740_v24  ;;  %v5746_v11 = vld [vmem:[%s7054_s0] sm:$0xff]   ;;  %v7070_v19 = vunpack.c.l.bf16 %v5740_v24 }
 0x2ff   :  { %v4651_v18 = vunpack.c.h.bf16 %v5746_v11 }
 0x300   :  { %v859_v20 = vmax.f32 %v857_v59, 0.0  ;;  %v858_v21 = vmax.f32 %v856_v37, 0.0  ;;  %v4650_v37 = vunpack.c.l.bf16 %v5746_v11 }
 0x301   :  { %v926_v62 = vpop.permute.xlu0 %925  ;;  %v1137_v59 = vpop.permute.xlu1 %1136 }
 0x302   :  { %v869_v40 = vadd.f32 1e-08, %v859_v20  ;;  %v868_v46 = vadd.f32 1e-08, %v858_v21 }
 0x304   :  { %5200 = vrsqrt.f32 %v869_v40 }
 0x305   :  { %5202 = vrsqrt.f32 %v868_v46  ;;  %v1142_v20 = vpop.permute.xlu0 %1141  ;;  %v5756_v46 = vld [vmem:[%s7054_s0 + $0x18] sm:$0xff]  }
 0x30e   :  { %v5201_v51 = vpop.eup %5200 }
 0x30f   :  { %v5203_v55 = vpop.eup %5202  ;;  %v877_v16 = vmul.f32 %v5201_v51, %v865_v41  ;;  %v876_v29 = vmul.f32 %v5201_v51, %v864_v48  ;;  %v878_v57 = vmul.f32 %v5201_v51, %v866_v49  ;;  %v879_v39 = vmul.f32 %v5201_v51, %v867_v50  ;;  %v5766_v41 = vld [vmem:[%s7054_s0 + $0x8] sm:$0xff]  }
 0x310   :  { %v873_v58 = vmul.f32 %v5203_v55, %v861_v32  ;;  %v872_v4 = vmul.f32 %v5203_v55, %v860_v52  ;;  %v874_v17 = vmul.f32 %v5203_v55, %v862_v53  ;;  %v875_v22 = vmul.f32 %v5203_v55, %v863_v34 }
 0x311   :  { %v905_v33 = vmul.f32 %v888_v7, %v877_v16  ;;  %v904_v47 = vmul.f32 %v883_v23, %v876_v29  ;;  %v906_v43 = vmul.f32 %v893_v27, %v878_v57  ;;  %v907_v42 = vmul.f32 %v898_v31, %v879_v39  ;;  %v1152_v39 = vpop.permute.xlu0 %1151 }
 0x312   :  { %v901_v56 = vmul.f32 %v888_v7, %v873_v58  ;;  %v900_v60 = vmul.f32 %v883_v23, %v872_v4  ;;  %v902_v54 = vmul.f32 %v893_v27, %v874_v17  ;;  %v903_v45 = vmul.f32 %v898_v31, %v875_v22 }
 0x313   :  { %v932_v26 = vadd.f32 %v911_v25, %v904_v47  ;;  %v933_v63 = vadd.f32 %v916_v38, %v905_v33  ;;  %v934_v5 = vadd.f32 %v921_v61, %v906_v43  ;;  %v935_v44 = vadd.f32 %v926_v62, %v907_v42  ;;  %v1147_v33 = vpop.permute.xlu1 %1146 }
 0x314   :  { %v928_v6 = vadd.f32 %v911_v25, %v900_v60  ;;  %v929_v8 = vadd.f32 %v916_v38, %v901_v56  ;;  %v930_v9 = vadd.f32 %v921_v61, %v902_v54  ;;  %v931_v10 = vadd.f32 %v926_v62, %v903_v45  ;;  %v4477_v62 = vld [vmem:[%s7055_s2 + $0x28] sm:$0xff] }
 0x315   :  { %v5043_v12 = vpack.c.bf16 %v933_v63, %v932_v26  ;;  %v5047_v0 = vpack.c.bf16 %v935_v44, %v934_v5  ;;  %v7068_v25 = vunpack.c.h.bf16 %v5756_v46  ;;  %v7069_v48 = vunpack.c.h.bf16 %v5766_v41  ;;  %v4478_v26 = vld [vmem:[%s7055_s2 + $0x30] sm:$0xff]  ;;  %v4479_v63 = vld [vmem:[%s7055_s2 + $0x38] sm:$0xff]  ;;  %v1175_v44 = vpop.permute.xlu0 %1174 }
 0x316   :  { %v5035_v13 = vpack.c.bf16 %v929_v8, %v928_v6  ;;  %v5039_v35 = vpack.c.bf16 %v931_v10, %v930_v9  ;;  %v7066_v49 = vunpack.c.l.bf16 %v5756_v46  ;;  %v7067_v32 = vunpack.c.l.bf16 %v5766_v41 }
 0x317   :  { %5044 = vmatprep.subr.bf16.mxu1 %v5043_v12  ;;  %v1170_v5 = vpop.permute.xlu1 %1169 }
 0x318   :  { %5036 = vmatprep.subr.bf16.mxu0 %v5035_v13  ;;  %5046 = vmatpush3.bf16.msra.mxu1 %v5043_v12 }
 0x319   :  { %5038 = vmatpush3.bf16.msra.mxu0 %v5035_v13  ;;  %5048 = vmatprep.subr.bf16.mxu1 %v5047_v0  ;;  %v1195_v8 = vpop.permute.xlu0 %1194 }
 0x31a   :  { %5040 = vmatprep.subr.bf16.mxu0 %v5039_v35 }
 0x31b   :  { %v1190_v6 = vpop.permute.xlu1 %1189 }
 0x31c   :  { %5050 = vmatpush3.bf16.msra.mxu1 %v5047_v0 }
 0x31d   :  { %5042 = vmatpush3.bf16.msra.mxu0 %v5039_v35 }
 0x31f   :  { %4846 = vmatmul.mubr.msk.f32.vlgmr.msra.gmra.mrb[4].mxu1 %vm130_vm0, %v937_v36 }
 0x320   :  { %4832 = vmatmul.mubr.msk.f32.vlgmr.msra.gmra.mrb[4].mxu0 %vm130_vm0, %v937_v36  ;;  %4848 = vmatprep.mubr.msk.f32.mxu1 %vm130_vm0, %v938_v1 }
 0x321   :  { %4834 = vmatprep.mubr.msk.f32.mxu0 %vm130_vm0, %v938_v1  ;;  %v1180_v1 = vpop.permute.xlu1 %1179 }
 0x323   :  { %4849 = vmatmul.mubr.msk.f32.gmra.mrb[6].mxu1 %vm130_vm0, %v939_v14 }
 0x324   :  { %4835 = vmatmul.mubr.msk.f32.gmra.mrb[6].mxu0 %vm130_vm0, %v939_v14  ;;  %4873 = vmatprep.mubr.msk.f32.mxu1 %vm130_vm0, %v4476_v15 }
 0x325   :  { %4859 = vmatprep.mubr.msk.f32.mxu0 %vm130_vm0, %v4476_v15 }
 0x3f2   :  { %v4847_v21 = vpop.f32.mrb[4].mxu1 }
 0x3f3   :  { %v4833_v7 = vpop.f32.mrb[4].mxu0  ;;  %v1127_v23 = vadd.f32 %v4847_v21, %v4659_v2  ;;  %v1103_v40 = vpop.f32.mrb[5].mxu1 }
 0x3f4   :  { %v1123_v38 = vadd.f32 %v4833_v7, %v4651_v18  ;;  %v1018_v27 = vpop.f32.mrb[5].mxu0  ;;  %v1126_v31 = vadd.f32 %v7070_v19, %v1103_v40 }
 0x3f5   :  { %v5770_v50 = vadd.f32 %v1142_v20, %v1127_v23  ;;  %v1122_v51 = vadd.f32 %v4650_v37, %v1018_v27 }
 0x3f6   :  { %v5775_v52 = vadd.f32 %v1142_v20, %v1123_v38  ;;  %v5777_v53 = vadd.f32 %v1137_v59, %v1126_v31  ;;  %v4850_v34 = vpop.f32.mrb[6].mxu1 }
 0x3f7   :  { %v5779_v55 = vadd.f32 %v1137_v59, %v1122_v51  ;;  %v4836_v16 = vpop.f32.mrb[6].mxu0  ;;  %v1129_v29 = vadd.f32 %v4850_v34, %v7068_v25  ;;  %v1113_v57 = vpop.f32.mrb[7].mxu1 }
 0x3f8   :  { %v1125_v58 = vadd.f32 %v4836_v16, %v7069_v48  ;;  %v1028_v4 = vpop.f32.mrb[7].mxu0  ;;  %v1128_v17 = vadd.f32 %v7066_v49, %v1113_v57  ;;  %v5059_v22 = vpack.c.bf16 %v5770_v50, %v5777_v53  ;;  %v1200_v59 = vpop.permute.xlu0 %1199 }
 0x3f9   :  { %v5789_v47 = vadd.f32 %v1152_v39, %v1129_v29  ;;  %v1124_v43 = vadd.f32 %v7067_v32, %v1028_v4  ;;  %v5051_v42 = vpack.c.bf16 %v5775_v52, %v5779_v55 }
 0x3fa   :  { %v5795_v56 = vadd.f32 %v1152_v39, %v1125_v58  ;;  %v5797_v60 = vadd.f32 %v1147_v33, %v1128_v17  ;;  %5060 = vmatprep.subr.bf16.mxu1 %v5059_v22  ;;  %v1185_v17 = vpop.permute.xlu1 %1184 }
 0x3fb   :  { %v5799_v54 = vadd.f32 %v1147_v33, %v1124_v43  ;;  %5052 = vmatprep.subr.bf16.mxu0 %v5051_v42  ;;  %5062 = vmatpush3.bf16.msra.mxu1 %v5059_v22 }
 0x3fc   :  { %5054 = vmatpush3.bf16.msra.mxu0 %v5051_v42  ;;  %v5063_v61 = vpack.c.bf16 %v5789_v47, %v5797_v60  ;;  %v1205_v39 = vpop.permute.xlu0 %1204 }
 0x3fd   :  { %v5055_v45 = vpack.c.bf16 %v5795_v56, %v5799_v54 }
 0x3fe   :  { %5064 = vmatprep.subr.bf16.mxu1 %v5063_v61 }
 0x3ff   :  { %5056 = vmatprep.subr.bf16.mxu0 %v5055_v45  ;;  %5066 = vmatpush3.bf16.msra.mxu1 %v5063_v61 }
 0x400   :  { %5058 = vmatpush3.bf16.msra.mxu0 %v5055_v45 }
 0x402   :  { %4874 = vmatmul.mubr.msk.f32.vlgmr.msra.gmra.mrb[8].mxu1 %vm130_vm0, %v4477_v62 }
 0x403   :  { %4860 = vmatmul.mubr.msk.f32.vlgmr.msra.gmra.mrb[8].mxu0 %vm130_vm0, %v4477_v62  ;;  %4876 = vmatprep.mubr.msk.f32.mxu1 %vm130_vm0, %v4478_v26 }
 0x404   :  { %4862 = vmatprep.mubr.msk.f32.mxu0 %vm130_vm0, %v4478_v26 }
 0x406   :  { %4877 = vmatmul.mubr.msk.f32.gmra.mrb[10].mxu1 %vm130_vm0, %v4479_v63 }
 0x407   :  { %4863 = vmatmul.mubr.msk.f32.gmra.mrb[10].mxu0 %vm130_vm0, %v4479_v63 }
 0x4d5   :  { %v4875_v9 = vpop.f32.mrb[8].mxu1 }
 0x4d6   :  { %v4861_v10 = vpop.f32.mrb[8].mxu0  ;;  %v1376_v12 = vadd.f32 %v4875_v9, %v1195_v8  ;;  %v1370_v13 = vpop.f32.mrb[9].mxu1 }
 0x4d7   :  { %v1291_v0 = vadd.f32 %v4861_v10, %v1175_v44  ;;  %v1285_v35 = vpop.f32.mrb[9].mxu0  ;;  %v1371_v36 = vadd.f32 %v1370_v13, %v1190_v6 }
 0x4d8   :  { %vm1394_vm6 = vcmp.ge.f32.partialorder %v1376_v12, 0.0  ;;  %v1402_v14 = vmul.f32 0.25, %v1376_v12  ;;  %v1286_v15 = vadd.f32 %v1285_v35, %v1170_v5 }
 0x4d9   :  { %vm1390_vm7 = vcmp.ge.f32.partialorder %v1291_v0, 0.0  ;;  %v1398_v20 = vmul.f32 0.25, %v1291_v0  ;;  %v4878_v21 = vpop.f32.mrb[10].mxu1  ;;  %v1401_v23 = vmul.f32 0.25, %v1371_v36  ;;  %vm1393_vm9 = vcmp.ge.f32.partialorder %v1371_v36, 0.0 }
 0x4da   :  { %v1397_v7 = vmul.f32 0.25, %v1286_v15  ;;  %v4864_v40 = vpop.f32.mrb[10].mxu0  ;;  %v1380_v38 = vpop.f32.mrb[11].mxu1  ;;  %v5820_v27 = vsel %vm1394_vm6, %v1376_v12, %v1402_v14  ;;  %vm1389_vm8 = vcmp.ge.f32.partialorder %v1286_v15, 0.0  ;;  %v1386_v22 = vadd.f32 %v4878_v21, %v1205_v39  ;;  %v4490_v39 = vld [vmem:[%s7057_s3 + $0x30] sm:$0xff] }
 0x4db   :  { %v1295_v31 = vpop.f32.mrb[11].mxu0  ;;  %v1438_v51 = vsel %vm345_vm1, %v5820_v27, 0.0  ;;  %v5824_v34 = vsel %vm1390_vm7, %v1291_v0, %v1398_v20  ;;  %v5828_v29 = vsel %vm1393_vm9, %v1371_v36, %v1401_v23  ;;  %v1301_v42 = vadd.f32 %v4864_v40, %v1185_v17  ;;  %v4492_v17 = vld [vmem:[%s7058_s4 + $0x20] sm:$0xff] }
 0x4dc   :  { %1439 = vadd.xlane.f32.xlu1 %v1438_v51  ;;  %v1426_v16 = vsel %vm345_vm1, %v5824_v34, 0.0  ;;  %v5830_v57 = vsel %vm1389_vm8, %v1286_v15, %v1397_v7  ;;  %v1466_v4 = vmul.f32 %v5824_v34, %v5824_v34  ;;  %v1435_v33 = vsel %vm345_vm1, %v5828_v29, 0.0 }
 0x4dd   :  { %1427 = vadd.xlane.f32.xlu0 %v1426_v16  ;;  %v1423_v58 = vsel %vm345_vm1, %v5830_v57, 0.0  ;;  %v1465_v43 = vmul.f32 %v5830_v57, %v5830_v57  ;;  %v1470_v45 = vmul.f32 %v5820_v27, %v5820_v27  ;;  %v1404_v62 = vmul.f32 0.25, %v1386_v22  ;;  %v4489_v16 = vld [vmem:[%s7057_s3 + $0x28] sm:$0xff] }
 0x4de   :  { %v1476_v61 = vsel %vm345_vm1, %v1466_v4, 0.0  ;;  %v1381_v26 = vadd.f32 %v1380_v38, %v1200_v59  ;;  %v1469_v5 = vmul.f32 %v5828_v29, %v5828_v29  ;;  %v1400_v44 = vmul.f32 0.25, %v1301_v42  ;;  %v4493_v4 = vld [vmem:[%s7058_s4 + $0x28] sm:$0xff] }
 0x4df   :  { %v1473_v63 = vsel %vm345_vm1, %v1465_v43, 0.0  ;;  %vm1396_vm12 = vcmp.ge.f32.partialorder %v1386_v22, 0.0  ;;  %v1296_v6 = vadd.f32 %v1295_v31, %v1180_v1  ;;  %vm1392_vm13 = vcmp.ge.f32.partialorder %v1301_v42, 0.0  ;;  %v4496_v43 = vld [vmem:[%s7059_s5 + $0x20] sm:$0xff] }
 0x4e0   :  { %1424 = vadd.xlane.f32.xlu1 %v1423_v58  ;;  %v1488_v8 = vsel %vm345_vm1, %v1470_v45, 0.0  ;;  %v1403_v9 = vmul.f32 0.25, %v1381_v26  ;;  %v1485_v10 = vsel %vm345_vm1, %v1469_v5, 0.0  ;;  %v5848_v12 = vsel %vm1396_vm12, %v1386_v22, %v1404_v62  ;;  %v4488_v58 = vld [vmem:[%s7057_s3 + $0x20] sm:$0xff]  ;;  %v4494_v22 = vld [vmem:[%s7058_s4 + $0x30] sm:$0xff]  ;;  %v4497_v45 = vld [vmem:[%s7059_s5 + $0x28] sm:$0xff] }
 0x4e1   :  { %1436 = vadd.xlane.f32.xlu0 %v1435_v33  ;;  %v1399_v13 = vmul.f32 0.25, %v1296_v6  ;;  %vm1395_vm14 = vcmp.ge.f32.partialorder %v1381_v26, 0.0  ;;  %v5850_v0 = vsel %vm1392_vm13, %v1301_v42, %v1400_v44  ;;  %vm1391_vm15 = vcmp.ge.f32.partialorder %v1296_v6, 0.0  ;;  %v4491_v33 = vld [vmem:[%s7057_s3 + $0x38] sm:$0xff]  ;;  %v4501_v5 = vld [vmem:[%s7060_s6 + $0x28] sm:$0xff]  ;;  %v4502_v44 = vld [vmem:[%s7060_s6 + $0x30] sm:$0xff] }
 0x4e2   :  { %v1444_v35 = vsel %vm345_vm1, %v5848_v12, 0.0  ;;  %v1432_v36 = vsel %vm345_vm1, %v5850_v0, 0.0  ;;  %v5856_v1 = vsel %vm1395_vm14, %v1381_v26, %v1403_v9  ;;  %v1472_v59 = vmul.f32 %v5848_v12, %v5848_v12  ;;  %v4495_v42 = vld [vmem:[%s7058_s4 + $0x38] sm:$0xff]  ;;  %v4500_v26 = vld [vmem:[%s7060_s6 + $0x20] sm:$0xff] }
 0x4e3   :  { %v5858_v14 = vsel %vm1391_vm15, %v1296_v6, %v1399_v13  ;;  %v1441_v15 = vsel %vm345_vm1, %v5856_v1, 0.0  ;;  %v1471_v23 = vmul.f32 %v5856_v1, %v5856_v1  ;;  %v1468_v38 = vmul.f32 %v5850_v0, %v5850_v0  ;;  %v4499_v62 = vld [vmem:[%s7059_s5 + $0x38] sm:$0xff] }
 0x4e4   :  { %1477 = vadd.xlane.f32.xlu1 %v1476_v61  ;;  %v1429_v20 = vsel %vm345_vm1, %v5858_v14, 0.0  ;;  %v1467_v21 = vmul.f32 %v5858_v14, %v5858_v14  ;;  %v1494_v7 = vsel %vm345_vm1, %v1472_v59, 0.0  ;;  %v4498_v61 = vld [vmem:[%s7059_s5 + $0x30] sm:$0xff] }
 0x4e5   :  { %1474 = vadd.xlane.f32.xlu0 %v1473_v63  ;;  %v1491_v31 = vsel %vm345_vm1, %v1471_v23, 0.0  ;;  %v1482_v51 = vsel %vm345_vm1, %v1468_v38, 0.0  ;;  %v4503_v63 = vld [vmem:[%s7060_s6 + $0x38] sm:$0xff] }
 0x4e6   :  { %v1479_v40 = vsel %vm345_vm1, %v1467_v21, 0.0 }
 0x4e8   :  { %1489 = vadd.xlane.f32.xlu1 %v1488_v8 }
 0x4e9   :  { %1486 = vadd.xlane.f32.xlu0 %v1485_v10 }
 0x4ec   :  { %1445 = vadd.xlane.f32.xlu1 %v1444_v35 }
 0x4ed   :  { %1433 = vadd.xlane.f32.xlu0 %v1432_v36 }
 0x4f0   :  { %1442 = vadd.xlane.f32.xlu1 %v1441_v15 }
 0x4f1   :  { %1430 = vadd.xlane.f32.xlu0 %v1429_v20 }
 0x4f4   :  { %1495 = vadd.xlane.f32.xlu1 %v1494_v7 }
 0x4f5   :  { %1480 = vadd.xlane.f32.xlu0 %v1479_v40 }
 0x4f8   :  { %1492 = vadd.xlane.f32.xlu1 %v1491_v31 }
 0x4f9   :  { %1483 = vadd.xlane.f32.xlu0 %v1482_v51 }
 0x509   :  { %1552 = vperm.xlu1 %5165, %v4489_v16  }
 0x50d   :  { %1557 = vperm.xlu1 %5165, %v4490_v39  }
 0x50f   :  { %1547 = vperm.xlu0 %5163, %v4488_v58  }
 0x511   :  { %1580 = vperm.xlu1 %5165, %v4493_v4  }
 0x513   :  { %1575 = vperm.xlu0 %5163, %v4492_v17  }
 0x515   :  { %1585 = vperm.xlu1 %5165, %v4494_v22  }
 0x517   :  { %1562 = vperm.xlu0 %5163, %v4491_v33  }
 0x519   :  { %1649 = vperm.xlu1 %5165, %v4496_v43  }
 0x51b   :  { %1590 = vperm.xlu0 %5163, %v4495_v42  }
 0x51d   :  { %5166 = vset.pattern.permute.xlu1 %v5233_v28 }
 0x51e   :  { %1676 = vperm.xlu1 %5166, %v4496_v43  }
 0x51f   :  { %5169 = vset.pattern.permute.xlu0 %v5234_v30 }
 0x520   :  { %1741 = vperm.xlu0 %5169, %v4496_v43  }
 0x522   :  { %5167 = vset.pattern.permute.xlu1 %v5232_v3 }
 0x523   :  { %1659 = vperm.xlu1 %5167, %v4498_v61  }
 0x524   :  { %5170 = vset.pattern.permute.xlu0 %v5233_v28 }
 0x525   :  { %1680 = vperm.xlu0 %5170, %v4497_v45  }
 0x527   :  { %5168 = vset.pattern.permute.xlu1 %v5233_v28 }
 0x528   :  { %1684 = vperm.xlu1 %5168, %v4498_v61  }
 0x529   :  { %1688 = vperm.xlu0 %5170, %v4499_v62  }
 0x52c   :  { %5171 = vset.pattern.permute.xlu1 %v5234_v30 }
 0x52d   :  { %1745 = vperm.xlu1 %5171, %v4497_v45   ;;  %5173 = vset.pattern.permute.xlu0 %v5232_v3 }
 0x52e   :  { %1654 = vperm.xlu0 %5173, %v4497_v45  }
 0x531   :  { %5172 = vset.pattern.permute.xlu1 %v5232_v3 }
 0x532   :  { %1664 = vperm.xlu1 %5172, %v4499_v62   ;;  %1779 = vperm.xlu0 %5173, %v4500_v26  }
 0x536   :  { %5174 = vset.pattern.permute.xlu1 %v5234_v30  ;;  %1794 = vperm.xlu0 %5173, %v4503_v63  }
 0x537   :  { %1749 = vperm.xlu1 %5174, %v4498_v61  }
 0x53b   :  { %1753 = vperm.xlu1 %5174, %v4499_v62  }
 0x53f   :  { %5175 = vset.pattern.permute.xlu1 %v5232_v3 }
 0x540   :  { %1784 = vperm.xlu1 %5175, %v4501_v5  }
 0x544   :  { %1789 = vperm.xlu1 %5175, %v4502_v44  }
 0x569   :  { %v1440_v6 = vpop.xlane.xlu1 %1439 }
 0x56a   :  { %v1428_v8 = vpop.xlane.xlu0 %1427 }
 0x56d   :  { %v1425_v9 = vpop.xlane.xlu1 %1424 }
 0x56e   :  { %v1437_v10 = vpop.xlane.xlu0 %1436  ;;  %v1447_v7 = vadd.f32 %v1428_v8, %v1425_v9 }
 0x56f   :  { %v1456_v21 = vadd.f32 %v1440_v6, %v1437_v10 }
 0x571   :  { %v1478_v13 = vpop.xlane.xlu1 %1477 }
 0x572   :  { %v1475_v35 = vpop.xlane.xlu0 %1474 }
 0x573   :  { %v1497_v17 = vadd.f32 %v1478_v13, %v1475_v35 }
 0x575   :  { %v1490_v36 = vpop.xlane.xlu1 %1489 }
 0x576   :  { %v1487_v15 = vpop.xlane.xlu0 %1486 }
 0x577   :  { %v1506_v33 = vadd.f32 %v1490_v36, %v1487_v15 }
 0x579   :  { %v1446_v59 = vpop.xlane.xlu1 %1445 }
 0x57a   :  { %v1434_v20 = vpop.xlane.xlu0 %1433 }
 0x57d   :  { %v1443_v23 = vpop.xlane.xlu1 %1442 }
 0x57e   :  { %v1431_v40 = vpop.xlane.xlu0 %1430  ;;  %v1457_v38 = vadd.f32 %v1456_v21, %v1443_v23 }
 0x57f   :  { %v1448_v31 = vadd.f32 %v1447_v7, %v1431_v40 }
 0x580   :  { %v1458_v51 = vadd.f32 %v1457_v38, %v1446_v59 }
 0x581   :  { %v1449_v16 = vadd.f32 %v1448_v31, %v1434_v20  ;;  %v1496_v39 = vpop.xlane.xlu1 %1495 }
 0x582   :  { %v1459_v58 = vrot.slane %v1458_v51, 4  ;;  %v1481_v4 = vpop.xlane.xlu0 %1480 }
 0x583   :  { %v1450_v22 = vrot.slane %v1449_v16, 4  ;;  %v1498_v61 = vadd.f32 %v1497_v17, %v1481_v4 }
 0x584   :  { %v1460_v43 = vadd.f32 %v1459_v58, %v1458_v51 }
 0x585   :  { %v1451_v42 = vadd.f32 %v1450_v22, %v1449_v16  ;;  %v1493_v45 = vpop.xlane.xlu1 %1492 }
 0x586   :  { %v1461_v62 = vrot.slane %v1460_v43, 2  ;;  %v1484_v26 = vpop.xlane.xlu0 %1483  ;;  %v1507_v63 = vadd.f32 %v1506_v33, %v1493_v45 }
 0x587   :  { %v1452_v5 = vrot.slane %v1451_v42, 2  ;;  %v1499_v44 = vadd.f32 %v1498_v61, %v1484_v26 }
 0x588   :  { %v1462_v6 = vadd.f32 %v1461_v62, %v1460_v43  ;;  %v1508_v8 = vadd.f32 %v1507_v63, %v1496_v39 }
 0x589   :  { %v1453_v9 = vadd.f32 %v1452_v5, %v1451_v42  ;;  %v1500_v10 = vrot.slane %v1499_v44, 4  ;;  %v1553_v5 = vpop.permute.xlu1 %1552 }
 0x58a   :  { %v1463_v59 = vrot.slane %v1462_v6, 1  ;;  %v1509_v20 = vrot.slane %v1508_v8, 4 }
 0x58b   :  { %v1454_v21 = vrot.slane %v1453_v9, 1  ;;  %v1501_v7 = vadd.f32 %v1500_v10, %v1499_v44 }
 0x58c   :  { %v1510_v13 = vadd.f32 %v1509_v20, %v1508_v8  ;;  %v1464_v15 = vadd.f32 %v1463_v59, %v1462_v6 }
 0x58d   :  { %v1455_v35 = vadd.f32 %v1454_v21, %v1453_v9  ;;  %v1502_v36 = vrot.slane %v1501_v7, 2  ;;  %v1558_v6 = vpop.permute.xlu1 %1557 }
 0x58e   :  { %v1511_v23 = vrot.slane %v1510_v13, 2  ;;  %v1516_v16 = vmul.f32 0.0010080645, %v1464_v15  ;;  %v1548_v44 = vpop.permute.xlu0 %1547 }
 0x58f   :  { %v1503_v40 = vadd.f32 %v1502_v36, %v1501_v7  ;;  %v1515_v31 = vmul.f32 0.0010080645, %v1455_v35 }
 0x590   :  { %v1512_v38 = vadd.f32 %v1511_v23, %v1510_v13  ;;  %v1520_v33 = vmul.f32 %v1516_v16, %v1516_v16  ;;  %v1530_v59 = vsub.f32 %v5820_v27, %v1516_v16  ;;  %v1529_v20 = vsub.f32 %v5828_v29, %v1516_v16 }
 0x591   :  { %v1504_v51 = vrot.slane %v1503_v40, 1  ;;  %v1519_v22 = vmul.f32 %v1515_v31, %v1515_v31  ;;  %v1526_v8 = vsub.f32 %v5824_v34, %v1515_v31  ;;  %v1525_v9 = vsub.f32 %v5830_v57, %v1515_v31  ;;  %v1581_v34 = vpop.permute.xlu1 %1580 }
 0x592   :  { %v1513_v58 = vrot.slane %v1512_v38, 1 }
 0x593   :  { %v1505_v4 = vadd.f32 %v1504_v51, %v1503_v40  ;;  %v1527_v40 = vsub.f32 %v5858_v14, %v1515_v31  ;;  %v1576_v51 = vpop.permute.xlu0 %1575 }
 0x594   :  { %v1514_v17 = vadd.f32 %v1513_v58, %v1512_v38  ;;  %v1531_v38 = vsub.f32 %v5856_v1, %v1516_v16 }
 0x595   :  { %v1517_v39 = vmul.f32 0.0010080645, %v1505_v4 }
 0x596   :  { %v1518_v43 = vmul.f32 0.0010080645, %v1514_v17 }
 0x597   :  { %v1521_v42 = vsub.f32 %v1517_v39, %v1519_v22 }
 0x598   :  { %v1522_v61 = vsub.f32 %v1518_v43, %v1520_v33  ;;  %v1586_v33 = vpop.permute.xlu1 %1585 }
 0x599   :  { %v1523_v45 = vmax.f32 %v1521_v42, 0.0 }
 0x59a   :  { %v1524_v62 = vmax.f32 %v1522_v61, 0.0  ;;  %v1532_v61 = vsub.f32 %v5848_v12, %v1516_v16 }
 0x59b   :  { %v1533_v26 = vadd.f32 1e-08, %v1523_v45  ;;  %v1528_v45 = vsub.f32 %v5850_v0, %v1515_v31 }
 0x59c   :  { %v1534_v63 = vadd.f32 1e-08, %v1524_v62 }
 0x59d   :  { %5204 = vrsqrt.f32 %v1533_v26  ;;  %v1563_v26 = vpop.permute.xlu0 %1562 }
 0x59e   :  { %5206 = vrsqrt.f32 %v1534_v63 }
 0x5a1   :  { %v1591_v16 = vpop.permute.xlu0 %1590 }
 0x5a7   :  { %v5205_v10 = vpop.eup %5204 }
 0x5a8   :  { %v5207_v21 = vpop.eup %5206  ;;  %v1538_v7 = vmul.f32 %v5205_v10, %v1526_v8  ;;  %v1537_v13 = vmul.f32 %v5205_v10, %v1525_v9  ;;  %v1539_v57 = vmul.f32 %v5205_v10, %v1527_v40  ;;  %v1540_v63 = vmul.f32 %v5205_v10, %v1528_v45 }
 0x5a9   :  { %v1542_v35 = vmul.f32 %v5207_v21, %v1530_v59  ;;  %v1541_v36 = vmul.f32 %v5207_v21, %v1529_v20  ;;  %v1543_v17 = vmul.f32 %v5207_v21, %v1531_v38  ;;  %v1544_v62 = vmul.f32 %v5207_v21, %v1532_v61  ;;  %v1742_v59 = vpop.permute.xlu0 %1741 }
 0x5aa   :  { %v1566_v15 = vmul.f32 %v1553_v5, %v1538_v7  ;;  %v1565_v23 = vmul.f32 %v1548_v44, %v1537_v13  ;;  %v1567_v14 = vmul.f32 %v1558_v6, %v1539_v57  ;;  %v1568_v12 = vmul.f32 %v1563_v26, %v1540_v63 }
 0x5ab   :  { %v1569_v58 = vmul.f32 %v1548_v44, %v1541_v36  ;;  %v1570_v29 = vmul.f32 %v1553_v5, %v1542_v35  ;;  %v1571_v1 = vmul.f32 %v1558_v6, %v1543_v17  ;;  %v1572_v5 = vmul.f32 %v1563_v26, %v1544_v62  ;;  %v1650_v44 = vpop.permute.xlu1 %1649 }
 0x5ac   :  { %v5940_v4 = vadd.f32 %v1576_v51, %v1565_v23  ;;  %v5942_v27 = vadd.f32 %v1581_v34, %v1566_v15  ;;  %v5956_v43 = vadd.f32 %v1586_v33, %v1567_v14  ;;  %v5976_v31 = vadd.f32 %v1591_v16, %v1568_v12 }
 0x5ad   :  { %v5948_v39 = vadd.f32 %v1576_v51, %v1569_v58  ;;  %v5950_v22 = vadd.f32 %v1581_v34, %v1570_v29  ;;  %v5958_v42 = vadd.f32 %v1586_v33, %v1571_v1  ;;  %v5974_v0 = vadd.f32 %v1591_v16, %v1572_v5  ;;  %v1681_v21 = vpop.permute.xlu0 %1680 }
 0x5ae   :  { %1614 = vrot.lane.b32.xlu1 %v5940_v4, %s5237_s15  ;;  %1616 = vrot.lane.b32.xlu0 %v5942_v27, %s5237_s15  ;;  %v1692_v5 = vmul.f32 %v1681_v21, %v5942_v27 }
 0x5af   :  { %v1677_v6 = vpop.permute.xlu1 %1676 }
 0x5b0   :  { %v1691_v62 = vmul.f32 %v1677_v6, %v5940_v4 }
 0x5b1   :  { %v5996_v13 = vpop.permute.xlu0 %1688 }
 0x5b2   :  { %1622 = vrot.lane.b32.xlu1 %v5948_v39, %s5237_s15  ;;  %1624 = vrot.lane.b32.xlu0 %v5950_v22, %s5237_s15 }
 0x5b3   :  { %v1660_v8 = vpop.permute.xlu1 %1659 }
 0x5b5   :  { %v1655_v36 = vpop.permute.xlu0 %1654 }
 0x5b6   :  { %1618 = vrot.lane.b32.xlu1 %v5956_v43, %s5237_s15  ;;  %1626 = vrot.lane.b32.xlu0 %v5958_v42, %s5237_s15 }
 0x5b7   :  { %v5990_v9 = vpop.permute.xlu1 %1684 }
 0x5b9   :  { %v1780_v23 = vpop.permute.xlu0 %1779 }
 0x5ba   :  { %1707 = vrot.lane.b32.xlu1 %v5940_v4, %s5238_s16  ;;  %1709 = vrot.lane.b32.xlu0 %v5942_v27, %s5238_s16 }
 0x5bb   :  { %v1746_v10 = vpop.permute.xlu1 %1745 }
 0x5bd   :  { %v6002_v38 = vpop.permute.xlu0 %1794 }
 0x5be   :  { %1715 = vrot.lane.b32.xlu1 %v5948_v39, %s5238_s16  ;;  %1717 = vrot.lane.b32.xlu0 %v5950_v22, %s5238_s16 }
 0x5bf   :  { %v5992_v20 = vpop.permute.xlu1 %1664 }
 0x5c2   :  { %1628 = vrot.lane.b32.xlu1 %v5974_v0, %s5237_s15  ;;  %1620 = vrot.lane.b32.xlu0 %v5976_v31, %s5237_s15 }
 0x5c3   :  { %v5994_v7 = vpop.permute.xlu1 %1749 }
 0x5c6   :  { %1719 = vrot.lane.b32.xlu1 %v5958_v42, %s5238_s16  ;;  %1711 = vrot.lane.b32.xlu0 %v5956_v43, %s5238_s16 }
 0x5c7   :  { %v5998_v35 = vpop.permute.xlu1 %1753 }
 0x5ca   :  { %1713 = vrot.lane.b32.xlu1 %v5976_v31, %s5238_s16  ;;  %1721 = vrot.lane.b32.xlu0 %v5974_v0, %s5238_s16 }
 0x5cb   :  { %v1785_v15 = vpop.permute.xlu1 %1784 }
 0x5cf   :  { %v6000_v40 = vpop.permute.xlu1 %1789 }
 0x620   :  { %v1615_v51 = vpop.permute.xlu1 %1614  ;;  %v1617_v34 = vpop.permute.xlu0 %1616 }
 0x621   :  { %v1639_v29 = vsel %vm1638_vm2, 0.0, %v1615_v51  ;;  %v1640_v17 = vsel %vm1638_vm2, 0.0, %v1617_v34  ;;  %v1695_v34 = vmul.f32 %v1677_v6, %v5948_v39 }
 0x622   :  { %v1667_v33 = vmul.f32 %v1650_v44, %v1639_v29  ;;  %v1668_v45 = vmul.f32 %v1655_v36, %v1640_v17 }
 0x624   :  { %v1623_v58 = vpop.permute.xlu1 %1622  ;;  %v1625_v57 = vpop.permute.xlu0 %1624  ;;  %v1699_v49 = vadd.f32 %v1691_v62, %v1667_v33 }
 0x625   :  { %v1643_v61 = vsel %vm1638_vm2, 0.0, %v1623_v58  ;;  %v1644_v26 = vsel %vm1638_vm2, 0.0, %v1625_v57  ;;  %v1700_v58 = vadd.f32 %v1692_v5, %v1668_v45  ;;  %v1696_v57 = vmul.f32 %v1681_v21, %v5950_v22 }
 0x626   :  { %v1671_v12 = vmul.f32 %v1650_v44, %v1643_v61  ;;  %v1672_v25 = vmul.f32 %v1655_v36, %v1644_v26  ;;  %v1693_v22 = vmul.f32 %v5990_v9, %v5956_v43 }
 0x628   :  { %v1619_v14 = vpop.permute.xlu1 %1618  ;;  %v1627_v1 = vpop.permute.xlu0 %1626  ;;  %v1703_v27 = vadd.f32 %v1695_v34, %v1671_v12  ;;  %v1704_v36 = vadd.f32 %v1696_v57, %v1672_v25 }
 0x629   :  { %v1641_v17 = vsel %vm1638_vm2, 0.0, %v1619_v14  ;;  %v1645_v44 = vsel %vm1638_vm2, 0.0, %v1627_v1 }
 0x62a   :  { %v1669_v6 = vmul.f32 %v1660_v8, %v1641_v17  ;;  %v1673_v1 = vmul.f32 %v1660_v8, %v1645_v44 }
 0x62c   :  { %v1708_v63 = vpop.permute.xlu1 %1707  ;;  %v1710_v16 = vpop.permute.xlu0 %1709 }
 0x62d   :  { %v1732_v51 = vsel %vm1731_vm3, %v1708_v63, 0.0  ;;  %v1733_v29 = vsel %vm1731_vm3, %v1710_v16, 0.0  ;;  %v1701_v16 = vadd.f32 %v1693_v22, %v1669_v6 }
 0x62e   :  { %v1756_v32 = vmul.f32 %v1742_v59, %v1732_v51  ;;  %v1757_v4 = vmul.f32 %v1746_v10, %v1733_v29 }
 0x630   :  { %v1764_v48 = vadd.f32 %v1756_v32, %v1699_v49  ;;  %v1716_v19 = vpop.permute.xlu1 %1715  ;;  %v1765_v61 = vadd.f32 %v1757_v4, %v1700_v58  ;;  %v1718_v63 = vpop.permute.xlu0 %1717 }
 0x631   :  { %v1736_v39 = vsel %vm1731_vm3, %v1716_v19, 0.0  ;;  %v1737_v62 = vsel %vm1731_vm3, %v1718_v63, 0.0 }
 0x632   :  { %v1797_v33 = vadd.f32 %v1780_v23, %v1764_v48  ;;  %v1760_v45 = vmul.f32 %v1742_v59, %v1736_v39  ;;  %v1798_v26 = vadd.f32 %v1785_v15, %v1765_v61  ;;  %v1761_v14 = vmul.f32 %v1746_v10, %v1737_v62 }
 0x633   :  { %v1697_v48 = vmul.f32 %v5990_v9, %v5958_v42 }
 0x634   :  { %v1768_v49 = vadd.f32 %v1760_v45, %v1703_v27  ;;  %v1629_v32 = vpop.permute.xlu1 %1628  ;;  %vm1805_vm4 = vcmp.ge.f32.partialorder %v1797_v33, 0.0  ;;  %v1813_v21 = vmul.f32 0.25, %v1797_v33  ;;  %v1769_v5 = vadd.f32 %v1761_v14, %v1704_v36  ;;  %v1621_v12 = vpop.permute.xlu0 %1620 }
 0x635   :  { %vm1806_vm5 = vcmp.ge.f32.partialorder %v1798_v26, 0.0  ;;  %v1814_v19 = vmul.f32 0.25, %v1798_v26  ;;  %v1642_v51 = vsel %vm1638_vm2, 0.0, %v1621_v12  ;;  %v1646_v8 = vsel %vm1638_vm2, 0.0, %v1629_v32 }
 0x636   :  { %v1801_v59 = vadd.f32 %v1780_v23, %v1768_v49  ;;  %v6022_v25 = vsel %vm1805_vm4, %v1797_v33, %v1813_v21  ;;  %v1802_v10 = vadd.f32 %v1785_v15, %v1769_v5  ;;  %v1705_v9 = vadd.f32 %v1697_v48, %v1673_v1 }
 0x637   :  { %v6025_v43 = vsel %vm1806_vm5, %v1798_v26, %v1814_v19  ;;  %v1839_v34 = vsel %vm345_vm1, %v6022_v25, 0.0  ;;  %v1670_v4 = vmul.f32 %v5992_v20, %v1642_v51  ;;  %v1674_v61 = vmul.f32 %v5992_v20, %v1646_v8 }
 0x638   :  { %v1842_v29 = vsel %vm345_vm1, %v6025_v43, 0.0  ;;  %1840 = vadd.xlane.f32.xlu1 %v1839_v34  ;;  %v1720_v58 = vpop.permute.xlu1 %1719  ;;  %vm1809_vm6 = vcmp.ge.f32.partialorder %v1801_v59, 0.0  ;;  %v1817_v42 = vmul.f32 0.25, %v1801_v59  ;;  %v1712_v23 = vpop.permute.xlu0 %1711  ;;  %vm1810_vm7 = vcmp.ge.f32.partialorder %v1802_v10, 0.0 }
 0x639   :  { %1843 = vadd.xlane.f32.xlu0 %v1842_v29  ;;  %v1738_v15 = vsel %vm1731_vm3, %v1720_v58, 0.0  ;;  %v1818_v17 = vmul.f32 0.25, %v1802_v10  ;;  %v1734_v57 = vsel %vm1731_vm3, %v1712_v23, 0.0  ;;  %v1694_v33 = vmul.f32 %v5996_v13, %v5976_v31 }
 0x63a   :  { %v1762_v27 = vmul.f32 %v5994_v7, %v1738_v15  ;;  %v6036_v44 = vsel %vm1809_vm6, %v1801_v59, %v1817_v42  ;;  %v1758_v63 = vmul.f32 %v5994_v7, %v1734_v57  ;;  %v1698_v26 = vmul.f32 %v5996_v13, %v5974_v0 }
 0x63b   :  { %v6040_v39 = vsel %vm1810_vm7, %v1802_v10, %v1818_v17  ;;  %v1851_v6 = vsel %vm345_vm1, %v6036_v44, 0.0  ;;  %v1702_v22 = vadd.f32 %v1694_v33, %v1670_v4  ;;  %v1882_v42 = vmul.f32 %v6025_v43, %v6025_v43 }
 0x63c   :  { %v1770_v62 = vadd.f32 %v1762_v27, %v1705_v9  ;;  %v1854_v45 = vsel %vm345_vm1, %v6040_v39, 0.0  ;;  %v1714_v36 = vpop.permute.xlu1 %1713  ;;  %v1766_v14 = vadd.f32 %v1758_v63, %v1701_v16  ;;  %v1722_v20 = vpop.permute.xlu0 %1721  ;;  %v1706_v21 = vadd.f32 %v1698_v26, %v1674_v61 }
 0x63d   :  { %1855 = vadd.xlane.f32.xlu1 %v1854_v45  ;;  %1852 = vadd.xlane.f32.xlu0 %v1851_v6  ;;  %v1735_v7 = vsel %vm1731_vm3, %v1714_v36, 0.0  ;;  %v1739_v32 = vsel %vm1731_vm3, %v1722_v20, 0.0  ;;  %v1881_v9 = vmul.f32 %v6022_v25, %v6022_v25  ;;  %v1892_v23 = vsel %vm345_vm1, %v1882_v42, 0.0  ;;  %v4508_v20 = vld [vmem:[%s7062_s8 + $0x20] sm:$0xff] }
 0x63e   :  { %v1803_v49 = vadd.f32 %v6000_v40, %v1770_v62  ;;  %v1759_v31 = vmul.f32 %v5998_v35, %v1735_v7  ;;  %v1799_v1 = vadd.f32 %v6000_v40, %v1766_v14  ;;  %v1763_v5 = vmul.f32 %v5998_v35, %v1739_v32  ;;  %v4505_v14 = vld [vmem:[%s7061_s7 + $0x28] sm:$0xff]  ;;  %v4504_v7 = vld [vmem:[%s7061_s7 + $0x20] sm:$0xff]  ;;  %v4510_v32 = vld [vmem:[%s7062_s8 + $0x30] sm:$0xff] }
 0x63f   :  { %v1889_v15 = vsel %vm345_vm1, %v1881_v9, 0.0  ;;  %v1886_v17 = vmul.f32 %v6040_v39, %v6040_v39  ;;  %v1885_v4 = vmul.f32 %v6036_v44, %v6036_v44 }
 0x640   :  { %v1767_v12 = vadd.f32 %v1759_v31, %v1702_v22  ;;  %vm1811_vm8 = vcmp.ge.f32.partialorder %v1803_v49, 0.0  ;;  %v1819_v0 = vmul.f32 0.25, %v1803_v49  ;;  %v1771_v13 = vadd.f32 %v1763_v5, %v1706_v21  ;;  %v4506_v22 = vld [vmem:[%s7061_s7 + $0x30] sm:$0xff]  ;;  %v4507_v31 = vld [vmem:[%s7061_s7 + $0x38] sm:$0xff]  ;;  %v4524_v21 = vld [vmem:[%s7063_s10 + $0x20] sm:$0xff] }
 0x641   :  { %vm1807_vm9 = vcmp.ge.f32.partialorder %v1799_v1, 0.0  ;;  %v1815_v19 = vmul.f32 0.25, %v1799_v1  ;;  %v1904_v57 = vsel %vm345_vm1, %v1886_v17, 0.0  ;;  %v1901_v27 = vsel %vm345_vm1, %v1885_v4, 0.0  ;;  %v4526_v5 = vld [vmem:[%s7063_s10 + $0x30] sm:$0xff] }
 0x642   :  { %v1800_v48 = vadd.f32 %v6002_v38, %v1767_v12  ;;  %v6057_v16 = vsel %vm1811_vm8, %v1803_v49, %v1819_v0  ;;  %v1804_v59 = vadd.f32 %v6002_v38, %v1771_v13  ;;  %v4509_v49 = vld [vmem:[%s7062_s8 + $0x28] sm:$0xff]  ;;  %v62_v0 = vld [vmem:[%s7056_s1 + $0x40] sm:$0xff]  ;;  %v4527_v13 = vld [vmem:[%s7063_s10 + $0x38] sm:$0xff] }
 0x643   :  { %v6060_v10 = vsel %vm1807_vm9, %v1799_v1, %v1815_v19  ;;  %v1857_v51 = vsel %vm345_vm1, %v6057_v16, 0.0  ;;  %v1887_v61 = vmul.f32 %v6057_v16, %v6057_v16  ;;  %v4511_v1 = vld [vmem:[%s7062_s8 + $0x38] sm:$0xff]  ;;  %v4525_v12 = vld [vmem:[%s7063_s10 + $0x28] sm:$0xff]  ;;  %v78_v19 = vld [vmem:[%s7056_s1 + $0xc0] sm:$0xff] }
 0x644   :  { %v1845_v35 = vsel %vm345_vm1, %v6060_v10, 0.0  ;;  %1858 = vadd.xlane.f32.xlu1 %v1857_v51  ;;  %vm1808_vm12 = vcmp.ge.f32.partialorder %v1800_v48, 0.0  ;;  %v1816_v40 = vmul.f32 0.25, %v1800_v48  ;;  %vm1812_vm13 = vcmp.ge.f32.partialorder %v1804_v59, 0.0  ;;  %v79_v51 = vld [vmem:[%s7056_s1 + $0xc8] sm:$0xff] }
 0x645   :  { %1846 = vadd.xlane.f32.xlu0 %v1845_v35  ;;  %v1820_v34 = vmul.f32 0.25, %v1804_v59  ;;  %v1883_v63 = vmul.f32 %v6060_v10, %v6060_v10  ;;  %v1907_v6 = vsel %vm345_vm1, %v1887_v61, 0.0  ;;  %v65_v35 = vld [vmem:[%s7056_s1 + $0x58] sm:$0xff] }
 0x646   :  { %v6066_v8 = vsel %vm1808_vm12, %v1800_v48, %v1816_v40  ;;  %v63_v48 = vld [vmem:[%s7056_s1 + $0x48] sm:$0xff]  ;;  %v80_v40 = vld [vmem:[%s7056_s1 + $0xd0] sm:$0xff] }
 0x647   :  { %v6068_v29 = vsel %vm1812_vm13, %v1804_v59, %v1820_v34  ;;  %v1848_v38 = vsel %vm345_vm1, %v6066_v8, 0.0  ;;  %v1895_v33 = vsel %vm345_vm1, %v1883_v63, 0.0  ;;  %v1884_v45 = vmul.f32 %v6066_v8, %v6066_v8  ;;  %v64_v59 = vld [vmem:[%s7056_s1 + $0x50] sm:$0xff]  ;;  %v81_v34 = vld [vmem:[%s7056_s1 + $0xd8] sm:$0xff] }
 0x648   :  { %v1860_v58 = vsel %vm345_vm1, %v6068_v29, 0.0  ;;  %v1888_v62 = vmul.f32 %v6068_v29, %v6068_v29 }
 0x649   :  { %1861 = vadd.xlane.f32.xlu1 %v1860_v58  ;;  %1849 = vadd.xlane.f32.xlu0 %v1848_v38  ;;  %v1898_v26 = vsel %vm345_vm1, %v1884_v45, 0.0  ;;  %v4512_v38 = vld [vmem:[%s7064_s9 + $0x20] sm:$0xff] }
 0x64a   :  { %v1910_v36 = vsel %vm345_vm1, %v1888_v62, 0.0  ;;  %4887 = vmatprep.mubr.msk.f32.mxu0 %vm130_vm0, %v4512_v38  ;;  %4901 = vmatprep.mubr.msk.f32.mxu1 %vm130_vm0, %v4512_v38 }
 0x64d   :  { %1893 = vadd.xlane.f32.xlu1 %v1892_v23  ;;  %1890 = vadd.xlane.f32.xlu0 %v1889_v15 }
 0x651   :  { %1905 = vadd.xlane.f32.xlu1 %v1904_v57  ;;  %1902 = vadd.xlane.f32.xlu0 %v1901_v27 }
 0x655   :  { %1908 = vadd.xlane.f32.xlu1 %v1907_v6  ;;  %1896 = vadd.xlane.f32.xlu0 %v1895_v33 }
 0x659   :  { %1911 = vadd.xlane.f32.xlu1 %v1910_v36  ;;  %1899 = vadd.xlane.f32.xlu0 %v1898_v26 }
 0x66a   :  { %1968 = vperm.xlu1 %5175, %v4505_v14  }
 0x66e   :  { %1991 = vperm.xlu1 %5175, %v4508_v20  }
 0x66f   :  { %1963 = vperm.xlu0 %5173, %v4504_v7  }
 0x672   :  { %1973 = vperm.xlu1 %5175, %v4506_v22  }
 0x673   :  { %1996 = vperm.xlu0 %5173, %v4509_v49  }
 0x676   :  { %2001 = vperm.xlu1 %5175, %v4510_v32  }
 0x677   :  { %1978 = vperm.xlu0 %5173, %v4507_v31  }
 0x67a   :  { %2219 = vperm.xlu1 %5175, %v4524_v21  }
 0x67b   :  { %2006 = vperm.xlu0 %5173, %v4511_v1  }
 0x67e   :  { %2229 = vperm.xlu1 %5175, %v4526_v5  }
 0x67f   :  { %2224 = vperm.xlu0 %5173, %v4525_v12  }
 0x682   :  { %2252 = vperm.xlu1 %5175, %v62_v0  }
 0x683   :  { %2234 = vperm.xlu0 %5173, %v4527_v13  }
 0x686   :  { %2272 = vperm.xlu1 %5175, %v78_v19  }
 0x687   :  { %2257 = vperm.xlu0 %5173, %v63_v48  }
 0x68a   :  { %2262 = vperm.xlu1 %5175, %v64_v59  }
 0x68b   :  { %2277 = vperm.xlu0 %5173, %v79_v51  }
 0x68e   :  { %2267 = vperm.xlu1 %5175, %v65_v35  }
 0x68f   :  { %2282 = vperm.xlu0 %5173, %v80_v40  }
 0x693   :  { %2287 = vperm.xlu0 %5173, %v81_v34  }
 0x6c5   :  { %v1841_v58 = vpop.xlane.xlu1 %1840 }
 0x6c6   :  { %v1844_v42 = vpop.xlane.xlu0 %1843 }
 0x6c7   :  { %v1863_v4 = vadd.f32 %v1844_v42, %v1841_v58 }
 0x6ca   :  { %v1856_v9 = vpop.xlane.xlu1 %1855  ;;  %v1853_v23 = vpop.xlane.xlu0 %1852 }
 0x6cb   :  { %v1872_v57 = vadd.f32 %v1856_v9, %v1853_v23 }
 0x6d1   :  { %v1859_v15 = vpop.xlane.xlu1 %1858 }
 0x6d2   :  { %v1847_v17 = vpop.xlane.xlu0 %1846  ;;  %v1873_v61 = vadd.f32 %v1872_v57, %v1859_v15 }
 0x6d3   :  { %v1864_v27 = vadd.f32 %v1863_v4, %v1847_v17 }
 0x6d6   :  { %v1850_v63 = vpop.xlane.xlu0 %1849  ;;  %v1862_v6 = vpop.xlane.xlu1 %1861 }
 0x6d7   :  { %v1865_v33 = vadd.f32 %v1864_v27, %v1850_v63  ;;  %v1874_v62 = vadd.f32 %v1873_v61, %v1862_v6 }
 0x6d9   :  { %v1866_v45 = vrot.slane %v1865_v33, 4  ;;  %v1875_v36 = vrot.slane %v1874_v62, 4 }
 0x6da   :  { %v1891_v26 = vpop.xlane.xlu0 %1890  ;;  %v1894_v14 = vpop.xlane.xlu1 %1893 }
 0x6db   :  { %v1867_v20 = vadd.f32 %v1866_v45, %v1865_v33  ;;  %v1876_v7 = vadd.f32 %v1875_v36, %v1874_v62  ;;  %v1913_v5 = vadd.f32 %v1894_v14, %v1891_v26 }
 0x6dd   :  { %v1868_v32 = vrot.slane %v1867_v20, 2  ;;  %v1877_v31 = vrot.slane %v1876_v7, 2 }
 0x6de   :  { %v1903_v22 = vpop.xlane.xlu0 %1902  ;;  %v1906_v49 = vpop.xlane.xlu1 %1905 }
 0x6df   :  { %v1922_v12 = vadd.f32 %v1906_v49, %v1903_v22  ;;  %v1869_v0 = vadd.f32 %v1868_v32, %v1867_v20  ;;  %v1878_v13 = vadd.f32 %v1877_v31, %v1876_v7 }
 0x6e1   :  { %v1870_v34 = vrot.slane %v1869_v0, 1  ;;  %v1879_v38 = vrot.slane %v1878_v13, 1 }
 0x6e2   :  { %v1897_v21 = vpop.xlane.xlu0 %1896  ;;  %v1909_v1 = vpop.xlane.xlu1 %1908 }
 0x6e3   :  { %v1914_v19 = vadd.f32 %v1913_v5, %v1897_v21  ;;  %v1923_v48 = vadd.f32 %v1922_v12, %v1909_v1  ;;  %v1871_v15 = vadd.f32 %v1870_v34, %v1869_v0  ;;  %v1880_v17 = vadd.f32 %v1879_v38, %v1878_v13 }
 0x6e5   :  { %v1931_v63 = vmul.f32 0.0010080645, %v1871_v15  ;;  %v1932_v6 = vmul.f32 0.0010080645, %v1880_v17 }
 0x6e6   :  { %v1900_v59 = vpop.xlane.xlu0 %1899  ;;  %v1912_v51 = vpop.xlane.xlu1 %1911 }
 0x6e7   :  { %v1915_v35 = vadd.f32 %v1914_v19, %v1900_v59  ;;  %v1924_v40 = vadd.f32 %v1923_v48, %v1912_v51  ;;  %v1935_v14 = vmul.f32 %v1931_v63, %v1931_v63  ;;  %v1936_v20 = vmul.f32 %v1932_v6, %v1932_v6 }
 0x6e8   :  { %v1942_v59 = vsub.f32 %v6025_v43, %v1931_v63  ;;  %v1941_v51 = vsub.f32 %v6022_v25, %v1931_v63  ;;  %v1946_v38 = vsub.f32 %v6040_v39, %v1932_v6 }
 0x6e9   :  { %v1916_v58 = vrot.slane %v1915_v35, 4  ;;  %v1925_v42 = vrot.slane %v1924_v40, 4 }
 0x6ea   :  { %v1969_v21 = vpop.permute.xlu1 %1968 }
 0x6eb   :  { %v1917_v9 = vadd.f32 %v1916_v58, %v1915_v35  ;;  %v1926_v23 = vadd.f32 %v1925_v42, %v1924_v40  ;;  %v1943_v35 = vsub.f32 %v6060_v10, %v1931_v63  ;;  %v1944_v40 = vsub.f32 %v6066_v8, %v1931_v63 }
 0x6ec   :  { %v1945_v58 = vsub.f32 %v6036_v44, %v1932_v6  ;;  %v1947_v42 = vsub.f32 %v6057_v16, %v1932_v6 }
 0x6ed   :  { %v1918_v4 = vrot.slane %v1917_v9, 2  ;;  %v1927_v57 = vrot.slane %v1926_v23, 2 }
 0x6ee   :  { %v1964_v1 = vpop.permute.xlu0 %1963  ;;  %v1992_v0 = vpop.permute.xlu1 %1991 }
 0x6ef   :  { %v1919_v27 = vadd.f32 %v1918_v4, %v1917_v9  ;;  %v1928_v61 = vadd.f32 %v1927_v57, %v1926_v23  ;;  %v1948_v9 = vsub.f32 %v6068_v29, %v1932_v6 }
 0x6f1   :  { %v1920_v33 = vrot.slane %v1919_v27, 1  ;;  %v1929_v62 = vrot.slane %v1928_v61, 1 }
 0x6f2   :  { %v1997_v13 = vpop.permute.xlu0 %1996  ;;  %v1974_v19 = vpop.permute.xlu1 %1973 }
 0x6f3   :  { %v1921_v45 = vadd.f32 %v1920_v33, %v1919_v27  ;;  %v1930_v36 = vadd.f32 %v1929_v62, %v1928_v61 }
 0x6f5   :  { %v1933_v26 = vmul.f32 0.0010080645, %v1921_v45  ;;  %v1934_v7 = vmul.f32 0.0010080645, %v1930_v36 }
 0x6f6   :  { %v1979_v48 = vpop.permute.xlu0 %1978  ;;  %v2002_v16 = vpop.permute.xlu1 %2001 }
 0x6f7   :  { %v1937_v22 = vsub.f32 %v1933_v26, %v1935_v14  ;;  %v1938_v49 = vsub.f32 %v1934_v7, %v1936_v20 }
 0x6f9   :  { %v1939_v32 = vmax.f32 %v1937_v22, 0.0  ;;  %v1940_v31 = vmax.f32 %v1938_v49, 0.0 }
 0x6fa   :  { %v2007_v36 = vpop.permute.xlu0 %2006 }
 0x6fb   :  { %v1949_v5 = vadd.f32 1e-08, %v1939_v32  ;;  %v1950_v12 = vadd.f32 1e-08, %v1940_v31 }
 0x6fd   :  { %5208 = vrsqrt.f32 %v1949_v5 }
 0x6fe   :  { %5210 = vrsqrt.f32 %v1950_v12  ;;  %v4514_v12 = vld [vmem:[%s7064_s9 + $0x30] sm:$0xff] }
 0x707   :  { %v5209_v34 = vpop.eup %5208 }
 0x708   :  { %v5211_v23 = vpop.eup %5210  ;;  %v1954_v15 = vmul.f32 %v5209_v34, %v1942_v59  ;;  %v1953_v17 = vmul.f32 %v5209_v34, %v1941_v51  ;;  %v1955_v4 = vmul.f32 %v5209_v34, %v1943_v35  ;;  %v1956_v43 = vmul.f32 %v5209_v34, %v1944_v40 }
 0x709   :  { %v1958_v57 = vmul.f32 %v5211_v23, %v1946_v38  ;;  %v1957_v25 = vmul.f32 %v5211_v23, %v1945_v58  ;;  %v1959_v27 = vmul.f32 %v5211_v23, %v1947_v42  ;;  %v1960_v10 = vmul.f32 %v5211_v23, %v1948_v9 }
 0x70a   :  { %v1982_v61 = vmul.f32 %v1969_v21, %v1954_v15  ;;  %v1981_v8 = vmul.f32 %v1964_v1, %v1953_v17  ;;  %v1983_v63 = vmul.f32 %v1974_v19, %v1955_v4  ;;  %v1984_v33 = vmul.f32 %v1979_v48, %v1956_v43 }
 0x70b   :  { %v1986_v39 = vmul.f32 %v1969_v21, %v1958_v57  ;;  %v1985_v62 = vmul.f32 %v1964_v1, %v1957_v25  ;;  %v1987_v44 = vmul.f32 %v1974_v19, %v1959_v27  ;;  %v1988_v45 = vmul.f32 %v1979_v48, %v1960_v10  ;;  %v4513_v1 = vld [vmem:[%s7064_s9 + $0x28] sm:$0xff]  ;;  %v2220_v19 = vpop.permute.xlu1 %2219  ;;  %v2225_v48 = vpop.permute.xlu0 %2224 }
 0x70c   :  { %v2009_v29 = vadd.f32 %v1992_v0, %v1981_v8  ;;  %v2010_v6 = vadd.f32 %v1997_v13, %v1982_v61  ;;  %v2011_v26 = vadd.f32 %v2002_v16, %v1983_v63  ;;  %v2012_v14 = vadd.f32 %v2007_v36, %v1984_v33 }
 0x70d   :  { %v2013_v20 = vadd.f32 %v1992_v0, %v1985_v62  ;;  %v2014_v7 = vadd.f32 %v1997_v13, %v1986_v39  ;;  %v2015_v22 = vadd.f32 %v2002_v16, %v1987_v44  ;;  %v2016_v49 = vadd.f32 %v2007_v36, %v1988_v45  ;;  %v4515_v0 = vld [vmem:[%s7064_s9 + $0x38] sm:$0xff]  ;;  %v4528_v13 = vld [vmem:[%s7055_s2 + $0x40] sm:$0xff]  ;;  %v4530_v62 = vld [vmem:[%s7055_s2 + $0x50] sm:$0xff] }
 0x70e   :  { %v5067_v32 = vpack.c.bf16 %v2010_v6, %v2009_v29  ;;  %v5071_v5 = vpack.c.bf16 %v2012_v14, %v2011_v26  ;;  %v4531_v44 = vld [vmem:[%s7055_s2 + $0x58] sm:$0xff] }
 0x70f   :  { %v5075_v31 = vpack.c.bf16 %v2014_v7, %v2013_v20  ;;  %v5079_v21 = vpack.c.bf16 %v2016_v49, %v2015_v22  ;;  %v2235_v25 = vpop.permute.xlu0 %2234  ;;  %v2230_v10 = vpop.permute.xlu1 %2229 }
 0x710   :  { %5068 = vmatprep.subr.bf16.mxu0 %v5067_v32 }
 0x711   :  { %5076 = vmatprep.subr.bf16.mxu1 %v5075_v31  ;;  %5070 = vmatpush3.bf16.msra.mxu0 %v5067_v32 }
 0x712   :  { %5078 = vmatpush3.bf16.msra.mxu1 %v5075_v31  ;;  %5072 = vmatprep.subr.bf16.mxu0 %v5071_v5 }
 0x713   :  { %5080 = vmatprep.subr.bf16.mxu1 %v5079_v21  ;;  %v2253_v45 = vpop.permute.xlu1 %2252  ;;  %v2258_v16 = vpop.permute.xlu0 %2257 }
 0x715   :  { %5074 = vmatpush3.bf16.msra.mxu0 %v5071_v5 }
 0x716   :  { %5082 = vmatpush3.bf16.msra.mxu1 %v5079_v21 }
 0x717   :  { %v2273_v36 = vpop.permute.xlu1 %2272  ;;  %v2278_v29 = vpop.permute.xlu0 %2277 }
 0x718   :  { %4888 = vmatmul.mubr.msk.f32.vlgmr.msra.gmra.mrb[12].mxu0 %vm130_vm0, %v4513_v1 }
 0x719   :  { %4902 = vmatmul.mubr.msk.f32.vlgmr.msra.gmra.mrb[12].mxu1 %vm130_vm0, %v4513_v1  ;;  %4890 = vmatprep.mubr.msk.f32.mxu0 %vm130_vm0, %v4514_v12 }
 0x71a   :  { %4904 = vmatprep.mubr.msk.f32.mxu1 %vm130_vm0, %v4514_v12 }
 0x71b   :  { %v2263_v32 = vpop.permute.xlu1 %2262  ;;  %v2283_v21 = vpop.permute.xlu0 %2282 }
 0x71c   :  { %4891 = vmatmul.mubr.msk.f32.gmra.mrb[14].mxu0 %vm130_vm0, %v4515_v0 }
 0x71d   :  { %4905 = vmatmul.mubr.msk.f32.gmra.mrb[14].mxu1 %vm130_vm0, %v4515_v0  ;;  %4915 = vmatprep.mubr.msk.f32.mxu0 %vm130_vm0, %v4528_v13 }
 0x71e   :  { %4929 = vmatprep.mubr.msk.f32.mxu1 %vm130_vm0, %v4528_v13 }
 0x7eb   :  { %v4889_v59 = vpop.f32.mrb[12].mxu0 }
 0x7ec   :  { %v2205_v51 = vadd.f32 %v4889_v59, %v5775_v52  ;;  %v4903_v35 = vpop.f32.mrb[12].mxu1  ;;  %v2100_v40 = vpop.f32.mrb[13].mxu0 }
 0x7ed   :  { %v2209_v34 = vadd.f32 %v4903_v35, %v5770_v50  ;;  %v2204_v38 = vadd.f32 %v2100_v40, %v5779_v55  ;;  %v2185_v58 = vpop.f32.mrb[13].mxu1 }
 0x7ee   :  { %v6194_v42 = vadd.f32 %v2225_v48, %v2205_v51  ;;  %v2208_v9 = vadd.f32 %v2185_v58, %v5777_v53 }
 0x7ef   :  { %v6197_v23 = vadd.f32 %v2225_v48, %v2209_v34  ;;  %v6199_v15 = vadd.f32 %v2220_v19, %v2204_v38  ;;  %v4892_v17 = vpop.f32.mrb[14].mxu0 }
 0x7f0   :  { %v6201_v4 = vadd.f32 %v2220_v19, %v2208_v9  ;;  %v2207_v52 = vadd.f32 %v4892_v17, %v5795_v56  ;;  %v4906_v43 = vpop.f32.mrb[14].mxu1  ;;  %v2110_v57 = vpop.f32.mrb[15].mxu0 }
 0x7f1   :  { %v2211_v50 = vadd.f32 %v4906_v43, %v5789_v47  ;;  %v2206_v55 = vadd.f32 %v2110_v57, %v5799_v54  ;;  %v2195_v27 = vpop.f32.mrb[15].mxu1  ;;  %v5083_v53 = vpack.c.bf16 %v6194_v42, %v6199_v15  ;;  %v2268_v9 = vpop.permute.xlu1 %2267 }
 0x7f2   :  { %v6208_v61 = vadd.f32 %v2235_v25, %v2207_v52  ;;  %v2210_v8 = vadd.f32 %v2195_v27, %v5797_v60  ;;  %v5091_v63 = vpack.c.bf16 %v6197_v23, %v6201_v4  ;;  %v4529_v60 = vld [vmem:[%s7055_s2 + $0x48] sm:$0xff]  ;;  %v2288_v43 = vpop.permute.xlu0 %2287 }
 0x7f3   :  { %v6213_v56 = vadd.f32 %v2235_v25, %v2211_v50  ;;  %v6215_v33 = vadd.f32 %v2230_v10, %v2206_v55  ;;  %5084 = vmatprep.subr.bf16.mxu0 %v5083_v53 }
 0x7f4   :  { %v6217_v47 = vadd.f32 %v2230_v10, %v2210_v8  ;;  %5092 = vmatprep.subr.bf16.mxu1 %v5091_v63  ;;  %5086 = vmatpush3.bf16.msra.mxu0 %v5083_v53 }
 0x7f5   :  { %5094 = vmatpush3.bf16.msra.mxu1 %v5091_v63  ;;  %v5087_v54 = vpack.c.bf16 %v6208_v61, %v6215_v33 }
 0x7f6   :  { %v5095_v39 = vpack.c.bf16 %v6213_v56, %v6217_v47 }
 0x7f7   :  { %5088 = vmatprep.subr.bf16.mxu0 %v5087_v54 }
 0x7f8   :  { %5096 = vmatprep.subr.bf16.mxu1 %v5095_v39  ;;  %5090 = vmatpush3.bf16.msra.mxu0 %v5087_v54 }
 0x7f9   :  { %5098 = vmatpush3.bf16.msra.mxu1 %v5095_v39 }
 0x7fb   :  { %4916 = vmatmul.mubr.msk.f32.vlgmr.msra.gmra.mrb[16].mxu0 %vm130_vm0, %v4529_v60 }
 0x7fc   :  { %4930 = vmatmul.mubr.msk.f32.vlgmr.msra.gmra.mrb[16].mxu1 %vm130_vm0, %v4529_v60  ;;  %4918 = vmatprep.mubr.msk.f32.mxu0 %vm130_vm0, %v4530_v62 }
 0x7fd   :  { %4932 = vmatprep.mubr.msk.f32.mxu1 %vm130_vm0, %v4530_v62 }
 0x7ff   :  { %4919 = vmatmul.mubr.msk.f32.gmra.mrb[18].mxu0 %vm130_vm0, %v4531_v44 }
 0x800   :  { %4933 = vmatmul.mubr.msk.f32.gmra.mrb[18].mxu1 %vm130_vm0, %v4531_v44 }
 0x8ce   :  { %v4917_v6 = vpop.f32.mrb[16].mxu0 }
 0x8cf   :  { %v2374_v26 = vadd.f32 %v4917_v6, %v2258_v16  ;;  %v4931_v14 = vpop.f32.mrb[16].mxu1  ;;  %v2368_v20 = vpop.f32.mrb[17].mxu0 }
 0x8d0   :  { %v2459_v7 = vadd.f32 %v4931_v14, %v2278_v29  ;;  %v2369_v22 = vadd.f32 %v2368_v20, %v2253_v45  ;;  %v2453_v49 = vpop.f32.mrb[17].mxu1 }
 0x8d1   :  { %vm2473_vm14 = vcmp.ge.f32.partialorder %v2374_v26, 0.0  ;;  %v2481_v31 = vmul.f32 0.25, %v2374_v26  ;;  %v2454_v5 = vadd.f32 %v2453_v49, %v2273_v36 }
 0x8d2   :  { %vm2477_vm15 = vcmp.ge.f32.partialorder %v2459_v7, 0.0  ;;  %v2485_v1 = vmul.f32 0.25, %v2459_v7  ;;  %v4920_v12 = vpop.f32.mrb[18].mxu0  ;;  %v2480_v0 = vmul.f32 0.25, %v2369_v22  ;;  %vm2472_vm4 = vcmp.ge.f32.partialorder %v2369_v22, 0.0 }
 0x8d3   :  { %v2484_v13 = vmul.f32 0.25, %v2454_v5  ;;  %v4934_v19 = vpop.f32.mrb[18].mxu1  ;;  %v2378_v48 = vpop.f32.mrb[19].mxu0  ;;  %v6238_v59 = vsel %vm2473_vm14, %v2374_v26, %v2481_v31  ;;  %vm2476_vm5 = vcmp.ge.f32.partialorder %v2454_v5, 0.0  ;;  %v2384_v57 = vadd.f32 %v4920_v12, %v2268_v9  ;;  %v4543_v9 = vld [vmem:[%s7057_s3 + $0x58] sm:$0xff] }
 0x8d4   :  { %v2463_v51 = vpop.f32.mrb[19].mxu1  ;;  %v6240_v35 = vsel %vm2477_vm15, %v2459_v7, %v2485_v1  ;;  %v2509_v40 = vsel %vm345_vm1, %v6238_v59, 0.0  ;;  %v6246_v38 = vsel %vm2472_vm4, %v2369_v22, %v2480_v0  ;;  %v2549_v50 = vmul.f32 %v6238_v59, %v6238_v59 }
 0x8d5   :  { %v2521_v34 = vsel %vm345_vm1, %v6240_v35, 0.0  ;;  %2510 = vadd.xlane.f32.xlu0 %v2509_v40  ;;  %v6248_v58 = vsel %vm2476_vm5, %v2454_v5, %v2484_v13  ;;  %v2548_v52 = vmul.f32 %v6246_v38, %v6246_v38  ;;  %v2506_v25 = vsel %vm345_vm1, %v6246_v38, 0.0  ;;  %v4541_v13 = vld [vmem:[%s7057_s3 + $0x48] sm:$0xff]  ;;  %v4544_v40 = vld [vmem:[%s7058_s4 + $0x40] sm:$0xff] }
 0x8d6   :  { %2522 = vadd.xlane.f32.xlu1 %v2521_v34  ;;  %v2518_v17 = vsel %vm345_vm1, %v6248_v58, 0.0  ;;  %v2469_v55 = vadd.f32 %v4934_v19, %v2288_v43  ;;  %v2552_v53 = vmul.f32 %v6248_v58, %v6248_v58  ;;  %v2483_v10 = vmul.f32 0.25, %v2384_v57  ;;  %v4542_v19 = vld [vmem:[%s7057_s3 + $0x50] sm:$0xff] }
 0x8d7   :  { %v2556_v27 = vsel %vm345_vm1, %v2548_v52, 0.0  ;;  %v2379_v8 = vadd.f32 %v2378_v48, %v2263_v32  ;;  %v2559_v63 = vsel %vm345_vm1, %v2549_v50, 0.0  ;;  %v2553_v54 = vmul.f32 %v6240_v35, %v6240_v35  ;;  %v4540_v48 = vld [vmem:[%s7057_s3 + $0x40] sm:$0xff]  ;;  %v4546_v34 = vld [vmem:[%s7058_s4 + $0x50] sm:$0xff]  ;;  %v4547_v52 = vld [vmem:[%s7058_s4 + $0x58] sm:$0xff] }
 0x8d8   :  { %vm2475_vm6 = vcmp.ge.f32.partialorder %v2384_v57, 0.0  ;;  %v2487_v39 = vmul.f32 0.25, %v2469_v55  ;;  %v2464_v60 = vadd.f32 %v2463_v51, %v2283_v21  ;;  %vm2479_vm7 = vcmp.ge.f32.partialorder %v2469_v55, 0.0  ;;  %v4545_v51 = vld [vmem:[%s7058_s4 + $0x48] sm:$0xff]  ;;  %v4550_v43 = vld [vmem:[%s7059_s5 + $0x50] sm:$0xff]  ;;  %v4552_v50 = vld [vmem:[%s7060_s6 + $0x40] sm:$0xff] }
 0x8d9   :  { %2519 = vadd.xlane.f32.xlu0 %v2518_v17  ;;  %v2568_v62 = vsel %vm345_vm1, %v2552_v53, 0.0  ;;  %v2482_v44 = vmul.f32 0.25, %v2379_v8  ;;  %v2571_v45 = vsel %vm345_vm1, %v2553_v54, 0.0  ;;  %v6266_v16 = vsel %vm2475_vm6, %v2384_v57, %v2483_v10  ;;  %v4548_v17 = vld [vmem:[%s7059_s5 + $0x40] sm:$0xff]  ;;  %v4549_v57 = vld [vmem:[%s7059_s5 + $0x48] sm:$0xff]  ;;  %v4554_v53 = vld [vmem:[%s7060_s6 + $0x50] sm:$0xff] }
 0x8da   :  { %2507 = vadd.xlane.f32.xlu1 %v2506_v25  ;;  %vm2474_vm8 = vcmp.ge.f32.partialorder %v2379_v8, 0.0  ;;  %v2486_v36 = vmul.f32 0.25, %v2464_v60  ;;  %v6268_v29 = vsel %vm2479_vm7, %v2469_v55, %v2487_v39  ;;  %vm2478_vm9 = vcmp.ge.f32.partialorder %v2464_v60, 0.0  ;;  %v4551_v25 = vld [vmem:[%s7059_s5 + $0x58] sm:$0xff] }
 0x8db   :  { %v2515_v6 = vsel %vm345_vm1, %v6266_v16, 0.0  ;;  %v2527_v26 = vsel %vm345_vm1, %v6268_v29, 0.0  ;;  %v6274_v14 = vsel %vm2474_vm8, %v2379_v8, %v2482_v44  ;;  %v2555_v32 = vmul.f32 %v6268_v29, %v6268_v29  ;;  %v4555_v55 = vld [vmem:[%s7060_s6 + $0x58] sm:$0xff] }
 0x8dc   :  { %v6276_v20 = vsel %vm2478_vm9, %v2464_v60, %v2486_v36  ;;  %v2512_v7 = vsel %vm345_vm1, %v6274_v14, 0.0  ;;  %v2550_v22 = vmul.f32 %v6274_v14, %v6274_v14  ;;  %v2551_v5 = vmul.f32 %v6266_v16, %v6266_v16 }
 0x8dd   :  { %2557 = vadd.xlane.f32.xlu0 %v2556_v27  ;;  %v2524_v49 = vsel %vm345_vm1, %v6276_v20, 0.0  ;;  %v2577_v21 = vsel %vm345_vm1, %v2555_v32, 0.0  ;;  %v2554_v1 = vmul.f32 %v6276_v20, %v6276_v20  ;;  %v4553_v27 = vld [vmem:[%s7060_s6 + $0x48] sm:$0xff] }
 0x8de   :  { %2560 = vadd.xlane.f32.xlu1 %v2559_v63  ;;  %v2562_v31 = vsel %vm345_vm1, %v2550_v22, 0.0  ;;  %v2565_v12 = vsel %vm345_vm1, %v2551_v5, 0.0 }
 0x8df   :  { %v2574_v0 = vsel %vm345_vm1, %v2554_v1, 0.0 }
 0x8e1   :  { %2569 = vadd.xlane.f32.xlu0 %v2568_v62 }
 0x8e2   :  { %2572 = vadd.xlane.f32.xlu1 %v2571_v45 }
 0x8e5   :  { %2516 = vadd.xlane.f32.xlu0 %v2515_v6 }
 0x8e6   :  { %2528 = vadd.xlane.f32.xlu1 %v2527_v26 }
 0x8e9   :  { %2513 = vadd.xlane.f32.xlu0 %v2512_v7 }
 0x8ea   :  { %2525 = vadd.xlane.f32.xlu1 %v2524_v49 }
 0x8ed   :  { %2563 = vadd.xlane.f32.xlu0 %v2562_v31 }
 0x8ee   :  { %2578 = vadd.xlane.f32.xlu1 %v2577_v21 }
 0x8f1   :  { %2566 = vadd.xlane.f32.xlu0 %v2565_v12 }
 0x8f2   :  { %2575 = vadd.xlane.f32.xlu1 %v2574_v0 }
 0x903   :  { %2635 = vperm.xlu1 %5175, %v4541_v13  }
 0x907   :  { %2640 = vperm.xlu1 %5175, %v4542_v19   ;;  %2630 = vperm.xlu0 %5173, %v4540_v48  }
 0x90b   :  { %2663 = vperm.xlu1 %5175, %v4545_v51   ;;  %2658 = vperm.xlu0 %5173, %v4544_v40  }
 0x90f   :  { %2668 = vperm.xlu1 %5175, %v4546_v34   ;;  %2645 = vperm.xlu0 %5173, %v4543_v9  }
 0x913   :  { %2731 = vperm.xlu1 %5175, %v4548_v17   ;;  %2673 = vperm.xlu0 %5173, %v4547_v52  }
 0x917   :  { %5176 = vset.pattern.permute.xlu1 %v5233_v28  ;;  %5179 = vset.pattern.permute.xlu0 %v5234_v30 }
 0x918   :  { %2758 = vperm.xlu1 %5176, %v4548_v17   ;;  %2822 = vperm.xlu0 %5179, %v4548_v17  }
 0x91c   :  { %5177 = vset.pattern.permute.xlu1 %v5232_v3  ;;  %5180 = vset.pattern.permute.xlu0 %v5233_v28 }
 0x91d   :  { %2741 = vperm.xlu1 %5177, %v4550_v43   ;;  %2762 = vperm.xlu0 %5180, %v4549_v57  }
 0x921   :  { %5178 = vset.pattern.permute.xlu1 %v5233_v28  ;;  %2770 = vperm.xlu0 %5180, %v4551_v25  }
 0x922   :  { %2766 = vperm.xlu1 %5178, %v4550_v43  }
 0x925   :  { %5183 = vset.pattern.permute.xlu0 %v5232_v3 }
 0x926   :  { %5181 = vset.pattern.permute.xlu1 %v5234_v30  ;;  %2736 = vperm.xlu0 %5183, %v4549_v57  }
 0x927   :  { %2826 = vperm.xlu1 %5181, %v4549_v57  }
 0x92a   :  { %2860 = vperm.xlu0 %5183, %v4552_v50  }
 0x92b   :  { %5182 = vset.pattern.permute.xlu1 %v5232_v3 }
 0x92c   :  { %2746 = vperm.xlu1 %5182, %v4551_v25  }
 0x92e   :  { %2875 = vperm.xlu0 %5183, %v4555_v55  }
 0x930   :  { %5184 = vset.pattern.permute.xlu1 %v5234_v30 }
 0x931   :  { %2830 = vperm.xlu1 %5184, %v4550_v43  }
 0x935   :  { %2834 = vperm.xlu1 %5184, %v4551_v25  }
 0x939   :  { %5185 = vset.pattern.permute.xlu1 %v5232_v3 }
 0x93a   :  { %2865 = vperm.xlu1 %5185, %v4553_v27  }
 0x93e   :  { %2870 = vperm.xlu1 %5185, %v4554_v53  }
 0x962   :  { %v2511_v10 = vpop.xlane.xlu0 %2510 }
 0x963   :  { %v2523_v8 = vpop.xlane.xlu1 %2522 }
 0x966   :  { %v2520_v63 = vpop.xlane.xlu0 %2519 }
 0x967   :  { %v2508_v54 = vpop.xlane.xlu1 %2507  ;;  %v2539_v26 = vadd.f32 %v2523_v8, %v2520_v63 }
 0x968   :  { %v2530_v6 = vadd.f32 %v2511_v10, %v2508_v54 }
 0x96a   :  { %v2558_v39 = vpop.xlane.xlu0 %2557 }
 0x96b   :  { %v2561_v60 = vpop.xlane.xlu1 %2560 }
 0x96c   :  { %v2580_v1 = vadd.f32 %v2561_v60, %v2558_v39 }
 0x96e   :  { %v2570_v62 = vpop.xlane.xlu0 %2569 }
 0x96f   :  { %v2573_v44 = vpop.xlane.xlu1 %2572 }
 0x970   :  { %v2589_v51 = vadd.f32 %v2573_v44, %v2570_v62 }
 0x972   :  { %v2517_v45 = vpop.xlane.xlu0 %2516 }
 0x973   :  { %v2529_v36 = vpop.xlane.xlu1 %2528 }
 0x976   :  { %v2514_v7 = vpop.xlane.xlu0 %2513 }
 0x977   :  { %v2531_v22 = vadd.f32 %v2530_v6, %v2514_v7  ;;  %v2526_v49 = vpop.xlane.xlu1 %2525 }
 0x978   :  { %v2540_v32 = vadd.f32 %v2539_v26, %v2526_v49 }
 0x979   :  { %v2532_v31 = vadd.f32 %v2531_v22, %v2517_v45 }
 0x97a   :  { %v2541_v5 = vadd.f32 %v2540_v32, %v2529_v36  ;;  %v2564_v21 = vpop.xlane.xlu0 %2563 }
 0x97b   :  { %v2533_v12 = vrot.slane %v2532_v31, 4  ;;  %v2579_v0 = vpop.xlane.xlu1 %2578  ;;  %v2581_v48 = vadd.f32 %v2580_v1, %v2564_v21 }
 0x97c   :  { %v2542_v13 = vrot.slane %v2541_v5, 4 }
 0x97d   :  { %v2534_v19 = vadd.f32 %v2533_v12, %v2532_v31 }
 0x97e   :  { %v2543_v40 = vadd.f32 %v2542_v13, %v2541_v5  ;;  %v2567_v34 = vpop.xlane.xlu0 %2566 }
 0x97f   :  { %v2535_v9 = vrot.slane %v2534_v19, 2  ;;  %v2582_v17 = vadd.f32 %v2581_v48, %v2567_v34  ;;  %v2576_v52 = vpop.xlane.xlu1 %2575 }
 0x980   :  { %v2544_v43 = vrot.slane %v2543_v40, 2  ;;  %v2590_v57 = vadd.f32 %v2589_v51, %v2576_v52 }
 0x981   :  { %v2536_v25 = vadd.f32 %v2535_v9, %v2534_v19  ;;  %v2583_v50 = vrot.slane %v2582_v17, 4 }
 0x982   :  { %v2545_v55 = vadd.f32 %v2544_v43, %v2543_v40  ;;  %v2591_v27 = vadd.f32 %v2590_v57, %v2579_v0 }
 0x983   :  { %v2537_v53 = vrot.slane %v2536_v25, 1  ;;  %v2584_v10 = vadd.f32 %v2583_v50, %v2582_v17  ;;  %v2636_v40 = vpop.permute.xlu1 %2635 }
 0x984   :  { %v2546_v8 = vrot.slane %v2545_v55, 1  ;;  %v2592_v63 = vrot.slane %v2591_v27, 4 }
 0x985   :  { %v2538_v54 = vadd.f32 %v2537_v53, %v2536_v25  ;;  %v2585_v39 = vrot.slane %v2584_v10, 2 }
 0x986   :  { %v2593_v60 = vadd.f32 %v2592_v63, %v2591_v27  ;;  %v2547_v62 = vadd.f32 %v2546_v8, %v2545_v55  ;;  %v2631_v34 = vpop.permute.xlu0 %2630 }
 0x987   :  { %v2586_v45 = vadd.f32 %v2585_v39, %v2584_v10  ;;  %v2598_v36 = vmul.f32 0.0010080645, %v2538_v54  ;;  %v2641_v9 = vpop.permute.xlu1 %2640 }
 0x988   :  { %v2594_v44 = vrot.slane %v2593_v60, 2  ;;  %v2599_v22 = vmul.f32 0.0010080645, %v2547_v62 }
 0x989   :  { %v2587_v6 = vrot.slane %v2586_v45, 1  ;;  %v2602_v31 = vmul.f32 %v2598_v36, %v2598_v36  ;;  %v2609_v17 = vsub.f32 %v6238_v59, %v2598_v36  ;;  %v2608_v52 = vsub.f32 %v6246_v38, %v2598_v36 }
 0x98a   :  { %v2595_v26 = vadd.f32 %v2594_v44, %v2593_v60  ;;  %v2603_v1 = vmul.f32 %v2599_v22, %v2599_v22  ;;  %v2613_v50 = vsub.f32 %v6240_v35, %v2599_v22  ;;  %v2612_v55 = vsub.f32 %v6248_v58, %v2599_v22  ;;  %v2659_v60 = vpop.permute.xlu0 %2658 }
 0x98b   :  { %v2588_v7 = vadd.f32 %v2587_v6, %v2586_v45  ;;  %v2610_v8 = vsub.f32 %v6274_v14, %v2598_v36  ;;  %v2614_v39 = vsub.f32 %v6276_v20, %v2599_v22  ;;  %v2664_v59 = vpop.permute.xlu1 %2663 }
 0x98c   :  { %v2596_v49 = vrot.slane %v2595_v26, 1 }
 0x98d   :  { %v2600_v32 = vmul.f32 0.0010080645, %v2588_v7 }
 0x98e   :  { %v2597_v5 = vadd.f32 %v2596_v49, %v2595_v26 }
 0x98f   :  { %v2604_v21 = vsub.f32 %v2600_v32, %v2602_v31  ;;  %v2669_v7 = vpop.permute.xlu1 %2668  ;;  %v2615_v31 = vsub.f32 %v6268_v29, %v2599_v22 }
 0x990   :  { %v2601_v12 = vmul.f32 0.0010080645, %v2597_v5  ;;  %v2611_v5 = vsub.f32 %v6266_v16, %v2598_v36 }
 0x991   :  { %v2606_v0 = vmax.f32 %v2604_v21, 0.0 }
 0x992   :  { %v2605_v13 = vsub.f32 %v2601_v12, %v2603_v1  ;;  %v2646_v1 = vpop.permute.xlu0 %2645 }
 0x993   :  { %v2616_v19 = vadd.f32 1e-08, %v2606_v0  ;;  %v2732_v22 = vpop.permute.xlu1 %2731 }
 0x994   :  { %v2607_v48 = vmax.f32 %v2605_v13, 0.0 }
 0x995   :  { %5212 = vrsqrt.f32 %v2616_v19 }
 0x996   :  { %v2617_v51 = vadd.f32 1e-08, %v2607_v48  ;;  %v2674_v29 = vpop.permute.xlu0 %2673 }
 0x997   :  { %v2759_v19 = vpop.permute.xlu1 %2758 }
 0x998   :  { %5214 = vrsqrt.f32 %v2617_v51 }
 0x99c   :  { %v2742_v48 = vpop.permute.xlu1 %2741 }
 0x99f   :  { %v5213_v43 = vpop.eup %5212 }
 0x9a0   :  { %v2621_v57 = vmul.f32 %v5213_v43, %v2609_v17  ;;  %v2620_v25 = vmul.f32 %v5213_v43, %v2608_v52  ;;  %v2622_v45 = vmul.f32 %v5213_v43, %v2610_v8  ;;  %v2623_v12 = vmul.f32 %v5213_v43, %v2611_v5 }
 0x9a1   :  { %v6408_v51 = vpop.permute.xlu1 %2766 }
 0x9a2   :  { %v5215_v27 = vpop.eup %5214  ;;  %v2649_v53 = vmul.f32 %v2636_v40, %v2621_v57  ;;  %v2648_v10 = vmul.f32 %v2631_v34, %v2620_v25  ;;  %v2650_v58 = vmul.f32 %v2641_v9, %v2622_v45  ;;  %v2651_v13 = vmul.f32 %v2646_v1, %v2623_v12 }
 0x9a3   :  { %v2625_v63 = vmul.f32 %v5215_v27, %v2613_v50  ;;  %v2624_v54 = vmul.f32 %v5215_v27, %v2612_v55  ;;  %v2626_v6 = vmul.f32 %v5215_v27, %v2614_v39  ;;  %v2627_v21 = vmul.f32 %v5215_v27, %v2615_v31 }
 0x9a4   :  { %v6358_v38 = vadd.f32 %v2659_v60, %v2648_v10  ;;  %v6360_v62 = vadd.f32 %v2664_v59, %v2649_v53  ;;  %v6374_v49 = vadd.f32 %v2669_v7, %v2650_v58  ;;  %v6394_v36 = vadd.f32 %v2674_v29, %v2651_v13 }
 0x9a5   :  { %v2653_v44 = vmul.f32 %v2636_v40, %v2625_v63  ;;  %v2652_v35 = vmul.f32 %v2631_v34, %v2624_v54  ;;  %v2654_v20 = vmul.f32 %v2641_v9, %v2626_v6  ;;  %v2655_v0 = vmul.f32 %v2646_v1, %v2627_v21  ;;  %v2823_v34 = vpop.permute.xlu0 %2822 }
 0x9a6   :  { %2697 = vrot.lane.b32.xlu1 %v6358_v38, %s5235_s24  ;;  %2699 = vrot.lane.b32.xlu0 %v6360_v62, %s5235_s24  ;;  %v2827_v40 = vpop.permute.xlu1 %2826  ;;  %v2773_v58 = vmul.f32 %v2759_v19, %v6358_v38 }
 0x9a7   :  { %v6366_v14 = vadd.f32 %v2659_v60, %v2652_v35  ;;  %v6368_v26 = vadd.f32 %v2664_v59, %v2653_v44  ;;  %v6376_v32 = vadd.f32 %v2669_v7, %v2654_v20  ;;  %v6392_v16 = vadd.f32 %v2674_v29, %v2655_v0 }
 0x9a9   :  { %v2763_v17 = vpop.permute.xlu0 %2762  ;;  %v2777_v12 = vmul.f32 %v2759_v19, %v6366_v14 }
 0x9aa   :  { %2705 = vrot.lane.b32.xlu1 %v6366_v14, %s5235_s24  ;;  %2707 = vrot.lane.b32.xlu0 %v6368_v26, %s5235_s24  ;;  %v2774_v31 = vmul.f32 %v2763_v17, %v6360_v62 }
 0x9ab   :  { %v6410_v9 = vpop.permute.xlu1 %2746 }
 0x9ad   :  { %v6414_v43 = vpop.permute.xlu0 %2770 }
 0x9ae   :  { %2701 = vrot.lane.b32.xlu1 %v6374_v49, %s5235_s24  ;;  %2709 = vrot.lane.b32.xlu0 %v6376_v32, %s5235_s24 }
 0x9b0   :  { %v6412_v52 = vpop.permute.xlu1 %2830 }
 0x9b1   :  { %v2737_v25 = vpop.permute.xlu0 %2736 }
 0x9b2   :  { %2789 = vrot.lane.b32.xlu1 %v6358_v38, %s5236_s25  ;;  %2791 = vrot.lane.b32.xlu0 %v6360_v62, %s5236_s25 }
 0x9b4   :  { %v6416_v57 = vpop.permute.xlu1 %2834 }
 0x9b5   :  { %v2861_v55 = vpop.permute.xlu0 %2860 }
 0x9b6   :  { %2797 = vrot.lane.b32.xlu1 %v6366_v14, %s5236_s25  ;;  %2799 = vrot.lane.b32.xlu0 %v6368_v26, %s5236_s25 }
 0x9b9   :  { %v2866_v50 = vpop.permute.xlu1 %2865  ;;  %v6420_v53 = vpop.permute.xlu0 %2875 }
 0x9ba   :  { %2711 = vrot.lane.b32.xlu1 %v6392_v16, %s5235_s24  ;;  %2703 = vrot.lane.b32.xlu0 %v6394_v36, %s5235_s24 }
 0x9bd   :  { %v6418_v27 = vpop.permute.xlu1 %2870 }
 0x9be   :  { %2801 = vrot.lane.b32.xlu1 %v6376_v32, %s5236_s25  ;;  %2793 = vrot.lane.b32.xlu0 %v6374_v49, %s5236_s25 }
 0x9c2   :  { %2795 = vrot.lane.b32.xlu1 %v6394_v36, %s5236_s25  ;;  %2803 = vrot.lane.b32.xlu0 %v6392_v16, %s5236_s25 }
 0xa18   :  { %v2698_v10 = vpop.permute.xlu1 %2697  ;;  %v2700_v8 = vpop.permute.xlu0 %2699 }
 0xa19   :  { %v2721_v39 = vsel %vm560_vm10, 0.0, %v2698_v10  ;;  %v2722_v60 = vsel %vm560_vm10, 0.0, %v2700_v8 }
 0xa1a   :  { %v2749_v44 = vmul.f32 %v2732_v22, %v2721_v39  ;;  %v2750_v6 = vmul.f32 %v2737_v25, %v2722_v60 }
 0xa1c   :  { %v2706_v63 = vpop.permute.xlu1 %2705  ;;  %v2708_v54 = vpop.permute.xlu0 %2707  ;;  %v2781_v0 = vadd.f32 %v2773_v58, %v2749_v44  ;;  %v2782_v10 = vadd.f32 %v2774_v31, %v2750_v6 }
 0xa1d   :  { %v2725_v35 = vsel %vm560_vm10, 0.0, %v2706_v63  ;;  %v2726_v20 = vsel %vm560_vm10, 0.0, %v2708_v54  ;;  %v2778_v54 = vmul.f32 %v2763_v17, %v6368_v26  ;;  %v2775_v26 = vmul.f32 %v6408_v51, %v6374_v49 }
 0xa1e   :  { %v2753_v5 = vmul.f32 %v2732_v22, %v2725_v35  ;;  %v2754_v8 = vmul.f32 %v2737_v25, %v2726_v20 }
 0xa20   :  { %v2702_v59 = vpop.permute.xlu1 %2701  ;;  %v2710_v45 = vpop.permute.xlu0 %2709  ;;  %v2785_v62 = vadd.f32 %v2777_v12, %v2753_v5  ;;  %v2786_v25 = vadd.f32 %v2778_v54, %v2754_v8 }
 0xa21   :  { %v2723_v63 = vsel %vm560_vm10, 0.0, %v2702_v59  ;;  %v2727_v22 = vsel %vm560_vm10, 0.0, %v2710_v45 }
 0xa22   :  { %v2751_v19 = vmul.f32 %v2742_v48, %v2723_v63  ;;  %v2755_v45 = vmul.f32 %v2742_v48, %v2727_v22 }
 0xa24   :  { %v2790_v7 = vpop.permute.xlu1 %2789  ;;  %v2792_v21 = vpop.permute.xlu0 %2791 }
 0xa25   :  { %v2813_v1 = vsel %vm653_vm11, %v2790_v7, 0.0  ;;  %v2814_v13 = vsel %vm653_vm11, %v2792_v21, 0.0 }
 0xa26   :  { %v2837_v29 = vmul.f32 %v2823_v34, %v2813_v1  ;;  %v2838_v38 = vmul.f32 %v2827_v40, %v2814_v13  ;;  %v2783_v13 = vadd.f32 %v2775_v26, %v2751_v19 }
 0xa28   :  { %v2845_v39 = vadd.f32 %v2837_v29, %v2781_v0  ;;  %v2798_v60 = vpop.permute.xlu1 %2797  ;;  %v2846_v35 = vadd.f32 %v2838_v38, %v2782_v10  ;;  %v2800_v7 = vpop.permute.xlu0 %2799  ;;  %v2779_v0 = vmul.f32 %v6408_v51, %v6376_v32 }
 0xa29   :  { %v2817_v14 = vsel %vm653_vm11, %v2798_v60, 0.0  ;;  %v2818_v58 = vsel %vm653_vm11, %v2800_v7, 0.0 }
 0xa2a   :  { %v2878_v44 = vadd.f32 %v2861_v55, %v2845_v39  ;;  %v2841_v6 = vmul.f32 %v2823_v34, %v2817_v14  ;;  %v2879_v20 = vadd.f32 %v2866_v50, %v2846_v35  ;;  %v2842_v59 = vmul.f32 %v2827_v40, %v2818_v58 }
 0xa2b   :  { %v2787_v51 = vadd.f32 %v2779_v0, %v2755_v45 }
 0xa2c   :  { %v2849_v17 = vadd.f32 %v2841_v6, %v2785_v62  ;;  %v2712_v31 = vpop.permute.xlu1 %2711  ;;  %vm2886_vm12 = vcmp.ge.f32.partialorder %v2878_v44, 0.0  ;;  %v2894_v5 = vmul.f32 0.25, %v2878_v44  ;;  %v2850_v21 = vadd.f32 %v2842_v59, %v2786_v25  ;;  %v2704_v1 = vpop.permute.xlu0 %2703 }
 0xa2d   :  { %vm2887_vm13 = vcmp.ge.f32.partialorder %v2879_v20, 0.0  ;;  %v2895_v12 = vmul.f32 0.25, %v2879_v20  ;;  %v2724_v10 = vsel %vm560_vm10, 0.0, %v2704_v1  ;;  %v2728_v48 = vsel %vm560_vm10, 0.0, %v2712_v31 }
 0xa2e   :  { %v2882_v34 = vadd.f32 %v2861_v55, %v2849_v17  ;;  %v6440_v29 = vsel %vm2886_vm12, %v2878_v44, %v2894_v5  ;;  %v2883_v40 = vadd.f32 %v2866_v50, %v2850_v21  ;;  %v2752_v39 = vmul.f32 %v6410_v9, %v2724_v10 }
 0xa2f   :  { %v6443_v49 = vsel %vm2887_vm13, %v2879_v20, %v2895_v12  ;;  %v2920_v8 = vsel %vm345_vm1, %v6440_v29, 0.0  ;;  %v2756_v35 = vmul.f32 %v6410_v9, %v2728_v48  ;;  %v2776_v44 = vmul.f32 %v6414_v43, %v6394_v36 }
 0xa30   :  { %v2923_v63 = vsel %vm345_vm1, %v6443_v49, 0.0  ;;  %2921 = vadd.xlane.f32.xlu1 %v2920_v8  ;;  %v2802_v38 = vpop.permute.xlu1 %2801  ;;  %vm2890_vm14 = vcmp.ge.f32.partialorder %v2882_v34, 0.0  ;;  %v2898_v32 = vmul.f32 0.25, %v2882_v34  ;;  %v2794_v55 = vpop.permute.xlu0 %2793  ;;  %vm2891_vm15 = vcmp.ge.f32.partialorder %v2883_v40, 0.0 }
 0xa31   :  { %2924 = vadd.xlane.f32.xlu0 %v2923_v63  ;;  %v2819_v50 = vsel %vm653_vm11, %v2802_v38, 0.0  ;;  %v2899_v54 = vmul.f32 0.25, %v2883_v40  ;;  %v2815_v60 = vsel %vm653_vm11, %v2794_v55, 0.0  ;;  %v2780_v20 = vmul.f32 %v6414_v43, %v6392_v16 }
 0xa32   :  { %v2843_v62 = vmul.f32 %v6412_v52, %v2819_v50  ;;  %v6454_v22 = vsel %vm2890_vm14, %v2882_v34, %v2898_v32  ;;  %v2839_v7 = vmul.f32 %v6412_v52, %v2815_v60  ;;  %v2784_v26 = vadd.f32 %v2776_v44, %v2752_v39 }
 0xa33   :  { %v6458_v14 = vsel %vm2891_vm15, %v2883_v40, %v2899_v54  ;;  %v2932_v19 = vsel %vm345_vm1, %v6454_v22, 0.0  ;;  %v2788_v5 = vadd.f32 %v2780_v20, %v2756_v35  ;;  %v2963_v32 = vmul.f32 %v6443_v49, %v6443_v49 }
 0xa34   :  { %v2851_v58 = vadd.f32 %v2843_v62, %v2787_v51  ;;  %v2935_v6 = vsel %vm345_vm1, %v6458_v14, 0.0  ;;  %v2796_v25 = vpop.permute.xlu1 %2795  ;;  %v2847_v59 = vadd.f32 %v2839_v7, %v2783_v13  ;;  %v2804_v9 = vpop.permute.xlu0 %2803  ;;  %v2962_v51 = vmul.f32 %v6440_v29, %v6440_v29 }
 0xa35   :  { %2936 = vadd.xlane.f32.xlu1 %v2935_v6  ;;  %2933 = vadd.xlane.f32.xlu0 %v2932_v19  ;;  %v2816_v52 = vsel %vm653_vm11, %v2796_v25, 0.0  ;;  %v2820_v31 = vsel %vm653_vm11, %v2804_v9, 0.0  ;;  %v2973_v55 = vsel %vm345_vm1, %v2963_v32, 0.0  ;;  %v2967_v54 = vmul.f32 %v6458_v14, %v6458_v14  ;;  %v4560_v9 = vld [vmem:[%s7062_s8 + $0x40] sm:$0xff] }
 0xa36   :  { %v2884_v17 = vadd.f32 %v6418_v27, %v2851_v58  ;;  %v2840_v36 = vmul.f32 %v6416_v57, %v2816_v52  ;;  %v2880_v45 = vadd.f32 %v6418_v27, %v2847_v59  ;;  %v2844_v21 = vmul.f32 %v6416_v57, %v2820_v31  ;;  %v4557_v59 = vld [vmem:[%s7061_s7 + $0x48] sm:$0xff]  ;;  %v4556_v52 = vld [vmem:[%s7061_s7 + $0x40] sm:$0xff]  ;;  %v4562_v31 = vld [vmem:[%s7062_s8 + $0x50] sm:$0xff] }
 0xa37   :  { %v2970_v50 = vsel %vm345_vm1, %v2962_v51, 0.0  ;;  %v2966_v39 = vmul.f32 %v6454_v22, %v6454_v22  ;;  %v2985_v60 = vsel %vm345_vm1, %v2967_v54, 0.0 }
 0xa38   :  { %v2848_v1 = vadd.f32 %v2840_v36, %v2784_v26  ;;  %vm2892_vm10 = vcmp.ge.f32.partialorder %v2884_v17, 0.0  ;;  %v2900_v16 = vmul.f32 0.25, %v2884_v17  ;;  %v2852_v43 = vadd.f32 %v2844_v21, %v2788_v5  ;;  %v4558_v26 = vld [vmem:[%s7061_s7 + $0x50] sm:$0xff]  ;;  %v4559_v36 = vld [vmem:[%s7061_s7 + $0x58] sm:$0xff]  ;;  %v4576_v5 = vld [vmem:[%s7063_s10 + $0x40] sm:$0xff] }
 0xa39   :  { %vm2888_vm4 = vcmp.ge.f32.partialorder %v2880_v45, 0.0  ;;  %v2896_v12 = vmul.f32 0.25, %v2880_v45  ;;  %v2982_v62 = vsel %vm345_vm1, %v2966_v39, 0.0  ;;  %v4578_v21 = vld [vmem:[%s7063_s10 + $0x50] sm:$0xff] }
 0xa3a   :  { %v2881_v0 = vadd.f32 %v6420_v53, %v2848_v1  ;;  %v6475_v13 = vsel %vm2892_vm10, %v2884_v17, %v2900_v16  ;;  %v2885_v34 = vadd.f32 %v6420_v53, %v2852_v43  ;;  %v4561_v17 = vld [vmem:[%s7062_s8 + $0x48] sm:$0xff]  ;;  %v66_v16 = vld [vmem:[%s7056_s1 + $0x60] sm:$0xff]  ;;  %v4579_v43 = vld [vmem:[%s7063_s10 + $0x58] sm:$0xff] }
 0xa3b   :  { %v6478_v40 = vsel %vm2888_vm4, %v2880_v45, %v2896_v12  ;;  %v2938_v10 = vsel %vm345_vm1, %v6475_v13, 0.0  ;;  %v2968_v35 = vmul.f32 %v6475_v13, %v6475_v13  ;;  %v4563_v45 = vld [vmem:[%s7062_s8 + $0x58] sm:$0xff]  ;;  %v4577_v1 = vld [vmem:[%s7063_s10 + $0x48] sm:$0xff]  ;;  %v82_v12 = vld [vmem:[%s7056_s1 + $0xe0] sm:$0xff] }
 0xa3c   :  { %v2926_v57 = vsel %vm345_vm1, %v6478_v40, 0.0  ;;  %2939 = vadd.xlane.f32.xlu1 %v2938_v10  ;;  %vm2889_vm11 = vcmp.ge.f32.partialorder %v2881_v0, 0.0  ;;  %v2897_v27 = vmul.f32 0.25, %v2881_v0  ;;  %vm2893_vm5 = vcmp.ge.f32.partialorder %v2885_v34, 0.0  ;;  %v83_v10 = vld [vmem:[%s7056_s1 + $0xe8] sm:$0xff] }
 0xa3d   :  { %2927 = vadd.xlane.f32.xlu0 %v2926_v57  ;;  %v2901_v8 = vmul.f32 0.25, %v2885_v34  ;;  %v2964_v7 = vmul.f32 %v6478_v40, %v6478_v40  ;;  %v2988_v19 = vsel %vm345_vm1, %v2968_v35, 0.0  ;;  %v69_v57 = vld [vmem:[%s7056_s1 + $0x78] sm:$0xff] }
 0xa3e   :  { %v6484_v48 = vsel %vm2889_vm11, %v2881_v0, %v2897_v27  ;;  %v67_v0 = vld [vmem:[%s7056_s1 + $0x68] sm:$0xff]  ;;  %v84_v27 = vld [vmem:[%s7056_s1 + $0xf0] sm:$0xff] }
 0xa3f   :  { %v6486_v63 = vsel %vm2893_vm5, %v2885_v34, %v2901_v8  ;;  %v2929_v53 = vsel %vm345_vm1, %v6484_v48, 0.0  ;;  %v2976_v44 = vsel %vm345_vm1, %v2964_v7, 0.0  ;;  %v2965_v6 = vmul.f32 %v6484_v48, %v6484_v48  ;;  %v68_v34 = vld [vmem:[%s7056_s1 + $0x70] sm:$0xff]  ;;  %v85_v8 = vld [vmem:[%s7056_s1 + $0xf8] sm:$0xff] }
 0xa40   :  { %v2941_v38 = vsel %vm345_vm1, %v6486_v63, 0.0  ;;  %v2969_v58 = vmul.f32 %v6486_v63, %v6486_v63 }
 0xa41   :  { %2942 = vadd.xlane.f32.xlu1 %v2941_v38  ;;  %2930 = vadd.xlane.f32.xlu0 %v2929_v53  ;;  %v2979_v20 = vsel %vm345_vm1, %v2965_v6, 0.0  ;;  %v4564_v53 = vld [vmem:[%s7064_s9 + $0x40] sm:$0xff] }
 0xa42   :  { %v2991_v25 = vsel %vm345_vm1, %v2969_v58, 0.0  ;;  %4943 = vmatprep.mubr.msk.f32.mxu0 %vm130_vm0, %v4564_v53  ;;  %4957 = vmatprep.mubr.msk.f32.mxu1 %vm130_vm0, %v4564_v53 }
 0xa45   :  { %2974 = vadd.xlane.f32.xlu1 %v2973_v55  ;;  %2971 = vadd.xlane.f32.xlu0 %v2970_v50 }
 0xa49   :  { %2986 = vadd.xlane.f32.xlu1 %v2985_v60  ;;  %2983 = vadd.xlane.f32.xlu0 %v2982_v62 }
 0xa4d   :  { %2989 = vadd.xlane.f32.xlu1 %v2988_v19  ;;  %2977 = vadd.xlane.f32.xlu0 %v2976_v44 }
 0xa51   :  { %2992 = vadd.xlane.f32.xlu1 %v2991_v25  ;;  %2980 = vadd.xlane.f32.xlu0 %v2979_v20 }
 0xa62   :  { %3049 = vperm.xlu1 %5185, %v4557_v59  }
 0xa66   :  { %3072 = vperm.xlu1 %5185, %v4560_v9  }
 0xa67   :  { %3044 = vperm.xlu0 %5183, %v4556_v52  }
 0xa6a   :  { %3054 = vperm.xlu1 %5185, %v4558_v26  }
 0xa6b   :  { %3077 = vperm.xlu0 %5183, %v4561_v17  }
 0xa6e   :  { %3082 = vperm.xlu1 %5185, %v4562_v31  }
 0xa6f   :  { %3059 = vperm.xlu0 %5183, %v4559_v36  }
 0xa72   :  { %3300 = vperm.xlu1 %5185, %v4576_v5  }
 0xa73   :  { %3087 = vperm.xlu0 %5183, %v4563_v45  }
 0xa76   :  { %3310 = vperm.xlu1 %5185, %v4578_v21  }
 0xa77   :  { %3305 = vperm.xlu0 %5183, %v4577_v1  }
 0xa7a   :  { %3333 = vperm.xlu1 %5185, %v66_v16  }
 0xa7b   :  { %3315 = vperm.xlu0 %5183, %v4579_v43  }
 0xa7e   :  { %3353 = vperm.xlu1 %5185, %v82_v12  }
 0xa7f   :  { %3338 = vperm.xlu0 %5183, %v67_v0  }
 0xa82   :  { %3343 = vperm.xlu1 %5185, %v68_v34  }
 0xa83   :  { %3358 = vperm.xlu0 %5183, %v83_v10  }
 0xa86   :  { %3348 = vperm.xlu1 %5185, %v69_v57  }
 0xa87   :  { %3363 = vperm.xlu0 %5183, %v84_v27  }
 0xa8b   :  { %3368 = vperm.xlu0 %5183, %v85_v8  }
 0xabd   :  { %v2922_v38 = vpop.xlane.xlu1 %2921 }
 0xabe   :  { %v2925_v32 = vpop.xlane.xlu0 %2924 }
 0xabf   :  { %v2944_v39 = vadd.f32 %v2925_v32, %v2922_v38 }
 0xac2   :  { %v2937_v51 = vpop.xlane.xlu1 %2936  ;;  %v2934_v55 = vpop.xlane.xlu0 %2933 }
 0xac3   :  { %v2953_v60 = vadd.f32 %v2937_v51, %v2934_v55 }
 0xac9   :  { %v2940_v50 = vpop.xlane.xlu1 %2939 }
 0xaca   :  { %v2928_v54 = vpop.xlane.xlu0 %2927  ;;  %v2954_v35 = vadd.f32 %v2953_v60, %v2940_v50 }
 0xacb   :  { %v2945_v62 = vadd.f32 %v2944_v39, %v2928_v54 }
 0xace   :  { %v2931_v7 = vpop.xlane.xlu0 %2930  ;;  %v2943_v19 = vpop.xlane.xlu1 %2942 }
 0xacf   :  { %v2946_v44 = vadd.f32 %v2945_v62, %v2931_v7  ;;  %v2955_v58 = vadd.f32 %v2954_v35, %v2943_v19 }
 0xad1   :  { %v2947_v6 = vrot.slane %v2946_v44, 4  ;;  %v2956_v25 = vrot.slane %v2955_v58, 4 }
 0xad2   :  { %v2972_v20 = vpop.xlane.xlu0 %2971  ;;  %v2975_v59 = vpop.xlane.xlu1 %2974 }
 0xad3   :  { %v2948_v9 = vadd.f32 %v2947_v6, %v2946_v44  ;;  %v2957_v52 = vadd.f32 %v2956_v25, %v2955_v58  ;;  %v2994_v21 = vadd.f32 %v2975_v59, %v2972_v20 }
 0xad5   :  { %v2949_v31 = vrot.slane %v2948_v9, 2  ;;  %v2958_v36 = vrot.slane %v2957_v52, 2 }
 0xad6   :  { %v2984_v26 = vpop.xlane.xlu0 %2983  ;;  %v2987_v17 = vpop.xlane.xlu1 %2986 }
 0xad7   :  { %v3003_v1 = vadd.f32 %v2987_v17, %v2984_v26  ;;  %v2950_v16 = vadd.f32 %v2949_v31, %v2948_v9  ;;  %v2959_v43 = vadd.f32 %v2958_v36, %v2957_v52 }
 0xad9   :  { %v2951_v8 = vrot.slane %v2950_v16, 1  ;;  %v2960_v53 = vrot.slane %v2959_v43, 1 }
 0xada   :  { %v2978_v5 = vpop.xlane.xlu0 %2977  ;;  %v2990_v45 = vpop.xlane.xlu1 %2989 }
 0xadb   :  { %v2995_v12 = vadd.f32 %v2994_v21, %v2978_v5  ;;  %v3004_v0 = vadd.f32 %v3003_v1, %v2990_v45  ;;  %v2952_v50 = vadd.f32 %v2951_v8, %v2950_v16  ;;  %v2961_v54 = vadd.f32 %v2960_v53, %v2959_v43 }
 0xadd   :  { %v3012_v7 = vmul.f32 0.0010080645, %v2952_v50  ;;  %v3013_v19 = vmul.f32 0.0010080645, %v2961_v54 }
 0xade   :  { %v2981_v34 = vpop.xlane.xlu0 %2980  ;;  %v2993_v10 = vpop.xlane.xlu1 %2992 }
 0xadf   :  { %v2996_v57 = vadd.f32 %v2995_v12, %v2981_v34  ;;  %v3005_v27 = vadd.f32 %v3004_v0, %v2993_v10  ;;  %v3016_v59 = vmul.f32 %v3012_v7, %v3012_v7  ;;  %v3017_v9 = vmul.f32 %v3013_v19, %v3013_v19 }
 0xae0   :  { %v3023_v34 = vsub.f32 %v6443_v49, %v3012_v7  ;;  %v3022_v10 = vsub.f32 %v6440_v29, %v3012_v7  ;;  %v3027_v53 = vsub.f32 %v6458_v14, %v3013_v19 }
 0xae1   :  { %v2997_v38 = vrot.slane %v2996_v57, 4  ;;  %v3006_v32 = vrot.slane %v3005_v27, 4 }
 0xae2   :  { %v3050_v5 = vpop.permute.xlu1 %3049 }
 0xae3   :  { %v2998_v51 = vadd.f32 %v2997_v38, %v2996_v57  ;;  %v3007_v55 = vadd.f32 %v3006_v32, %v3005_v27  ;;  %v3024_v57 = vsub.f32 %v6478_v40, %v3012_v7  ;;  %v3025_v27 = vsub.f32 %v6484_v48, %v3012_v7 }
 0xae4   :  { %v3026_v38 = vsub.f32 %v6454_v22, %v3013_v19  ;;  %v3028_v32 = vsub.f32 %v6475_v13, %v3013_v19 }
 0xae5   :  { %v2999_v39 = vrot.slane %v2998_v51, 2  ;;  %v3008_v60 = vrot.slane %v3007_v55, 2 }
 0xae6   :  { %v3045_v45 = vpop.permute.xlu0 %3044  ;;  %v3073_v16 = vpop.permute.xlu1 %3072 }
 0xae7   :  { %v3000_v62 = vadd.f32 %v2999_v39, %v2998_v51  ;;  %v3009_v35 = vadd.f32 %v3008_v60, %v3007_v55  ;;  %v3029_v51 = vsub.f32 %v6486_v63, %v3013_v19 }
 0xae9   :  { %v3001_v44 = vrot.slane %v3000_v62, 1  ;;  %v3010_v58 = vrot.slane %v3009_v35, 1 }
 0xaea   :  { %v3078_v43 = vpop.permute.xlu0 %3077  ;;  %v3055_v12 = vpop.permute.xlu1 %3054 }
 0xaeb   :  { %v3002_v6 = vadd.f32 %v3001_v44, %v3000_v62  ;;  %v3011_v25 = vadd.f32 %v3010_v58, %v3009_v35 }
 0xaed   :  { %v3014_v20 = vmul.f32 0.0010080645, %v3002_v6  ;;  %v3015_v52 = vmul.f32 0.0010080645, %v3011_v25 }
 0xaee   :  { %v3060_v0 = vpop.permute.xlu0 %3059  ;;  %v3083_v13 = vpop.permute.xlu1 %3082 }
 0xaef   :  { %v3018_v26 = vsub.f32 %v3014_v20, %v3016_v59  ;;  %v3019_v17 = vsub.f32 %v3015_v52, %v3017_v9 }
 0xaf1   :  { %v3020_v31 = vmax.f32 %v3018_v26, 0.0  ;;  %v3021_v36 = vmax.f32 %v3019_v17, 0.0 }
 0xaf2   :  { %v3088_v25 = vpop.permute.xlu0 %3087 }
 0xaf3   :  { %v3030_v21 = vadd.f32 1e-08, %v3020_v31  ;;  %v3031_v1 = vadd.f32 1e-08, %v3021_v36 }
 0xaf5   :  { %5216 = vrsqrt.f32 %v3030_v21 }
 0xaf6   :  { %5218 = vrsqrt.f32 %v3031_v1 }
 0xaff   :  { %v5217_v8 = vpop.eup %5216 }
 0xb00   :  { %v5219_v55 = vpop.eup %5218  ;;  %v3035_v50 = vmul.f32 %v5217_v8, %v3023_v34  ;;  %v3034_v54 = vmul.f32 %v5217_v8, %v3022_v10  ;;  %v3036_v39 = vmul.f32 %v5217_v8, %v3024_v57  ;;  %v3037_v49 = vmul.f32 %v5217_v8, %v3025_v27 }
 0xb01   :  { %v3039_v60 = vmul.f32 %v5219_v55, %v3027_v53  ;;  %v3038_v29 = vmul.f32 %v5219_v55, %v3026_v38  ;;  %v3040_v62 = vmul.f32 %v5219_v55, %v3028_v32  ;;  %v3041_v40 = vmul.f32 %v5219_v55, %v3029_v51 }
 0xb02   :  { %v3063_v35 = vmul.f32 %v3050_v5, %v3035_v50  ;;  %v3062_v48 = vmul.f32 %v3045_v45, %v3034_v54  ;;  %v3064_v7 = vmul.f32 %v3055_v12, %v3036_v39  ;;  %v3065_v44 = vmul.f32 %v3060_v0, %v3037_v49 }
 0xb03   :  { %v3067_v14 = vmul.f32 %v3050_v5, %v3039_v60  ;;  %v3066_v58 = vmul.f32 %v3045_v45, %v3038_v29  ;;  %v3068_v22 = vmul.f32 %v3055_v12, %v3040_v62  ;;  %v3069_v6 = vmul.f32 %v3060_v0, %v3041_v40  ;;  %v4565_v5 = vld [vmem:[%s7064_s9 + $0x48] sm:$0xff]  ;;  %v4566_v45 = vld [vmem:[%s7064_s9 + $0x50] sm:$0xff]  ;;  %v3301_v12 = vpop.permute.xlu1 %3300  ;;  %v3306_v0 = vpop.permute.xlu0 %3305 }
 0xb04   :  { %v3090_v63 = vadd.f32 %v3073_v16, %v3062_v48  ;;  %v3091_v19 = vadd.f32 %v3078_v43, %v3063_v35  ;;  %v3092_v20 = vadd.f32 %v3083_v13, %v3064_v7  ;;  %v3093_v59 = vadd.f32 %v3088_v25, %v3065_v44 }
 0xb05   :  { %v3094_v9 = vadd.f32 %v3073_v16, %v3066_v58  ;;  %v3095_v52 = vadd.f32 %v3078_v43, %v3067_v14  ;;  %v3096_v26 = vadd.f32 %v3083_v13, %v3068_v22  ;;  %v3097_v17 = vadd.f32 %v3088_v25, %v3069_v6  ;;  %v4567_v16 = vld [vmem:[%s7064_s9 + $0x58] sm:$0xff]  ;;  %v4580_v43 = vld [vmem:[%s7055_s2 + $0x60] sm:$0xff]  ;;  %v4582_v58 = vld [vmem:[%s7055_s2 + $0x70] sm:$0xff] }
 0xb06   :  { %v5099_v31 = vpack.c.bf16 %v3091_v19, %v3090_v63  ;;  %v5103_v21 = vpack.c.bf16 %v3093_v59, %v3092_v20  ;;  %v4583_v22 = vld [vmem:[%s7055_s2 + $0x78] sm:$0xff] }
 0xb07   :  { %v5107_v36 = vpack.c.bf16 %v3095_v52, %v3094_v9  ;;  %v5111_v1 = vpack.c.bf16 %v3097_v17, %v3096_v26  ;;  %v3316_v29 = vpop.permute.xlu0 %3315  ;;  %v3311_v40 = vpop.permute.xlu1 %3310 }
 0xb08   :  { %5100 = vmatprep.subr.bf16.mxu0 %v5099_v31 }
 0xb09   :  { %5108 = vmatprep.subr.bf16.mxu1 %v5107_v36  ;;  %5102 = vmatpush3.bf16.msra.mxu0 %v5099_v31 }
 0xb0a   :  { %5110 = vmatpush3.bf16.msra.mxu1 %v5107_v36  ;;  %5104 = vmatprep.subr.bf16.mxu0 %v5103_v21 }
 0xb0b   :  { %5112 = vmatprep.subr.bf16.mxu1 %v5111_v1  ;;  %v3334_v6 = vpop.permute.xlu1 %3333  ;;  %v3339_v13 = vpop.permute.xlu0 %3338 }
 0xb0d   :  { %5106 = vmatpush3.bf16.msra.mxu0 %v5103_v21 }
 0xb0e   :  { %5114 = vmatpush3.bf16.msra.mxu1 %v5111_v1 }
 0xb0f   :  { %v3354_v25 = vpop.permute.xlu1 %3353  ;;  %v3359_v63 = vpop.permute.xlu0 %3358 }
 0xb10   :  { %4944 = vmatmul.mubr.msk.f32.vlgmr.msra.gmra.mrb[20].mxu0 %vm130_vm0, %v4565_v5 }
 0xb11   :  { %4958 = vmatmul.mubr.msk.f32.vlgmr.msra.gmra.mrb[20].mxu1 %vm130_vm0, %v4565_v5  ;;  %4946 = vmatprep.mubr.msk.f32.mxu0 %vm130_vm0, %v4566_v45 }
 0xb12   :  { %4960 = vmatprep.mubr.msk.f32.mxu1 %vm130_vm0, %v4566_v45 }
 0xb13   :  { %v3344_v31 = vpop.permute.xlu1 %3343  ;;  %v3364_v1 = vpop.permute.xlu0 %3363 }
 0xb14   :  { %4947 = vmatmul.mubr.msk.f32.gmra.mrb[22].mxu0 %vm130_vm0, %v4567_v16 }
 0xb15   :  { %4961 = vmatmul.mubr.msk.f32.gmra.mrb[22].mxu1 %vm130_vm0, %v4567_v16  ;;  %4971 = vmatprep.mubr.msk.f32.mxu0 %vm130_vm0, %v4580_v43 }
 0xb16   :  { %4985 = vmatprep.mubr.msk.f32.mxu1 %vm130_vm0, %v4580_v43 }
 0xbe3   :  { %v4945_v34 = vpop.f32.mrb[20].mxu0 }
 0xbe4   :  { %v3286_v10 = vadd.f32 %v4945_v34, %v6194_v42  ;;  %v4959_v57 = vpop.f32.mrb[20].mxu1  ;;  %v3181_v27 = vpop.f32.mrb[21].mxu0 }
 0xbe5   :  { %v3290_v8 = vadd.f32 %v4959_v57, %v6197_v23  ;;  %v3285_v53 = vadd.f32 %v3181_v27, %v6199_v15  ;;  %v3266_v38 = vpop.f32.mrb[21].mxu1 }
 0xbe6   :  { %v6612_v32 = vadd.f32 %v3306_v0, %v3286_v10  ;;  %v3289_v51 = vadd.f32 %v3266_v38, %v6201_v4 }
 0xbe7   :  { %v6615_v55 = vadd.f32 %v3306_v0, %v3290_v8  ;;  %v6617_v50 = vadd.f32 %v3301_v12, %v3285_v53  ;;  %v4948_v54 = vpop.f32.mrb[22].mxu0 }
 0xbe8   :  { %v6619_v39 = vadd.f32 %v3301_v12, %v3289_v51  ;;  %v3288_v42 = vadd.f32 %v4948_v54, %v6208_v61  ;;  %v4962_v49 = vpop.f32.mrb[22].mxu1  ;;  %v3191_v60 = vpop.f32.mrb[23].mxu0 }
 0xbe9   :  { %v3292_v23 = vadd.f32 %v4962_v49, %v6213_v56  ;;  %v3287_v15 = vadd.f32 %v3191_v60, %v6215_v33  ;;  %v3276_v62 = vpop.f32.mrb[23].mxu1  ;;  %v5115_v4 = vpack.c.bf16 %v6612_v32, %v6617_v50  ;;  %v3349_v51 = vpop.permute.xlu1 %3348 }
 0xbea   :  { %v6626_v35 = vadd.f32 %v3316_v29, %v3288_v42  ;;  %v3291_v48 = vadd.f32 %v3276_v62, %v6217_v47  ;;  %v5123_v7 = vpack.c.bf16 %v6615_v55, %v6619_v39  ;;  %v4581_v47 = vld [vmem:[%s7055_s2 + $0x68] sm:$0xff]  ;;  %v3369_v49 = vpop.permute.xlu0 %3368 }
 0xbeb   :  { %v6631_v61 = vadd.f32 %v3316_v29, %v3292_v23  ;;  %v6633_v44 = vadd.f32 %v3311_v40, %v3287_v15  ;;  %5116 = vmatprep.subr.bf16.mxu0 %v5115_v4 }
 0xbec   :  { %v6635_v56 = vadd.f32 %v3311_v40, %v3291_v48  ;;  %5124 = vmatprep.subr.bf16.mxu1 %v5123_v7  ;;  %5118 = vmatpush3.bf16.msra.mxu0 %v5115_v4 }
 0xbed   :  { %5126 = vmatpush3.bf16.msra.mxu1 %v5123_v7  ;;  %v5119_v33 = vpack.c.bf16 %v6626_v35, %v6633_v44 }
 0xbee   :  { %v5127_v14 = vpack.c.bf16 %v6631_v61, %v6635_v56 }
 0xbef   :  { %5120 = vmatprep.subr.bf16.mxu0 %v5119_v33 }
 0xbf0   :  { %5128 = vmatprep.subr.bf16.mxu1 %v5127_v14  ;;  %5122 = vmatpush3.bf16.msra.mxu0 %v5119_v33 }
 0xbf1   :  { %5130 = vmatpush3.bf16.msra.mxu1 %v5127_v14 }
 0xbf3   :  { %4972 = vmatmul.mubr.msk.f32.vlgmr.msra.gmra.mrb[24].mxu0 %vm130_vm0, %v4581_v47 }
 0xbf4   :  { %4986 = vmatmul.mubr.msk.f32.vlgmr.msra.gmra.mrb[24].mxu1 %vm130_vm0, %v4581_v47  ;;  %4974 = vmatprep.mubr.msk.f32.mxu0 %vm130_vm0, %v4582_v58 }
 0xbf5   :  { %4988 = vmatprep.mubr.msk.f32.mxu1 %vm130_vm0, %v4582_v58 }
 0xbf7   :  { %4975 = vmatmul.mubr.msk.f32.gmra.mrb[26].mxu0 %vm130_vm0, %v4583_v22 }
 0xbf8   :  { %4989 = vmatmul.mubr.msk.f32.gmra.mrb[26].mxu1 %vm130_vm0, %v4583_v22 }
 0xcc6   :  { %v4973_v19 = vpop.f32.mrb[24].mxu0 }
 0xcc7   :  { %v3455_v20 = vadd.f32 %v4973_v19, %v3339_v13  ;;  %v4987_v59 = vpop.f32.mrb[24].mxu1  ;;  %v3449_v9 = vpop.f32.mrb[25].mxu0 }
 0xcc8   :  { %v3540_v52 = vadd.f32 %v4987_v59, %v3359_v63  ;;  %v3450_v26 = vadd.f32 %v3449_v9, %v3334_v6  ;;  %v3534_v17 = vpop.f32.mrb[25].mxu1 }
 0xcc9   :  { %vm3554_vm6 = vcmp.ge.f32.partialorder %v3455_v20, 0.0  ;;  %v3562_v36 = vmul.f32 0.25, %v3455_v20  ;;  %v3535_v21 = vadd.f32 %v3534_v17, %v3354_v25 }
 0xcca   :  { %vm3558_vm7 = vcmp.ge.f32.partialorder %v3540_v52, 0.0  ;;  %v3566_v5 = vmul.f32 0.25, %v3540_v52  ;;  %v4976_v45 = vpop.f32.mrb[26].mxu0  ;;  %v3561_v16 = vmul.f32 0.25, %v3450_v26  ;;  %vm3553_vm8 = vcmp.ge.f32.partialorder %v3450_v26, 0.0 }
 0xccb   :  { %v3565_v43 = vmul.f32 0.25, %v3535_v21  ;;  %v4990_v12 = vpop.f32.mrb[26].mxu1  ;;  %v3459_v0 = vpop.f32.mrb[27].mxu0  ;;  %v6656_v34 = vsel %vm3554_vm6, %v3455_v20, %v3562_v36  ;;  %vm3557_vm9 = vcmp.ge.f32.partialorder %v3535_v21, 0.0  ;;  %v3465_v60 = vadd.f32 %v4976_v45, %v3349_v51  ;;  %v4595_v51 = vld [vmem:[%s7057_s3 + $0x78] sm:$0xff] }
 0xccc   :  { %v3544_v10 = vpop.f32.mrb[27].mxu1  ;;  %v6658_v57 = vsel %vm3558_vm7, %v3540_v52, %v3566_v5  ;;  %v3590_v27 = vsel %vm345_vm1, %v6656_v34, 0.0  ;;  %v6664_v53 = vsel %vm3553_vm8, %v3450_v26, %v3561_v16  ;;  %v3630_v23 = vmul.f32 %v6656_v34, %v6656_v34 }
 0xccd   :  { %v3602_v8 = vsel %vm345_vm1, %v6658_v57, 0.0  ;;  %3591 = vadd.xlane.f32.xlu0 %v3590_v27  ;;  %v6666_v38 = vsel %vm3557_vm9, %v3535_v21, %v3565_v43  ;;  %v3629_v42 = vmul.f32 %v6664_v53, %v6664_v53  ;;  %v3587_v29 = vsel %vm345_vm1, %v6664_v53, 0.0  ;;  %v4593_v43 = vld [vmem:[%s7057_s3 + $0x68] sm:$0xff]  ;;  %v4596_v27 = vld [vmem:[%s7058_s4 + $0x60] sm:$0xff] }
 0xcce   :  { %3603 = vadd.xlane.f32.xlu1 %v3602_v8  ;;  %v3599_v54 = vsel %vm345_vm1, %v6666_v38, 0.0  ;;  %v3550_v15 = vadd.f32 %v4990_v12, %v3369_v49  ;;  %v3633_v4 = vmul.f32 %v6666_v38, %v6666_v38  ;;  %v3564_v40 = vmul.f32 0.25, %v3465_v60  ;;  %v4594_v12 = vld [vmem:[%s7057_s3 + $0x70] sm:$0xff] }
 0xccf   :  { %v3637_v62 = vsel %vm345_vm1, %v3629_v42, 0.0  ;;  %v3460_v48 = vadd.f32 %v3459_v0, %v3344_v31  ;;  %v3640_v7 = vsel %vm345_vm1, %v3630_v23, 0.0  ;;  %v3634_v33 = vmul.f32 %v6658_v57, %v6658_v57  ;;  %v4592_v0 = vld [vmem:[%s7057_s3 + $0x60] sm:$0xff]  ;;  %v4598_v8 = vld [vmem:[%s7058_s4 + $0x70] sm:$0xff]  ;;  %v4599_v42 = vld [vmem:[%s7058_s4 + $0x78] sm:$0xff] }
 0xcd0   :  { %vm3556_vm12 = vcmp.ge.f32.partialorder %v3465_v60, 0.0  ;;  %v3568_v14 = vmul.f32 0.25, %v3550_v15  ;;  %v3545_v47 = vadd.f32 %v3544_v10, %v3364_v1  ;;  %vm3560_vm13 = vcmp.ge.f32.partialorder %v3550_v15, 0.0  ;;  %v4597_v10 = vld [vmem:[%s7058_s4 + $0x68] sm:$0xff]  ;;  %v4602_v49 = vld [vmem:[%s7059_s5 + $0x70] sm:$0xff]  ;;  %v4604_v23 = vld [vmem:[%s7060_s6 + $0x60] sm:$0xff] }
 0xcd1   :  { %3600 = vadd.xlane.f32.xlu0 %v3599_v54  ;;  %v3649_v58 = vsel %vm345_vm1, %v3633_v4, 0.0  ;;  %v3563_v22 = vmul.f32 0.25, %v3460_v48  ;;  %v3652_v6 = vsel %vm345_vm1, %v3634_v33, 0.0  ;;  %v6684_v13 = vsel %vm3556_vm12, %v3465_v60, %v3564_v40  ;;  %v4600_v54 = vld [vmem:[%s7059_s5 + $0x60] sm:$0xff]  ;;  %v4601_v60 = vld [vmem:[%s7059_s5 + $0x68] sm:$0xff] }
 0xcd2   :  { %3588 = vadd.xlane.f32.xlu1 %v3587_v29  ;;  %vm3555_vm14 = vcmp.ge.f32.partialorder %v3460_v48, 0.0  ;;  %v3567_v25 = vmul.f32 0.25, %v3545_v47  ;;  %v6686_v63 = vsel %vm3560_vm13, %v3550_v15, %v3568_v14  ;;  %vm3559_vm15 = vcmp.ge.f32.partialorder %v3545_v47, 0.0  ;;  %v4603_v29 = vld [vmem:[%s7059_s5 + $0x78] sm:$0xff] }
 0xcd3   :  { %v3596_v19 = vsel %vm345_vm1, %v6684_v13, 0.0  ;;  %v3608_v20 = vsel %vm345_vm1, %v6686_v63, 0.0  ;;  %v6692_v59 = vsel %vm3555_vm14, %v3460_v48, %v3563_v22  ;;  %v3636_v31 = vmul.f32 %v6686_v63, %v6686_v63  ;;  %v4607_v15 = vld [vmem:[%s7060_s6 + $0x78] sm:$0xff] }
 0xcd4   :  { %v6694_v9 = vsel %vm3559_vm15, %v3545_v47, %v3567_v25  ;;  %v3593_v52 = vsel %vm345_vm1, %v6692_v59, 0.0  ;;  %v3631_v26 = vmul.f32 %v6692_v59, %v6692_v59  ;;  %v3632_v21 = vmul.f32 %v6684_v13, %v6684_v13 }
 0xcd5   :  { %3638 = vadd.xlane.f32.xlu0 %v3637_v62  ;;  %v3605_v17 = vsel %vm345_vm1, %v6694_v9, 0.0  ;;  %v3658_v1 = vsel %vm345_vm1, %v3636_v31, 0.0  ;;  %v3635_v5 = vmul.f32 %v6694_v9, %v6694_v9  ;;  %v4606_v62 = vld [vmem:[%s7060_s6 + $0x70] sm:$0xff] }
 0xcd6   :  { %3641 = vadd.xlane.f32.xlu1 %v3640_v7  ;;  %v3643_v36 = vsel %vm345_vm1, %v3631_v26, 0.0  ;;  %v3646_v45 = vsel %vm345_vm1, %v3632_v21, 0.0 }
 0xcd7   :  { %v3655_v16 = vsel %vm345_vm1, %v3635_v5, 0.0 }
 0xcd9   :  { %3650 = vadd.xlane.f32.xlu0 %v3649_v58 }
 0xcda   :  { %3653 = vadd.xlane.f32.xlu1 %v3652_v6 }
 0xcdd   :  { %3597 = vadd.xlane.f32.xlu0 %v3596_v19 }
 0xcde   :  { %3609 = vadd.xlane.f32.xlu1 %v3608_v20 }
 0xce1   :  { %3594 = vadd.xlane.f32.xlu0 %v3593_v52 }
 0xce2   :  { %3606 = vadd.xlane.f32.xlu1 %v3605_v17 }
 0xce5   :  { %3644 = vadd.xlane.f32.xlu0 %v3643_v36 }
 0xce6   :  { %3659 = vadd.xlane.f32.xlu1 %v3658_v1 }
 0xce9   :  { %3647 = vadd.xlane.f32.xlu0 %v3646_v45 }
 0xcea   :  { %3656 = vadd.xlane.f32.xlu1 %v3655_v16 }
 0xcfb   :  { %3716 = vperm.xlu1 %5185, %v4593_v43  }
 0xcff   :  { %3721 = vperm.xlu1 %5185, %v4594_v12   ;;  %3711 = vperm.xlu0 %5183, %v4592_v0  }
 0xd03   :  { %3744 = vperm.xlu1 %5185, %v4597_v10   ;;  %3739 = vperm.xlu0 %5183, %v4596_v27  }
 0xd07   :  { %3749 = vperm.xlu1 %5185, %v4598_v8   ;;  %3726 = vperm.xlu0 %5183, %v4595_v51  }
 0xd0b   :  { %3812 = vperm.xlu1 %5185, %v4600_v54   ;;  %3754 = vperm.xlu0 %5183, %v4599_v42  }
 0xd0f   :  { %5186 = vset.pattern.permute.xlu1 %v5233_v28  ;;  %5189 = vset.pattern.permute.xlu0 %v5234_v30 }
 0xd10   :  { %3839 = vperm.xlu1 %5186, %v4600_v54   ;;  %3903 = vperm.xlu0 %5189, %v4600_v54  }
 0xd14   :  { %5187 = vset.pattern.permute.xlu1 %v5232_v3  ;;  %5190 = vset.pattern.permute.xlu0 %v5233_v28 }
 0xd15   :  { %3822 = vperm.xlu1 %5187, %v4602_v49   ;;  %3843 = vperm.xlu0 %5190, %v4601_v60  }
 0xd19   :  { %5188 = vset.pattern.permute.xlu1 %v5233_v28  ;;  %3851 = vperm.xlu0 %5190, %v4603_v29   ;;  %v4605_v28 = vld [vmem:[%s7060_s6 + $0x68] sm:$0xff] }
 0xd1a   :  { %3847 = vperm.xlu1 %5188, %v4602_v49  }
 0xd1d   :  { %5193 = vset.pattern.permute.xlu0 %v5232_v3 }
 0xd1e   :  { %5191 = vset.pattern.permute.xlu1 %v5234_v30  ;;  %3817 = vperm.xlu0 %5193, %v4601_v60  }
 0xd1f   :  { %3907 = vperm.xlu1 %5191, %v4601_v60  }
 0xd22   :  { %3941 = vperm.xlu0 %5193, %v4604_v23  }
 0xd23   :  { %5192 = vset.pattern.permute.xlu1 %v5232_v3 }
 0xd24   :  { %3827 = vperm.xlu1 %5192, %v4603_v29  }
 0xd26   :  { %3956 = vperm.xlu0 %5193, %v4607_v15  }
 0xd28   :  { %5194 = vset.pattern.permute.xlu1 %v5234_v30 }
 0xd29   :  { %3911 = vperm.xlu1 %5194, %v4602_v49  }
 0xd2d   :  { %3915 = vperm.xlu1 %5194, %v4603_v29  }
 0xd31   :  { %5195 = vset.pattern.permute.xlu1 %v5232_v3 }
 0xd32   :  { %3946 = vperm.xlu1 %5195, %v4605_v28  }
 0xd36   :  { %3951 = vperm.xlu1 %5195, %v4606_v62  }
 0xd5a   :  { %v3592_v4 = vpop.xlane.xlu0 %3591 }
 0xd5b   :  { %v3604_v40 = vpop.xlane.xlu1 %3603 }
 0xd5e   :  { %v3601_v48 = vpop.xlane.xlu0 %3600 }
 0xd5f   :  { %v3589_v7 = vpop.xlane.xlu1 %3588  ;;  %v3620_v25 = vadd.f32 %v3604_v40, %v3601_v48 }
 0xd60   :  { %v3611_v6 = vadd.f32 %v3592_v4, %v3589_v7 }
 0xd62   :  { %v3639_v33 = vpop.xlane.xlu0 %3638 }
 0xd63   :  { %v3642_v30 = vpop.xlane.xlu1 %3641 }
 0xd64   :  { %v3661_v36 = vadd.f32 %v3642_v30, %v3639_v33 }
 0xd66   :  { %v3651_v14 = vpop.xlane.xlu0 %3650 }
 0xd67   :  { %v3654_v47 = vpop.xlane.xlu1 %3653 }
 0xd68   :  { %v3670_v43 = vadd.f32 %v3654_v47, %v3651_v14 }
 0xd6a   :  { %v3598_v58 = vpop.xlane.xlu0 %3597 }
 0xd6b   :  { %v3610_v22 = vpop.xlane.xlu1 %3609 }
 0xd6e   :  { %v3595_v19 = vpop.xlane.xlu0 %3594 }
 0xd6f   :  { %v3612_v3 = vadd.f32 %v3611_v6, %v3595_v19  ;;  %v3607_v20 = vpop.xlane.xlu1 %3606 }
 0xd70   :  { %v3621_v52 = vadd.f32 %v3620_v25, %v3607_v20 }
 0xd71   :  { %v3613_v26 = vadd.f32 %v3612_v3, %v3598_v58 }
 0xd72   :  { %v3622_v17 = vadd.f32 %v3621_v52, %v3610_v22  ;;  %v3645_v31 = vpop.xlane.xlu0 %3644 }
 0xd73   :  { %v3614_v21 = vrot.slane %v3613_v26, 4  ;;  %v3660_v1 = vpop.xlane.xlu1 %3659  ;;  %v3662_v16 = vadd.f32 %v3661_v36, %v3645_v31 }
 0xd74   :  { %v3623_v5 = vrot.slane %v3622_v17, 4 }
 0xd75   :  { %v3615_v45 = vadd.f32 %v3614_v21, %v3613_v26 }
 0xd76   :  { %v3624_v12 = vadd.f32 %v3623_v5, %v3622_v17  ;;  %v3648_v0 = vpop.xlane.xlu0 %3647 }
 0xd77   :  { %v3616_v10 = vrot.slane %v3615_v45, 2  ;;  %v3663_v27 = vadd.f32 %v3662_v16, %v3648_v0  ;;  %v3657_v8 = vpop.xlane.xlu1 %3656 }
 0xd78   :  { %v3625_v51 = vrot.slane %v3624_v12, 2  ;;  %v3671_v54 = vadd.f32 %v3670_v43, %v3657_v8 }
 0xd79   :  { %v3617_v42 = vadd.f32 %v3616_v10, %v3615_v45  ;;  %v3664_v49 = vrot.slane %v3663_v27, 4 }
 0xd7a   :  { %v3626_v60 = vadd.f32 %v3625_v51, %v3624_v12  ;;  %v3672_v29 = vadd.f32 %v3671_v54, %v3660_v1 }
 0xd7b   :  { %v3618_v23 = vrot.slane %v3617_v42, 1  ;;  %v3665_v15 = vadd.f32 %v3664_v49, %v3663_v27  ;;  %v3717_v45 = vpop.permute.xlu1 %3716 }
 0xd7c   :  { %v3627_v28 = vrot.slane %v3626_v60, 1  ;;  %v3673_v62 = vrot.slane %v3672_v29, 4 }
 0xd7d   :  { %v3619_v4 = vadd.f32 %v3618_v23, %v3617_v42  ;;  %v3666_v40 = vrot.slane %v3665_v15, 2 }
 0xd7e   :  { %v3674_v48 = vadd.f32 %v3673_v62, %v3672_v29  ;;  %v3628_v33 = vadd.f32 %v3627_v28, %v3626_v60  ;;  %v3712_v16 = vpop.permute.xlu0 %3711 }
 0xd7f   :  { %v3667_v7 = vadd.f32 %v3666_v40, %v3665_v15  ;;  %v3679_v14 = vmul.f32 0.0010080645, %v3619_v4  ;;  %v3722_v43 = vpop.permute.xlu1 %3721 }
 0xd80   :  { %v3675_v30 = vrot.slane %v3674_v48, 2  ;;  %v3680_v6 = vmul.f32 0.0010080645, %v3628_v33 }
 0xd81   :  { %v3668_v47 = vrot.slane %v3667_v7, 1  ;;  %v3683_v3 = vmul.f32 %v3679_v14, %v3679_v14  ;;  %v3690_v12 = vsub.f32 %v6656_v34, %v3679_v14  ;;  %v3689_v0 = vsub.f32 %v6664_v53, %v3679_v14 }
 0xd82   :  { %v3676_v58 = vadd.f32 %v3675_v30, %v3674_v48  ;;  %v3684_v26 = vmul.f32 %v3680_v6, %v3680_v6  ;;  %v3694_v51 = vsub.f32 %v6658_v57, %v3680_v6  ;;  %v3693_v54 = vsub.f32 %v6666_v38, %v3680_v6  ;;  %v3740_v62 = vpop.permute.xlu0 %3739 }
 0xd83   :  { %v3669_v22 = vadd.f32 %v3668_v47, %v3667_v7  ;;  %v3691_v29 = vsub.f32 %v6692_v59, %v3679_v14  ;;  %v3695_v28 = vsub.f32 %v6694_v9, %v3680_v6  ;;  %v3745_v34 = vpop.permute.xlu1 %3744 }
 0xd84   :  { %v3677_v25 = vrot.slane %v3676_v58, 1 }
 0xd85   :  { %v3681_v19 = vmul.f32 0.0010080645, %v3669_v22  ;;  %v3696_v22 = vsub.f32 %v6686_v63, %v3680_v6 }
 0xd86   :  { %v3678_v20 = vadd.f32 %v3677_v25, %v3676_v58  ;;  %v3692_v25 = vsub.f32 %v6684_v13, %v3679_v14 }
 0xd87   :  { %v3685_v52 = vsub.f32 %v3681_v19, %v3683_v3  ;;  %v3750_v30 = vpop.permute.xlu1 %3749  ;;  %v3727_v3 = vpop.permute.xlu0 %3726 }
 0xd88   :  { %v3682_v17 = vmul.f32 0.0010080645, %v3678_v20 }
 0xd89   :  { %v3687_v31 = vmax.f32 %v3685_v52, 0.0 }
 0xd8a   :  { %v3686_v36 = vsub.f32 %v3682_v17, %v3684_v26 }
 0xd8b   :  { %v3697_v21 = vadd.f32 1e-08, %v3687_v31  ;;  %v3755_v63 = vpop.permute.xlu0 %3754  ;;  %v3813_v6 = vpop.permute.xlu1 %3812 }
 0xd8c   :  { %v3688_v1 = vmax.f32 %v3686_v36, 0.0 }
 0xd8d   :  { %5220 = vrsqrt.f32 %v3697_v21 }
 0xd8e   :  { %v3698_v5 = vadd.f32 1e-08, %v3688_v1 }
 0xd8f   :  { %v3840_v17 = vpop.permute.xlu1 %3839  ;;  %v3904_v1 = vpop.permute.xlu0 %3903 }
 0xd90   :  { %5222 = vrsqrt.f32 %v3698_v5 }
 0xd94   :  { %v3823_v31 = vpop.permute.xlu1 %3822 }
 0xd97   :  { %v5221_v10 = vpop.eup %5220 }
 0xd98   :  { %v3702_v27 = vmul.f32 %v5221_v10, %v3690_v12  ;;  %v3701_v8 = vmul.f32 %v5221_v10, %v3689_v0  ;;  %v3703_v4 = vmul.f32 %v5221_v10, %v3691_v29  ;;  %v3704_v20 = vmul.f32 %v5221_v10, %v3692_v25 }
 0xd99   :  { %v6826_v36 = vpop.permute.xlu1 %3847 }
 0xd9a   :  { %v5223_v42 = vpop.eup %5222  ;;  %v3730_v49 = vmul.f32 %v3717_v45, %v3702_v27  ;;  %v3729_v60 = vmul.f32 %v3712_v16, %v3701_v8  ;;  %v3731_v38 = vmul.f32 %v3722_v43, %v3703_v4  ;;  %v3732_v26 = vmul.f32 %v3727_v3, %v3704_v20 }
 0xd9b   :  { %v3706_v23 = vmul.f32 %v5223_v42, %v3694_v51  ;;  %v3705_v15 = vmul.f32 %v5223_v42, %v3693_v54  ;;  %v3707_v7 = vmul.f32 %v5223_v42, %v3695_v28  ;;  %v3708_v19 = vmul.f32 %v5223_v42, %v3696_v22 }
 0xd9c   :  { %v6776_v53 = vadd.f32 %v3740_v62, %v3729_v60  ;;  %v6778_v40 = vadd.f32 %v3745_v34, %v3730_v49  ;;  %v6792_v47 = vadd.f32 %v3750_v30, %v3731_v38  ;;  %v6812_v14 = vadd.f32 %v3755_v63, %v3732_v26 }
 0xd9d   :  { %v3734_v48 = vmul.f32 %v3717_v45, %v3706_v23  ;;  %v3733_v57 = vmul.f32 %v3712_v16, %v3705_v15  ;;  %v3735_v9 = vmul.f32 %v3722_v43, %v3707_v7  ;;  %v3736_v52 = vmul.f32 %v3727_v3, %v3708_v19  ;;  %v3844_v45 = vpop.permute.xlu0 %3843 }
 0xd9e   :  { %3778 = vrot.lane.b32.xlu1 %v6776_v53, %s5237_s15  ;;  %3780 = vrot.lane.b32.xlu0 %v6778_v40, %s5237_s15  ;;  %v3908_v21 = vpop.permute.xlu1 %3907  ;;  %v3855_v38 = vmul.f32 %v3844_v45, %v6778_v40 }
 0xd9f   :  { %v6784_v59 = vadd.f32 %v3740_v62, %v3733_v57  ;;  %v6786_v33 = vadd.f32 %v3745_v34, %v3734_v48  ;;  %v6794_v58 = vadd.f32 %v3750_v30, %v3735_v9  ;;  %v6810_v13 = vadd.f32 %v3755_v63, %v3736_v52 }
 0xda0   :  { %v3854_v48 = vmul.f32 %v3840_v17, %v6776_v53 }
 0xda1   :  { %v6832_v43 = vpop.permute.xlu0 %3851  ;;  %v3858_v25 = vmul.f32 %v3840_v17, %v6784_v59 }
 0xda2   :  { %3786 = vrot.lane.b32.xlu1 %v6784_v59, %s5237_s15  ;;  %3788 = vrot.lane.b32.xlu0 %v6786_v33, %s5237_s15 }
 0xda3   :  { %v6828_v5 = vpop.permute.xlu1 %3827 }
 0xda5   :  { %v3818_v0 = vpop.permute.xlu0 %3817 }
 0xda6   :  { %3782 = vrot.lane.b32.xlu1 %v6792_v47, %s5237_s15  ;;  %3790 = vrot.lane.b32.xlu0 %v6794_v58, %s5237_s15 }
 0xda8   :  { %v6830_v16 = vpop.permute.xlu1 %3911 }
 0xda9   :  { %v3942_v27 = vpop.permute.xlu0 %3941 }
 0xdaa   :  { %3870 = vrot.lane.b32.xlu1 %v6776_v53, %s5238_s16  ;;  %3872 = vrot.lane.b32.xlu0 %v6778_v40, %s5238_s16 }
 0xdac   :  { %v6834_v12 = vpop.permute.xlu1 %3915 }
 0xdad   :  { %v6838_v51 = vpop.permute.xlu0 %3956 }
 0xdae   :  { %3878 = vrot.lane.b32.xlu1 %v6784_v59, %s5238_s16  ;;  %3880 = vrot.lane.b32.xlu0 %v6786_v33, %s5238_s16 }
 0xdb1   :  { %v3947_v10 = vpop.permute.xlu1 %3946 }
 0xdb2   :  { %3792 = vrot.lane.b32.xlu1 %v6810_v13, %s5237_s15  ;;  %3784 = vrot.lane.b32.xlu0 %v6812_v14, %s5237_s15 }
 0xdb5   :  { %v6836_v8 = vpop.permute.xlu1 %3951 }
 0xdb6   :  { %3882 = vrot.lane.b32.xlu1 %v6794_v58, %s5238_s16  ;;  %3874 = vrot.lane.b32.xlu0 %v6792_v47, %s5238_s16 }
 0xdba   :  { %3876 = vrot.lane.b32.xlu1 %v6812_v14, %s5238_s16  ;;  %3884 = vrot.lane.b32.xlu0 %v6810_v13, %s5238_s16 }
 0xe10   :  { %v3779_v54 = vpop.permute.xlu1 %3778  ;;  %v3781_v42 = vpop.permute.xlu0 %3780 }
 0xe11   :  { %v3802_v29 = vsel %vm1638_vm2, 0.0, %v3779_v54  ;;  %v3803_v23 = vsel %vm1638_vm2, 0.0, %v3781_v42  ;;  %v3859_v54 = vmul.f32 %v3844_v45, %v6786_v33  ;;  %v3856_v33 = vmul.f32 %v6826_v36, %v6792_v47 }
 0xe12   :  { %v3830_v62 = vmul.f32 %v3813_v6, %v3802_v29  ;;  %v3831_v4 = vmul.f32 %v3818_v0, %v3803_v23 }
 0xe14   :  { %v3787_v49 = vpop.permute.xlu1 %3786  ;;  %v3789_v60 = vpop.permute.xlu0 %3788  ;;  %v3862_v19 = vadd.f32 %v3854_v48, %v3830_v62  ;;  %v3863_v52 = vadd.f32 %v3855_v38, %v3831_v4 }
 0xe15   :  { %v3806_v34 = vsel %vm1638_vm2, 0.0, %v3787_v49  ;;  %v3807_v57 = vsel %vm1638_vm2, 0.0, %v3789_v60 }
 0xe16   :  { %v3834_v9 = vmul.f32 %v3813_v6, %v3806_v34  ;;  %v3835_v26 = vmul.f32 %v3818_v0, %v3807_v57 }
 0xe18   :  { %v3783_v15 = vpop.permute.xlu1 %3782  ;;  %v3791_v28 = vpop.permute.xlu0 %3790  ;;  %v3866_v40 = vadd.f32 %v3858_v25, %v3834_v9  ;;  %v3867_v0 = vadd.f32 %v3859_v54, %v3835_v26 }
 0xe19   :  { %v3804_v63 = vsel %vm1638_vm2, 0.0, %v3783_v15  ;;  %v3808_v6 = vsel %vm1638_vm2, 0.0, %v3791_v28 }
 0xe1a   :  { %v3832_v17 = vmul.f32 %v3823_v31, %v3804_v63  ;;  %v3836_v28 = vmul.f32 %v3823_v31, %v3808_v6 }
 0xe1c   :  { %v3871_v7 = vpop.permute.xlu1 %3870  ;;  %v3873_v30 = vpop.permute.xlu0 %3872 }
 0xe1d   :  { %v3894_v22 = vsel %vm1731_vm3, %v3871_v7, 0.0  ;;  %v3895_v3 = vsel %vm1731_vm3, %v3873_v30, 0.0  ;;  %v3860_v30 = vmul.f32 %v6826_v36, %v6794_v58 }
 0xe1e   :  { %v3918_v20 = vmul.f32 %v3904_v1, %v3894_v22  ;;  %v3919_v53 = vmul.f32 %v3908_v21, %v3895_v3  ;;  %v3864_v22 = vadd.f32 %v3856_v33, %v3832_v17 }
 0xe1f   :  { %v3868_v36 = vadd.f32 %v3860_v30, %v3836_v28 }
 0xe20   :  { %v3926_v42 = vadd.f32 %v3918_v20, %v3862_v19  ;;  %v3879_v49 = vpop.permute.xlu1 %3878  ;;  %v3927_v60 = vadd.f32 %v3919_v53, %v3863_v52  ;;  %v3881_v29 = vpop.permute.xlu0 %3880 }
 0xe21   :  { %v3898_v59 = vsel %vm1731_vm3, %v3879_v49, 0.0  ;;  %v3899_v62 = vsel %vm1731_vm3, %v3881_v29, 0.0  ;;  %v3857_v29 = vmul.f32 %v6832_v43, %v6812_v14 }
 0xe22   :  { %v3959_v23 = vadd.f32 %v3942_v27, %v3926_v42  ;;  %v3922_v34 = vmul.f32 %v3904_v1, %v3898_v59  ;;  %v3960_v4 = vadd.f32 %v3947_v10, %v3927_v60  ;;  %v3923_v15 = vmul.f32 %v3908_v21, %v3899_v62 }
 0xe23   :  { %v3861_v62 = vmul.f32 %v6832_v43, %v6810_v13 }
 0xe24   :  { %v3930_v45 = vadd.f32 %v3922_v34, %v3866_v40  ;;  %v3793_v48 = vpop.permute.xlu1 %3792  ;;  %vm3967_vm10 = vcmp.ge.f32.partialorder %v3959_v23, 0.0  ;;  %v3975_v57 = vmul.f32 0.25, %v3959_v23  ;;  %v3931_v7 = vadd.f32 %v3923_v15, %v3867_v0  ;;  %v3785_v38 = vpop.permute.xlu0 %3784 }
 0xe25   :  { %vm3968_vm4 = vcmp.ge.f32.partialorder %v3960_v4, 0.0  ;;  %v3976_v9 = vmul.f32 0.25, %v3960_v4  ;;  %v3805_v19 = vsel %vm1638_vm2, 0.0, %v3785_v38  ;;  %v3809_v31 = vsel %vm1638_vm2, 0.0, %v3793_v48 }
 0xe26   :  { %v3963_v1 = vadd.f32 %v3942_v27, %v3930_v45  ;;  %v6858_v25 = vsel %vm3967_vm10, %v3959_v23, %v3975_v57  ;;  %v3964_v21 = vadd.f32 %v3947_v10, %v3931_v7  ;;  %v3833_v63 = vmul.f32 %v6828_v5, %v3805_v19 }
 0xe27   :  { %v6861_v47 = vsel %vm3968_vm4, %v3960_v4, %v3976_v9  ;;  %v4001_v3 = vsel %vm345_vm1, %v6858_v25, 0.0  ;;  %v3837_v49 = vmul.f32 %v6828_v5, %v3809_v31 }
 0xe28   :  { %v4004_v20 = vsel %vm345_vm1, %v6861_v47, 0.0  ;;  %4002 = vadd.xlane.f32.xlu1 %v4001_v3  ;;  %v3883_v52 = vpop.permute.xlu1 %3882  ;;  %vm3971_vm11 = vcmp.ge.f32.partialorder %v3963_v1, 0.0  ;;  %v3979_v58 = vmul.f32 0.25, %v3963_v1  ;;  %v3875_v27 = vpop.permute.xlu0 %3874  ;;  %vm3972_vm5 = vcmp.ge.f32.partialorder %v3964_v21, 0.0 }
 0xe29   :  { %4005 = vadd.xlane.f32.xlu0 %v4004_v20  ;;  %v3900_v10 = vsel %vm1731_vm3, %v3883_v52, 0.0  ;;  %v3980_v26 = vmul.f32 0.25, %v3964_v21  ;;  %v3896_v53 = vsel %vm1731_vm3, %v3875_v27, 0.0  ;;  %v3865_v0 = vadd.f32 %v3857_v29, %v3833_v63 }
 0xe2a   :  { %v3924_v54 = vmul.f32 %v6830_v16, %v3900_v10  ;;  %v6872_v42 = vsel %vm3971_vm11, %v3963_v1, %v3979_v58  ;;  %v3920_v40 = vmul.f32 %v6830_v16, %v3896_v53  ;;  %v3869_v33 = vadd.f32 %v3861_v62, %v3837_v49  ;;  %v4608_v62 = vld [vmem:[%s7061_s7 + $0x60] sm:$0xff] }
 0xe2b   :  { %v6876_v6 = vsel %vm3972_vm5, %v3964_v21, %v3980_v26  ;;  %v4013_v60 = vsel %vm345_vm1, %v6872_v42, 0.0  ;;  %v4044_v31 = vmul.f32 %v6861_v47, %v6861_v47  ;;  %v4043_v20 = vmul.f32 %v6858_v25, %v6858_v25 }
 0xe2c   :  { %v3932_v59 = vadd.f32 %v3924_v54, %v3868_v36  ;;  %v4016_v17 = vsel %vm345_vm1, %v6876_v6, 0.0  ;;  %v3877_v23 = vpop.permute.xlu1 %3876  ;;  %v3928_v34 = vadd.f32 %v3920_v40, %v3864_v22  ;;  %v3885_v5 = vpop.permute.xlu0 %3884  ;;  %v4048_v36 = vmul.f32 %v6876_v6, %v6876_v6 }
 0xe2d   :  { %4017 = vadd.xlane.f32.xlu1 %v4016_v17  ;;  %4014 = vadd.xlane.f32.xlu0 %v4013_v60  ;;  %v3897_v16 = vsel %vm1731_vm3, %v3877_v23, 0.0  ;;  %v3901_v15 = vsel %vm1731_vm3, %v3885_v5, 0.0  ;;  %v4054_v52 = vsel %vm345_vm1, %v4044_v31, 0.0  ;;  %v4051_v58 = vsel %vm345_vm1, %v4043_v20, 0.0  ;;  %v4609_v17 = vld [vmem:[%s7061_s7 + $0x68] sm:$0xff]  ;;  %v4612_v23 = vld [vmem:[%s7062_s8 + $0x60] sm:$0xff] }
 0xe2e   :  { %v3965_v4 = vadd.f32 %v6836_v8, %v3932_v59  ;;  %v3921_v14 = vmul.f32 %v6834_v12, %v3897_v16  ;;  %v3961_v45 = vadd.f32 %v6836_v8, %v3928_v34  ;;  %v3925_v48 = vmul.f32 %v6834_v12, %v3901_v15  ;;  %v4610_v34 = vld [vmem:[%s7061_s7 + $0x70] sm:$0xff]  ;;  %v4613_v5 = vld [vmem:[%s7062_s8 + $0x68] sm:$0xff]  ;;  %v4615_v15 = vld [vmem:[%s7062_s8 + $0x78] sm:$0xff] }
 0xe2f   :  { %v4047_v27 = vmul.f32 %v6872_v42, %v6872_v42  ;;  %v4066_v10 = vsel %vm345_vm1, %v4048_v36, 0.0  ;;  %v4614_v16 = vld [vmem:[%s7062_s8 + $0x70] sm:$0xff] }
 0xe30   :  { %v3929_v57 = vadd.f32 %v3921_v14, %v3865_v0  ;;  %vm3973_vm2 = vcmp.ge.f32.partialorder %v3965_v4, 0.0  ;;  %v3981_v13 = vmul.f32 0.25, %v3965_v4  ;;  %v3933_v43 = vadd.f32 %v3925_v48, %v3869_v33  ;;  %v4611_v0 = vld [vmem:[%s7061_s7 + $0x78] sm:$0xff]  ;;  %v4630_v14 = vld [vmem:[%s7063_s10 + $0x70] sm:$0xff]  ;;  %v4629_v33 = vld [vmem:[%s7063_s10 + $0x68] sm:$0xff] }
 0xe31   :  { %vm3969_vm6 = vcmp.ge.f32.partialorder %v3961_v45, 0.0  ;;  %v3977_v28 = vmul.f32 0.25, %v3961_v45  ;;  %v4063_v26 = vsel %vm345_vm1, %v4047_v27, 0.0  ;;  %v4616_v48 = vld [vmem:[%s7064_s9 + $0x60] sm:$0xff] }
 0xe32   :  { %v3962_v7 = vadd.f32 %v6838_v51, %v3929_v57  ;;  %v6893_v38 = vsel %vm3973_vm2, %v3965_v4, %v3981_v13  ;;  %v3966_v9 = vadd.f32 %v6838_v51, %v3933_v43  ;;  %v4628_v4 = vld [vmem:[%s7063_s10 + $0x60] sm:$0xff]  ;;  %4999 = vmatprep.mubr.msk.f32.mxu0 %vm130_vm0, %v4616_v48  ;;  %5013 = vmatprep.mubr.msk.f32.mxu1 %vm130_vm0, %v4616_v48 }
 0xe33   :  { %v6896_v30 = vsel %vm3969_vm6, %v3961_v45, %v3977_v28  ;;  %v4019_v22 = vsel %vm345_vm1, %v6893_v38, 0.0  ;;  %v4049_v63 = vmul.f32 %v6893_v38, %v6893_v38  ;;  %v4631_v45 = vld [vmem:[%s7063_s10 + $0x78] sm:$0xff] }
 0xe34   :  { %v4007_v12 = vsel %vm345_vm1, %v6896_v30, 0.0  ;;  %4020 = vadd.xlane.f32.xlu1 %v4019_v22  ;;  %vm3970_vm3 = vcmp.ge.f32.partialorder %v3962_v7, 0.0  ;;  %v3978_v8 = vmul.f32 0.25, %v3962_v7  ;;  %vm3974_vm7 = vcmp.ge.f32.partialorder %v3966_v9, 0.0 }
 0xe35   :  { %4008 = vadd.xlane.f32.xlu0 %v4007_v12  ;;  %v3982_v1 = vmul.f32 0.25, %v3966_v9  ;;  %v4045_v53 = vmul.f32 %v6896_v30, %v6896_v30  ;;  %v4069_v54 = vsel %vm345_vm1, %v4049_v63, 0.0 }
 0xe36   :  { %v6902_v21 = vsel %vm3970_vm3, %v3962_v7, %v3978_v8 }
 0xe37   :  { %v6904_v19 = vsel %vm3974_vm7, %v3966_v9, %v3982_v1  ;;  %v4010_v51 = vsel %vm345_vm1, %v6902_v21, 0.0  ;;  %v4057_v49 = vsel %vm345_vm1, %v4045_v53, 0.0  ;;  %v4046_v60 = vmul.f32 %v6902_v21, %v6902_v21 }
 0xe38   :  { %v4022_v3 = vsel %vm345_vm1, %v6904_v19, 0.0  ;;  %v4050_v40 = vmul.f32 %v6904_v19, %v6904_v19 }
 0xe39   :  { %4023 = vadd.xlane.f32.xlu1 %v4022_v3  ;;  %4011 = vadd.xlane.f32.xlu0 %v4010_v51  ;;  %v4060_v59 = vsel %vm345_vm1, %v4046_v60, 0.0 }
 0xe3a   :  { %v4072_v29 = vsel %vm345_vm1, %v4050_v40, 0.0 }
 0xe3d   :  { %4055 = vadd.xlane.f32.xlu1 %v4054_v52  ;;  %4052 = vadd.xlane.f32.xlu0 %v4051_v58 }
 0xe41   :  { %4067 = vadd.xlane.f32.xlu1 %v4066_v10  ;;  %4064 = vadd.xlane.f32.xlu0 %v4063_v26 }
 0xe45   :  { %4070 = vadd.xlane.f32.xlu1 %v4069_v54  ;;  %4058 = vadd.xlane.f32.xlu0 %v4057_v49 }
 0xe49   :  { %4073 = vadd.xlane.f32.xlu1 %v4072_v29  ;;  %4061 = vadd.xlane.f32.xlu0 %v4060_v59 }
 0xe5a   :  { %4130 = vperm.xlu1 %5195, %v4609_v17  }
 0xe5e   :  { %4153 = vperm.xlu1 %5195, %v4612_v23  }
 0xe5f   :  { %4125 = vperm.xlu0 %5193, %v4608_v62  }
 0xe62   :  { %4135 = vperm.xlu1 %5195, %v4610_v34  }
 0xe63   :  { %4158 = vperm.xlu0 %5193, %v4613_v5  }
 0xe66   :  { %4163 = vperm.xlu1 %5195, %v4614_v16  }
 0xe67   :  { %4140 = vperm.xlu0 %5193, %v4611_v0  }
 0xe6a   :  { %4381 = vperm.xlu1 %5195, %v4628_v4  }
 0xe6b   :  { %4168 = vperm.xlu0 %5193, %v4615_v15  }
 0xe6e   :  { %4391 = vperm.xlu1 %5195, %v4630_v14  }
 0xe6f   :  { %4386 = vperm.xlu0 %5193, %v4629_v33  }
 0xe73   :  { %4396 = vperm.xlu0 %5193, %v4631_v45  }
 0xeb5   :  { %v4003_v57 = vpop.xlane.xlu1 %4002 }
 0xeb6   :  { %v4006_v13 = vpop.xlane.xlu0 %4005 }
 0xeb7   :  { %v4025_v22 = vadd.f32 %v4006_v13, %v4003_v57 }
 0xeba   :  { %v4018_v43 = vpop.xlane.xlu1 %4017  ;;  %v4015_v28 = vpop.xlane.xlu0 %4014 }
 0xebb   :  { %v4034_v12 = vadd.f32 %v4018_v43, %v4015_v28 }
 0xec1   :  { %v4021_v7 = vpop.xlane.xlu1 %4020 }
 0xec2   :  { %v4009_v9 = vpop.xlane.xlu0 %4008  ;;  %v4035_v1 = vadd.f32 %v4034_v12, %v4021_v7 }
 0xec3   :  { %v4026_v8 = vadd.f32 %v4025_v22, %v4009_v9 }
 0xec6   :  { %v4012_v51 = vpop.xlane.xlu0 %4011  ;;  %v4024_v3 = vpop.xlane.xlu1 %4023 }
 0xec7   :  { %v4027_v31 = vadd.f32 %v4026_v8, %v4012_v51  ;;  %v4036_v20 = vadd.f32 %v4035_v1, %v4024_v3 }
 0xec9   :  { %v4028_v52 = vrot.slane %v4027_v31, 4  ;;  %v4037_v58 = vrot.slane %v4036_v20, 4 }
 0xeca   :  { %v4053_v36 = vpop.xlane.xlu0 %4052  ;;  %v4056_v27 = vpop.xlane.xlu1 %4055 }
 0xecb   :  { %v4029_v10 = vadd.f32 %v4028_v52, %v4027_v31  ;;  %v4038_v26 = vadd.f32 %v4037_v58, %v4036_v20  ;;  %v4075_v29 = vadd.f32 %v4056_v27, %v4053_v36 }
 0xecd   :  { %v4030_v54 = vrot.slane %v4029_v10, 2  ;;  %v4039_v49 = vrot.slane %v4038_v26, 2 }
 0xece   :  { %v4065_v63 = vpop.xlane.xlu0 %4064  ;;  %v4068_v53 = vpop.xlane.xlu1 %4067 }
 0xecf   :  { %v4084_v59 = vadd.f32 %v4068_v53, %v4065_v63  ;;  %v4031_v17 = vadd.f32 %v4030_v54, %v4029_v10  ;;  %v4040_v23 = vadd.f32 %v4039_v49, %v4038_v26 }
 0xed1   :  { %v4032_v15 = vrot.slane %v4031_v17, 1  ;;  %v4041_v14 = vrot.slane %v4040_v23, 1 }
 0xed2   :  { %v4059_v40 = vpop.xlane.xlu0 %4058  ;;  %v4071_v60 = vpop.xlane.xlu1 %4070 }
 0xed3   :  { %v4076_v62 = vadd.f32 %v4075_v29, %v4059_v40  ;;  %v4085_v34 = vadd.f32 %v4084_v59, %v4071_v60  ;;  %v4033_v13 = vadd.f32 %v4032_v15, %v4031_v17  ;;  %v4042_v43 = vadd.f32 %v4041_v14, %v4040_v23 }
 0xed5   :  { %v4093_v12 = vmul.f32 0.0010080645, %v4033_v13  ;;  %v4094_v8 = vmul.f32 0.0010080645, %v4042_v43 }
 0xed6   :  { %v4062_v5 = vpop.xlane.xlu0 %4061  ;;  %v4074_v16 = vpop.xlane.xlu1 %4073 }
 0xed7   :  { %v4077_v0 = vadd.f32 %v4076_v62, %v4062_v5  ;;  %v4086_v4 = vadd.f32 %v4085_v34, %v4074_v16  ;;  %v4097_v52 = vmul.f32 %v4093_v12, %v4093_v12  ;;  %v4098_v58 = vmul.f32 %v4094_v8, %v4094_v8 }
 0xed8   :  { %v4104_v23 = vsub.f32 %v6861_v47, %v4093_v12  ;;  %v4103_v62 = vsub.f32 %v6858_v25, %v4093_v12  ;;  %v4105_v34 = vsub.f32 %v6896_v30, %v4093_v12  ;;  %v4106_v5 = vsub.f32 %v6902_v21, %v4093_v12 }
 0xed9   :  { %v4078_v33 = vrot.slane %v4077_v0, 4  ;;  %v4087_v45 = vrot.slane %v4086_v4, 4  ;;  %v4109_v15 = vsub.f32 %v6893_v38, %v4094_v8  ;;  %v4110_v14 = vsub.f32 %v6904_v19, %v4094_v8 }
 0xeda   :  { %v4131_v53 = vpop.permute.xlu1 %4130 }
 0xedb   :  { %v4079_v48 = vadd.f32 %v4078_v33, %v4077_v0  ;;  %v4088_v57 = vadd.f32 %v4087_v45, %v4086_v4  ;;  %v4108_v0 = vsub.f32 %v6876_v6, %v4094_v8  ;;  %v4107_v4 = vsub.f32 %v6872_v42, %v4094_v8 }
 0xedd   :  { %v4080_v28 = vrot.slane %v4079_v48, 2  ;;  %v4089_v7 = vrot.slane %v4088_v57, 2 }
 0xede   :  { %v4126_v54 = vpop.permute.xlu0 %4125  ;;  %v4154_v60 = vpop.permute.xlu1 %4153 }
 0xedf   :  { %v4081_v9 = vadd.f32 %v4080_v28, %v4079_v48  ;;  %v4090_v22 = vadd.f32 %v4089_v7, %v4088_v57 }
 0xee1   :  { %v4082_v1 = vrot.slane %v4081_v9, 1  ;;  %v4091_v51 = vrot.slane %v4090_v22, 1 }
 0xee2   :  { %v4159_v29 = vpop.permute.xlu0 %4158  ;;  %v4136_v59 = vpop.permute.xlu1 %4135 }
 0xee3   :  { %v4083_v3 = vadd.f32 %v4082_v1, %v4081_v9  ;;  %v4092_v31 = vadd.f32 %v4091_v51, %v4090_v22 }
 0xee5   :  { %v4095_v20 = vmul.f32 0.0010080645, %v4083_v3  ;;  %v4096_v36 = vmul.f32 0.0010080645, %v4092_v31 }
 0xee6   :  { %v4141_v17 = vpop.permute.xlu0 %4140  ;;  %v4164_v38 = vpop.permute.xlu1 %4163 }
 0xee7   :  { %v4099_v27 = vsub.f32 %v4095_v20, %v4097_v52  ;;  %v4100_v10 = vsub.f32 %v4096_v36, %v4098_v58 }
 0xee9   :  { %v4101_v26 = vmax.f32 %v4099_v27, 0.0  ;;  %v4102_v63 = vmax.f32 %v4100_v10, 0.0 }
 0xeea   :  { %v4169_v1 = vpop.permute.xlu0 %4168 }
 0xeeb   :  { %v4111_v49 = vadd.f32 1e-08, %v4101_v26  ;;  %v4112_v40 = vadd.f32 1e-08, %v4102_v63  ;;  %v4617_v63 = vld [vmem:[%s7064_s9 + $0x68] sm:$0xff] }
 0xeed   :  { %5224 = vrsqrt.f32 %v4111_v49  ;;  %v4382_v49 = vpop.permute.xlu1 %4381 }
 0xeee   :  { %5226 = vrsqrt.f32 %v4112_v40  ;;  %v4387_v40 = vpop.permute.xlu0 %4386 }
 0xef7   :  { %v5225_v16 = vpop.eup %5224 }
 0xef8   :  { %v5227_v33 = vpop.eup %5226  ;;  %v4116_v45 = vmul.f32 %v5225_v16, %v4104_v23  ;;  %v4115_v48 = vmul.f32 %v5225_v16, %v4103_v62  ;;  %v4117_v57 = vmul.f32 %v5225_v16, %v4105_v34  ;;  %v4118_v47 = vmul.f32 %v5225_v16, %v4106_v5 }
 0xef9   :  { %v4120_v13 = vmul.f32 %v5227_v33, %v4108_v0  ;;  %v4119_v25 = vmul.f32 %v5227_v33, %v4107_v4  ;;  %v4121_v43 = vmul.f32 %v5227_v33, %v4109_v15  ;;  %v4122_v30 = vmul.f32 %v5227_v33, %v4110_v14 }
 0xefa   :  { %v4144_v28 = vmul.f32 %v4131_v53, %v4116_v45  ;;  %v4143_v21 = vmul.f32 %v4126_v54, %v4115_v48  ;;  %v4145_v7 = vmul.f32 %v4136_v59, %v4117_v57  ;;  %v4146_v9 = vmul.f32 %v4141_v17, %v4118_v47  ;;  %v4397_v57 = vpop.permute.xlu0 %4396 }
 0xefb   :  { %v4148_v6 = vmul.f32 %v4131_v53, %v4120_v13  ;;  %v4147_v22 = vmul.f32 %v4126_v54, %v4119_v25  ;;  %v4149_v42 = vmul.f32 %v4136_v59, %v4121_v43  ;;  %v4150_v12 = vmul.f32 %v4141_v17, %v4122_v30  ;;  %v4618_v53 = vld [vmem:[%s7064_s9 + $0x70] sm:$0xff]  ;;  %v4619_v54 = vld [vmem:[%s7064_s9 + $0x78] sm:$0xff]  ;;  %v4392_v25 = vpop.permute.xlu1 %4391 }
 0xefc   :  { %v4171_v19 = vadd.f32 %v4154_v60, %v4143_v21  ;;  %v4172_v8 = vadd.f32 %v4159_v29, %v4144_v28  ;;  %v4173_v51 = vadd.f32 %v4164_v38, %v4145_v7  ;;  %v4174_v3 = vadd.f32 %v4169_v1, %v4146_v9 }
 0xefd   :  { %v4175_v31 = vadd.f32 %v4154_v60, %v4147_v22  ;;  %v4176_v20 = vadd.f32 %v4159_v29, %v4148_v6  ;;  %v4177_v52 = vadd.f32 %v4164_v38, %v4149_v42  ;;  %v4178_v58 = vadd.f32 %v4169_v1, %v4150_v12 }
 0xefe   :  { %v5131_v36 = vpack.c.bf16 %v4172_v8, %v4171_v19  ;;  %v5135_v10 = vpack.c.bf16 %v4174_v3, %v4173_v51  ;;  %v7071_v43 = vunpack.c.l.bf16 %v5740_v24  ;;  %v7073_v24 = vunpack.c.h.bf16 %v5756_v46 }
 0xeff   :  { %v5139_v27 = vpack.c.bf16 %v4176_v20, %v4175_v31  ;;  %v5143_v26 = vpack.c.bf16 %v4178_v58, %v4177_v52  ;;  %v7074_v6 = vunpack.c.l.bf16 %v5766_v41  ;;  %v7075_v12 = vunpack.c.l.bf16 %v5756_v46 }
 0xf00   :  { %5132 = vmatprep.subr.bf16.mxu0 %v5131_v36 }
 0xf01   :  { %5140 = vmatprep.subr.bf16.mxu1 %v5139_v27  ;;  %5134 = vmatpush3.bf16.msra.mxu0 %v5131_v36 }
 0xf02   :  { %5142 = vmatpush3.bf16.msra.mxu1 %v5139_v27  ;;  %5136 = vmatprep.subr.bf16.mxu0 %v5135_v10 }
 0xf03   :  { %5144 = vmatprep.subr.bf16.mxu1 %v5143_v26 }
 0xf05   :  { %5138 = vmatpush3.bf16.msra.mxu0 %v5135_v10 }
 0xf06   :  { %5146 = vmatpush3.bf16.msra.mxu1 %v5143_v26 }
 0xf08   :  { %5000 = vmatmul.mubr.msk.f32.vlgmr.msra.gmra.mrb[28].mxu0 %vm130_vm0, %v4617_v63 }
 0xf09   :  { %5014 = vmatmul.mubr.msk.f32.vlgmr.msra.gmra.mrb[28].mxu1 %vm130_vm0, %v4617_v63  ;;  %5002 = vmatprep.mubr.msk.f32.mxu0 %vm130_vm0, %v4618_v53 }
 0xf0a   :  { %5016 = vmatprep.mubr.msk.f32.mxu1 %vm130_vm0, %v4618_v53 }
 0xf0c   :  { %5003 = vmatmul.mubr.msk.f32.gmra.mrb[30].mxu0 %vm130_vm0, %v4619_v54 }
 0xf0d   :  { %5017 = vmatmul.mubr.msk.f32.gmra.mrb[30].mxu1 %vm130_vm0, %v4619_v54  ;;  %vm4447_vm0 = vcmask 248832  }
 0xfdb   :  { %v5001_v60 = vpop.f32.mrb[28].mxu0 }
 0xfdc   :  { %v4367_v29 = vadd.f32 %v5001_v60, %v6612_v32  ;;  %v5015_v59 = vpop.f32.mrb[28].mxu1  ;;  %v4262_v17 = vpop.f32.mrb[29].mxu0 }
 0xfdd   :  { %v4371_v23 = vadd.f32 %v5015_v59, %v6615_v55  ;;  %v4366_v62 = vadd.f32 %v4262_v17, %v6617_v50  ;;  %v4347_v34 = vpop.f32.mrb[29].mxu1 }
 0xfde   :  { %v4400_v5 = vadd.f32 %v4387_v40, %v4367_v29  ;;  %v4370_v16 = vadd.f32 %v4347_v34, %v6619_v39 }
 0xfdf   :  { %v4404_v0 = vadd.f32 %v4387_v40, %v4371_v23  ;;  %v4399_v4 = vadd.f32 %v4382_v49, %v4366_v62  ;;  %v5004_v15 = vpop.f32.mrb[30].mxu0 }
 0xfe0   :  { %v4408_v14 = vadd.f32 %v4651_v18, %v4400_v5  ;;  %v4403_v33 = vadd.f32 %v4382_v49, %v4370_v16  ;;  %v4369_v32 = vadd.f32 %v5004_v15, %v6626_v35  ;;  %v5018_v45 = vpop.f32.mrb[30].mxu1  ;;  %v4272_v48 = vpop.f32.mrb[31].mxu0 }
 0xfe1   :  { %v4412_v55 = vadd.f32 %v4659_v2, %v4404_v0  ;;  %v4407_v50 = vadd.f32 %v4650_v37, %v4399_v4  ;;  %v4373_v39 = vadd.f32 %v5018_v45, %v6631_v61  ;;  %v4368_v47 = vadd.f32 %v4272_v48, %v6633_v44  ;;  %v4357_v13 = vpop.f32.mrb[31].mxu1 }
 0xfe2   :  { %v4641_v18 = vpack.c.bf16 %v4408_v14, %v4408_v14  ;;  %v4411_v30 = vadd.f32 %v7071_v43, %v4403_v33  ;;  %v4402_v35 = vadd.f32 %v4397_v57, %v4369_v32  ;;  %v4372_v28 = vadd.f32 %v4357_v13, %v6635_v56 }
 0xfe3   :  { %v4645_v21 = vpack.c.bf16 %v4412_v55, %v4412_v55  ;;  %v4640_v7 = vpack.c.bf16 %v4407_v50, %v4407_v50  ;;  %v4406_v9 = vadd.f32 %v4397_v57, %v4373_v39  ;;  %v4401_v2 = vadd.f32 %v4392_v25, %v4368_v47 }
 0xfe4   :  { %4449 = vst.msk [vmem:[%s7065_s11 + $0x4] sm:$0xf] %vm4447_vm0, %v4641_v18  ;;  %v4644_v11 = vpack.c.bf16 %v4411_v30, %v4411_v30  ;;  %v7072_v37 = vunpack.c.h.bf16 %v5766_v41  ;;  %v4405_v44 = vadd.f32 %v4392_v25, %v4372_v28 }
 0xfe5   :  { %4453 = vst.msk [vmem:[%s7065_s11 + $0x14] sm:$0xf] %vm4447_vm0, %v4645_v21  ;;  %4448 = vst.msk [vmem:[%s7065_s11] sm:$0xf] %vm4447_vm0, %v4640_v7  ;;  %v4414_v56 = vadd.f32 %v7073_v24, %v4406_v9  ;;  %v4409_v22 = vadd.f32 %v7074_v6, %v4401_v2 }
 0xfe6   :  { %v4410_v61 = vadd.f32 %v7072_v37, %v4402_v35  ;;  %4452 = vst.msk [vmem:[%s7065_s11 + $0x10] sm:$0xf] %vm4447_vm0, %v4644_v11  ;;  %v4413_v38 = vadd.f32 %v7075_v12, %v4405_v44 }
 0xfe7   :  { %v4647_v1 = vpack.c.bf16 %v4414_v56, %v4414_v56  ;;  %v4642_v19 = vpack.c.bf16 %v4409_v22, %v4409_v22 }
 0xfe8   :  { %v4643_v42 = vpack.c.bf16 %v4410_v61, %v4410_v61  ;;  %v4646_v8 = vpack.c.bf16 %v4413_v38, %v4413_v38 }
 0xfe9   :  { %4455 = vst.msk [vmem:[%s7065_s11 + $0x1c] sm:$0xf] %vm4447_vm0, %v4647_v1  ;;  %4450 = vst.msk [vmem:[%s7065_s11 + $0x8] sm:$0xf] %vm4447_vm0, %v4642_v19 }
 0xfea   :  { %4451 = vst.msk [vmem:[%s7065_s11 + $0xc] sm:$0xf] %vm4447_vm0, %v4643_v42  ;;  %4454 = vst.msk [vmem:[%s7065_s11 + $0x18] sm:$0xf] %vm4447_vm0, %v4646_v8 }

</bundles_post_ra>
